<compile_context>
chip_gen: v7x
topology: tpu7x:2x2x1
jax: 0.10.0
libtpu: 0.0.40
codegen_flags: <defaults>
</compile_context>

<pallas_src>
import functools

import jax
import jax.numpy as jnp
from jax.experimental import pallas as pl
from jax.experimental.pallas import tpu as pltpu

NEG_SLOPE = 0.01
EPS = 1e-5


def _leaky(x):
    return jnp.where(x > 0, x, NEG_SLOPE * x)


def _bitonic_sort_rows(x):
    """Ascending sort of each row along the last axis.

    Pads rows to 128 lanes with +BIG so pltpu.roll rotates the native lane
    width (physical rotate == logical rotate), runs the full static bitonic
    network (28 stages for width 128: roll -> XLU, min/max/select -> VPU,
    no cross-lane reductions), then slices the real values back out (they
    sort to the front).
    """
    *lead, f = x.shape
    width = 128
    assert f <= width  # TODO(synk): multi-vreg rows (>128 features) unsupported.
    big = jnp.float32(3.0e38)
    if f < width:
        x = jnp.concatenate(
            [x, jnp.full((*lead, width - f), big, jnp.float32)], axis=-1)
    lane = jax.lax.broadcasted_iota(jnp.int32, x.shape, x.ndim - 1)
    size = 2
    while size <= width:
        stride = size // 2
        while stride >= 1:
            lo = (lane & stride) == 0            # lower index of its pair
            up = (lane & size) == 0              # ascending sub-sequence
            partner = jnp.where(
                lo,
                pltpu.roll(x, width - stride, axis=x.ndim - 1),   # x[i + stride]
                pltpu.roll(x, stride, axis=x.ndim - 1))           # x[i - stride]
            take_min = lo == up
            x = jnp.where(take_min, jnp.minimum(x, partner),
                          jnp.maximum(x, partner))
            stride //= 2
        size *= 2
    return x[..., :f]


def _sort_pool_flat(h, k):
    """DGL SortPooling on a (Gb, N, F) slab -> (Gb, k*F), flattened node-major.

    Node selection is rank-based (ties broken by smaller node index, i.e. a
    stable descending top-k by the row max == last element of the sorted row);
    the gather is a one-hot MXU matmul. Selected rows are then sorted
    ascending with the bitonic network.
    """
    gb, n, f = h.shape
    score = jnp.max(h, axis=-1, keepdims=True)                      # (Gb,N,1)
    # Replicate the score along the lane axis with a K=1 MXU outer product
    # (avoids an explicit sublane->lane transpose).
    ones_col = jnp.ones((gb, n, 1), jnp.float32)
    score_lane = jnp.einsum('gio,gjo->gij', ones_col, score,
                            preferred_element_type=jnp.float32)     # [g,*,i]=score[i]
    j_iota = jax.lax.broadcasted_iota(jnp.int32, (gb, n, n), 1)
    i_iota = jax.lax.broadcasted_iota(jnp.int32, (gb, n, n), 2)
    # beats[g, j, i] = 1  iff node j outranks node i.
    beats = jnp.where((score > score_lane) |
                      ((score == score_lane) & (j_iota < i_iota)), 1.0, 0.0)
    rank = jnp.sum(beats, axis=1, keepdims=True).astype(jnp.int32)  # (Gb,1,N)
    r_iota = jax.lax.broadcasted_iota(jnp.int32, (gb, k, n), 1)
    sel = jnp.where(rank == r_iota, 1.0, 0.0)                       # (Gb,k,N)
    picked = jnp.einsum('gkn,gnf->gkf', sel, h,
                        preferred_element_type=jnp.float32)         # (Gb,k,F)
    srt = _bitonic_sort_rows(picked)
    # torch flatten of (k, F) is node-major: concat the k rows along lanes.
    return jnp.concatenate([srt[:, i, :] for i in range(k)], axis=-1)


def gm_embedder_kernel(pool_k, f_in, a_ref, xn_ref, w1_ref, w2_ref,
                       gn1_ref, gn2_ref, out_ref):
    a = a_ref[...]                           # (Gb, N, N) f32, [graph, dst, src]
    xn = xn_ref[...]                         # (Gb, N, F_in + 2) f32
    gb, n, _ = a.shape
    x = xn[:, :, :f_in]
    norm_in = xn[:, :, f_in:f_in + 1]        # rsqrt(in-degree),  dst side
    norm_out = xn[:, :, f_in + 1:f_in + 2]   # rsqrt(out-degree), src side
    inv_n = jnp.float32(1.0 / n)
    ones_row = jnp.ones((gb, 1, n), jnp.float32)

    def aggregate(h):
        # D_in^{-1/2} A_w D_out^{-1/2} h  (DGL GraphConv norm='both').
        agg = jnp.einsum('gds,gsf->gdf', a, h * norm_out,
                         preferred_element_type=jnp.float32)
        return agg * norm_in

    def dense(h, w_ref):
        f = h.shape[-1]
        y = jnp.dot(h.reshape(gb * n, f), w_ref[...],
                    preferred_element_type=jnp.float32)
        return y.reshape(gb, n, w_ref.shape[-1])

    def graph_norm(h, gn_ref):
        f = h.shape[-1]
        gamma = gn_ref[0:1, :]
        beta = gn_ref[1:2, :]
        alpha = gn_ref[2:3, :]
        # One fused stats matmul: E[h] and E[h^2] in a single (1,N)@(N,2F) pass.
        stats = jnp.einsum('gon,gnc->goc', ones_row,
                           jnp.concatenate([h, h * h], axis=-1),
                           preferred_element_type=jnp.float32) * inv_n
        mean = stats[:, :, :f]
        eh2 = stats[:, :, f:]
        var = eh2 - (2.0 * alpha - alpha * alpha) * (mean * mean)
        shifted = h - alpha * mean
        return gamma * shifted * jax.lax.rsqrt(var + EPS) + beta

    # conv1 (in_dim <= hidden): aggregate first, then weight (DGL ordering).
    h1 = _leaky(graph_norm(dense(aggregate(x), w1_ref), gn1_ref))
    r1 = _sort_pool_flat(h1, pool_k)                      # (Gb, k*H)
    # conv2 (hidden > hidden//4): weight first, then aggregate (DGL ordering).
    h2 = _leaky(graph_norm(aggregate(dense(h1, w2_ref)), gn2_ref))
    r2 = _sort_pool_flat(h2, pool_k)                      # (Gb, k*H4)
    # hstack(flatten(r1), flatten(r2)) followed by the module's final LeakyReLU.
    out_ref[...] = _leaky(jnp.concatenate([r1, r2], axis=-1))


def gm_embedder_forward(a_w, a_mask, x, params, pool_k, graphs_per_step=4):
    """Batch of G equal-size dense graphs.

    a_w   : (G, N, N) f32, A[g, dst, src] = edge weight (0 where no edge).
    a_mask: (G, N, N) f32 binary graph structure (for un-weighted degrees).
    x     : (G, N, F) f32 node features.
    Returns (G, pool_k*H + pool_k*(H//4)) embeddings (hstack order r1 then r2).
    """
    G, N, _ = a_w.shape
    F = x.shape[-1]
    H = params["w1"].shape[-1]
    H4 = params["w2"].shape[-1]
    assert pool_k <= N   # TODO(synk): zero padding for k > N not implemented.
    gb = min(graphs_per_step, G)
    assert G % gb == 0, "graph count must be divisible by graphs_per_step"

    # Structure-only work stays in the wrapper: un-weighted degrees and their
    # rsqrt norms (DGL GraphConv norm='both' clamps degrees to >= 1).
    deg_in = jnp.sum(a_mask, axis=2, keepdims=True)                       # (G,N,1)
    deg_out = jnp.swapaxes(jnp.sum(a_mask, axis=1, keepdims=True), 1, 2)  # (G,N,1)
    norm_in = jax.lax.rsqrt(jnp.maximum(deg_in, 1.0))
    norm_out = jax.lax.rsqrt(jnp.maximum(deg_out, 1.0))
    # One packed small input stream instead of three (fewer DMAs per step).
    xn = jnp.concatenate([x, norm_in, norm_out], axis=-1)                 # (G,N,F+2)

    gn1 = jnp.concatenate([params["gn1_gamma"], params["gn1_beta"],
                           params["gn1_alpha"]], axis=0)                  # (3,H)
    gn2 = jnp.concatenate([params["gn2_gamma"], params["gn2_beta"],
                           params["gn2_alpha"]], axis=0)                  # (3,H4)

    d_out = pool_k * H + pool_k * H4
    steps = G // gb

    per_batch = lambda g: (g, 0, 0)
    resident = lambda g: (0, 0)

    out = pl.pallas_call(
        functools.partial(gm_embedder_kernel, pool_k, F),
        out_shape=jax.ShapeDtypeStruct((steps, gb, d_out), jnp.float32),
        grid_spec=pltpu.PrefetchScalarGridSpec(
            num_scalar_prefetch=0,
            grid=(steps,),
            in_specs=[
                pl.BlockSpec((gb, N, N), per_batch),       # adjacency (f32)
                pl.BlockSpec((gb, N, F + 2), per_batch),   # features ++ norms
                pl.BlockSpec((F, H), resident),            # W1
                pl.BlockSpec((H, H4), resident),           # W2
                pl.BlockSpec((3, H), resident),            # GraphNorm1 g/b/a
                pl.BlockSpec((3, H4), resident),           # GraphNorm2 g/b/a
            ],
            out_specs=pl.BlockSpec((None, gb, d_out), per_batch),
        ),
        compiler_params=pltpu.CompilerParams(
            dimension_semantics=("parallel",),
        ),
    )(a_w, xn, params["w1"], params["w2"], gn1, gn2)

    return out.reshape(G, d_out)


def _kaiming_uniform(key, shape, a=NEG_SLOPE):
    # torch.nn.init.kaiming_uniform_(mode='fan_in') on a 2-D weight tensor.
    fan_in = shape[1]
    gain = (2.0 / (1.0 + a * a)) ** 0.5
    bound = gain * (3.0 / fan_in) ** 0.5
    return jax.random.uniform(key, shape, jnp.float32, -bound, bound)


def make_params(key, in_dim, hidden_dim):
    h4 = hidden_dim // 4
    k1, k2 = jax.random.split(key)
    return dict(
        w1=_kaiming_uniform(k1, (in_dim, hidden_dim)),
        w2=_kaiming_uniform(k2, (hidden_dim, h4)),
        gn1_gamma=jnp.ones((1, hidden_dim), jnp.float32),
        gn1_beta=jnp.zeros((1, hidden_dim), jnp.float32),
        gn1_alpha=jnp.ones((1, hidden_dim), jnp.float32),
        gn2_gamma=jnp.ones((1, h4), jnp.float32),
        gn2_beta=jnp.zeros((1, h4), jnp.float32),
        gn2_alpha=jnp.ones((1, h4), jnp.float32),
    )


if __name__ == "__main__":
    G, N, IN_DIM, HIDDEN, POOL_K = 8, 64, 8, 32, 4

    key = jax.random.PRNGKey(0)
    k_graph, k_ew, k_feat, k_params = jax.random.split(key, 4)

    # Random directed graphs with self-loops; A[g, dst, src].
    a_mask = (jax.random.uniform(k_graph, (G, N, N)) < 0.2).astype(jnp.float32)
    eye = jnp.broadcast_to(jnp.eye(N, dtype=jnp.float32), (G, N, N))
    a_mask = jnp.clip(a_mask + eye, 0.0, 1.0)
    edge_w = jax.random.uniform(k_ew, (G, N, N), jnp.float32, 0.1, 1.0)
    a_w = a_mask * edge_w

    features = jax.random.normal(k_feat, (G, N, IN_DIM), dtype=jnp.float32)
    params = make_params(k_params, IN_DIM, HIDDEN)

    out = gm_embedder_forward(a_w, a_mask, features, params, POOL_K,
                              graphs_per_step=4)
    out = jax.block_until_ready(out)
    embed_dim = POOL_K * HIDDEN + POOL_K * (HIDDEN // 4)
    assert out.shape == (G, embed_dim), out.shape
    assert bool(jnp.all(jnp.isfinite(out)))
    print("KERNEL_OK")
</pallas_src>

<mosaic_0001>
module attributes {stable_mosaic.version = 11 : i64} {
  func.func @gm_embedder_kernel(%arg0: i32, %arg1: memref<4x64x64xf32, #tpu.memory_space<vmem>>, %arg2: memref<4x64x10xf32, #tpu.memory_space<vmem>>, %arg3: memref<8x32xf32, #tpu.memory_space<vmem>>, %arg4: memref<32x8xf32, #tpu.memory_space<vmem>>, %arg5: memref<3x32xf32, #tpu.memory_space<vmem>>, %arg6: memref<3x8xf32, #tpu.memory_space<vmem>>, %arg7: memref<1x4x160xf32, #tpu.memory_space<vmem>>) attributes {dimension_semantics = [#tpu.dimension_semantics<parallel>], iteration_bounds = array<i64: 2>, scalar_prefetch = 0 : i64, scratch_operands = 0 : i64, tpu.core_type = #tpu.core_type<tc>, window_params = [{transform_indices = @transform_0, window_bounds = array<i64: 4, 64, 64>}, {transform_indices = @transform_1, window_bounds = array<i64: 4, 64, 10>}, {pipeline_mode = #tpu.pipeline_mode<synchronous>, transform_indices = @transform_2, window_bounds = array<i64: 8, 32>}, {pipeline_mode = #tpu.pipeline_mode<synchronous>, transform_indices = @transform_3, window_bounds = array<i64: 32, 8>}, {pipeline_mode = #tpu.pipeline_mode<synchronous>, transform_indices = @transform_4, window_bounds = array<i64: 3, 32>}, {pipeline_mode = #tpu.pipeline_mode<synchronous>, transform_indices = @transform_5, window_bounds = array<i64: 3, 8>}, {transform_indices = @transform_6, window_bounds = array<i64: 1, 4, 160>}]} {
    %c0 = arith.constant 0 : index
    %c0_0 = arith.constant 0 : index
    %c0_1 = arith.constant 0 : index
    %0 = vector.load %arg1[%c0, %c0_0, %c0_1] : memref<4x64x64xf32, #tpu.memory_space<vmem>>, vector<4x64x64xf32>
    %c0_2 = arith.constant 0 : index
    %c0_3 = arith.constant 0 : index
    %c0_4 = arith.constant 0 : index
    %1 = vector.load %arg2[%c0_2, %c0_3, %c0_4] : memref<4x64x10xf32, #tpu.memory_space<vmem>>, vector<4x64x10xf32>
    %2 = vector.extract_strided_slice %1 {offsets = [0, 0, 0], sizes = [4, 64, 8], strides = [1, 1, 1]} : vector<4x64x10xf32> to vector<4x64x8xf32>
    %3 = vector.extract_strided_slice %1 {offsets = [0, 0, 8], sizes = [4, 64, 1], strides = [1, 1, 1]} : vector<4x64x10xf32> to vector<4x64x1xf32>
    %4 = vector.extract_strided_slice %1 {offsets = [0, 0, 9], sizes = [4, 64, 1], strides = [1, 1, 1]} : vector<4x64x10xf32> to vector<4x64x1xf32>
    %cst = arith.constant 1.000000e+00 : f32
    %5 = vector.broadcast %cst : f32 to vector<4x1x64xf32>
    %6 = vector.broadcast %4 : vector<4x64x1xf32> to vector<4x64x8xf32>
    %7 = arith.mulf %2, %6 : vector<4x64x8xf32>
    "tpu.trace_start"() <{level = 10 : i32, message = "gds,gsf->gdf"}> : () -> ()
    %cst_5 = arith.constant dense<0.000000e+00> : vector<4x64x8xf32>
    %8 = tpu.matmul %0, %7, %cst_5 {dimension_numbers = #tpu.dot_dimension_numbers<[2], [1], [1], [2], [0, 0, 0, 1, 1, 2], [0], [0]>} : vector<4x64x64xf32>, vector<4x64x8xf32>, vector<4x64x8xf32> -> vector<4x64x8xf32>
    "tpu.trace_stop"() : () -> ()
    %9 = vector.broadcast %3 : vector<4x64x1xf32> to vector<4x64x8xf32>
    %10 = arith.mulf %8, %9 : vector<4x64x8xf32>
    %11 = vector.shape_cast %10 : vector<4x64x8xf32> to vector<256x8xf32>
    %c0_6 = arith.constant 0 : index
    %c0_7 = arith.constant 0 : index
    %12 = vector.load %arg3[%c0_6, %c0_7] : memref<8x32xf32, #tpu.memory_space<vmem>>, vector<8x32xf32>
    %cst_8 = arith.constant dense<0.000000e+00> : vector<256x32xf32>
    %13 = tpu.matmul %11, %12, %cst_8 {dimension_numbers = #tpu.dot_dimension_numbers<[1], [0], [0], [1], [0, 0, 1, 1], [], []>} : vector<256x8xf32>, vector<8x32xf32>, vector<256x32xf32> -> vector<256x32xf32>
    %14 = vector.shape_cast %13 : vector<256x32xf32> to vector<4x64x32xf32>
    %c0_9 = arith.constant 0 : index
    %c0_10 = arith.constant 0 : index
    %15 = vector.load %arg5[%c0_9, %c0_10] : memref<3x32xf32, #tpu.memory_space<vmem>>, vector<1x32xf32>
    %c1 = arith.constant 1 : index
    %c0_11 = arith.constant 0 : index
    %16 = vector.load %arg5[%c1, %c0_11] : memref<3x32xf32, #tpu.memory_space<vmem>>, vector<1x32xf32>
    %c2 = arith.constant 2 : index
    %c0_12 = arith.constant 0 : index
    %17 = vector.load %arg5[%c2, %c0_12] : memref<3x32xf32, #tpu.memory_space<vmem>>, vector<1x32xf32>
    %18 = arith.mulf %14, %14 : vector<4x64x32xf32>
    %19 = tpu.concatenate %14, %18 in 2 : vector<4x64x32xf32>, vector<4x64x32xf32> -> vector<4x64x64xf32>
    "tpu.trace_start"() <{level = 10 : i32, message = "gon,gnc->goc"}> : () -> ()
    %cst_13 = arith.constant dense<0.000000e+00> : vector<4x1x64xf32>
    %20 = tpu.matmul %5, %19, %cst_13 {dimension_numbers = #tpu.dot_dimension_numbers<[2], [1], [1], [2], [0, 0, 0, 1, 1, 2], [0], [0]>} : vector<4x1x64xf32>, vector<4x64x64xf32>, vector<4x1x64xf32> -> vector<4x1x64xf32>
    "tpu.trace_stop"() : () -> ()
    %cst_14 = arith.constant 1.562500e-02 : f32
    %21 = vector.broadcast %cst_14 : f32 to vector<4x1x64xf32>
    %22 = arith.mulf %20, %21 : vector<4x1x64xf32>
    %23 = vector.extract_strided_slice %22 {offsets = [0, 0, 0], sizes = [4, 1, 32], strides = [1, 1, 1]} : vector<4x1x64xf32> to vector<4x1x32xf32>
    %24 = vector.extract_strided_slice %22 {offsets = [0, 0, 32], sizes = [4, 1, 32], strides = [1, 1, 1]} : vector<4x1x64xf32> to vector<4x1x32xf32>
    %cst_15 = arith.constant 2.000000e+00 : f32
    %25 = vector.broadcast %cst_15 : f32 to vector<1x32xf32>
    %26 = arith.mulf %25, %17 : vector<1x32xf32>
    %27 = arith.mulf %17, %17 : vector<1x32xf32>
    %28 = arith.subf %26, %27 : vector<1x32xf32>
    %29 = arith.mulf %23, %23 : vector<4x1x32xf32>
    %30 = vector.shape_cast %28 : vector<1x32xf32> to vector<1x1x32xf32>
    %31 = vector.broadcast %30 : vector<1x1x32xf32> to vector<4x1x32xf32>
    %32 = arith.mulf %31, %29 : vector<4x1x32xf32>
    %33 = arith.subf %24, %32 : vector<4x1x32xf32>
    %34 = vector.shape_cast %17 : vector<1x32xf32> to vector<1x1x32xf32>
    %35 = vector.broadcast %34 : vector<1x1x32xf32> to vector<4x1x32xf32>
    %36 = arith.mulf %35, %23 : vector<4x1x32xf32>
    %37 = vector.broadcast %36 : vector<4x1x32xf32> to vector<4x64x32xf32>
    %38 = arith.subf %14, %37 : vector<4x64x32xf32>
    %39 = vector.shape_cast %15 : vector<1x32xf32> to vector<1x1x32xf32>
    %40 = vector.broadcast %39 : vector<1x1x32xf32> to vector<4x64x32xf32>
    %41 = arith.mulf %40, %38 : vector<4x64x32xf32>
    %cst_16 = arith.constant 9.99999974E-6 : f32
    %42 = vector.broadcast %cst_16 : f32 to vector<4x1x32xf32>
    %43 = arith.addf %33, %42 : vector<4x1x32xf32>
    %44 = math.rsqrt %43 : vector<4x1x32xf32>
    %45 = vector.broadcast %44 : vector<4x1x32xf32> to vector<4x64x32xf32>
    %46 = arith.mulf %41, %45 : vector<4x64x32xf32>
    %47 = vector.shape_cast %16 : vector<1x32xf32> to vector<1x1x32xf32>
    %48 = vector.broadcast %47 : vector<1x1x32xf32> to vector<4x64x32xf32>
    %49 = arith.addf %46, %48 : vector<4x64x32xf32>
    %cst_17 = arith.constant 0.000000e+00 : f32
    %50 = vector.broadcast %cst_17 : f32 to vector<4x64x32xf32>
    %51 = arith.cmpf ogt, %49, %50 : vector<4x64x32xf32>
    %cst_18 = arith.constant 0.00999999977 : f32
    %52 = vector.broadcast %cst_18 : f32 to vector<4x64x32xf32>
    %53 = arith.mulf %52, %49 : vector<4x64x32xf32>
    %54 = arith.select %51, %49, %53 : vector<4x64x32xi1>, vector<4x64x32xf32>
    %cst_19 = arith.constant dense<0xFF800000> : vector<4x64xf32>
    %55 = vector.multi_reduction <maximumf>, %54, %cst_19 [2] : vector<4x64x32xf32> to vector<4x64xf32>
    %56 = vector.shape_cast %55 : vector<4x64xf32> to vector<4x64x1xf32>
    %cst_20 = arith.constant 1.000000e+00 : f32
    %57 = vector.broadcast %cst_20 : f32 to vector<4x64x1xf32>
    "tpu.trace_start"() <{level = 10 : i32, message = "gio,gjo->gij"}> : () -> ()
    %cst_21 = arith.constant dense<0.000000e+00> : vector<4x64x64xf32>
    %58 = tpu.matmul %57, %56, %cst_21 {dimension_numbers = #tpu.dot_dimension_numbers<[2], [2], [1], [1], [0, 0, 0, 1, 1, 1], [0], [0]>} : vector<4x64x1xf32>, vector<4x64x1xf32>, vector<4x64x64xf32> -> vector<4x64x64xf32>
    "tpu.trace_stop"() : () -> ()
    %59 = tpu.iota {dimensions = array<i32: 1>} : vector<4x64x64xi32>
    %60 = tpu.iota {dimensions = array<i32: 2>} : vector<4x64x64xi32>
    %61 = vector.broadcast %56 : vector<4x64x1xf32> to vector<4x64x64xf32>
    %62 = arith.cmpf ogt, %61, %58 : vector<4x64x64xf32>
    %63 = vector.broadcast %56 : vector<4x64x1xf32> to vector<4x64x64xf32>
    %64 = arith.cmpf oeq, %63, %58 : vector<4x64x64xf32>
    %65 = arith.cmpi slt, %59, %60 : vector<4x64x64xi32>
    %66 = arith.andi %64, %65 : vector<4x64x64xi1>
    %67 = arith.ori %62, %66 : vector<4x64x64xi1>
    %cst_22 = arith.constant 1.000000e+00 : f32
    %cst_23 = arith.constant 0.000000e+00 : f32
    %68 = vector.broadcast %cst_22 : f32 to vector<4x64x64xf32>
    %69 = vector.broadcast %cst_23 : f32 to vector<4x64x64xf32>
    %70 = arith.select %67, %68, %69 : vector<4x64x64xi1>, vector<4x64x64xf32>
    %cst_24 = arith.constant dense<0.000000e+00> : vector<4x64xf32>
    %71 = vector.multi_reduction <add>, %70, %cst_24 [1] : vector<4x64x64xf32> to vector<4x64xf32>
    %72 = vector.shape_cast %71 : vector<4x64xf32> to vector<4x1x64xf32>
    %73 = arith.fptosi %72 : vector<4x1x64xf32> to vector<4x1x64xi32>
    %74 = tpu.iota {dimensions = array<i32: 1>} : vector<4x4x64xi32>
    %75 = vector.broadcast %73 : vector<4x1x64xi32> to vector<4x4x64xi32>
    %76 = arith.cmpi eq, %75, %74 : vector<4x4x64xi32>
    %cst_25 = arith.constant 1.000000e+00 : f32
    %cst_26 = arith.constant 0.000000e+00 : f32
    %77 = vector.broadcast %cst_25 : f32 to vector<4x4x64xf32>
    %78 = vector.broadcast %cst_26 : f32 to vector<4x4x64xf32>
    %79 = arith.select %76, %77, %78 : vector<4x4x64xi1>, vector<4x4x64xf32>
    "tpu.trace_start"() <{level = 10 : i32, message = "gkn,gnf->gkf"}> : () -> ()
    %cst_27 = arith.constant dense<0.000000e+00> : vector<4x4x32xf32>
    %80 = tpu.matmul %79, %54, %cst_27 {dimension_numbers = #tpu.dot_dimension_numbers<[2], [1], [1], [2], [0, 0, 0, 1, 1, 2], [0], [0]>} : vector<4x4x64xf32>, vector<4x64x32xf32>, vector<4x4x32xf32> -> vector<4x4x32xf32>
    %cst_28 = arith.constant 3.000000e+38 : f32
    "tpu.trace_stop"() : () -> ()
    %81 = vector.broadcast %cst_28 : f32 to vector<4x4x96xf32>
    %82 = tpu.concatenate %80, %81 in 2 : vector<4x4x32xf32>, vector<4x4x96xf32> -> vector<4x4x128xf32>
    %83 = tpu.iota {dimensions = array<i32: 2>} : vector<4x4x128xi32>
    %c1_i32 = arith.constant 1 : i32
    %84 = vector.broadcast %c1_i32 : i32 to vector<4x4x128xi32>
    %85 = arith.andi %83, %84 : vector<4x4x128xi32>
    %c0_i32 = arith.constant 0 : i32
    %86 = vector.broadcast %c0_i32 : i32 to vector<4x4x128xi32>
    %87 = arith.cmpi eq, %85, %86 : vector<4x4x128xi32>
    %c2_i32 = arith.constant 2 : i32
    %88 = vector.broadcast %c2_i32 : i32 to vector<4x4x128xi32>
    %89 = arith.andi %83, %88 : vector<4x4x128xi32>
    %c0_i32_29 = arith.constant 0 : i32
    %90 = vector.broadcast %c0_i32_29 : i32 to vector<4x4x128xi32>
    %91 = arith.cmpi eq, %89, %90 : vector<4x4x128xi32>
    %c127_i32 = arith.constant 127 : i32
    %92 = tpu.dynamic_rotate %82 by %c127_i32 dim 2 : vector<4x4x128xf32>, i32 -> vector<4x4x128xf32>
    %c1_i32_30 = arith.constant 1 : i32
    %93 = tpu.dynamic_rotate %82 by %c1_i32_30 dim 2 : vector<4x4x128xf32>, i32 -> vector<4x4x128xf32>
    %94 = arith.select %87, %92, %93 : vector<4x4x128xi1>, vector<4x4x128xf32>
    %95 = arith.xori %87, %91 : vector<4x4x128xi1>
    %cst_31 = arith.constant dense<true> : vector<4x4x128xi1>
    %96 = arith.xori %95, %cst_31 : vector<4x4x128xi1>
    %97 = arith.minimumf %82, %94 : vector<4x4x128xf32>
    %98 = arith.maximumf %82, %94 : vector<4x4x128xf32>
    %99 = arith.select %96, %97, %98 : vector<4x4x128xi1>, vector<4x4x128xf32>
    %c2_i32_32 = arith.constant 2 : i32
    %100 = vector.broadcast %c2_i32_32 : i32 to vector<4x4x128xi32>
    %101 = arith.andi %83, %100 : vector<4x4x128xi32>
    %c0_i32_33 = arith.constant 0 : i32
    %102 = vector.broadcast %c0_i32_33 : i32 to vector<4x4x128xi32>
    %103 = arith.cmpi eq, %101, %102 : vector<4x4x128xi32>
    %c4_i32 = arith.constant 4 : i32
    %104 = vector.broadcast %c4_i32 : i32 to vector<4x4x128xi32>
    %105 = arith.andi %83, %104 : vector<4x4x128xi32>
    %c0_i32_34 = arith.constant 0 : i32
    %106 = vector.broadcast %c0_i32_34 : i32 to vector<4x4x128xi32>
    %107 = arith.cmpi eq, %105, %106 : vector<4x4x128xi32>
    %c126_i32 = arith.constant 126 : i32
    %108 = tpu.dynamic_rotate %99 by %c126_i32 dim 2 : vector<4x4x128xf32>, i32 -> vector<4x4x128xf32>
    %c2_i32_35 = arith.constant 2 : i32
    %109 = tpu.dynamic_rotate %99 by %c2_i32_35 dim 2 : vector<4x4x128xf32>, i32 -> vector<4x4x128xf32>
    %110 = arith.select %103, %108, %109 : vector<4x4x128xi1>, vector<4x4x128xf32>
    %111 = arith.xori %103, %107 : vector<4x4x128xi1>
    %cst_36 = arith.constant dense<true> : vector<4x4x128xi1>
    %112 = arith.xori %111, %cst_36 : vector<4x4x128xi1>
    %113 = arith.minimumf %99, %110 : vector<4x4x128xf32>
    %114 = arith.maximumf %99, %110 : vector<4x4x128xf32>
    %115 = arith.select %112, %113, %114 : vector<4x4x128xi1>, vector<4x4x128xf32>
    %c1_i32_37 = arith.constant 1 : i32
    %116 = vector.broadcast %c1_i32_37 : i32 to vector<4x4x128xi32>
    %117 = arith.andi %83, %116 : vector<4x4x128xi32>
    %c0_i32_38 = arith.constant 0 : i32
    %118 = vector.broadcast %c0_i32_38 : i32 to vector<4x4x128xi32>
    %119 = arith.cmpi eq, %117, %118 : vector<4x4x128xi32>
    %c4_i32_39 = arith.constant 4 : i32
    %120 = vector.broadcast %c4_i32_39 : i32 to vector<4x4x128xi32>
    %121 = arith.andi %83, %120 : vector<4x4x128xi32>
    %c0_i32_40 = arith.constant 0 : i32
    %122 = vector.broadcast %c0_i32_40 : i32 to vector<4x4x128xi32>
    %123 = arith.cmpi eq, %121, %122 : vector<4x4x128xi32>
    %c127_i32_41 = arith.constant 127 : i32
    %124 = tpu.dynamic_rotate %115 by %c127_i32_41 dim 2 : vector<4x4x128xf32>, i32 -> vector<4x4x128xf32>
    %c1_i32_42 = arith.constant 1 : i32
    %125 = tpu.dynamic_rotate %115 by %c1_i32_42 dim 2 : vector<4x4x128xf32>, i32 -> vector<4x4x128xf32>
    %126 = arith.select %119, %124, %125 : vector<4x4x128xi1>, vector<4x4x128xf32>
    %127 = arith.xori %119, %123 : vector<4x4x128xi1>
    %cst_43 = arith.constant dense<true> : vector<4x4x128xi1>
    %128 = arith.xori %127, %cst_43 : vector<4x4x128xi1>
    %129 = arith.minimumf %115, %126 : vector<4x4x128xf32>
    %130 = arith.maximumf %115, %126 : vector<4x4x128xf32>
    %131 = arith.select %128, %129, %130 : vector<4x4x128xi1>, vector<4x4x128xf32>
    %c4_i32_44 = arith.constant 4 : i32
    %132 = vector.broadcast %c4_i32_44 : i32 to vector<4x4x128xi32>
    %133 = arith.andi %83, %132 : vector<4x4x128xi32>
    %c0_i32_45 = arith.constant 0 : i32
    %134 = vector.broadcast %c0_i32_45 : i32 to vector<4x4x128xi32>
    %135 = arith.cmpi eq, %133, %134 : vector<4x4x128xi32>
    %c8_i32 = arith.constant 8 : i32
    %136 = vector.broadcast %c8_i32 : i32 to vector<4x4x128xi32>
    %137 = arith.andi %83, %136 : vector<4x4x128xi32>
    %c0_i32_46 = arith.constant 0 : i32
    %138 = vector.broadcast %c0_i32_46 : i32 to vector<4x4x128xi32>
    %139 = arith.cmpi eq, %137, %138 : vector<4x4x128xi32>
    %c124_i32 = arith.constant 124 : i32
    %140 = tpu.dynamic_rotate %131 by %c124_i32 dim 2 : vector<4x4x128xf32>, i32 -> vector<4x4x128xf32>
    %c4_i32_47 = arith.constant 4 : i32
    %141 = tpu.dynamic_rotate %131 by %c4_i32_47 dim 2 : vector<4x4x128xf32>, i32 -> vector<4x4x128xf32>
    %142 = arith.select %135, %140, %141 : vector<4x4x128xi1>, vector<4x4x128xf32>
    %143 = arith.xori %135, %139 : vector<4x4x128xi1>
    %cst_48 = arith.constant dense<true> : vector<4x4x128xi1>
    %144 = arith.xori %143, %cst_48 : vector<4x4x128xi1>
    %145 = arith.minimumf %131, %142 : vector<4x4x128xf32>
    %146 = arith.maximumf %131, %142 : vector<4x4x128xf32>
    %147 = arith.select %144, %145, %146 : vector<4x4x128xi1>, vector<4x4x128xf32>
    %c2_i32_49 = arith.constant 2 : i32
    %148 = vector.broadcast %c2_i32_49 : i32 to vector<4x4x128xi32>
    %149 = arith.andi %83, %148 : vector<4x4x128xi32>
    %c0_i32_50 = arith.constant 0 : i32
    %150 = vector.broadcast %c0_i32_50 : i32 to vector<4x4x128xi32>
    %151 = arith.cmpi eq, %149, %150 : vector<4x4x128xi32>
    %c8_i32_51 = arith.constant 8 : i32
    %152 = vector.broadcast %c8_i32_51 : i32 to vector<4x4x128xi32>
    %153 = arith.andi %83, %152 : vector<4x4x128xi32>
    %c0_i32_52 = arith.constant 0 : i32
    %154 = vector.broadcast %c0_i32_52 : i32 to vector<4x4x128xi32>
    %155 = arith.cmpi eq, %153, %154 : vector<4x4x128xi32>
    %c126_i32_53 = arith.constant 126 : i32
    %156 = tpu.dynamic_rotate %147 by %c126_i32_53 dim 2 : vector<4x4x128xf32>, i32 -> vector<4x4x128xf32>
    %c2_i32_54 = arith.constant 2 : i32
    %157 = tpu.dynamic_rotate %147 by %c2_i32_54 dim 2 : vector<4x4x128xf32>, i32 -> vector<4x4x128xf32>
    %158 = arith.select %151, %156, %157 : vector<4x4x128xi1>, vector<4x4x128xf32>
    %159 = arith.xori %151, %155 : vector<4x4x128xi1>
    %cst_55 = arith.constant dense<true> : vector<4x4x128xi1>
    %160 = arith.xori %159, %cst_55 : vector<4x4x128xi1>
    %161 = arith.minimumf %147, %158 : vector<4x4x128xf32>
    %162 = arith.maximumf %147, %158 : vector<4x4x128xf32>
    %163 = arith.select %160, %161, %162 : vector<4x4x128xi1>, vector<4x4x128xf32>
    %c1_i32_56 = arith.constant 1 : i32
    %164 = vector.broadcast %c1_i32_56 : i32 to vector<4x4x128xi32>
    %165 = arith.andi %83, %164 : vector<4x4x128xi32>
    %c0_i32_57 = arith.constant 0 : i32
    %166 = vector.broadcast %c0_i32_57 : i32 to vector<4x4x128xi32>
    %167 = arith.cmpi eq, %165, %166 : vector<4x4x128xi32>
    %c8_i32_58 = arith.constant 8 : i32
    %168 = vector.broadcast %c8_i32_58 : i32 to vector<4x4x128xi32>
    %169 = arith.andi %83, %168 : vector<4x4x128xi32>
    %c0_i32_59 = arith.constant 0 : i32
    %170 = vector.broadcast %c0_i32_59 : i32 to vector<4x4x128xi32>
    %171 = arith.cmpi eq, %169, %170 : vector<4x4x128xi32>
    %c127_i32_60 = arith.constant 127 : i32
    %172 = tpu.dynamic_rotate %163 by %c127_i32_60 dim 2 : vector<4x4x128xf32>, i32 -> vector<4x4x128xf32>
    %c1_i32_61 = arith.constant 1 : i32
    %173 = tpu.dynamic_rotate %163 by %c1_i32_61 dim 2 : vector<4x4x128xf32>, i32 -> vector<4x4x128xf32>
    %174 = arith.select %167, %172, %173 : vector<4x4x128xi1>, vector<4x4x128xf32>
    %175 = arith.xori %167, %171 : vector<4x4x128xi1>
    %cst_62 = arith.constant dense<true> : vector<4x4x128xi1>
    %176 = arith.xori %175, %cst_62 : vector<4x4x128xi1>
    %177 = arith.minimumf %163, %174 : vector<4x4x128xf32>
    %178 = arith.maximumf %163, %174 : vector<4x4x128xf32>
    %179 = arith.select %176, %177, %178 : vector<4x4x128xi1>, vector<4x4x128xf32>
    %c8_i32_63 = arith.constant 8 : i32
    %180 = vector.broadcast %c8_i32_63 : i32 to vector<4x4x128xi32>
    %181 = arith.andi %83, %180 : vector<4x4x128xi32>
    %c0_i32_64 = arith.constant 0 : i32
    %182 = vector.broadcast %c0_i32_64 : i32 to vector<4x4x128xi32>
    %183 = arith.cmpi eq, %181, %182 : vector<4x4x128xi32>
    %c16_i32 = arith.constant 16 : i32
    %184 = vector.broadcast %c16_i32 : i32 to vector<4x4x128xi32>
    %185 = arith.andi %83, %184 : vector<4x4x128xi32>
    %c0_i32_65 = arith.constant 0 : i32
    %186 = vector.broadcast %c0_i32_65 : i32 to vector<4x4x128xi32>
    %187 = arith.cmpi eq, %185, %186 : vector<4x4x128xi32>
    %c120_i32 = arith.constant 120 : i32
    %188 = tpu.dynamic_rotate %179 by %c120_i32 dim 2 : vector<4x4x128xf32>, i32 -> vector<4x4x128xf32>
    %c8_i32_66 = arith.constant 8 : i32
    %189 = tpu.dynamic_rotate %179 by %c8_i32_66 dim 2 : vector<4x4x128xf32>, i32 -> vector<4x4x128xf32>
    %190 = arith.select %183, %188, %189 : vector<4x4x128xi1>, vector<4x4x128xf32>
    %191 = arith.xori %183, %187 : vector<4x4x128xi1>
    %cst_67 = arith.constant dense<true> : vector<4x4x128xi1>
    %192 = arith.xori %191, %cst_67 : vector<4x4x128xi1>
    %193 = arith.minimumf %179, %190 : vector<4x4x128xf32>
    %194 = arith.maximumf %179, %190 : vector<4x4x128xf32>
    %195 = arith.select %192, %193, %194 : vector<4x4x128xi1>, vector<4x4x128xf32>
    %c4_i32_68 = arith.constant 4 : i32
    %196 = vector.broadcast %c4_i32_68 : i32 to vector<4x4x128xi32>
    %197 = arith.andi %83, %196 : vector<4x4x128xi32>
    %c0_i32_69 = arith.constant 0 : i32
    %198 = vector.broadcast %c0_i32_69 : i32 to vector<4x4x128xi32>
    %199 = arith.cmpi eq, %197, %198 : vector<4x4x128xi32>
    %c16_i32_70 = arith.constant 16 : i32
    %200 = vector.broadcast %c16_i32_70 : i32 to vector<4x4x128xi32>
    %201 = arith.andi %83, %200 : vector<4x4x128xi32>
    %c0_i32_71 = arith.constant 0 : i32
    %202 = vector.broadcast %c0_i32_71 : i32 to vector<4x4x128xi32>
    %203 = arith.cmpi eq, %201, %202 : vector<4x4x128xi32>
    %c124_i32_72 = arith.constant 124 : i32
    %204 = tpu.dynamic_rotate %195 by %c124_i32_72 dim 2 : vector<4x4x128xf32>, i32 -> vector<4x4x128xf32>
    %c4_i32_73 = arith.constant 4 : i32
    %205 = tpu.dynamic_rotate %195 by %c4_i32_73 dim 2 : vector<4x4x128xf32>, i32 -> vector<4x4x128xf32>
    %206 = arith.select %199, %204, %205 : vector<4x4x128xi1>, vector<4x4x128xf32>
    %207 = arith.xori %199, %203 : vector<4x4x128xi1>
    %cst_74 = arith.constant dense<true> : vector<4x4x128xi1>
    %208 = arith.xori %207, %cst_74 : vector<4x4x128xi1>
    %209 = arith.minimumf %195, %206 : vector<4x4x128xf32>
    %210 = arith.maximumf %195, %206 : vector<4x4x128xf32>
    %211 = arith.select %208, %209, %210 : vector<4x4x128xi1>, vector<4x4x128xf32>
    %c2_i32_75 = arith.constant 2 : i32
    %212 = vector.broadcast %c2_i32_75 : i32 to vector<4x4x128xi32>
    %213 = arith.andi %83, %212 : vector<4x4x128xi32>
    %c0_i32_76 = arith.constant 0 : i32
    %214 = vector.broadcast %c0_i32_76 : i32 to vector<4x4x128xi32>
    %215 = arith.cmpi eq, %213, %214 : vector<4x4x128xi32>
    %c16_i32_77 = arith.constant 16 : i32
    %216 = vector.broadcast %c16_i32_77 : i32 to vector<4x4x128xi32>
    %217 = arith.andi %83, %216 : vector<4x4x128xi32>
    %c0_i32_78 = arith.constant 0 : i32
    %218 = vector.broadcast %c0_i32_78 : i32 to vector<4x4x128xi32>
    %219 = arith.cmpi eq, %217, %218 : vector<4x4x128xi32>
    %c126_i32_79 = arith.constant 126 : i32
    %220 = tpu.dynamic_rotate %211 by %c126_i32_79 dim 2 : vector<4x4x128xf32>, i32 -> vector<4x4x128xf32>
    %c2_i32_80 = arith.constant 2 : i32
    %221 = tpu.dynamic_rotate %211 by %c2_i32_80 dim 2 : vector<4x4x128xf32>, i32 -> vector<4x4x128xf32>
    %222 = arith.select %215, %220, %221 : vector<4x4x128xi1>, vector<4x4x128xf32>
    %223 = arith.xori %215, %219 : vector<4x4x128xi1>
    %cst_81 = arith.constant dense<true> : vector<4x4x128xi1>
    %224 = arith.xori %223, %cst_81 : vector<4x4x128xi1>
    %225 = arith.minimumf %211, %222 : vector<4x4x128xf32>
    %226 = arith.maximumf %211, %222 : vector<4x4x128xf32>
    %227 = arith.select %224, %225, %226 : vector<4x4x128xi1>, vector<4x4x128xf32>
    %c1_i32_82 = arith.constant 1 : i32
    %228 = vector.broadcast %c1_i32_82 : i32 to vector<4x4x128xi32>
    %229 = arith.andi %83, %228 : vector<4x4x128xi32>
    %c0_i32_83 = arith.constant 0 : i32
    %230 = vector.broadcast %c0_i32_83 : i32 to vector<4x4x128xi32>
    %231 = arith.cmpi eq, %229, %230 : vector<4x4x128xi32>
    %c16_i32_84 = arith.constant 16 : i32
    %232 = vector.broadcast %c16_i32_84 : i32 to vector<4x4x128xi32>
    %233 = arith.andi %83, %232 : vector<4x4x128xi32>
    %c0_i32_85 = arith.constant 0 : i32
    %234 = vector.broadcast %c0_i32_85 : i32 to vector<4x4x128xi32>
    %235 = arith.cmpi eq, %233, %234 : vector<4x4x128xi32>
    %c127_i32_86 = arith.constant 127 : i32
    %236 = tpu.dynamic_rotate %227 by %c127_i32_86 dim 2 : vector<4x4x128xf32>, i32 -> vector<4x4x128xf32>
    %c1_i32_87 = arith.constant 1 : i32
    %237 = tpu.dynamic_rotate %227 by %c1_i32_87 dim 2 : vector<4x4x128xf32>, i32 -> vector<4x4x128xf32>
    %238 = arith.select %231, %236, %237 : vector<4x4x128xi1>, vector<4x4x128xf32>
    %239 = arith.xori %231, %235 : vector<4x4x128xi1>
    %cst_88 = arith.constant dense<true> : vector<4x4x128xi1>
    %240 = arith.xori %239, %cst_88 : vector<4x4x128xi1>
    %241 = arith.minimumf %227, %238 : vector<4x4x128xf32>
    %242 = arith.maximumf %227, %238 : vector<4x4x128xf32>
    %243 = arith.select %240, %241, %242 : vector<4x4x128xi1>, vector<4x4x128xf32>
    %c16_i32_89 = arith.constant 16 : i32
    %244 = vector.broadcast %c16_i32_89 : i32 to vector<4x4x128xi32>
    %245 = arith.andi %83, %244 : vector<4x4x128xi32>
    %c0_i32_90 = arith.constant 0 : i32
    %246 = vector.broadcast %c0_i32_90 : i32 to vector<4x4x128xi32>
    %247 = arith.cmpi eq, %245, %246 : vector<4x4x128xi32>
    %c32_i32 = arith.constant 32 : i32
    %248 = vector.broadcast %c32_i32 : i32 to vector<4x4x128xi32>
    %249 = arith.andi %83, %248 : vector<4x4x128xi32>
    %c0_i32_91 = arith.constant 0 : i32
    %250 = vector.broadcast %c0_i32_91 : i32 to vector<4x4x128xi32>
    %251 = arith.cmpi eq, %249, %250 : vector<4x4x128xi32>
    %c112_i32 = arith.constant 112 : i32
    %252 = tpu.dynamic_rotate %243 by %c112_i32 dim 2 : vector<4x4x128xf32>, i32 -> vector<4x4x128xf32>
    %c16_i32_92 = arith.constant 16 : i32
    %253 = tpu.dynamic_rotate %243 by %c16_i32_92 dim 2 : vector<4x4x128xf32>, i32 -> vector<4x4x128xf32>
    %254 = arith.select %247, %252, %253 : vector<4x4x128xi1>, vector<4x4x128xf32>
    %255 = arith.xori %247, %251 : vector<4x4x128xi1>
    %cst_93 = arith.constant dense<true> : vector<4x4x128xi1>
    %256 = arith.xori %255, %cst_93 : vector<4x4x128xi1>
    %257 = arith.minimumf %243, %254 : vector<4x4x128xf32>
    %258 = arith.maximumf %243, %254 : vector<4x4x128xf32>
    %259 = arith.select %256, %257, %258 : vector<4x4x128xi1>, vector<4x4x128xf32>
    %c8_i32_94 = arith.constant 8 : i32
    %260 = vector.broadcast %c8_i32_94 : i32 to vector<4x4x128xi32>
    %261 = arith.andi %83, %260 : vector<4x4x128xi32>
    %c0_i32_95 = arith.constant 0 : i32
    %262 = vector.broadcast %c0_i32_95 : i32 to vector<4x4x128xi32>
    %263 = arith.cmpi eq, %261, %262 : vector<4x4x128xi32>
    %c32_i32_96 = arith.constant 32 : i32
    %264 = vector.broadcast %c32_i32_96 : i32 to vector<4x4x128xi32>
    %265 = arith.andi %83, %264 : vector<4x4x128xi32>
    %c0_i32_97 = arith.constant 0 : i32
    %266 = vector.broadcast %c0_i32_97 : i32 to vector<4x4x128xi32>
    %267 = arith.cmpi eq, %265, %266 : vector<4x4x128xi32>
    %c120_i32_98 = arith.constant 120 : i32
    %268 = tpu.dynamic_rotate %259 by %c120_i32_98 dim 2 : vector<4x4x128xf32>, i32 -> vector<4x4x128xf32>
    %c8_i32_99 = arith.constant 8 : i32
    %269 = tpu.dynamic_rotate %259 by %c8_i32_99 dim 2 : vector<4x4x128xf32>, i32 -> vector<4x4x128xf32>
    %270 = arith.select %263, %268, %269 : vector<4x4x128xi1>, vector<4x4x128xf32>
    %271 = arith.xori %263, %267 : vector<4x4x128xi1>
    %cst_100 = arith.constant dense<true> : vector<4x4x128xi1>
    %272 = arith.xori %271, %cst_100 : vector<4x4x128xi1>
    %273 = arith.minimumf %259, %270 : vector<4x4x128xf32>
    %274 = arith.maximumf %259, %270 : vector<4x4x128xf32>
    %275 = arith.select %272, %273, %274 : vector<4x4x128xi1>, vector<4x4x128xf32>
    %c4_i32_101 = arith.constant 4 : i32
    %276 = vector.broadcast %c4_i32_101 : i32 to vector<4x4x128xi32>
    %277 = arith.andi %83, %276 : vector<4x4x128xi32>
    %c0_i32_102 = arith.constant 0 : i32
    %278 = vector.broadcast %c0_i32_102 : i32 to vector<4x4x128xi32>
    %279 = arith.cmpi eq, %277, %278 : vector<4x4x128xi32>
    %c32_i32_103 = arith.constant 32 : i32
    %280 = vector.broadcast %c32_i32_103 : i32 to vector<4x4x128xi32>
    %281 = arith.andi %83, %280 : vector<4x4x128xi32>
    %c0_i32_104 = arith.constant 0 : i32
    %282 = vector.broadcast %c0_i32_104 : i32 to vector<4x4x128xi32>
    %283 = arith.cmpi eq, %281, %282 : vector<4x4x128xi32>
    %c124_i32_105 = arith.constant 124 : i32
    %284 = tpu.dynamic_rotate %275 by %c124_i32_105 dim 2 : vector<4x4x128xf32>, i32 -> vector<4x4x128xf32>
    %c4_i32_106 = arith.constant 4 : i32
    %285 = tpu.dynamic_rotate %275 by %c4_i32_106 dim 2 : vector<4x4x128xf32>, i32 -> vector<4x4x128xf32>
    %286 = arith.select %279, %284, %285 : vector<4x4x128xi1>, vector<4x4x128xf32>
    %287 = arith.xori %279, %283 : vector<4x4x128xi1>
    %cst_107 = arith.constant dense<true> : vector<4x4x128xi1>
    %288 = arith.xori %287, %cst_107 : vector<4x4x128xi1>
    %289 = arith.minimumf %275, %286 : vector<4x4x128xf32>
    %290 = arith.maximumf %275, %286 : vector<4x4x128xf32>
    %291 = arith.select %288, %289, %290 : vector<4x4x128xi1>, vector<4x4x128xf32>
    %c2_i32_108 = arith.constant 2 : i32
    %292 = vector.broadcast %c2_i32_108 : i32 to vector<4x4x128xi32>
    %293 = arith.andi %83, %292 : vector<4x4x128xi32>
    %c0_i32_109 = arith.constant 0 : i32
    %294 = vector.broadcast %c0_i32_109 : i32 to vector<4x4x128xi32>
    %295 = arith.cmpi eq, %293, %294 : vector<4x4x128xi32>
    %c32_i32_110 = arith.constant 32 : i32
    %296 = vector.broadcast %c32_i32_110 : i32 to vector<4x4x128xi32>
    %297 = arith.andi %83, %296 : vector<4x4x128xi32>
    %c0_i32_111 = arith.constant 0 : i32
    %298 = vector.broadcast %c0_i32_111 : i32 to vector<4x4x128xi32>
    %299 = arith.cmpi eq, %297, %298 : vector<4x4x128xi32>
    %c126_i32_112 = arith.constant 126 : i32
    %300 = tpu.dynamic_rotate %291 by %c126_i32_112 dim 2 : vector<4x4x128xf32>, i32 -> vector<4x4x128xf32>
    %c2_i32_113 = arith.constant 2 : i32
    %301 = tpu.dynamic_rotate %291 by %c2_i32_113 dim 2 : vector<4x4x128xf32>, i32 -> vector<4x4x128xf32>
    %302 = arith.select %295, %300, %301 : vector<4x4x128xi1>, vector<4x4x128xf32>
    %303 = arith.xori %295, %299 : vector<4x4x128xi1>
    %cst_114 = arith.constant dense<true> : vector<4x4x128xi1>
    %304 = arith.xori %303, %cst_114 : vector<4x4x128xi1>
    %305 = arith.minimumf %291, %302 : vector<4x4x128xf32>
    %306 = arith.maximumf %291, %302 : vector<4x4x128xf32>
    %307 = arith.select %304, %305, %306 : vector<4x4x128xi1>, vector<4x4x128xf32>
    %c1_i32_115 = arith.constant 1 : i32
    %308 = vector.broadcast %c1_i32_115 : i32 to vector<4x4x128xi32>
    %309 = arith.andi %83, %308 : vector<4x4x128xi32>
    %c0_i32_116 = arith.constant 0 : i32
    %310 = vector.broadcast %c0_i32_116 : i32 to vector<4x4x128xi32>
    %311 = arith.cmpi eq, %309, %310 : vector<4x4x128xi32>
    %c32_i32_117 = arith.constant 32 : i32
    %312 = vector.broadcast %c32_i32_117 : i32 to vector<4x4x128xi32>
    %313 = arith.andi %83, %312 : vector<4x4x128xi32>
    %c0_i32_118 = arith.constant 0 : i32
    %314 = vector.broadcast %c0_i32_118 : i32 to vector<4x4x128xi32>
    %315 = arith.cmpi eq, %313, %314 : vector<4x4x128xi32>
    %c127_i32_119 = arith.constant 127 : i32
    %316 = tpu.dynamic_rotate %307 by %c127_i32_119 dim 2 : vector<4x4x128xf32>, i32 -> vector<4x4x128xf32>
    %c1_i32_120 = arith.constant 1 : i32
    %317 = tpu.dynamic_rotate %307 by %c1_i32_120 dim 2 : vector<4x4x128xf32>, i32 -> vector<4x4x128xf32>
    %318 = arith.select %311, %316, %317 : vector<4x4x128xi1>, vector<4x4x128xf32>
    %319 = arith.xori %311, %315 : vector<4x4x128xi1>
    %cst_121 = arith.constant dense<true> : vector<4x4x128xi1>
    %320 = arith.xori %319, %cst_121 : vector<4x4x128xi1>
    %321 = arith.minimumf %307, %318 : vector<4x4x128xf32>
    %322 = arith.maximumf %307, %318 : vector<4x4x128xf32>
    %323 = arith.select %320, %321, %322 : vector<4x4x128xi1>, vector<4x4x128xf32>
    %c32_i32_122 = arith.constant 32 : i32
    %324 = vector.broadcast %c32_i32_122 : i32 to vector<4x4x128xi32>
    %325 = arith.andi %83, %324 : vector<4x4x128xi32>
    %c0_i32_123 = arith.constant 0 : i32
    %326 = vector.broadcast %c0_i32_123 : i32 to vector<4x4x128xi32>
    %327 = arith.cmpi eq, %325, %326 : vector<4x4x128xi32>
    %c64_i32 = arith.constant 64 : i32
    %328 = vector.broadcast %c64_i32 : i32 to vector<4x4x128xi32>
    %329 = arith.andi %83, %328 : vector<4x4x128xi32>
    %c0_i32_124 = arith.constant 0 : i32
    %330 = vector.broadcast %c0_i32_124 : i32 to vector<4x4x128xi32>
    %331 = arith.cmpi eq, %329, %330 : vector<4x4x128xi32>
    %c96_i32 = arith.constant 96 : i32
    %332 = tpu.dynamic_rotate %323 by %c96_i32 dim 2 : vector<4x4x128xf32>, i32 -> vector<4x4x128xf32>
    %c32_i32_125 = arith.constant 32 : i32
    %333 = tpu.dynamic_rotate %323 by %c32_i32_125 dim 2 : vector<4x4x128xf32>, i32 -> vector<4x4x128xf32>
    %334 = arith.select %327, %332, %333 : vector<4x4x128xi1>, vector<4x4x128xf32>
    %335 = arith.xori %327, %331 : vector<4x4x128xi1>
    %cst_126 = arith.constant dense<true> : vector<4x4x128xi1>
    %336 = arith.xori %335, %cst_126 : vector<4x4x128xi1>
    %337 = arith.minimumf %323, %334 : vector<4x4x128xf32>
    %338 = arith.maximumf %323, %334 : vector<4x4x128xf32>
    %339 = arith.select %336, %337, %338 : vector<4x4x128xi1>, vector<4x4x128xf32>
    %c16_i32_127 = arith.constant 16 : i32
    %340 = vector.broadcast %c16_i32_127 : i32 to vector<4x4x128xi32>
    %341 = arith.andi %83, %340 : vector<4x4x128xi32>
    %c0_i32_128 = arith.constant 0 : i32
    %342 = vector.broadcast %c0_i32_128 : i32 to vector<4x4x128xi32>
    %343 = arith.cmpi eq, %341, %342 : vector<4x4x128xi32>
    %c64_i32_129 = arith.constant 64 : i32
    %344 = vector.broadcast %c64_i32_129 : i32 to vector<4x4x128xi32>
    %345 = arith.andi %83, %344 : vector<4x4x128xi32>
    %c0_i32_130 = arith.constant 0 : i32
    %346 = vector.broadcast %c0_i32_130 : i32 to vector<4x4x128xi32>
    %347 = arith.cmpi eq, %345, %346 : vector<4x4x128xi32>
    %c112_i32_131 = arith.constant 112 : i32
    %348 = tpu.dynamic_rotate %339 by %c112_i32_131 dim 2 : vector<4x4x128xf32>, i32 -> vector<4x4x128xf32>
    %c16_i32_132 = arith.constant 16 : i32
    %349 = tpu.dynamic_rotate %339 by %c16_i32_132 dim 2 : vector<4x4x128xf32>, i32 -> vector<4x4x128xf32>
    %350 = arith.select %343, %348, %349 : vector<4x4x128xi1>, vector<4x4x128xf32>
    %351 = arith.xori %343, %347 : vector<4x4x128xi1>
    %cst_133 = arith.constant dense<true> : vector<4x4x128xi1>
    %352 = arith.xori %351, %cst_133 : vector<4x4x128xi1>
    %353 = arith.minimumf %339, %350 : vector<4x4x128xf32>
    %354 = arith.maximumf %339, %350 : vector<4x4x128xf32>
    %355 = arith.select %352, %353, %354 : vector<4x4x128xi1>, vector<4x4x128xf32>
    %c8_i32_134 = arith.constant 8 : i32
    %356 = vector.broadcast %c8_i32_134 : i32 to vector<4x4x128xi32>
    %357 = arith.andi %83, %356 : vector<4x4x128xi32>
    %c0_i32_135 = arith.constant 0 : i32
    %358 = vector.broadcast %c0_i32_135 : i32 to vector<4x4x128xi32>
    %359 = arith.cmpi eq, %357, %358 : vector<4x4x128xi32>
    %c64_i32_136 = arith.constant 64 : i32
    %360 = vector.broadcast %c64_i32_136 : i32 to vector<4x4x128xi32>
    %361 = arith.andi %83, %360 : vector<4x4x128xi32>
    %c0_i32_137 = arith.constant 0 : i32
    %362 = vector.broadcast %c0_i32_137 : i32 to vector<4x4x128xi32>
    %363 = arith.cmpi eq, %361, %362 : vector<4x4x128xi32>
    %c120_i32_138 = arith.constant 120 : i32
    %364 = tpu.dynamic_rotate %355 by %c120_i32_138 dim 2 : vector<4x4x128xf32>, i32 -> vector<4x4x128xf32>
    %c8_i32_139 = arith.constant 8 : i32
    %365 = tpu.dynamic_rotate %355 by %c8_i32_139 dim 2 : vector<4x4x128xf32>, i32 -> vector<4x4x128xf32>
    %366 = arith.select %359, %364, %365 : vector<4x4x128xi1>, vector<4x4x128xf32>
    %367 = arith.xori %359, %363 : vector<4x4x128xi1>
    %cst_140 = arith.constant dense<true> : vector<4x4x128xi1>
    %368 = arith.xori %367, %cst_140 : vector<4x4x128xi1>
    %369 = arith.minimumf %355, %366 : vector<4x4x128xf32>
    %370 = arith.maximumf %355, %366 : vector<4x4x128xf32>
    %371 = arith.select %368, %369, %370 : vector<4x4x128xi1>, vector<4x4x128xf32>
    %c4_i32_141 = arith.constant 4 : i32
    %372 = vector.broadcast %c4_i32_141 : i32 to vector<4x4x128xi32>
    %373 = arith.andi %83, %372 : vector<4x4x128xi32>
    %c0_i32_142 = arith.constant 0 : i32
    %374 = vector.broadcast %c0_i32_142 : i32 to vector<4x4x128xi32>
    %375 = arith.cmpi eq, %373, %374 : vector<4x4x128xi32>
    %c64_i32_143 = arith.constant 64 : i32
    %376 = vector.broadcast %c64_i32_143 : i32 to vector<4x4x128xi32>
    %377 = arith.andi %83, %376 : vector<4x4x128xi32>
    %c0_i32_144 = arith.constant 0 : i32
    %378 = vector.broadcast %c0_i32_144 : i32 to vector<4x4x128xi32>
    %379 = arith.cmpi eq, %377, %378 : vector<4x4x128xi32>
    %c124_i32_145 = arith.constant 124 : i32
    %380 = tpu.dynamic_rotate %371 by %c124_i32_145 dim 2 : vector<4x4x128xf32>, i32 -> vector<4x4x128xf32>
    %c4_i32_146 = arith.constant 4 : i32
    %381 = tpu.dynamic_rotate %371 by %c4_i32_146 dim 2 : vector<4x4x128xf32>, i32 -> vector<4x4x128xf32>
    %382 = arith.select %375, %380, %381 : vector<4x4x128xi1>, vector<4x4x128xf32>
    %383 = arith.xori %375, %379 : vector<4x4x128xi1>
    %cst_147 = arith.constant dense<true> : vector<4x4x128xi1>
    %384 = arith.xori %383, %cst_147 : vector<4x4x128xi1>
    %385 = arith.minimumf %371, %382 : vector<4x4x128xf32>
    %386 = arith.maximumf %371, %382 : vector<4x4x128xf32>
    %387 = arith.select %384, %385, %386 : vector<4x4x128xi1>, vector<4x4x128xf32>
    %c2_i32_148 = arith.constant 2 : i32
    %388 = vector.broadcast %c2_i32_148 : i32 to vector<4x4x128xi32>
    %389 = arith.andi %83, %388 : vector<4x4x128xi32>
    %c0_i32_149 = arith.constant 0 : i32
    %390 = vector.broadcast %c0_i32_149 : i32 to vector<4x4x128xi32>
    %391 = arith.cmpi eq, %389, %390 : vector<4x4x128xi32>
    %c64_i32_150 = arith.constant 64 : i32
    %392 = vector.broadcast %c64_i32_150 : i32 to vector<4x4x128xi32>
    %393 = arith.andi %83, %392 : vector<4x4x128xi32>
    %c0_i32_151 = arith.constant 0 : i32
    %394 = vector.broadcast %c0_i32_151 : i32 to vector<4x4x128xi32>
    %395 = arith.cmpi eq, %393, %394 : vector<4x4x128xi32>
    %c126_i32_152 = arith.constant 126 : i32
    %396 = tpu.dynamic_rotate %387 by %c126_i32_152 dim 2 : vector<4x4x128xf32>, i32 -> vector<4x4x128xf32>
    %c2_i32_153 = arith.constant 2 : i32
    %397 = tpu.dynamic_rotate %387 by %c2_i32_153 dim 2 : vector<4x4x128xf32>, i32 -> vector<4x4x128xf32>
    %398 = arith.select %391, %396, %397 : vector<4x4x128xi1>, vector<4x4x128xf32>
    %399 = arith.xori %391, %395 : vector<4x4x128xi1>
    %cst_154 = arith.constant dense<true> : vector<4x4x128xi1>
    %400 = arith.xori %399, %cst_154 : vector<4x4x128xi1>
    %401 = arith.minimumf %387, %398 : vector<4x4x128xf32>
    %402 = arith.maximumf %387, %398 : vector<4x4x128xf32>
    %403 = arith.select %400, %401, %402 : vector<4x4x128xi1>, vector<4x4x128xf32>
    %c1_i32_155 = arith.constant 1 : i32
    %404 = vector.broadcast %c1_i32_155 : i32 to vector<4x4x128xi32>
    %405 = arith.andi %83, %404 : vector<4x4x128xi32>
    %c0_i32_156 = arith.constant 0 : i32
    %406 = vector.broadcast %c0_i32_156 : i32 to vector<4x4x128xi32>
    %407 = arith.cmpi eq, %405, %406 : vector<4x4x128xi32>
    %c64_i32_157 = arith.constant 64 : i32
    %408 = vector.broadcast %c64_i32_157 : i32 to vector<4x4x128xi32>
    %409 = arith.andi %83, %408 : vector<4x4x128xi32>
    %c0_i32_158 = arith.constant 0 : i32
    %410 = vector.broadcast %c0_i32_158 : i32 to vector<4x4x128xi32>
    %411 = arith.cmpi eq, %409, %410 : vector<4x4x128xi32>
    %c127_i32_159 = arith.constant 127 : i32
    %412 = tpu.dynamic_rotate %403 by %c127_i32_159 dim 2 : vector<4x4x128xf32>, i32 -> vector<4x4x128xf32>
    %c1_i32_160 = arith.constant 1 : i32
    %413 = tpu.dynamic_rotate %403 by %c1_i32_160 dim 2 : vector<4x4x128xf32>, i32 -> vector<4x4x128xf32>
    %414 = arith.select %407, %412, %413 : vector<4x4x128xi1>, vector<4x4x128xf32>
    %415 = arith.xori %407, %411 : vector<4x4x128xi1>
    %cst_161 = arith.constant dense<true> : vector<4x4x128xi1>
    %416 = arith.xori %415, %cst_161 : vector<4x4x128xi1>
    %417 = arith.minimumf %403, %414 : vector<4x4x128xf32>
    %418 = arith.maximumf %403, %414 : vector<4x4x128xf32>
    %419 = arith.select %416, %417, %418 : vector<4x4x128xi1>, vector<4x4x128xf32>
    %c64_i32_162 = arith.constant 64 : i32
    %420 = vector.broadcast %c64_i32_162 : i32 to vector<4x4x128xi32>
    %421 = arith.andi %83, %420 : vector<4x4x128xi32>
    %c0_i32_163 = arith.constant 0 : i32
    %422 = vector.broadcast %c0_i32_163 : i32 to vector<4x4x128xi32>
    %423 = arith.cmpi eq, %421, %422 : vector<4x4x128xi32>
    %c128_i32 = arith.constant 128 : i32
    %424 = vector.broadcast %c128_i32 : i32 to vector<4x4x128xi32>
    %425 = arith.andi %83, %424 : vector<4x4x128xi32>
    %c0_i32_164 = arith.constant 0 : i32
    %426 = vector.broadcast %c0_i32_164 : i32 to vector<4x4x128xi32>
    %427 = arith.cmpi eq, %425, %426 : vector<4x4x128xi32>
    %c64_i32_165 = arith.constant 64 : i32
    %428 = tpu.dynamic_rotate %419 by %c64_i32_165 dim 2 : vector<4x4x128xf32>, i32 -> vector<4x4x128xf32>
    %c64_i32_166 = arith.constant 64 : i32
    %429 = tpu.dynamic_rotate %419 by %c64_i32_166 dim 2 : vector<4x4x128xf32>, i32 -> vector<4x4x128xf32>
    %430 = arith.select %423, %428, %429 : vector<4x4x128xi1>, vector<4x4x128xf32>
    %431 = arith.xori %423, %427 : vector<4x4x128xi1>
    %cst_167 = arith.constant dense<true> : vector<4x4x128xi1>
    %432 = arith.xori %431, %cst_167 : vector<4x4x128xi1>
    %433 = arith.minimumf %419, %430 : vector<4x4x128xf32>
    %434 = arith.maximumf %419, %430 : vector<4x4x128xf32>
    %435 = arith.select %432, %433, %434 : vector<4x4x128xi1>, vector<4x4x128xf32>
    %c32_i32_168 = arith.constant 32 : i32
    %436 = vector.broadcast %c32_i32_168 : i32 to vector<4x4x128xi32>
    %437 = arith.andi %83, %436 : vector<4x4x128xi32>
    %c0_i32_169 = arith.constant 0 : i32
    %438 = vector.broadcast %c0_i32_169 : i32 to vector<4x4x128xi32>
    %439 = arith.cmpi eq, %437, %438 : vector<4x4x128xi32>
    %c128_i32_170 = arith.constant 128 : i32
    %440 = vector.broadcast %c128_i32_170 : i32 to vector<4x4x128xi32>
    %441 = arith.andi %83, %440 : vector<4x4x128xi32>
    %c0_i32_171 = arith.constant 0 : i32
    %442 = vector.broadcast %c0_i32_171 : i32 to vector<4x4x128xi32>
    %443 = arith.cmpi eq, %441, %442 : vector<4x4x128xi32>
    %c96_i32_172 = arith.constant 96 : i32
    %444 = tpu.dynamic_rotate %435 by %c96_i32_172 dim 2 : vector<4x4x128xf32>, i32 -> vector<4x4x128xf32>
    %c32_i32_173 = arith.constant 32 : i32
    %445 = tpu.dynamic_rotate %435 by %c32_i32_173 dim 2 : vector<4x4x128xf32>, i32 -> vector<4x4x128xf32>
    %446 = arith.select %439, %444, %445 : vector<4x4x128xi1>, vector<4x4x128xf32>
    %447 = arith.xori %439, %443 : vector<4x4x128xi1>
    %cst_174 = arith.constant dense<true> : vector<4x4x128xi1>
    %448 = arith.xori %447, %cst_174 : vector<4x4x128xi1>
    %449 = arith.minimumf %435, %446 : vector<4x4x128xf32>
    %450 = arith.maximumf %435, %446 : vector<4x4x128xf32>
    %451 = arith.select %448, %449, %450 : vector<4x4x128xi1>, vector<4x4x128xf32>
    %c16_i32_175 = arith.constant 16 : i32
    %452 = vector.broadcast %c16_i32_175 : i32 to vector<4x4x128xi32>
    %453 = arith.andi %83, %452 : vector<4x4x128xi32>
    %c0_i32_176 = arith.constant 0 : i32
    %454 = vector.broadcast %c0_i32_176 : i32 to vector<4x4x128xi32>
    %455 = arith.cmpi eq, %453, %454 : vector<4x4x128xi32>
    %c128_i32_177 = arith.constant 128 : i32
    %456 = vector.broadcast %c128_i32_177 : i32 to vector<4x4x128xi32>
    %457 = arith.andi %83, %456 : vector<4x4x128xi32>
    %c0_i32_178 = arith.constant 0 : i32
    %458 = vector.broadcast %c0_i32_178 : i32 to vector<4x4x128xi32>
    %459 = arith.cmpi eq, %457, %458 : vector<4x4x128xi32>
    %c112_i32_179 = arith.constant 112 : i32
    %460 = tpu.dynamic_rotate %451 by %c112_i32_179 dim 2 : vector<4x4x128xf32>, i32 -> vector<4x4x128xf32>
    %c16_i32_180 = arith.constant 16 : i32
    %461 = tpu.dynamic_rotate %451 by %c16_i32_180 dim 2 : vector<4x4x128xf32>, i32 -> vector<4x4x128xf32>
    %462 = arith.select %455, %460, %461 : vector<4x4x128xi1>, vector<4x4x128xf32>
    %463 = arith.xori %455, %459 : vector<4x4x128xi1>
    %cst_181 = arith.constant dense<true> : vector<4x4x128xi1>
    %464 = arith.xori %463, %cst_181 : vector<4x4x128xi1>
    %465 = arith.minimumf %451, %462 : vector<4x4x128xf32>
    %466 = arith.maximumf %451, %462 : vector<4x4x128xf32>
    %467 = arith.select %464, %465, %466 : vector<4x4x128xi1>, vector<4x4x128xf32>
    %c8_i32_182 = arith.constant 8 : i32
    %468 = vector.broadcast %c8_i32_182 : i32 to vector<4x4x128xi32>
    %469 = arith.andi %83, %468 : vector<4x4x128xi32>
    %c0_i32_183 = arith.constant 0 : i32
    %470 = vector.broadcast %c0_i32_183 : i32 to vector<4x4x128xi32>
    %471 = arith.cmpi eq, %469, %470 : vector<4x4x128xi32>
    %c128_i32_184 = arith.constant 128 : i32
    %472 = vector.broadcast %c128_i32_184 : i32 to vector<4x4x128xi32>
    %473 = arith.andi %83, %472 : vector<4x4x128xi32>
    %c0_i32_185 = arith.constant 0 : i32
    %474 = vector.broadcast %c0_i32_185 : i32 to vector<4x4x128xi32>
    %475 = arith.cmpi eq, %473, %474 : vector<4x4x128xi32>
    %c120_i32_186 = arith.constant 120 : i32
    %476 = tpu.dynamic_rotate %467 by %c120_i32_186 dim 2 : vector<4x4x128xf32>, i32 -> vector<4x4x128xf32>
    %c8_i32_187 = arith.constant 8 : i32
    %477 = tpu.dynamic_rotate %467 by %c8_i32_187 dim 2 : vector<4x4x128xf32>, i32 -> vector<4x4x128xf32>
    %478 = arith.select %471, %476, %477 : vector<4x4x128xi1>, vector<4x4x128xf32>
    %479 = arith.xori %471, %475 : vector<4x4x128xi1>
    %cst_188 = arith.constant dense<true> : vector<4x4x128xi1>
    %480 = arith.xori %479, %cst_188 : vector<4x4x128xi1>
    %481 = arith.minimumf %467, %478 : vector<4x4x128xf32>
    %482 = arith.maximumf %467, %478 : vector<4x4x128xf32>
    %483 = arith.select %480, %481, %482 : vector<4x4x128xi1>, vector<4x4x128xf32>
    %c4_i32_189 = arith.constant 4 : i32
    %484 = vector.broadcast %c4_i32_189 : i32 to vector<4x4x128xi32>
    %485 = arith.andi %83, %484 : vector<4x4x128xi32>
    %c0_i32_190 = arith.constant 0 : i32
    %486 = vector.broadcast %c0_i32_190 : i32 to vector<4x4x128xi32>
    %487 = arith.cmpi eq, %485, %486 : vector<4x4x128xi32>
    %c128_i32_191 = arith.constant 128 : i32
    %488 = vector.broadcast %c128_i32_191 : i32 to vector<4x4x128xi32>
    %489 = arith.andi %83, %488 : vector<4x4x128xi32>
    %c0_i32_192 = arith.constant 0 : i32
    %490 = vector.broadcast %c0_i32_192 : i32 to vector<4x4x128xi32>
    %491 = arith.cmpi eq, %489, %490 : vector<4x4x128xi32>
    %c124_i32_193 = arith.constant 124 : i32
    %492 = tpu.dynamic_rotate %483 by %c124_i32_193 dim 2 : vector<4x4x128xf32>, i32 -> vector<4x4x128xf32>
    %c4_i32_194 = arith.constant 4 : i32
    %493 = tpu.dynamic_rotate %483 by %c4_i32_194 dim 2 : vector<4x4x128xf32>, i32 -> vector<4x4x128xf32>
    %494 = arith.select %487, %492, %493 : vector<4x4x128xi1>, vector<4x4x128xf32>
    %495 = arith.xori %487, %491 : vector<4x4x128xi1>
    %cst_195 = arith.constant dense<true> : vector<4x4x128xi1>
    %496 = arith.xori %495, %cst_195 : vector<4x4x128xi1>
    %497 = arith.minimumf %483, %494 : vector<4x4x128xf32>
    %498 = arith.maximumf %483, %494 : vector<4x4x128xf32>
    %499 = arith.select %496, %497, %498 : vector<4x4x128xi1>, vector<4x4x128xf32>
    %c2_i32_196 = arith.constant 2 : i32
    %500 = vector.broadcast %c2_i32_196 : i32 to vector<4x4x128xi32>
    %501 = arith.andi %83, %500 : vector<4x4x128xi32>
    %c0_i32_197 = arith.constant 0 : i32
    %502 = vector.broadcast %c0_i32_197 : i32 to vector<4x4x128xi32>
    %503 = arith.cmpi eq, %501, %502 : vector<4x4x128xi32>
    %c128_i32_198 = arith.constant 128 : i32
    %504 = vector.broadcast %c128_i32_198 : i32 to vector<4x4x128xi32>
    %505 = arith.andi %83, %504 : vector<4x4x128xi32>
    %c0_i32_199 = arith.constant 0 : i32
    %506 = vector.broadcast %c0_i32_199 : i32 to vector<4x4x128xi32>
    %507 = arith.cmpi eq, %505, %506 : vector<4x4x128xi32>
    %c126_i32_200 = arith.constant 126 : i32
    %508 = tpu.dynamic_rotate %499 by %c126_i32_200 dim 2 : vector<4x4x128xf32>, i32 -> vector<4x4x128xf32>
    %c2_i32_201 = arith.constant 2 : i32
    %509 = tpu.dynamic_rotate %499 by %c2_i32_201 dim 2 : vector<4x4x128xf32>, i32 -> vector<4x4x128xf32>
    %510 = arith.select %503, %508, %509 : vector<4x4x128xi1>, vector<4x4x128xf32>
    %511 = arith.xori %503, %507 : vector<4x4x128xi1>
    %cst_202 = arith.constant dense<true> : vector<4x4x128xi1>
    %512 = arith.xori %511, %cst_202 : vector<4x4x128xi1>
    %513 = arith.minimumf %499, %510 : vector<4x4x128xf32>
    %514 = arith.maximumf %499, %510 : vector<4x4x128xf32>
    %515 = arith.select %512, %513, %514 : vector<4x4x128xi1>, vector<4x4x128xf32>
    %c1_i32_203 = arith.constant 1 : i32
    %516 = vector.broadcast %c1_i32_203 : i32 to vector<4x4x128xi32>
    %517 = arith.andi %83, %516 : vector<4x4x128xi32>
    %c0_i32_204 = arith.constant 0 : i32
    %518 = vector.broadcast %c0_i32_204 : i32 to vector<4x4x128xi32>
    %519 = arith.cmpi eq, %517, %518 : vector<4x4x128xi32>
    %c128_i32_205 = arith.constant 128 : i32
    %520 = vector.broadcast %c128_i32_205 : i32 to vector<4x4x128xi32>
    %521 = arith.andi %83, %520 : vector<4x4x128xi32>
    %c0_i32_206 = arith.constant 0 : i32
    %522 = vector.broadcast %c0_i32_206 : i32 to vector<4x4x128xi32>
    %523 = arith.cmpi eq, %521, %522 : vector<4x4x128xi32>
    %c127_i32_207 = arith.constant 127 : i32
    %524 = tpu.dynamic_rotate %515 by %c127_i32_207 dim 2 : vector<4x4x128xf32>, i32 -> vector<4x4x128xf32>
    %c1_i32_208 = arith.constant 1 : i32
    %525 = tpu.dynamic_rotate %515 by %c1_i32_208 dim 2 : vector<4x4x128xf32>, i32 -> vector<4x4x128xf32>
    %526 = arith.select %519, %524, %525 : vector<4x4x128xi1>, vector<4x4x128xf32>
    %527 = arith.xori %519, %523 : vector<4x4x128xi1>
    %cst_209 = arith.constant dense<true> : vector<4x4x128xi1>
    %528 = arith.xori %527, %cst_209 : vector<4x4x128xi1>
    %529 = arith.minimumf %515, %526 : vector<4x4x128xf32>
    %530 = arith.maximumf %515, %526 : vector<4x4x128xf32>
    %531 = arith.select %528, %529, %530 : vector<4x4x128xi1>, vector<4x4x128xf32>
    %532 = vector.extract_strided_slice %531 {offsets = [0, 0, 0], sizes = [4, 4, 32], strides = [1, 1, 1]} : vector<4x4x128xf32> to vector<4x4x32xf32>
    %533 = vector.extract_strided_slice %532 {offsets = [0, 0, 0], sizes = [4, 1, 32], strides = [1, 1, 1]} : vector<4x4x32xf32> to vector<4x1x32xf32>
    %534 = vector.shape_cast %533 : vector<4x1x32xf32> to vector<4x32xf32>
    %535 = vector.extract_strided_slice %532 {offsets = [0, 1, 0], sizes = [4, 1, 32], strides = [1, 1, 1]} : vector<4x4x32xf32> to vector<4x1x32xf32>
    %536 = vector.shape_cast %535 : vector<4x1x32xf32> to vector<4x32xf32>
    %537 = vector.extract_strided_slice %532 {offsets = [0, 2, 0], sizes = [4, 1, 32], strides = [1, 1, 1]} : vector<4x4x32xf32> to vector<4x1x32xf32>
    %538 = vector.shape_cast %537 : vector<4x1x32xf32> to vector<4x32xf32>
    %539 = vector.extract_strided_slice %532 {offsets = [0, 3, 0], sizes = [4, 1, 32], strides = [1, 1, 1]} : vector<4x4x32xf32> to vector<4x1x32xf32>
    %540 = vector.shape_cast %539 : vector<4x1x32xf32> to vector<4x32xf32>
    %541 = tpu.concatenate %534, %536, %538, %540 in 1 : vector<4x32xf32>, vector<4x32xf32>, vector<4x32xf32>, vector<4x32xf32> -> vector<4x128xf32>
    %542 = vector.shape_cast %54 : vector<4x64x32xf32> to vector<256x32xf32>
    %c0_210 = arith.constant 0 : index
    %c0_211 = arith.constant 0 : index
    %543 = vector.load %arg4[%c0_210, %c0_211] : memref<32x8xf32, #tpu.memory_space<vmem>>, vector<32x8xf32>
    %cst_212 = arith.constant dense<0.000000e+00> : vector<256x8xf32>
    %544 = tpu.matmul %542, %543, %cst_212 {dimension_numbers = #tpu.dot_dimension_numbers<[1], [0], [0], [1], [0, 0, 1, 1], [], []>} : vector<256x32xf32>, vector<32x8xf32>, vector<256x8xf32> -> vector<256x8xf32>
    %545 = vector.shape_cast %544 : vector<256x8xf32> to vector<4x64x8xf32>
    %546 = vector.broadcast %4 : vector<4x64x1xf32> to vector<4x64x8xf32>
    %547 = arith.mulf %545, %546 : vector<4x64x8xf32>
    "tpu.trace_start"() <{level = 10 : i32, message = "gds,gsf->gdf"}> : () -> ()
    %cst_213 = arith.constant dense<0.000000e+00> : vector<4x64x8xf32>
    %548 = tpu.matmul %0, %547, %cst_213 {dimension_numbers = #tpu.dot_dimension_numbers<[2], [1], [1], [2], [0, 0, 0, 1, 1, 2], [0], [0]>} : vector<4x64x64xf32>, vector<4x64x8xf32>, vector<4x64x8xf32> -> vector<4x64x8xf32>
    "tpu.trace_stop"() : () -> ()
    %549 = vector.broadcast %3 : vector<4x64x1xf32> to vector<4x64x8xf32>
    %550 = arith.mulf %548, %549 : vector<4x64x8xf32>
    %c0_214 = arith.constant 0 : index
    %c0_215 = arith.constant 0 : index
    %551 = vector.load %arg6[%c0_214, %c0_215] : memref<3x8xf32, #tpu.memory_space<vmem>>, vector<1x8xf32>
    %c1_216 = arith.constant 1 : index
    %c0_217 = arith.constant 0 : index
    %552 = vector.load %arg6[%c1_216, %c0_217] : memref<3x8xf32, #tpu.memory_space<vmem>>, vector<1x8xf32>
    %c2_218 = arith.constant 2 : index
    %c0_219 = arith.constant 0 : index
    %553 = vector.load %arg6[%c2_218, %c0_219] : memref<3x8xf32, #tpu.memory_space<vmem>>, vector<1x8xf32>
    %554 = arith.mulf %550, %550 : vector<4x64x8xf32>
    %555 = tpu.concatenate %550, %554 in 2 : vector<4x64x8xf32>, vector<4x64x8xf32> -> vector<4x64x16xf32>
    "tpu.trace_start"() <{level = 10 : i32, message = "gon,gnc->goc"}> : () -> ()
    %cst_220 = arith.constant dense<0.000000e+00> : vector<4x1x16xf32>
    %556 = tpu.matmul %5, %555, %cst_220 {dimension_numbers = #tpu.dot_dimension_numbers<[2], [1], [1], [2], [0, 0, 0, 1, 1, 2], [0], [0]>} : vector<4x1x64xf32>, vector<4x64x16xf32>, vector<4x1x16xf32> -> vector<4x1x16xf32>
    "tpu.trace_stop"() : () -> ()
    %cst_221 = arith.constant 1.562500e-02 : f32
    %557 = vector.broadcast %cst_221 : f32 to vector<4x1x16xf32>
    %558 = arith.mulf %556, %557 : vector<4x1x16xf32>
    %559 = vector.extract_strided_slice %558 {offsets = [0, 0, 0], sizes = [4, 1, 8], strides = [1, 1, 1]} : vector<4x1x16xf32> to vector<4x1x8xf32>
    %560 = vector.extract_strided_slice %558 {offsets = [0, 0, 8], sizes = [4, 1, 8], strides = [1, 1, 1]} : vector<4x1x16xf32> to vector<4x1x8xf32>
    %cst_222 = arith.constant 2.000000e+00 : f32
    %561 = vector.broadcast %cst_222 : f32 to vector<1x8xf32>
    %562 = arith.mulf %561, %553 : vector<1x8xf32>
    %563 = arith.mulf %553, %553 : vector<1x8xf32>
    %564 = arith.subf %562, %563 : vector<1x8xf32>
    %565 = arith.mulf %559, %559 : vector<4x1x8xf32>
    %566 = vector.shape_cast %564 : vector<1x8xf32> to vector<1x1x8xf32>
    %567 = vector.broadcast %566 : vector<1x1x8xf32> to vector<4x1x8xf32>
    %568 = arith.mulf %567, %565 : vector<4x1x8xf32>
    %569 = arith.subf %560, %568 : vector<4x1x8xf32>
    %570 = vector.shape_cast %553 : vector<1x8xf32> to vector<1x1x8xf32>
    %571 = vector.broadcast %570 : vector<1x1x8xf32> to vector<4x1x8xf32>
    %572 = arith.mulf %571, %559 : vector<4x1x8xf32>
    %573 = vector.broadcast %572 : vector<4x1x8xf32> to vector<4x64x8xf32>
    %574 = arith.subf %550, %573 : vector<4x64x8xf32>
    %575 = vector.shape_cast %551 : vector<1x8xf32> to vector<1x1x8xf32>
    %576 = vector.broadcast %575 : vector<1x1x8xf32> to vector<4x64x8xf32>
    %577 = arith.mulf %576, %574 : vector<4x64x8xf32>
    %cst_223 = arith.constant 9.99999974E-6 : f32
    %578 = vector.broadcast %cst_223 : f32 to vector<4x1x8xf32>
    %579 = arith.addf %569, %578 : vector<4x1x8xf32>
    %580 = math.rsqrt %579 : vector<4x1x8xf32>
    %581 = vector.broadcast %580 : vector<4x1x8xf32> to vector<4x64x8xf32>
    %582 = arith.mulf %577, %581 : vector<4x64x8xf32>
    %583 = vector.shape_cast %552 : vector<1x8xf32> to vector<1x1x8xf32>
    %584 = vector.broadcast %583 : vector<1x1x8xf32> to vector<4x64x8xf32>
    %585 = arith.addf %582, %584 : vector<4x64x8xf32>
    %cst_224 = arith.constant 0.000000e+00 : f32
    %586 = vector.broadcast %cst_224 : f32 to vector<4x64x8xf32>
    %587 = arith.cmpf ogt, %585, %586 : vector<4x64x8xf32>
    %cst_225 = arith.constant 0.00999999977 : f32
    %588 = vector.broadcast %cst_225 : f32 to vector<4x64x8xf32>
    %589 = arith.mulf %588, %585 : vector<4x64x8xf32>
    %590 = arith.select %587, %585, %589 : vector<4x64x8xi1>, vector<4x64x8xf32>
    %cst_226 = arith.constant dense<0xFF800000> : vector<4x64xf32>
    %591 = vector.multi_reduction <maximumf>, %590, %cst_226 [2] : vector<4x64x8xf32> to vector<4x64xf32>
    %592 = vector.shape_cast %591 : vector<4x64xf32> to vector<4x64x1xf32>
    %cst_227 = arith.constant 1.000000e+00 : f32
    %593 = vector.broadcast %cst_227 : f32 to vector<4x64x1xf32>
    "tpu.trace_start"() <{level = 10 : i32, message = "gio,gjo->gij"}> : () -> ()
    %cst_228 = arith.constant dense<0.000000e+00> : vector<4x64x64xf32>
    %594 = tpu.matmul %593, %592, %cst_228 {dimension_numbers = #tpu.dot_dimension_numbers<[2], [2], [1], [1], [0, 0, 0, 1, 1, 1], [0], [0]>} : vector<4x64x1xf32>, vector<4x64x1xf32>, vector<4x64x64xf32> -> vector<4x64x64xf32>
    "tpu.trace_stop"() : () -> ()
    %595 = tpu.iota {dimensions = array<i32: 1>} : vector<4x64x64xi32>
    %596 = tpu.iota {dimensions = array<i32: 2>} : vector<4x64x64xi32>
    %597 = vector.broadcast %592 : vector<4x64x1xf32> to vector<4x64x64xf32>
    %598 = arith.cmpf ogt, %597, %594 : vector<4x64x64xf32>
    %599 = vector.broadcast %592 : vector<4x64x1xf32> to vector<4x64x64xf32>
    %600 = arith.cmpf oeq, %599, %594 : vector<4x64x64xf32>
    %601 = arith.cmpi slt, %595, %596 : vector<4x64x64xi32>
    %602 = arith.andi %600, %601 : vector<4x64x64xi1>
    %603 = arith.ori %598, %602 : vector<4x64x64xi1>
    %cst_229 = arith.constant 1.000000e+00 : f32
    %cst_230 = arith.constant 0.000000e+00 : f32
    %604 = vector.broadcast %cst_229 : f32 to vector<4x64x64xf32>
    %605 = vector.broadcast %cst_230 : f32 to vector<4x64x64xf32>
    %606 = arith.select %603, %604, %605 : vector<4x64x64xi1>, vector<4x64x64xf32>
    %cst_231 = arith.constant dense<0.000000e+00> : vector<4x64xf32>
    %607 = vector.multi_reduction <add>, %606, %cst_231 [1] : vector<4x64x64xf32> to vector<4x64xf32>
    %608 = vector.shape_cast %607 : vector<4x64xf32> to vector<4x1x64xf32>
    %609 = arith.fptosi %608 : vector<4x1x64xf32> to vector<4x1x64xi32>
    %610 = tpu.iota {dimensions = array<i32: 1>} : vector<4x4x64xi32>
    %611 = vector.broadcast %609 : vector<4x1x64xi32> to vector<4x4x64xi32>
    %612 = arith.cmpi eq, %611, %610 : vector<4x4x64xi32>
    %cst_232 = arith.constant 1.000000e+00 : f32
    %cst_233 = arith.constant 0.000000e+00 : f32
    %613 = vector.broadcast %cst_232 : f32 to vector<4x4x64xf32>
    %614 = vector.broadcast %cst_233 : f32 to vector<4x4x64xf32>
    %615 = arith.select %612, %613, %614 : vector<4x4x64xi1>, vector<4x4x64xf32>
    "tpu.trace_start"() <{level = 10 : i32, message = "gkn,gnf->gkf"}> : () -> ()
    %cst_234 = arith.constant dense<0.000000e+00> : vector<4x4x8xf32>
    %616 = tpu.matmul %615, %590, %cst_234 {dimension_numbers = #tpu.dot_dimension_numbers<[2], [1], [1], [2], [0, 0, 0, 1, 1, 2], [0], [0]>} : vector<4x4x64xf32>, vector<4x64x8xf32>, vector<4x4x8xf32> -> vector<4x4x8xf32>
    %cst_235 = arith.constant 3.000000e+38 : f32
    "tpu.trace_stop"() : () -> ()
    %617 = vector.broadcast %cst_235 : f32 to vector<4x4x120xf32>
    %618 = tpu.concatenate %616, %617 in 2 : vector<4x4x8xf32>, vector<4x4x120xf32> -> vector<4x4x128xf32>
    %619 = tpu.iota {dimensions = array<i32: 2>} : vector<4x4x128xi32>
    %c1_i32_236 = arith.constant 1 : i32
    %620 = vector.broadcast %c1_i32_236 : i32 to vector<4x4x128xi32>
    %621 = arith.andi %619, %620 : vector<4x4x128xi32>
    %c0_i32_237 = arith.constant 0 : i32
    %622 = vector.broadcast %c0_i32_237 : i32 to vector<4x4x128xi32>
    %623 = arith.cmpi eq, %621, %622 : vector<4x4x128xi32>
    %c2_i32_238 = arith.constant 2 : i32
    %624 = vector.broadcast %c2_i32_238 : i32 to vector<4x4x128xi32>
    %625 = arith.andi %619, %624 : vector<4x4x128xi32>
    %c0_i32_239 = arith.constant 0 : i32
    %626 = vector.broadcast %c0_i32_239 : i32 to vector<4x4x128xi32>
    %627 = arith.cmpi eq, %625, %626 : vector<4x4x128xi32>
    %c127_i32_240 = arith.constant 127 : i32
    %628 = tpu.dynamic_rotate %618 by %c127_i32_240 dim 2 : vector<4x4x128xf32>, i32 -> vector<4x4x128xf32>
    %c1_i32_241 = arith.constant 1 : i32
    %629 = tpu.dynamic_rotate %618 by %c1_i32_241 dim 2 : vector<4x4x128xf32>, i32 -> vector<4x4x128xf32>
    %630 = arith.select %623, %628, %629 : vector<4x4x128xi1>, vector<4x4x128xf32>
    %631 = arith.xori %623, %627 : vector<4x4x128xi1>
    %cst_242 = arith.constant dense<true> : vector<4x4x128xi1>
    %632 = arith.xori %631, %cst_242 : vector<4x4x128xi1>
    %633 = arith.minimumf %618, %630 : vector<4x4x128xf32>
    %634 = arith.maximumf %618, %630 : vector<4x4x128xf32>
    %635 = arith.select %632, %633, %634 : vector<4x4x128xi1>, vector<4x4x128xf32>
    %c2_i32_243 = arith.constant 2 : i32
    %636 = vector.broadcast %c2_i32_243 : i32 to vector<4x4x128xi32>
    %637 = arith.andi %619, %636 : vector<4x4x128xi32>
    %c0_i32_244 = arith.constant 0 : i32
    %638 = vector.broadcast %c0_i32_244 : i32 to vector<4x4x128xi32>
    %639 = arith.cmpi eq, %637, %638 : vector<4x4x128xi32>
    %c4_i32_245 = arith.constant 4 : i32
    %640 = vector.broadcast %c4_i32_245 : i32 to vector<4x4x128xi32>
    %641 = arith.andi %619, %640 : vector<4x4x128xi32>
    %c0_i32_246 = arith.constant 0 : i32
    %642 = vector.broadcast %c0_i32_246 : i32 to vector<4x4x128xi32>
    %643 = arith.cmpi eq, %641, %642 : vector<4x4x128xi32>
    %c126_i32_247 = arith.constant 126 : i32
    %644 = tpu.dynamic_rotate %635 by %c126_i32_247 dim 2 : vector<4x4x128xf32>, i32 -> vector<4x4x128xf32>
    %c2_i32_248 = arith.constant 2 : i32
    %645 = tpu.dynamic_rotate %635 by %c2_i32_248 dim 2 : vector<4x4x128xf32>, i32 -> vector<4x4x128xf32>
    %646 = arith.select %639, %644, %645 : vector<4x4x128xi1>, vector<4x4x128xf32>
    %647 = arith.xori %639, %643 : vector<4x4x128xi1>
    %cst_249 = arith.constant dense<true> : vector<4x4x128xi1>
    %648 = arith.xori %647, %cst_249 : vector<4x4x128xi1>
    %649 = arith.minimumf %635, %646 : vector<4x4x128xf32>
    %650 = arith.maximumf %635, %646 : vector<4x4x128xf32>
    %651 = arith.select %648, %649, %650 : vector<4x4x128xi1>, vector<4x4x128xf32>
    %c1_i32_250 = arith.constant 1 : i32
    %652 = vector.broadcast %c1_i32_250 : i32 to vector<4x4x128xi32>
    %653 = arith.andi %619, %652 : vector<4x4x128xi32>
    %c0_i32_251 = arith.constant 0 : i32
    %654 = vector.broadcast %c0_i32_251 : i32 to vector<4x4x128xi32>
    %655 = arith.cmpi eq, %653, %654 : vector<4x4x128xi32>
    %c4_i32_252 = arith.constant 4 : i32
    %656 = vector.broadcast %c4_i32_252 : i32 to vector<4x4x128xi32>
    %657 = arith.andi %619, %656 : vector<4x4x128xi32>
    %c0_i32_253 = arith.constant 0 : i32
    %658 = vector.broadcast %c0_i32_253 : i32 to vector<4x4x128xi32>
    %659 = arith.cmpi eq, %657, %658 : vector<4x4x128xi32>
    %c127_i32_254 = arith.constant 127 : i32
    %660 = tpu.dynamic_rotate %651 by %c127_i32_254 dim 2 : vector<4x4x128xf32>, i32 -> vector<4x4x128xf32>
    %c1_i32_255 = arith.constant 1 : i32
    %661 = tpu.dynamic_rotate %651 by %c1_i32_255 dim 2 : vector<4x4x128xf32>, i32 -> vector<4x4x128xf32>
    %662 = arith.select %655, %660, %661 : vector<4x4x128xi1>, vector<4x4x128xf32>
    %663 = arith.xori %655, %659 : vector<4x4x128xi1>
    %cst_256 = arith.constant dense<true> : vector<4x4x128xi1>
    %664 = arith.xori %663, %cst_256 : vector<4x4x128xi1>
    %665 = arith.minimumf %651, %662 : vector<4x4x128xf32>
    %666 = arith.maximumf %651, %662 : vector<4x4x128xf32>
    %667 = arith.select %664, %665, %666 : vector<4x4x128xi1>, vector<4x4x128xf32>
    %c4_i32_257 = arith.constant 4 : i32
    %668 = vector.broadcast %c4_i32_257 : i32 to vector<4x4x128xi32>
    %669 = arith.andi %619, %668 : vector<4x4x128xi32>
    %c0_i32_258 = arith.constant 0 : i32
    %670 = vector.broadcast %c0_i32_258 : i32 to vector<4x4x128xi32>
    %671 = arith.cmpi eq, %669, %670 : vector<4x4x128xi32>
    %c8_i32_259 = arith.constant 8 : i32
    %672 = vector.broadcast %c8_i32_259 : i32 to vector<4x4x128xi32>
    %673 = arith.andi %619, %672 : vector<4x4x128xi32>
    %c0_i32_260 = arith.constant 0 : i32
    %674 = vector.broadcast %c0_i32_260 : i32 to vector<4x4x128xi32>
    %675 = arith.cmpi eq, %673, %674 : vector<4x4x128xi32>
    %c124_i32_261 = arith.constant 124 : i32
    %676 = tpu.dynamic_rotate %667 by %c124_i32_261 dim 2 : vector<4x4x128xf32>, i32 -> vector<4x4x128xf32>
    %c4_i32_262 = arith.constant 4 : i32
    %677 = tpu.dynamic_rotate %667 by %c4_i32_262 dim 2 : vector<4x4x128xf32>, i32 -> vector<4x4x128xf32>
    %678 = arith.select %671, %676, %677 : vector<4x4x128xi1>, vector<4x4x128xf32>
    %679 = arith.xori %671, %675 : vector<4x4x128xi1>
    %cst_263 = arith.constant dense<true> : vector<4x4x128xi1>
    %680 = arith.xori %679, %cst_263 : vector<4x4x128xi1>
    %681 = arith.minimumf %667, %678 : vector<4x4x128xf32>
    %682 = arith.maximumf %667, %678 : vector<4x4x128xf32>
    %683 = arith.select %680, %681, %682 : vector<4x4x128xi1>, vector<4x4x128xf32>
    %c2_i32_264 = arith.constant 2 : i32
    %684 = vector.broadcast %c2_i32_264 : i32 to vector<4x4x128xi32>
    %685 = arith.andi %619, %684 : vector<4x4x128xi32>
    %c0_i32_265 = arith.constant 0 : i32
    %686 = vector.broadcast %c0_i32_265 : i32 to vector<4x4x128xi32>
    %687 = arith.cmpi eq, %685, %686 : vector<4x4x128xi32>
    %c8_i32_266 = arith.constant 8 : i32
    %688 = vector.broadcast %c8_i32_266 : i32 to vector<4x4x128xi32>
    %689 = arith.andi %619, %688 : vector<4x4x128xi32>
    %c0_i32_267 = arith.constant 0 : i32
    %690 = vector.broadcast %c0_i32_267 : i32 to vector<4x4x128xi32>
    %691 = arith.cmpi eq, %689, %690 : vector<4x4x128xi32>
    %c126_i32_268 = arith.constant 126 : i32
    %692 = tpu.dynamic_rotate %683 by %c126_i32_268 dim 2 : vector<4x4x128xf32>, i32 -> vector<4x4x128xf32>
    %c2_i32_269 = arith.constant 2 : i32
    %693 = tpu.dynamic_rotate %683 by %c2_i32_269 dim 2 : vector<4x4x128xf32>, i32 -> vector<4x4x128xf32>
    %694 = arith.select %687, %692, %693 : vector<4x4x128xi1>, vector<4x4x128xf32>
    %695 = arith.xori %687, %691 : vector<4x4x128xi1>
    %cst_270 = arith.constant dense<true> : vector<4x4x128xi1>
    %696 = arith.xori %695, %cst_270 : vector<4x4x128xi1>
    %697 = arith.minimumf %683, %694 : vector<4x4x128xf32>
    %698 = arith.maximumf %683, %694 : vector<4x4x128xf32>
    %699 = arith.select %696, %697, %698 : vector<4x4x128xi1>, vector<4x4x128xf32>
    %c1_i32_271 = arith.constant 1 : i32
    %700 = vector.broadcast %c1_i32_271 : i32 to vector<4x4x128xi32>
    %701 = arith.andi %619, %700 : vector<4x4x128xi32>
    %c0_i32_272 = arith.constant 0 : i32
    %702 = vector.broadcast %c0_i32_272 : i32 to vector<4x4x128xi32>
    %703 = arith.cmpi eq, %701, %702 : vector<4x4x128xi32>
    %c8_i32_273 = arith.constant 8 : i32
    %704 = vector.broadcast %c8_i32_273 : i32 to vector<4x4x128xi32>
    %705 = arith.andi %619, %704 : vector<4x4x128xi32>
    %c0_i32_274 = arith.constant 0 : i32
    %706 = vector.broadcast %c0_i32_274 : i32 to vector<4x4x128xi32>
    %707 = arith.cmpi eq, %705, %706 : vector<4x4x128xi32>
    %c127_i32_275 = arith.constant 127 : i32
    %708 = tpu.dynamic_rotate %699 by %c127_i32_275 dim 2 : vector<4x4x128xf32>, i32 -> vector<4x4x128xf32>
    %c1_i32_276 = arith.constant 1 : i32
    %709 = tpu.dynamic_rotate %699 by %c1_i32_276 dim 2 : vector<4x4x128xf32>, i32 -> vector<4x4x128xf32>
    %710 = arith.select %703, %708, %709 : vector<4x4x128xi1>, vector<4x4x128xf32>
    %711 = arith.xori %703, %707 : vector<4x4x128xi1>
    %cst_277 = arith.constant dense<true> : vector<4x4x128xi1>
    %712 = arith.xori %711, %cst_277 : vector<4x4x128xi1>
    %713 = arith.minimumf %699, %710 : vector<4x4x128xf32>
    %714 = arith.maximumf %699, %710 : vector<4x4x128xf32>
    %715 = arith.select %712, %713, %714 : vector<4x4x128xi1>, vector<4x4x128xf32>
    %c8_i32_278 = arith.constant 8 : i32
    %716 = vector.broadcast %c8_i32_278 : i32 to vector<4x4x128xi32>
    %717 = arith.andi %619, %716 : vector<4x4x128xi32>
    %c0_i32_279 = arith.constant 0 : i32
    %718 = vector.broadcast %c0_i32_279 : i32 to vector<4x4x128xi32>
    %719 = arith.cmpi eq, %717, %718 : vector<4x4x128xi32>
    %c16_i32_280 = arith.constant 16 : i32
    %720 = vector.broadcast %c16_i32_280 : i32 to vector<4x4x128xi32>
    %721 = arith.andi %619, %720 : vector<4x4x128xi32>
    %c0_i32_281 = arith.constant 0 : i32
    %722 = vector.broadcast %c0_i32_281 : i32 to vector<4x4x128xi32>
    %723 = arith.cmpi eq, %721, %722 : vector<4x4x128xi32>
    %c120_i32_282 = arith.constant 120 : i32
    %724 = tpu.dynamic_rotate %715 by %c120_i32_282 dim 2 : vector<4x4x128xf32>, i32 -> vector<4x4x128xf32>
    %c8_i32_283 = arith.constant 8 : i32
    %725 = tpu.dynamic_rotate %715 by %c8_i32_283 dim 2 : vector<4x4x128xf32>, i32 -> vector<4x4x128xf32>
    %726 = arith.select %719, %724, %725 : vector<4x4x128xi1>, vector<4x4x128xf32>
    %727 = arith.xori %719, %723 : vector<4x4x128xi1>
    %cst_284 = arith.constant dense<true> : vector<4x4x128xi1>
    %728 = arith.xori %727, %cst_284 : vector<4x4x128xi1>
    %729 = arith.minimumf %715, %726 : vector<4x4x128xf32>
    %730 = arith.maximumf %715, %726 : vector<4x4x128xf32>
    %731 = arith.select %728, %729, %730 : vector<4x4x128xi1>, vector<4x4x128xf32>
    %c4_i32_285 = arith.constant 4 : i32
    %732 = vector.broadcast %c4_i32_285 : i32 to vector<4x4x128xi32>
    %733 = arith.andi %619, %732 : vector<4x4x128xi32>
    %c0_i32_286 = arith.constant 0 : i32
    %734 = vector.broadcast %c0_i32_286 : i32 to vector<4x4x128xi32>
    %735 = arith.cmpi eq, %733, %734 : vector<4x4x128xi32>
    %c16_i32_287 = arith.constant 16 : i32
    %736 = vector.broadcast %c16_i32_287 : i32 to vector<4x4x128xi32>
    %737 = arith.andi %619, %736 : vector<4x4x128xi32>
    %c0_i32_288 = arith.constant 0 : i32
    %738 = vector.broadcast %c0_i32_288 : i32 to vector<4x4x128xi32>
    %739 = arith.cmpi eq, %737, %738 : vector<4x4x128xi32>
    %c124_i32_289 = arith.constant 124 : i32
    %740 = tpu.dynamic_rotate %731 by %c124_i32_289 dim 2 : vector<4x4x128xf32>, i32 -> vector<4x4x128xf32>
    %c4_i32_290 = arith.constant 4 : i32
    %741 = tpu.dynamic_rotate %731 by %c4_i32_290 dim 2 : vector<4x4x128xf32>, i32 -> vector<4x4x128xf32>
    %742 = arith.select %735, %740, %741 : vector<4x4x128xi1>, vector<4x4x128xf32>
    %743 = arith.xori %735, %739 : vector<4x4x128xi1>
    %cst_291 = arith.constant dense<true> : vector<4x4x128xi1>
    %744 = arith.xori %743, %cst_291 : vector<4x4x128xi1>
    %745 = arith.minimumf %731, %742 : vector<4x4x128xf32>
    %746 = arith.maximumf %731, %742 : vector<4x4x128xf32>
    %747 = arith.select %744, %745, %746 : vector<4x4x128xi1>, vector<4x4x128xf32>
    %c2_i32_292 = arith.constant 2 : i32
    %748 = vector.broadcast %c2_i32_292 : i32 to vector<4x4x128xi32>
    %749 = arith.andi %619, %748 : vector<4x4x128xi32>
    %c0_i32_293 = arith.constant 0 : i32
    %750 = vector.broadcast %c0_i32_293 : i32 to vector<4x4x128xi32>
    %751 = arith.cmpi eq, %749, %750 : vector<4x4x128xi32>
    %c16_i32_294 = arith.constant 16 : i32
    %752 = vector.broadcast %c16_i32_294 : i32 to vector<4x4x128xi32>
    %753 = arith.andi %619, %752 : vector<4x4x128xi32>
    %c0_i32_295 = arith.constant 0 : i32
    %754 = vector.broadcast %c0_i32_295 : i32 to vector<4x4x128xi32>
    %755 = arith.cmpi eq, %753, %754 : vector<4x4x128xi32>
    %c126_i32_296 = arith.constant 126 : i32
    %756 = tpu.dynamic_rotate %747 by %c126_i32_296 dim 2 : vector<4x4x128xf32>, i32 -> vector<4x4x128xf32>
    %c2_i32_297 = arith.constant 2 : i32
    %757 = tpu.dynamic_rotate %747 by %c2_i32_297 dim 2 : vector<4x4x128xf32>, i32 -> vector<4x4x128xf32>
    %758 = arith.select %751, %756, %757 : vector<4x4x128xi1>, vector<4x4x128xf32>
    %759 = arith.xori %751, %755 : vector<4x4x128xi1>
    %cst_298 = arith.constant dense<true> : vector<4x4x128xi1>
    %760 = arith.xori %759, %cst_298 : vector<4x4x128xi1>
    %761 = arith.minimumf %747, %758 : vector<4x4x128xf32>
    %762 = arith.maximumf %747, %758 : vector<4x4x128xf32>
    %763 = arith.select %760, %761, %762 : vector<4x4x128xi1>, vector<4x4x128xf32>
    %c1_i32_299 = arith.constant 1 : i32
    %764 = vector.broadcast %c1_i32_299 : i32 to vector<4x4x128xi32>
    %765 = arith.andi %619, %764 : vector<4x4x128xi32>
    %c0_i32_300 = arith.constant 0 : i32
    %766 = vector.broadcast %c0_i32_300 : i32 to vector<4x4x128xi32>
    %767 = arith.cmpi eq, %765, %766 : vector<4x4x128xi32>
    %c16_i32_301 = arith.constant 16 : i32
    %768 = vector.broadcast %c16_i32_301 : i32 to vector<4x4x128xi32>
    %769 = arith.andi %619, %768 : vector<4x4x128xi32>
    %c0_i32_302 = arith.constant 0 : i32
    %770 = vector.broadcast %c0_i32_302 : i32 to vector<4x4x128xi32>
    %771 = arith.cmpi eq, %769, %770 : vector<4x4x128xi32>
    %c127_i32_303 = arith.constant 127 : i32
    %772 = tpu.dynamic_rotate %763 by %c127_i32_303 dim 2 : vector<4x4x128xf32>, i32 -> vector<4x4x128xf32>
    %c1_i32_304 = arith.constant 1 : i32
    %773 = tpu.dynamic_rotate %763 by %c1_i32_304 dim 2 : vector<4x4x128xf32>, i32 -> vector<4x4x128xf32>
    %774 = arith.select %767, %772, %773 : vector<4x4x128xi1>, vector<4x4x128xf32>
    %775 = arith.xori %767, %771 : vector<4x4x128xi1>
    %cst_305 = arith.constant dense<true> : vector<4x4x128xi1>
    %776 = arith.xori %775, %cst_305 : vector<4x4x128xi1>
    %777 = arith.minimumf %763, %774 : vector<4x4x128xf32>
    %778 = arith.maximumf %763, %774 : vector<4x4x128xf32>
    %779 = arith.select %776, %777, %778 : vector<4x4x128xi1>, vector<4x4x128xf32>
    %c16_i32_306 = arith.constant 16 : i32
    %780 = vector.broadcast %c16_i32_306 : i32 to vector<4x4x128xi32>
    %781 = arith.andi %619, %780 : vector<4x4x128xi32>
    %c0_i32_307 = arith.constant 0 : i32
    %782 = vector.broadcast %c0_i32_307 : i32 to vector<4x4x128xi32>
    %783 = arith.cmpi eq, %781, %782 : vector<4x4x128xi32>
    %c32_i32_308 = arith.constant 32 : i32
    %784 = vector.broadcast %c32_i32_308 : i32 to vector<4x4x128xi32>
    %785 = arith.andi %619, %784 : vector<4x4x128xi32>
    %c0_i32_309 = arith.constant 0 : i32
    %786 = vector.broadcast %c0_i32_309 : i32 to vector<4x4x128xi32>
    %787 = arith.cmpi eq, %785, %786 : vector<4x4x128xi32>
    %c112_i32_310 = arith.constant 112 : i32
    %788 = tpu.dynamic_rotate %779 by %c112_i32_310 dim 2 : vector<4x4x128xf32>, i32 -> vector<4x4x128xf32>
    %c16_i32_311 = arith.constant 16 : i32
    %789 = tpu.dynamic_rotate %779 by %c16_i32_311 dim 2 : vector<4x4x128xf32>, i32 -> vector<4x4x128xf32>
    %790 = arith.select %783, %788, %789 : vector<4x4x128xi1>, vector<4x4x128xf32>
    %791 = arith.xori %783, %787 : vector<4x4x128xi1>
    %cst_312 = arith.constant dense<true> : vector<4x4x128xi1>
    %792 = arith.xori %791, %cst_312 : vector<4x4x128xi1>
    %793 = arith.minimumf %779, %790 : vector<4x4x128xf32>
    %794 = arith.maximumf %779, %790 : vector<4x4x128xf32>
    %795 = arith.select %792, %793, %794 : vector<4x4x128xi1>, vector<4x4x128xf32>
    %c8_i32_313 = arith.constant 8 : i32
    %796 = vector.broadcast %c8_i32_313 : i32 to vector<4x4x128xi32>
    %797 = arith.andi %619, %796 : vector<4x4x128xi32>
    %c0_i32_314 = arith.constant 0 : i32
    %798 = vector.broadcast %c0_i32_314 : i32 to vector<4x4x128xi32>
    %799 = arith.cmpi eq, %797, %798 : vector<4x4x128xi32>
    %c32_i32_315 = arith.constant 32 : i32
    %800 = vector.broadcast %c32_i32_315 : i32 to vector<4x4x128xi32>
    %801 = arith.andi %619, %800 : vector<4x4x128xi32>
    %c0_i32_316 = arith.constant 0 : i32
    %802 = vector.broadcast %c0_i32_316 : i32 to vector<4x4x128xi32>
    %803 = arith.cmpi eq, %801, %802 : vector<4x4x128xi32>
    %c120_i32_317 = arith.constant 120 : i32
    %804 = tpu.dynamic_rotate %795 by %c120_i32_317 dim 2 : vector<4x4x128xf32>, i32 -> vector<4x4x128xf32>
    %c8_i32_318 = arith.constant 8 : i32
    %805 = tpu.dynamic_rotate %795 by %c8_i32_318 dim 2 : vector<4x4x128xf32>, i32 -> vector<4x4x128xf32>
    %806 = arith.select %799, %804, %805 : vector<4x4x128xi1>, vector<4x4x128xf32>
    %807 = arith.xori %799, %803 : vector<4x4x128xi1>
    %cst_319 = arith.constant dense<true> : vector<4x4x128xi1>
    %808 = arith.xori %807, %cst_319 : vector<4x4x128xi1>
    %809 = arith.minimumf %795, %806 : vector<4x4x128xf32>
    %810 = arith.maximumf %795, %806 : vector<4x4x128xf32>
    %811 = arith.select %808, %809, %810 : vector<4x4x128xi1>, vector<4x4x128xf32>
    %c4_i32_320 = arith.constant 4 : i32
    %812 = vector.broadcast %c4_i32_320 : i32 to vector<4x4x128xi32>
    %813 = arith.andi %619, %812 : vector<4x4x128xi32>
    %c0_i32_321 = arith.constant 0 : i32
    %814 = vector.broadcast %c0_i32_321 : i32 to vector<4x4x128xi32>
    %815 = arith.cmpi eq, %813, %814 : vector<4x4x128xi32>
    %c32_i32_322 = arith.constant 32 : i32
    %816 = vector.broadcast %c32_i32_322 : i32 to vector<4x4x128xi32>
    %817 = arith.andi %619, %816 : vector<4x4x128xi32>
    %c0_i32_323 = arith.constant 0 : i32
    %818 = vector.broadcast %c0_i32_323 : i32 to vector<4x4x128xi32>
    %819 = arith.cmpi eq, %817, %818 : vector<4x4x128xi32>
    %c124_i32_324 = arith.constant 124 : i32
    %820 = tpu.dynamic_rotate %811 by %c124_i32_324 dim 2 : vector<4x4x128xf32>, i32 -> vector<4x4x128xf32>
    %c4_i32_325 = arith.constant 4 : i32
    %821 = tpu.dynamic_rotate %811 by %c4_i32_325 dim 2 : vector<4x4x128xf32>, i32 -> vector<4x4x128xf32>
    %822 = arith.select %815, %820, %821 : vector<4x4x128xi1>, vector<4x4x128xf32>
    %823 = arith.xori %815, %819 : vector<4x4x128xi1>
    %cst_326 = arith.constant dense<true> : vector<4x4x128xi1>
    %824 = arith.xori %823, %cst_326 : vector<4x4x128xi1>
    %825 = arith.minimumf %811, %822 : vector<4x4x128xf32>
    %826 = arith.maximumf %811, %822 : vector<4x4x128xf32>
    %827 = arith.select %824, %825, %826 : vector<4x4x128xi1>, vector<4x4x128xf32>
    %c2_i32_327 = arith.constant 2 : i32
    %828 = vector.broadcast %c2_i32_327 : i32 to vector<4x4x128xi32>
    %829 = arith.andi %619, %828 : vector<4x4x128xi32>
    %c0_i32_328 = arith.constant 0 : i32
    %830 = vector.broadcast %c0_i32_328 : i32 to vector<4x4x128xi32>
    %831 = arith.cmpi eq, %829, %830 : vector<4x4x128xi32>
    %c32_i32_329 = arith.constant 32 : i32
    %832 = vector.broadcast %c32_i32_329 : i32 to vector<4x4x128xi32>
    %833 = arith.andi %619, %832 : vector<4x4x128xi32>
    %c0_i32_330 = arith.constant 0 : i32
    %834 = vector.broadcast %c0_i32_330 : i32 to vector<4x4x128xi32>
    %835 = arith.cmpi eq, %833, %834 : vector<4x4x128xi32>
    %c126_i32_331 = arith.constant 126 : i32
    %836 = tpu.dynamic_rotate %827 by %c126_i32_331 dim 2 : vector<4x4x128xf32>, i32 -> vector<4x4x128xf32>
    %c2_i32_332 = arith.constant 2 : i32
    %837 = tpu.dynamic_rotate %827 by %c2_i32_332 dim 2 : vector<4x4x128xf32>, i32 -> vector<4x4x128xf32>
    %838 = arith.select %831, %836, %837 : vector<4x4x128xi1>, vector<4x4x128xf32>
    %839 = arith.xori %831, %835 : vector<4x4x128xi1>
    %cst_333 = arith.constant dense<true> : vector<4x4x128xi1>
    %840 = arith.xori %839, %cst_333 : vector<4x4x128xi1>
    %841 = arith.minimumf %827, %838 : vector<4x4x128xf32>
    %842 = arith.maximumf %827, %838 : vector<4x4x128xf32>
    %843 = arith.select %840, %841, %842 : vector<4x4x128xi1>, vector<4x4x128xf32>
    %c1_i32_334 = arith.constant 1 : i32
    %844 = vector.broadcast %c1_i32_334 : i32 to vector<4x4x128xi32>
    %845 = arith.andi %619, %844 : vector<4x4x128xi32>
    %c0_i32_335 = arith.constant 0 : i32
    %846 = vector.broadcast %c0_i32_335 : i32 to vector<4x4x128xi32>
    %847 = arith.cmpi eq, %845, %846 : vector<4x4x128xi32>
    %c32_i32_336 = arith.constant 32 : i32
    %848 = vector.broadcast %c32_i32_336 : i32 to vector<4x4x128xi32>
    %849 = arith.andi %619, %848 : vector<4x4x128xi32>
    %c0_i32_337 = arith.constant 0 : i32
    %850 = vector.broadcast %c0_i32_337 : i32 to vector<4x4x128xi32>
    %851 = arith.cmpi eq, %849, %850 : vector<4x4x128xi32>
    %c127_i32_338 = arith.constant 127 : i32
    %852 = tpu.dynamic_rotate %843 by %c127_i32_338 dim 2 : vector<4x4x128xf32>, i32 -> vector<4x4x128xf32>
    %c1_i32_339 = arith.constant 1 : i32
    %853 = tpu.dynamic_rotate %843 by %c1_i32_339 dim 2 : vector<4x4x128xf32>, i32 -> vector<4x4x128xf32>
    %854 = arith.select %847, %852, %853 : vector<4x4x128xi1>, vector<4x4x128xf32>
    %855 = arith.xori %847, %851 : vector<4x4x128xi1>
    %cst_340 = arith.constant dense<true> : vector<4x4x128xi1>
    %856 = arith.xori %855, %cst_340 : vector<4x4x128xi1>
    %857 = arith.minimumf %843, %854 : vector<4x4x128xf32>
    %858 = arith.maximumf %843, %854 : vector<4x4x128xf32>
    %859 = arith.select %856, %857, %858 : vector<4x4x128xi1>, vector<4x4x128xf32>
    %c32_i32_341 = arith.constant 32 : i32
    %860 = vector.broadcast %c32_i32_341 : i32 to vector<4x4x128xi32>
    %861 = arith.andi %619, %860 : vector<4x4x128xi32>
    %c0_i32_342 = arith.constant 0 : i32
    %862 = vector.broadcast %c0_i32_342 : i32 to vector<4x4x128xi32>
    %863 = arith.cmpi eq, %861, %862 : vector<4x4x128xi32>
    %c64_i32_343 = arith.constant 64 : i32
    %864 = vector.broadcast %c64_i32_343 : i32 to vector<4x4x128xi32>
    %865 = arith.andi %619, %864 : vector<4x4x128xi32>
    %c0_i32_344 = arith.constant 0 : i32
    %866 = vector.broadcast %c0_i32_344 : i32 to vector<4x4x128xi32>
    %867 = arith.cmpi eq, %865, %866 : vector<4x4x128xi32>
    %c96_i32_345 = arith.constant 96 : i32
    %868 = tpu.dynamic_rotate %859 by %c96_i32_345 dim 2 : vector<4x4x128xf32>, i32 -> vector<4x4x128xf32>
    %c32_i32_346 = arith.constant 32 : i32
    %869 = tpu.dynamic_rotate %859 by %c32_i32_346 dim 2 : vector<4x4x128xf32>, i32 -> vector<4x4x128xf32>
    %870 = arith.select %863, %868, %869 : vector<4x4x128xi1>, vector<4x4x128xf32>
    %871 = arith.xori %863, %867 : vector<4x4x128xi1>
    %cst_347 = arith.constant dense<true> : vector<4x4x128xi1>
    %872 = arith.xori %871, %cst_347 : vector<4x4x128xi1>
    %873 = arith.minimumf %859, %870 : vector<4x4x128xf32>
    %874 = arith.maximumf %859, %870 : vector<4x4x128xf32>
    %875 = arith.select %872, %873, %874 : vector<4x4x128xi1>, vector<4x4x128xf32>
    %c16_i32_348 = arith.constant 16 : i32
    %876 = vector.broadcast %c16_i32_348 : i32 to vector<4x4x128xi32>
    %877 = arith.andi %619, %876 : vector<4x4x128xi32>
    %c0_i32_349 = arith.constant 0 : i32
    %878 = vector.broadcast %c0_i32_349 : i32 to vector<4x4x128xi32>
    %879 = arith.cmpi eq, %877, %878 : vector<4x4x128xi32>
    %c64_i32_350 = arith.constant 64 : i32
    %880 = vector.broadcast %c64_i32_350 : i32 to vector<4x4x128xi32>
    %881 = arith.andi %619, %880 : vector<4x4x128xi32>
    %c0_i32_351 = arith.constant 0 : i32
    %882 = vector.broadcast %c0_i32_351 : i32 to vector<4x4x128xi32>
    %883 = arith.cmpi eq, %881, %882 : vector<4x4x128xi32>
    %c112_i32_352 = arith.constant 112 : i32
    %884 = tpu.dynamic_rotate %875 by %c112_i32_352 dim 2 : vector<4x4x128xf32>, i32 -> vector<4x4x128xf32>
    %c16_i32_353 = arith.constant 16 : i32
    %885 = tpu.dynamic_rotate %875 by %c16_i32_353 dim 2 : vector<4x4x128xf32>, i32 -> vector<4x4x128xf32>
    %886 = arith.select %879, %884, %885 : vector<4x4x128xi1>, vector<4x4x128xf32>
    %887 = arith.xori %879, %883 : vector<4x4x128xi1>
    %cst_354 = arith.constant dense<true> : vector<4x4x128xi1>
    %888 = arith.xori %887, %cst_354 : vector<4x4x128xi1>
    %889 = arith.minimumf %875, %886 : vector<4x4x128xf32>
    %890 = arith.maximumf %875, %886 : vector<4x4x128xf32>
    %891 = arith.select %888, %889, %890 : vector<4x4x128xi1>, vector<4x4x128xf32>
    %c8_i32_355 = arith.constant 8 : i32
    %892 = vector.broadcast %c8_i32_355 : i32 to vector<4x4x128xi32>
    %893 = arith.andi %619, %892 : vector<4x4x128xi32>
    %c0_i32_356 = arith.constant 0 : i32
    %894 = vector.broadcast %c0_i32_356 : i32 to vector<4x4x128xi32>
    %895 = arith.cmpi eq, %893, %894 : vector<4x4x128xi32>
    %c64_i32_357 = arith.constant 64 : i32
    %896 = vector.broadcast %c64_i32_357 : i32 to vector<4x4x128xi32>
    %897 = arith.andi %619, %896 : vector<4x4x128xi32>
    %c0_i32_358 = arith.constant 0 : i32
    %898 = vector.broadcast %c0_i32_358 : i32 to vector<4x4x128xi32>
    %899 = arith.cmpi eq, %897, %898 : vector<4x4x128xi32>
    %c120_i32_359 = arith.constant 120 : i32
    %900 = tpu.dynamic_rotate %891 by %c120_i32_359 dim 2 : vector<4x4x128xf32>, i32 -> vector<4x4x128xf32>
    %c8_i32_360 = arith.constant 8 : i32
    %901 = tpu.dynamic_rotate %891 by %c8_i32_360 dim 2 : vector<4x4x128xf32>, i32 -> vector<4x4x128xf32>
    %902 = arith.select %895, %900, %901 : vector<4x4x128xi1>, vector<4x4x128xf32>
    %903 = arith.xori %895, %899 : vector<4x4x128xi1>
    %cst_361 = arith.constant dense<true> : vector<4x4x128xi1>
    %904 = arith.xori %903, %cst_361 : vector<4x4x128xi1>
    %905 = arith.minimumf %891, %902 : vector<4x4x128xf32>
    %906 = arith.maximumf %891, %902 : vector<4x4x128xf32>
    %907 = arith.select %904, %905, %906 : vector<4x4x128xi1>, vector<4x4x128xf32>
    %c4_i32_362 = arith.constant 4 : i32
    %908 = vector.broadcast %c4_i32_362 : i32 to vector<4x4x128xi32>
    %909 = arith.andi %619, %908 : vector<4x4x128xi32>
    %c0_i32_363 = arith.constant 0 : i32
    %910 = vector.broadcast %c0_i32_363 : i32 to vector<4x4x128xi32>
    %911 = arith.cmpi eq, %909, %910 : vector<4x4x128xi32>
    %c64_i32_364 = arith.constant 64 : i32
    %912 = vector.broadcast %c64_i32_364 : i32 to vector<4x4x128xi32>
    %913 = arith.andi %619, %912 : vector<4x4x128xi32>
    %c0_i32_365 = arith.constant 0 : i32
    %914 = vector.broadcast %c0_i32_365 : i32 to vector<4x4x128xi32>
    %915 = arith.cmpi eq, %913, %914 : vector<4x4x128xi32>
    %c124_i32_366 = arith.constant 124 : i32
    %916 = tpu.dynamic_rotate %907 by %c124_i32_366 dim 2 : vector<4x4x128xf32>, i32 -> vector<4x4x128xf32>
    %c4_i32_367 = arith.constant 4 : i32
    %917 = tpu.dynamic_rotate %907 by %c4_i32_367 dim 2 : vector<4x4x128xf32>, i32 -> vector<4x4x128xf32>
    %918 = arith.select %911, %916, %917 : vector<4x4x128xi1>, vector<4x4x128xf32>
    %919 = arith.xori %911, %915 : vector<4x4x128xi1>
    %cst_368 = arith.constant dense<true> : vector<4x4x128xi1>
    %920 = arith.xori %919, %cst_368 : vector<4x4x128xi1>
    %921 = arith.minimumf %907, %918 : vector<4x4x128xf32>
    %922 = arith.maximumf %907, %918 : vector<4x4x128xf32>
    %923 = arith.select %920, %921, %922 : vector<4x4x128xi1>, vector<4x4x128xf32>
    %c2_i32_369 = arith.constant 2 : i32
    %924 = vector.broadcast %c2_i32_369 : i32 to vector<4x4x128xi32>
    %925 = arith.andi %619, %924 : vector<4x4x128xi32>
    %c0_i32_370 = arith.constant 0 : i32
    %926 = vector.broadcast %c0_i32_370 : i32 to vector<4x4x128xi32>
    %927 = arith.cmpi eq, %925, %926 : vector<4x4x128xi32>
    %c64_i32_371 = arith.constant 64 : i32
    %928 = vector.broadcast %c64_i32_371 : i32 to vector<4x4x128xi32>
    %929 = arith.andi %619, %928 : vector<4x4x128xi32>
    %c0_i32_372 = arith.constant 0 : i32
    %930 = vector.broadcast %c0_i32_372 : i32 to vector<4x4x128xi32>
    %931 = arith.cmpi eq, %929, %930 : vector<4x4x128xi32>
    %c126_i32_373 = arith.constant 126 : i32
    %932 = tpu.dynamic_rotate %923 by %c126_i32_373 dim 2 : vector<4x4x128xf32>, i32 -> vector<4x4x128xf32>
    %c2_i32_374 = arith.constant 2 : i32
    %933 = tpu.dynamic_rotate %923 by %c2_i32_374 dim 2 : vector<4x4x128xf32>, i32 -> vector<4x4x128xf32>
    %934 = arith.select %927, %932, %933 : vector<4x4x128xi1>, vector<4x4x128xf32>
    %935 = arith.xori %927, %931 : vector<4x4x128xi1>
    %cst_375 = arith.constant dense<true> : vector<4x4x128xi1>
    %936 = arith.xori %935, %cst_375 : vector<4x4x128xi1>
    %937 = arith.minimumf %923, %934 : vector<4x4x128xf32>
    %938 = arith.maximumf %923, %934 : vector<4x4x128xf32>
    %939 = arith.select %936, %937, %938 : vector<4x4x128xi1>, vector<4x4x128xf32>
    %c1_i32_376 = arith.constant 1 : i32
    %940 = vector.broadcast %c1_i32_376 : i32 to vector<4x4x128xi32>
    %941 = arith.andi %619, %940 : vector<4x4x128xi32>
    %c0_i32_377 = arith.constant 0 : i32
    %942 = vector.broadcast %c0_i32_377 : i32 to vector<4x4x128xi32>
    %943 = arith.cmpi eq, %941, %942 : vector<4x4x128xi32>
    %c64_i32_378 = arith.constant 64 : i32
    %944 = vector.broadcast %c64_i32_378 : i32 to vector<4x4x128xi32>
    %945 = arith.andi %619, %944 : vector<4x4x128xi32>
    %c0_i32_379 = arith.constant 0 : i32
    %946 = vector.broadcast %c0_i32_379 : i32 to vector<4x4x128xi32>
    %947 = arith.cmpi eq, %945, %946 : vector<4x4x128xi32>
    %c127_i32_380 = arith.constant 127 : i32
    %948 = tpu.dynamic_rotate %939 by %c127_i32_380 dim 2 : vector<4x4x128xf32>, i32 -> vector<4x4x128xf32>
    %c1_i32_381 = arith.constant 1 : i32
    %949 = tpu.dynamic_rotate %939 by %c1_i32_381 dim 2 : vector<4x4x128xf32>, i32 -> vector<4x4x128xf32>
    %950 = arith.select %943, %948, %949 : vector<4x4x128xi1>, vector<4x4x128xf32>
    %951 = arith.xori %943, %947 : vector<4x4x128xi1>
    %cst_382 = arith.constant dense<true> : vector<4x4x128xi1>
    %952 = arith.xori %951, %cst_382 : vector<4x4x128xi1>
    %953 = arith.minimumf %939, %950 : vector<4x4x128xf32>
    %954 = arith.maximumf %939, %950 : vector<4x4x128xf32>
    %955 = arith.select %952, %953, %954 : vector<4x4x128xi1>, vector<4x4x128xf32>
    %c64_i32_383 = arith.constant 64 : i32
    %956 = vector.broadcast %c64_i32_383 : i32 to vector<4x4x128xi32>
    %957 = arith.andi %619, %956 : vector<4x4x128xi32>
    %c0_i32_384 = arith.constant 0 : i32
    %958 = vector.broadcast %c0_i32_384 : i32 to vector<4x4x128xi32>
    %959 = arith.cmpi eq, %957, %958 : vector<4x4x128xi32>
    %c128_i32_385 = arith.constant 128 : i32
    %960 = vector.broadcast %c128_i32_385 : i32 to vector<4x4x128xi32>
    %961 = arith.andi %619, %960 : vector<4x4x128xi32>
    %c0_i32_386 = arith.constant 0 : i32
    %962 = vector.broadcast %c0_i32_386 : i32 to vector<4x4x128xi32>
    %963 = arith.cmpi eq, %961, %962 : vector<4x4x128xi32>
    %c64_i32_387 = arith.constant 64 : i32
    %964 = tpu.dynamic_rotate %955 by %c64_i32_387 dim 2 : vector<4x4x128xf32>, i32 -> vector<4x4x128xf32>
    %c64_i32_388 = arith.constant 64 : i32
    %965 = tpu.dynamic_rotate %955 by %c64_i32_388 dim 2 : vector<4x4x128xf32>, i32 -> vector<4x4x128xf32>
    %966 = arith.select %959, %964, %965 : vector<4x4x128xi1>, vector<4x4x128xf32>
    %967 = arith.xori %959, %963 : vector<4x4x128xi1>
    %cst_389 = arith.constant dense<true> : vector<4x4x128xi1>
    %968 = arith.xori %967, %cst_389 : vector<4x4x128xi1>
    %969 = arith.minimumf %955, %966 : vector<4x4x128xf32>
    %970 = arith.maximumf %955, %966 : vector<4x4x128xf32>
    %971 = arith.select %968, %969, %970 : vector<4x4x128xi1>, vector<4x4x128xf32>
    %c32_i32_390 = arith.constant 32 : i32
    %972 = vector.broadcast %c32_i32_390 : i32 to vector<4x4x128xi32>
    %973 = arith.andi %619, %972 : vector<4x4x128xi32>
    %c0_i32_391 = arith.constant 0 : i32
    %974 = vector.broadcast %c0_i32_391 : i32 to vector<4x4x128xi32>
    %975 = arith.cmpi eq, %973, %974 : vector<4x4x128xi32>
    %c128_i32_392 = arith.constant 128 : i32
    %976 = vector.broadcast %c128_i32_392 : i32 to vector<4x4x128xi32>
    %977 = arith.andi %619, %976 : vector<4x4x128xi32>
    %c0_i32_393 = arith.constant 0 : i32
    %978 = vector.broadcast %c0_i32_393 : i32 to vector<4x4x128xi32>
    %979 = arith.cmpi eq, %977, %978 : vector<4x4x128xi32>
    %c96_i32_394 = arith.constant 96 : i32
    %980 = tpu.dynamic_rotate %971 by %c96_i32_394 dim 2 : vector<4x4x128xf32>, i32 -> vector<4x4x128xf32>
    %c32_i32_395 = arith.constant 32 : i32
    %981 = tpu.dynamic_rotate %971 by %c32_i32_395 dim 2 : vector<4x4x128xf32>, i32 -> vector<4x4x128xf32>
    %982 = arith.select %975, %980, %981 : vector<4x4x128xi1>, vector<4x4x128xf32>
    %983 = arith.xori %975, %979 : vector<4x4x128xi1>
    %cst_396 = arith.constant dense<true> : vector<4x4x128xi1>
    %984 = arith.xori %983, %cst_396 : vector<4x4x128xi1>
    %985 = arith.minimumf %971, %982 : vector<4x4x128xf32>
    %986 = arith.maximumf %971, %982 : vector<4x4x128xf32>
    %987 = arith.select %984, %985, %986 : vector<4x4x128xi1>, vector<4x4x128xf32>
    %c16_i32_397 = arith.constant 16 : i32
    %988 = vector.broadcast %c16_i32_397 : i32 to vector<4x4x128xi32>
    %989 = arith.andi %619, %988 : vector<4x4x128xi32>
    %c0_i32_398 = arith.constant 0 : i32
    %990 = vector.broadcast %c0_i32_398 : i32 to vector<4x4x128xi32>
    %991 = arith.cmpi eq, %989, %990 : vector<4x4x128xi32>
    %c128_i32_399 = arith.constant 128 : i32
    %992 = vector.broadcast %c128_i32_399 : i32 to vector<4x4x128xi32>
    %993 = arith.andi %619, %992 : vector<4x4x128xi32>
    %c0_i32_400 = arith.constant 0 : i32
    %994 = vector.broadcast %c0_i32_400 : i32 to vector<4x4x128xi32>
    %995 = arith.cmpi eq, %993, %994 : vector<4x4x128xi32>
    %c112_i32_401 = arith.constant 112 : i32
    %996 = tpu.dynamic_rotate %987 by %c112_i32_401 dim 2 : vector<4x4x128xf32>, i32 -> vector<4x4x128xf32>
    %c16_i32_402 = arith.constant 16 : i32
    %997 = tpu.dynamic_rotate %987 by %c16_i32_402 dim 2 : vector<4x4x128xf32>, i32 -> vector<4x4x128xf32>
    %998 = arith.select %991, %996, %997 : vector<4x4x128xi1>, vector<4x4x128xf32>
    %999 = arith.xori %991, %995 : vector<4x4x128xi1>
    %cst_403 = arith.constant dense<true> : vector<4x4x128xi1>
    %1000 = arith.xori %999, %cst_403 : vector<4x4x128xi1>
    %1001 = arith.minimumf %987, %998 : vector<4x4x128xf32>
    %1002 = arith.maximumf %987, %998 : vector<4x4x128xf32>
    %1003 = arith.select %1000, %1001, %1002 : vector<4x4x128xi1>, vector<4x4x128xf32>
    %c8_i32_404 = arith.constant 8 : i32
    %1004 = vector.broadcast %c8_i32_404 : i32 to vector<4x4x128xi32>
    %1005 = arith.andi %619, %1004 : vector<4x4x128xi32>
    %c0_i32_405 = arith.constant 0 : i32
    %1006 = vector.broadcast %c0_i32_405 : i32 to vector<4x4x128xi32>
    %1007 = arith.cmpi eq, %1005, %1006 : vector<4x4x128xi32>
    %c128_i32_406 = arith.constant 128 : i32
    %1008 = vector.broadcast %c128_i32_406 : i32 to vector<4x4x128xi32>
    %1009 = arith.andi %619, %1008 : vector<4x4x128xi32>
    %c0_i32_407 = arith.constant 0 : i32
    %1010 = vector.broadcast %c0_i32_407 : i32 to vector<4x4x128xi32>
    %1011 = arith.cmpi eq, %1009, %1010 : vector<4x4x128xi32>
    %c120_i32_408 = arith.constant 120 : i32
    %1012 = tpu.dynamic_rotate %1003 by %c120_i32_408 dim 2 : vector<4x4x128xf32>, i32 -> vector<4x4x128xf32>
    %c8_i32_409 = arith.constant 8 : i32
    %1013 = tpu.dynamic_rotate %1003 by %c8_i32_409 dim 2 : vector<4x4x128xf32>, i32 -> vector<4x4x128xf32>
    %1014 = arith.select %1007, %1012, %1013 : vector<4x4x128xi1>, vector<4x4x128xf32>
    %1015 = arith.xori %1007, %1011 : vector<4x4x128xi1>
    %cst_410 = arith.constant dense<true> : vector<4x4x128xi1>
    %1016 = arith.xori %1015, %cst_410 : vector<4x4x128xi1>
    %1017 = arith.minimumf %1003, %1014 : vector<4x4x128xf32>
    %1018 = arith.maximumf %1003, %1014 : vector<4x4x128xf32>
    %1019 = arith.select %1016, %1017, %1018 : vector<4x4x128xi1>, vector<4x4x128xf32>
    %c4_i32_411 = arith.constant 4 : i32
    %1020 = vector.broadcast %c4_i32_411 : i32 to vector<4x4x128xi32>
    %1021 = arith.andi %619, %1020 : vector<4x4x128xi32>
    %c0_i32_412 = arith.constant 0 : i32
    %1022 = vector.broadcast %c0_i32_412 : i32 to vector<4x4x128xi32>
    %1023 = arith.cmpi eq, %1021, %1022 : vector<4x4x128xi32>
    %c128_i32_413 = arith.constant 128 : i32
    %1024 = vector.broadcast %c128_i32_413 : i32 to vector<4x4x128xi32>
    %1025 = arith.andi %619, %1024 : vector<4x4x128xi32>
    %c0_i32_414 = arith.constant 0 : i32
    %1026 = vector.broadcast %c0_i32_414 : i32 to vector<4x4x128xi32>
    %1027 = arith.cmpi eq, %1025, %1026 : vector<4x4x128xi32>
    %c124_i32_415 = arith.constant 124 : i32
    %1028 = tpu.dynamic_rotate %1019 by %c124_i32_415 dim 2 : vector<4x4x128xf32>, i32 -> vector<4x4x128xf32>
    %c4_i32_416 = arith.constant 4 : i32
    %1029 = tpu.dynamic_rotate %1019 by %c4_i32_416 dim 2 : vector<4x4x128xf32>, i32 -> vector<4x4x128xf32>
    %1030 = arith.select %1023, %1028, %1029 : vector<4x4x128xi1>, vector<4x4x128xf32>
    %1031 = arith.xori %1023, %1027 : vector<4x4x128xi1>
    %cst_417 = arith.constant dense<true> : vector<4x4x128xi1>
    %1032 = arith.xori %1031, %cst_417 : vector<4x4x128xi1>
    %1033 = arith.minimumf %1019, %1030 : vector<4x4x128xf32>
    %1034 = arith.maximumf %1019, %1030 : vector<4x4x128xf32>
    %1035 = arith.select %1032, %1033, %1034 : vector<4x4x128xi1>, vector<4x4x128xf32>
    %c2_i32_418 = arith.constant 2 : i32
    %1036 = vector.broadcast %c2_i32_418 : i32 to vector<4x4x128xi32>
    %1037 = arith.andi %619, %1036 : vector<4x4x128xi32>
    %c0_i32_419 = arith.constant 0 : i32
    %1038 = vector.broadcast %c0_i32_419 : i32 to vector<4x4x128xi32>
    %1039 = arith.cmpi eq, %1037, %1038 : vector<4x4x128xi32>
    %c128_i32_420 = arith.constant 128 : i32
    %1040 = vector.broadcast %c128_i32_420 : i32 to vector<4x4x128xi32>
    %1041 = arith.andi %619, %1040 : vector<4x4x128xi32>
    %c0_i32_421 = arith.constant 0 : i32
    %1042 = vector.broadcast %c0_i32_421 : i32 to vector<4x4x128xi32>
    %1043 = arith.cmpi eq, %1041, %1042 : vector<4x4x128xi32>
    %c126_i32_422 = arith.constant 126 : i32
    %1044 = tpu.dynamic_rotate %1035 by %c126_i32_422 dim 2 : vector<4x4x128xf32>, i32 -> vector<4x4x128xf32>
    %c2_i32_423 = arith.constant 2 : i32
    %1045 = tpu.dynamic_rotate %1035 by %c2_i32_423 dim 2 : vector<4x4x128xf32>, i32 -> vector<4x4x128xf32>
    %1046 = arith.select %1039, %1044, %1045 : vector<4x4x128xi1>, vector<4x4x128xf32>
    %1047 = arith.xori %1039, %1043 : vector<4x4x128xi1>
    %cst_424 = arith.constant dense<true> : vector<4x4x128xi1>
    %1048 = arith.xori %1047, %cst_424 : vector<4x4x128xi1>
    %1049 = arith.minimumf %1035, %1046 : vector<4x4x128xf32>
    %1050 = arith.maximumf %1035, %1046 : vector<4x4x128xf32>
    %1051 = arith.select %1048, %1049, %1050 : vector<4x4x128xi1>, vector<4x4x128xf32>
    %c1_i32_425 = arith.constant 1 : i32
    %1052 = vector.broadcast %c1_i32_425 : i32 to vector<4x4x128xi32>
    %1053 = arith.andi %619, %1052 : vector<4x4x128xi32>
    %c0_i32_426 = arith.constant 0 : i32
    %1054 = vector.broadcast %c0_i32_426 : i32 to vector<4x4x128xi32>
    %1055 = arith.cmpi eq, %1053, %1054 : vector<4x4x128xi32>
    %c128_i32_427 = arith.constant 128 : i32
    %1056 = vector.broadcast %c128_i32_427 : i32 to vector<4x4x128xi32>
    %1057 = arith.andi %619, %1056 : vector<4x4x128xi32>
    %c0_i32_428 = arith.constant 0 : i32
    %1058 = vector.broadcast %c0_i32_428 : i32 to vector<4x4x128xi32>
    %1059 = arith.cmpi eq, %1057, %1058 : vector<4x4x128xi32>
    %c127_i32_429 = arith.constant 127 : i32
    %1060 = tpu.dynamic_rotate %1051 by %c127_i32_429 dim 2 : vector<4x4x128xf32>, i32 -> vector<4x4x128xf32>
    %c1_i32_430 = arith.constant 1 : i32
    %1061 = tpu.dynamic_rotate %1051 by %c1_i32_430 dim 2 : vector<4x4x128xf32>, i32 -> vector<4x4x128xf32>
    %1062 = arith.select %1055, %1060, %1061 : vector<4x4x128xi1>, vector<4x4x128xf32>
    %1063 = arith.xori %1055, %1059 : vector<4x4x128xi1>
    %cst_431 = arith.constant dense<true> : vector<4x4x128xi1>
    %1064 = arith.xori %1063, %cst_431 : vector<4x4x128xi1>
    %1065 = arith.minimumf %1051, %1062 : vector<4x4x128xf32>
    %1066 = arith.maximumf %1051, %1062 : vector<4x4x128xf32>
    %1067 = arith.select %1064, %1065, %1066 : vector<4x4x128xi1>, vector<4x4x128xf32>
    %1068 = vector.extract_strided_slice %1067 {offsets = [0, 0, 0], sizes = [4, 4, 8], strides = [1, 1, 1]} : vector<4x4x128xf32> to vector<4x4x8xf32>
    %1069 = vector.extract_strided_slice %1068 {offsets = [0, 0, 0], sizes = [4, 1, 8], strides = [1, 1, 1]} : vector<4x4x8xf32> to vector<4x1x8xf32>
    %1070 = vector.shape_cast %1069 : vector<4x1x8xf32> to vector<4x8xf32>
    %1071 = vector.extract_strided_slice %1068 {offsets = [0, 1, 0], sizes = [4, 1, 8], strides = [1, 1, 1]} : vector<4x4x8xf32> to vector<4x1x8xf32>
    %1072 = vector.shape_cast %1071 : vector<4x1x8xf32> to vector<4x8xf32>
    %1073 = vector.extract_strided_slice %1068 {offsets = [0, 2, 0], sizes = [4, 1, 8], strides = [1, 1, 1]} : vector<4x4x8xf32> to vector<4x1x8xf32>
    %1074 = vector.shape_cast %1073 : vector<4x1x8xf32> to vector<4x8xf32>
    %1075 = vector.extract_strided_slice %1068 {offsets = [0, 3, 0], sizes = [4, 1, 8], strides = [1, 1, 1]} : vector<4x4x8xf32> to vector<4x1x8xf32>
    %1076 = vector.shape_cast %1075 : vector<4x1x8xf32> to vector<4x8xf32>
    %1077 = tpu.concatenate %1070, %1072, %1074, %1076 in 1 : vector<4x8xf32>, vector<4x8xf32>, vector<4x8xf32>, vector<4x8xf32> -> vector<4x32xf32>
    %1078 = tpu.concatenate %541, %1077 in 1 : vector<4x128xf32>, vector<4x32xf32> -> vector<4x160xf32>
    %cst_432 = arith.constant 0.000000e+00 : f32
    %1079 = vector.broadcast %cst_432 : f32 to vector<4x160xf32>
    %1080 = arith.cmpf ogt, %1078, %1079 : vector<4x160xf32>
    %cst_433 = arith.constant 0.00999999977 : f32
    %1081 = vector.broadcast %cst_433 : f32 to vector<4x160xf32>
    %1082 = arith.mulf %1081, %1078 : vector<4x160xf32>
    %1083 = arith.select %1080, %1078, %1082 : vector<4x160xi1>, vector<4x160xf32>
    %c0_434 = arith.constant 0 : index
    %c0_435 = arith.constant 0 : index
    %c0_436 = arith.constant 0 : index
    %1084 = vector.load %arg7[%c0_434, %c0_435, %c0_436] : memref<1x4x160xf32, #tpu.memory_space<vmem>>, vector<1x4x160xf32>
    %1085 = vector.shape_cast %1084 : vector<1x4x160xf32> to vector<4x160xf32>
    %1086 = vector.shape_cast %1083 : vector<4x160xf32> to vector<1x4x160xf32>
    tpu.vector_store %arg7[%c0_434, %c0_435, %c0_436], %1086 {strides = array<i32>} : memref<1x4x160xf32, #tpu.memory_space<vmem>>, vector<1x4x160xf32>,
    return
  }
  func.func @transform_0(%arg0: i32) -> (i32, i32, i32) {
    %c0_i32 = arith.constant 0 : i32
    %c0_i32_0 = arith.constant 0 : i32
    %c0_i32_1 = arith.constant 0 : i32
    return %arg0, %c0_i32, %c0_i32_0 : i32, i32, i32
  }
  func.func @transform_1(%arg0: i32) -> (i32, i32, i32) {
    %c0_i32 = arith.constant 0 : i32
    %c0_i32_0 = arith.constant 0 : i32
    %c0_i32_1 = arith.constant 0 : i32
    return %arg0, %c0_i32, %c0_i32_0 : i32, i32, i32
  }
  func.func @transform_2(%arg0: i32) -> (i32, i32) {
    %c0_i32 = arith.constant 0 : i32
    %c0_i32_0 = arith.constant 0 : i32
    %c0_i32_1 = arith.constant 0 : i32
    return %c0_i32, %c0_i32_0 : i32, i32
  }
  func.func @transform_3(%arg0: i32) -> (i32, i32) {
    %c0_i32 = arith.constant 0 : i32
    %c0_i32_0 = arith.constant 0 : i32
    %c0_i32_1 = arith.constant 0 : i32
    return %c0_i32, %c0_i32_0 : i32, i32
  }
  func.func @transform_4(%arg0: i32) -> (i32, i32) {
    %c0_i32 = arith.constant 0 : i32
    %c0_i32_0 = arith.constant 0 : i32
    %c0_i32_1 = arith.constant 0 : i32
    return %c0_i32, %c0_i32_0 : i32, i32
  }
  func.func @transform_5(%arg0: i32) -> (i32, i32) {
    %c0_i32 = arith.constant 0 : i32
    %c0_i32_0 = arith.constant 0 : i32
    %c0_i32_1 = arith.constant 0 : i32
    return %c0_i32, %c0_i32_0 : i32, i32
  }
  func.func @transform_6(%arg0: i32) -> (i32, i32, i32) {
    %c0_i32 = arith.constant 0 : i32
    %c0_i32_0 = arith.constant 0 : i32
    %c0_i32_1 = arith.constant 0 : i32
    return %arg0, %c0_i32, %c0_i32_0 : i32, i32, i32
  }
}

</mosaic_0001>

<bundles_post_ra>
// kernel: tpu_custom_call.1
= control target key start
LH: loop header
LB: loop body
LE: loop exit
PB: predicated region body
PF: predicated region fallthrough
CT: control target
= control target key end

     0   :  { %11 = vsyncpa [#allocation3], 0  ;;  %s16931_s0 = inlined_call_operand.vmem [shape: f32[8,64,64], index: 0, kind: input, shape index: {}]   ;;  %s16932_s1 = inlined_call_operand.vmem [shape: f32[8,64,10], index: 1, kind: input, shape index: {}]   ;;  %s16933_s2 = inlined_call_operand.vmem [shape: f32[8,32], index: 2, kind: input, shape index: {}]   ;;  %s16934_s3 = inlined_call_operand.vmem [shape: f32[32,8], index: 3, kind: input, shape index: {}]   ;;  %s16935_s4 = inlined_call_operand.vmem [shape: f32[3,32], index: 4, kind: input, shape index: {}]   ;;  %s16936_s5 = inlined_call_operand.vmem [shape: f32[3,8], index: 5, kind: input, shape index: {}]   ;;  %s16937_s6 = inlined_call_operand.hbm [shape: f32[2,4,160], index: 6, kind: output, shape index: {}]  }
   0x1   :  { %13 = vsyncpa [#allocation3 + $0x1], 0  ;;  %s10892_s21 = smov 0   ;;  %s10894_s22 = smov 0  }
   0x2   :  { %s10896_s23 = smov 0   ;;  %s10898_s24 = smov 0  }
   0x3 LB: > { %s10913_s25 = sadd.s32 4294967295, %s10833_s24   ;;  %s8331_s26 = sadd.s32 4294967294, %s10833_s24   ;;  %s10833_s24 = sphi %s10898_s24, %s17674_s24   ;;  %s10829_s23 = sphi %s10896_s23, %s17673_s23   ;;  %s10825_s22 = sphi %s10894_s22, %s17672_s22   ;;  %s10821_s21 = sphi %s10892_s21, %s17671_s21  }
   0x4   : > { %s10917_s27 = sadd.s32 1, %s10833_s24   ;;  %s162_s28 = sadd.s32 1, %s10829_s23 }
   0x5   : > { %s159_s29 = ssub.s32 %s10833_s24, %s10917_s27  ;;  %p172_p0 = scmp.ne.s32.totalorder %s10829_s23, %s10825_s22 }
   0x6   : > { %p160_p1 = scmp.eq.s32.totalorder %s159_s29, 0  ;;  %p173_p2 = scmp.eq.s32.totalorder %s10913_s25, 1 }
   0x7   : > { %p178_p3 = scmp.ne.s32.totalorder %s10825_s22, %s10821_s21  ;;  %p179_p4 = scmp.eq.s32.totalorder %s8331_s26, 1 }
   0x8   : > { %s10928_s30 = scalar_select %p160_p1, %s10829_s23, %s162_s28  }
   0x9   : > { %p10930_p5 = por %p173_p2, %p172_p0  ;;  %p10934_p6 = por %p179_p4, %p178_p3 }
   0xa   : > { %p8334_p7 = scmp.ge.s32.totalorder %s10833_s24, 1  ;;  %p229_p8 = scmp.lt.s32.totalorder %s10833_s24, 3 }
   0xc   : > { %p230_p9 = pnand %p8334_p7, %p229_p8 }
   0xe   : > { %233 = sbr.rel (%p230_p9) target bundleno = 7173 (0x1c05), region = 44 }
  0x15   : > { %s8336_s9 = sshll.u32 %s10913_s25, 2  ;;  %v10835_v0 = vmov 9   ;;  %vm17037_vm0 = vcmask 523264   ;;  %v10836_v27 = vmov 8   ;;  %vm17022_vm1 = vcmask 64512   ;;  %s10838_s19 = smov 32  }
  0x16   : > { %10550 = vset.pattern.permute.xlu1 %v10835_v0  ;;  %10549 = vset.pattern.permute.xlu0 %v10835_v0  ;;  %p267_p10 = scmp.lt.s32.totalorder %s8336_s9, 7  ;;  %vm17025_vm2 = vmmov 0   ;;  %vm17023_vm3 = vcmask 261120   ;;  %s10842_s28 = smov 96   ;;  %vm17024_vm12 = vcmask 7168  }
  0x17   : > { %s10845_s15 = smov 1   ;;  %s10846_s17 = smov 127  }
  0x18   : > { %s17676_s9 = smov (!%p267_p10, %s8336_s9), 7  ;;  %s10848_s18 = smov 126  }
  0x19   : > { %s8623_s10 = sshll.u32 %s17676_s9, 6  ;;  %s10849_s20 = smov 2  }
  0x1a   : > { %s10949_s13 = scalar_lea.vmem %s16932_s1, %s8623_s10  ;;  %s11008_s16 = scalar_lea.vmem %s16931_s0, %s8623_s10 }
  0x1b   : > { %v10952_v1 = vld [vmem:[%s10949_s13 + $0x10] sm:$0xff]  ;;  %v10955_v2 = vld [vmem:[%s10949_s13] sm:$0xff]  ;;  %v10960_v3 = vld [vmem:[%s10949_s13 + $0x18] sm:$0xff]  ;;  %s10844_s10 = smov 120   ;;  %s10850_s26 = smov 124  }
  0x1c   : > { %356 = vperm.xlu1 %10550, %v10952_v1   ;;  %346 = vperm.xlu0 %10549, %v10955_v2   ;;  %v10963_v4 = vld [vmem:[%s10949_s13 + $0x8] sm:$0xff]  ;;  %v10971_v6 = vld [vmem:[%s10949_s13 + $0x20] sm:$0xff]  ;;  %v10976_v7 = vld [vmem:[%s10949_s13 + $0x38] sm:$0xff]  ;;  %s10851_s29 = smov 4   ;;  %s10852_s9 = smov 112  }
  0x1d   : > { %v10968_v5 = vld [vmem:[%s10949_s13 + $0x28] sm:$0xff]  ;;  %v10979_v8 = vld [vmem:[%s10949_s13 + $0x30] sm:$0xff]  ;;  %v10987_v10 = vld [vmem:[%s10949_s13 + $0x40] sm:$0xff]  ;;  %s10853_s11 = smov 16   ;;  %s10854_s12 = smov 64  }
  0x1e   : > { %v10984_v9 = vld [vmem:[%s10949_s13 + $0x48] sm:$0xff]  ;;  %v10992_v11 = vld [vmem:[%s10949_s13 + $0x58] sm:$0xff]  ;;  %v10995_v12 = vld [vmem:[%s10949_s13 + $0x50] sm:$0xff] }
  0x1f   : > { %v11000_v13 = vld [vmem:[%s10949_s13 + $0x68] sm:$0xff]  ;;  %v11003_v14 = vld [vmem:[%s10949_s13 + $0x60] sm:$0xff]  ;;  %v11015_v16 = vld [vmem:[%s10949_s13 + $0x78] sm:$0xff] }
  0x20   : > { %361 = vperm.xlu1 %10550, %v10960_v3   ;;  %351 = vperm.xlu0 %10549, %v10963_v4   ;;  %v280_v15 = vld [vmem:[%s11008_s16] sm:$0xff]  ;;  %v11018_v17 = vld [vmem:[%s10949_s13 + $0x70] sm:$0xff]  ;;  %v11023_v18 = vld [vmem:[%s10949_s13 + $0x88] sm:$0xff] }
  0x21   : > { %9111 = vmatprep.mubr.msk.f32.mxu0 %vm17037_vm0, %v280_v15  ;;  %v11026_v19 = vld [vmem:[%s10949_s13 + $0x80] sm:$0xff]  ;;  %v11031_v20 = vld [vmem:[%s10949_s13 + $0x98] sm:$0xff]  ;;  %v11034_v21 = vld [vmem:[%s10949_s13 + $0x90] sm:$0xff] }
  0x22   : > { %v288_v22 = vld [vmem:[%s11008_s16 + $0x40] sm:$0xff]  ;;  %v11041_v23 = vld [vmem:[%s10949_s13 + $0xa8] sm:$0xff]  ;;  %v11049_v25 = vld [vmem:[%s10949_s13 + $0xb8] sm:$0xff] }
  0x23   : > { %9139 = vmatprep.mubr.msk.f32.mxu1 %vm17037_vm0, %v288_v22  ;;  %v11044_v24 = vld [vmem:[%s10949_s13 + $0xa0] sm:$0xff]  ;;  %v11052_v26 = vld [vmem:[%s10949_s13 + $0xb0] sm:$0xff]  ;;  %v11075_v29 = vld [vmem:[%s10949_s13 + $0xc8] sm:$0xff] }
  0x24   : > { %371 = vperm.xlu1 %10550, %v10968_v5   ;;  %366 = vperm.xlu0 %10549, %v10971_v6   ;;  %v11069_v28 = vld [vmem:[%s10949_s13 + $0xc0] sm:$0xff]  ;;  %v11081_v30 = vld [vmem:[%s10949_s13 + $0xd0] sm:$0xff]  ;;  %v11086_v31 = vld [vmem:[%s10949_s13 + $0xe8] sm:$0xff] }
  0x25   : > { %v11089_v32 = vld [vmem:[%s10949_s13 + $0xd8] sm:$0xff]  ;;  %v11094_v33 = vld [vmem:[%s10949_s13 + $0xf0] sm:$0xff]  ;;  %v11100_v34 = vld [vmem:[%s10949_s13 + $0xe0] sm:$0xff] }
  0x26   : > { %v11111_v35 = vld [vmem:[%s10949_s13 + $0xf8] sm:$0xff]  ;;  %v285_v15 = vld [vmem:[%s11008_s16 + $0x28] sm:$0xff] }
  0x28   : > { %381 = vperm.xlu1 %10550, %v10976_v7   ;;  %376 = vperm.xlu0 %10549, %v10979_v8  }
  0x2c   : > { %391 = vperm.xlu1 %10550, %v10984_v9   ;;  %386 = vperm.xlu0 %10549, %v10987_v10  }
  0x30   : > { %401 = vperm.xlu1 %10550, %v10992_v11   ;;  %396 = vperm.xlu0 %10549, %v10995_v12  }
  0x34   : > { %411 = vperm.xlu1 %10550, %v11000_v13   ;;  %406 = vperm.xlu0 %10549, %v11003_v14  }
  0x38   : > { %421 = vperm.xlu1 %10550, %v11015_v16   ;;  %416 = vperm.xlu0 %10549, %v11018_v17  }
  0x3c   : > { %431 = vperm.xlu1 %10550, %v11023_v18   ;;  %426 = vperm.xlu0 %10549, %v11026_v19  }
  0x40   : > { %441 = vperm.xlu1 %10550, %v11031_v20   ;;  %436 = vperm.xlu0 %10549, %v11034_v21  }
  0x44   : > { %451 = vperm.xlu1 %10550, %v11041_v23   ;;  %446 = vperm.xlu0 %10549, %v11044_v24  }
  0x48   : > { %461 = vperm.xlu1 %10550, %v11049_v25   ;;  %456 = vperm.xlu0 %10549, %v11052_v26  }
  0x4c   : > { %10552 = vset.pattern.permute.xlu1 %v10836_v27  ;;  %10551 = vset.pattern.permute.xlu0 %v10836_v27 }
  0x4d   : > { %1058 = vperm.xlu1 %10552, %v10963_v4   ;;  %1054 = vperm.xlu0 %10551, %v10955_v2  }
  0x51   : > { %1062 = vperm.xlu1 %10552, %v10952_v1   ;;  %1066 = vperm.xlu0 %10551, %v10960_v3  }
  0x55   : > { %1070 = vperm.xlu1 %10552, %v10971_v6   ;;  %1074 = vperm.xlu0 %10551, %v10968_v5  }
  0x59   : > { %1078 = vperm.xlu1 %10552, %v10979_v8   ;;  %1082 = vperm.xlu0 %10551, %v10976_v7  }
  0x5d   : > { %1086 = vperm.xlu1 %10552, %v10987_v10   ;;  %1090 = vperm.xlu0 %10551, %v10984_v9  }
  0x61   : > { %1094 = vperm.xlu1 %10552, %v10995_v12   ;;  %1098 = vperm.xlu0 %10551, %v10992_v11  }
  0x65   : > { %10553 = vset.pattern.permute.xlu1 %v10835_v0  ;;  %1110 = vperm.xlu0 %10551, %v11018_v17  }
  0x66   : > { %466 = vperm.xlu1 %10553, %v11069_v28  }
  0x69   : > { %10556 = vset.pattern.permute.xlu0 %v10835_v0 }
  0x6a   : > { %10554 = vset.pattern.permute.xlu1 %v10836_v27  ;;  %471 = vperm.xlu0 %10556, %v11075_v29  }
  0x6b   : > { %1102 = vperm.xlu1 %10554, %v11003_v14  }
  0x6e   : > { %476 = vperm.xlu0 %10556, %v11081_v30  }
  0x6f   : > { %1106 = vperm.xlu1 %10554, %v11000_v13  }
  0x72   : > { %491 = vperm.xlu0 %10556, %v11086_v31  }
  0x73   : > { %10555 = vset.pattern.permute.xlu1 %v10835_v0 }
  0x74   : > { %481 = vperm.xlu1 %10555, %v11089_v32  }
  0x76   : > { %496 = vperm.xlu0 %10556, %v11094_v33  }
  0x78   : > { %10557 = vset.pattern.permute.xlu1 %v10836_v27 }
  0x79   : > { %1114 = vperm.xlu1 %10557, %v11015_v16  }
  0x7a   : > { %10561 = vset.pattern.permute.xlu0 %v10836_v27 }
  0x7b   : > { %1126 = vperm.xlu0 %10561, %v11034_v21  }
  0x7d   : > { %10558 = vset.pattern.permute.xlu1 %v10835_v0 }
  0x7e   : > { %486 = vperm.xlu1 %10558, %v11100_v34  }
  0x7f   : > { %1138 = vperm.xlu0 %10561, %v11041_v23  }
  0x82   : > { %10559 = vset.pattern.permute.xlu1 %v10836_v27 }
  0x83   : > { %1118 = vperm.xlu1 %10559, %v11026_v19   ;;  %1146 = vperm.xlu0 %10561, %v11049_v25  }
  0x87   : > { %1122 = vperm.xlu1 %10559, %v11023_v18   ;;  %1154 = vperm.xlu0 %10561, %v11075_v29  }
  0x8b   : > { %10560 = vset.pattern.permute.xlu1 %v10835_v0  ;;  %1162 = vperm.xlu0 %10561, %v11089_v32  }
  0x8c   : > { %501 = vperm.xlu1 %10560, %v11111_v35  }
  0x8f   : > { %1170 = vperm.xlu0 %10561, %v11086_v31  }
  0x90   : > { %10562 = vset.pattern.permute.xlu1 %v10836_v27  ;;  %v286_v27 = vld [vmem:[%s11008_s16 + $0x30] sm:$0xff] }
  0x91   : > { %1130 = vperm.xlu1 %10562, %v11031_v20  }
  0x93   : > { %1178 = vperm.xlu0 %10561, %v11111_v35  }
  0x95   : > { %1134 = vperm.xlu1 %10562, %v11044_v24  }
  0x99   : > { %1142 = vperm.xlu1 %10562, %v11052_v26  }
  0x9b   : > { %v11121_v36 = vpop.permute.xlu1 %356  ;;  %v11123_v37 = vpop.permute.xlu0 %346 }
  0x9c   : > { %17096 = vst [vmem:[#allocation5_spill] sm:$0xff] %v11121_v36  ;;  %17097 = vst [vmem:[#allocation6_spill] sm:$0xff] %v11123_v37  ;;  %v506_v40 = vmul.f32 %v11121_v36, %v10952_v1  ;;  %v504_v42 = vmul.f32 %v11123_v37, %v10955_v2  ;;  %v281_v1 = vld [vmem:[%s11008_s16 + $0x8] sm:$0xff] }
  0x9d   : > { %1150 = vperm.xlu1 %10562, %v11069_v28  }
  0x9f   : > { %v11126_v38 = vpop.permute.xlu1 %361  ;;  %v11128_v39 = vpop.permute.xlu0 %351 }
  0xa0   : > { %17098 = vst [vmem:[#allocation7_spill] sm:$0xff] %v11126_v38  ;;  %17099 = vst [vmem:[#allocation8_spill] sm:$0xff] %v11128_v39  ;;  %v507_v41 = vmul.f32 %v11126_v38, %v10960_v3  ;;  %v505_v43 = vmul.f32 %v11128_v39, %v10963_v4  ;;  %v282_v3 = vld [vmem:[%s11008_s16 + $0x10] sm:$0xff] }
  0xa1   : > { %1158 = vperm.xlu1 %10562, %v11081_v30  }
  0xa2   : > { %v9953_v44 = vpack.c.bf16 %v505_v43, %v504_v42  ;;  %v9957_v49 = vpack.c.bf16 %v507_v41, %v506_v40  ;;  %v287_v42 = vld [vmem:[%s11008_s16 + $0x38] sm:$0xff]  ;;  %v289_v43 = vld [vmem:[%s11008_s16 + $0x48] sm:$0xff] }
  0xa3   : > { %v11139_v45 = vpop.permute.xlu1 %371  ;;  %v11141_v46 = vpop.permute.xlu0 %366 }
  0xa4   : > { %17100 = vst [vmem:[#allocation9_spill] sm:$0xff] %v11139_v45  ;;  %17101 = vst [vmem:[#allocation10_spill] sm:$0xff] %v11141_v46  ;;  %v509_v47 = vmul.f32 %v11139_v45, %v10968_v5  ;;  %v508_v48 = vmul.f32 %v11141_v46, %v10971_v6  ;;  %9954 = vmatprep.subr.bf16.mxu0 %v9953_v44 }
  0xa5   : > { %9956 = vmatpush3.bf16.msra.mxu0 %v9953_v44  ;;  %1166 = vperm.xlu1 %10562, %v11100_v34  }
  0xa6   : > { %9958 = vmatprep.subr.bf16.mxu0 %v9957_v49  ;;  %v9961_v54 = vpack.c.bf16 %v509_v47, %v508_v48  ;;  %v290_v47 = vld [vmem:[%s11008_s16 + $0x50] sm:$0xff] }
  0xa7   : > { %v11148_v50 = vpop.permute.xlu1 %381  ;;  %v11150_v51 = vpop.permute.xlu0 %376 }
  0xa8   : > { %17102 = vst [vmem:[#allocation11_spill] sm:$0xff] %v11148_v50  ;;  %17103 = vst [vmem:[#allocation12_spill] sm:$0xff] %v11150_v51  ;;  %v511_v52 = vmul.f32 %v11148_v50, %v10976_v7  ;;  %v510_v53 = vmul.f32 %v11150_v51, %v10979_v8  ;;  %v283_v8 = vld [vmem:[%s11008_s16 + $0x18] sm:$0xff] }
  0xa9   : > { %9960 = vmatpush3.bf16.msra.mxu0 %v9957_v49  ;;  %1174 = vperm.xlu1 %10562, %v11094_v33  }
  0xaa   : > { %9962 = vmatprep.subr.bf16.mxu0 %v9961_v54  ;;  %v9965_v57 = vpack.c.bf16 %v511_v52, %v510_v53  ;;  %v291_v53 = vld [vmem:[%s11008_s16 + $0x58] sm:$0xff] }
  0xab   : > { %v11157_v55 = vpop.permute.xlu1 %391  ;;  %v11159_v56 = vpop.permute.xlu0 %386 }
  0xac   : > { %17104 = vst [vmem:[#allocation13_spill] sm:$0xff] %v11157_v55  ;;  %17105 = vst [vmem:[#allocation14_spill] sm:$0xff] %v11159_v56  ;;  %v512_v58 = vmul.f32 %v11159_v56, %v10987_v10  ;;  %v513_v59 = vmul.f32 %v11157_v55, %v10984_v9  ;;  %v284_v10 = vld [vmem:[%s11008_s16 + $0x20] sm:$0xff] }
  0xad   : > { %9964 = vmatpush3.bf16.msra.mxu0 %v9961_v54 }
  0xae   : > { %9966 = vmatprep.subr.bf16.mxu0 %v9965_v57  ;;  %v9969_v60 = vpack.c.bf16 %v513_v59, %v512_v58 }
  0xaf   : > { %v11165_v61 = vpop.permute.xlu1 %401  ;;  %v11167_v62 = vpop.permute.xlu0 %396 }
  0xb0   : > { %17106 = vst [vmem:[#allocation15_spill] sm:$0xff] %v11165_v61  ;;  %17107 = vst [vmem:[#allocation16_spill] sm:$0xff] %v11167_v62  ;;  %v515_v63 = vmul.f32 %v11165_v61, %v10992_v11  ;;  %v514_v0 = vmul.f32 %v11167_v62, %v10995_v12  ;;  %9970 = vmatprep.subr.bf16.mxu1 %v9969_v60 }
  0xb1   : > { %9968 = vmatpush3.bf16.msra.mxu0 %v9965_v57  ;;  %9972 = vmatpush3.bf16.msra.mxu1 %v9969_v60  ;;  %v292_v57 = vld [vmem:[%s11008_s16 + $0x60] sm:$0xff]  ;;  %v293_v60 = vld [vmem:[%s11008_s16 + $0x68] sm:$0xff] }
  0xb2   : > { %v9973_v2 = vpack.c.bf16 %v515_v63, %v514_v0  ;;  %v294_v0 = vld [vmem:[%s11008_s16 + $0x70] sm:$0xff] }
  0xb3   : > { %v11175_v4 = vpop.permute.xlu1 %411  ;;  %v11177_v5 = vpop.permute.xlu0 %406 }
  0xb4   : > { %17108 = vst [vmem:[#allocation17_spill] sm:$0xff] %v11175_v4  ;;  %17109 = vst [vmem:[#allocation18_spill] sm:$0xff] %v11177_v5  ;;  %v517_v6 = vmul.f32 %v11175_v4, %v11000_v13  ;;  %v516_v7 = vmul.f32 %v11177_v5, %v11003_v14  ;;  %9112 = vmatmul.mubr.msk.f32.vlgmr.msra.gmra.mrb[0].mxu0 %vm17037_vm0, %v281_v1  ;;  %9974 = vmatprep.subr.bf16.mxu1 %v9973_v2  ;;  %v16996_v5 = vlaneseq }
  0xb5   : > { %9976 = vmatpush3.bf16.msra.mxu1 %v9973_v2  ;;  %9114 = vmatprep.mubr.msk.f32.mxu0 %vm17037_vm0, %v282_v3  ;;  %v295_v3 = vld [vmem:[%s11008_s16 + $0x78] sm:$0xff] }
  0xb6   : > { %v9977_v9 = vpack.c.bf16 %v517_v6, %v516_v7  ;;  %v304_v7 = vld [vmem:[%s11008_s16 + $0xc0] sm:$0xff] }
  0xb7   : > { %v11187_v11 = vpop.permute.xlu1 %421  ;;  %v11189_v12 = vpop.permute.xlu0 %416 }
  0xb8   : > { %17110 = vst [vmem:[#allocation19_spill] sm:$0xff] %v11187_v11  ;;  %17111 = vst [vmem:[#allocation20_spill] sm:$0xff] %v11189_v12  ;;  %v519_v13 = vmul.f32 %v11187_v11, %v11015_v16  ;;  %v518_v14 = vmul.f32 %v11189_v12, %v11018_v17  ;;  %9115 = vmatmul.mubr.msk.f32.gmra.mrb[2].mxu0 %vm17037_vm0, %v283_v8  ;;  %9978 = vmatprep.subr.bf16.mxu1 %v9977_v9 }
  0xb9   : > { %9980 = vmatpush3.bf16.msra.mxu1 %v9977_v9  ;;  %9117 = vmatprep.mubr.msk.f32.mxu0 %vm17037_vm0, %v284_v10  ;;  %v298_v9 = vld [vmem:[%s11008_s16 + $0x90] sm:$0xff] }
  0xba   : > { %v9981_v22 = vpack.c.bf16 %v519_v13, %v518_v14  ;;  %v299_v14 = vld [vmem:[%s11008_s16 + $0x98] sm:$0xff] }
  0xbb   : > { %v11199_v40 = vpop.permute.xlu1 %431  ;;  %v11201_v41 = vpop.permute.xlu0 %426 }
  0xbc   : > { %17112 = vst [vmem:[#allocation21_spill] sm:$0xff] %v11199_v40  ;;  %17113 = vst [vmem:[#allocation22_spill] sm:$0xff] %v11201_v41  ;;  %v521_v16 = vmul.f32 %v11199_v40, %v11023_v18  ;;  %v520_v17 = vmul.f32 %v11201_v41, %v11026_v19  ;;  %9118 = vmatmul.mubr.msk.f32.gmra.mrb[4].mxu0 %vm17037_vm0, %v285_v15  ;;  %9982 = vmatprep.subr.bf16.mxu1 %v9981_v22  ;;  %v296_v18 = vld [vmem:[%s11008_s16 + $0x80] sm:$0xff] }
  0xbd   : > { %9984 = vmatpush3.bf16.msra.mxu1 %v9981_v22  ;;  %9120 = vmatprep.mubr.msk.f32.mxu0 %vm17037_vm0, %v286_v27  ;;  %v300_v15 = vld [vmem:[%s11008_s16 + $0xa0] sm:$0xff] }
  0xbe   : > { %v9985_v44 = vpack.c.bf16 %v521_v16, %v520_v17  ;;  %v301_v16 = vld [vmem:[%s11008_s16 + $0xa8] sm:$0xff]  ;;  %v302_v17 = vld [vmem:[%s11008_s16 + $0xb0] sm:$0xff] }
  0xbf   : > { %v11212_v48 = vpop.permute.xlu1 %441  ;;  %v11214_v49 = vpop.permute.xlu0 %436 }
  0xc0   : > { %17114 = vst [vmem:[#allocation23_spill] sm:$0xff] %v11212_v48  ;;  %17115 = vst [vmem:[#allocation24_spill] sm:$0xff] %v11214_v49  ;;  %v523_v19 = vmul.f32 %v11212_v48, %v11031_v20  ;;  %v522_v52 = vmul.f32 %v11214_v49, %v11034_v21  ;;  %9121 = vmatmul.mubr.msk.f32.gmra.mrb[6].mxu0 %vm17037_vm0, %v287_v42  ;;  %9140 = vmatmul.mubr.msk.f32.vlgmr.msra.gmra.mrb[0].mxu1 %vm17037_vm0, %v289_v43 }
  0xc1   : > { %9986 = vmatprep.subr.bf16.mxu0 %v9985_v44  ;;  %9142 = vmatprep.mubr.msk.f32.mxu1 %vm17037_vm0, %v290_v47 }
  0xc2   : > { %9988 = vmatpush3.bf16.msra.mxu0 %v9985_v44  ;;  %v9989_v54 = vpack.c.bf16 %v523_v19, %v522_v52  ;;  %9167 = vmatprep.mubr.msk.f32.mxu0 %vm17037_vm0, %v296_v18  ;;  %v303_v44 = vld [vmem:[%s11008_s16 + $0xb8] sm:$0xff] }
  0xc3   : > { %v11227_v58 = vpop.permute.xlu1 %451  ;;  %v11229_v20 = vpop.permute.xlu0 %446 }
  0xc4   : > { %17116 = vst [vmem:[#allocation25_spill] sm:$0xff] %v11227_v58  ;;  %17117 = vst [vmem:[#allocation26_spill] sm:$0xff] %v11229_v20  ;;  %v525_v21 = vmul.f32 %v11227_v58, %v11041_v23  ;;  %v524_v59 = vmul.f32 %v11229_v20, %v11044_v24  ;;  %9143 = vmatmul.mubr.msk.f32.gmra.mrb[2].mxu1 %vm17037_vm0, %v291_v53  ;;  %9990 = vmatprep.subr.bf16.mxu0 %v9989_v54 }
  0xc5   : > { %9145 = vmatprep.mubr.msk.f32.mxu1 %vm17037_vm0, %v292_v57 }
  0xc6   : > { %9992 = vmatpush3.bf16.msra.mxu0 %v9989_v54  ;;  %v9993_v63 = vpack.c.bf16 %v525_v21, %v524_v59 }
  0xc7   : > { %v11239_v1 = vpop.permute.xlu1 %461  ;;  %v11241_v2 = vpop.permute.xlu0 %456 }
  0xc8   : > { %17118 = vst [vmem:[#allocation27_spill] sm:$0xff] %v11239_v1  ;;  %17119 = vst [vmem:[#allocation28_spill] sm:$0xff] %v11241_v2  ;;  %v527_v23 = vmul.f32 %v11239_v1, %v11049_v25  ;;  %v526_v24 = vmul.f32 %v11241_v2, %v11052_v26  ;;  %9146 = vmatmul.mubr.msk.f32.gmra.mrb[4].mxu1 %vm17037_vm0, %v293_v60  ;;  %9994 = vmatprep.subr.bf16.mxu0 %v9993_v63  ;;  %v297_v26 = vld [vmem:[%s11008_s16 + $0x88] sm:$0xff] }
  0xc9   : > { %9148 = vmatprep.mubr.msk.f32.mxu1 %vm17037_vm0, %v294_v0 }
  0xca   : > { %9996 = vmatpush3.bf16.msra.mxu0 %v9993_v63  ;;  %v9997_v6 = vpack.c.bf16 %v527_v23, %v526_v24 }
  0xcc   : > { %9149 = vmatmul.mubr.msk.f32.gmra.mrb[6].mxu1 %vm17037_vm0, %v295_v3  ;;  %9998 = vmatprep.subr.bf16.mxu0 %v9997_v6  ;;  %v11252_v8 = vpop.permute.xlu1 %1058  ;;  %v11254_v25 = vpop.permute.xlu0 %1054 }
  0xcd   : > { %17120 = vst [vmem:[#allocation29_spill] sm:$0xff] %v11252_v8  ;;  %17121 = vst [vmem:[#allocation30_spill] sm:$0xff] %v11254_v25  ;;  %9195 = vmatprep.mubr.msk.f32.mxu1 %vm17037_vm0, %v304_v7 }
  0xce   : > { %10000 = vmatpush3.bf16.msra.mxu0 %v9997_v6 }
  0xd0   : > { %v11259_v10 = vpop.permute.xlu1 %1062  ;;  %v11261_v13 = vpop.permute.xlu0 %1066 }
  0xd1   : > { %17122 = vst [vmem:[#allocation31_spill] sm:$0xff] %v11259_v10  ;;  %17123 = vst [vmem:[#allocation32_spill] sm:$0xff] %v11261_v13  ;;  %9168 = vmatmul.mubr.msk.f32.vlgmr.msra.gmra.mrb[8].mxu0 %vm17037_vm0, %v297_v26 }
  0xd2   : > { %9170 = vmatprep.mubr.msk.f32.mxu0 %vm17037_vm0, %v298_v9 }
  0xd4   : > { %v11267_v22 = vpop.permute.xlu1 %1070  ;;  %v11269_v27 = vpop.permute.xlu0 %1074 }
  0xd5   : > { %17124 = vst [vmem:[#allocation33_spill] sm:$0xff] %v11267_v22  ;;  %17125 = vst [vmem:[#allocation34_spill] sm:$0xff] %v11269_v27  ;;  %9171 = vmatmul.mubr.msk.f32.gmra.mrb[10].mxu0 %vm17037_vm0, %v299_v14 }
  0xd6   : > { %9173 = vmatprep.mubr.msk.f32.mxu0 %vm17037_vm0, %v300_v15 }
  0xd8   : > { %v11275_v42 = vpop.permute.xlu1 %1078  ;;  %v11277_v43 = vpop.permute.xlu0 %1082 }
  0xd9   : > { %17126 = vst [vmem:[#allocation35_spill] sm:$0xff] %v11275_v42  ;;  %17127 = vst [vmem:[#allocation36_spill] sm:$0xff] %v11277_v43  ;;  %9174 = vmatmul.mubr.msk.f32.gmra.mrb[12].mxu0 %vm17037_vm0, %v301_v16 }
  0xda   : > { %9176 = vmatprep.mubr.msk.f32.mxu0 %vm17037_vm0, %v302_v17 }
  0xdc   : > { %v11282_v47 = vpop.permute.xlu1 %1086  ;;  %v11284_v18 = vpop.permute.xlu0 %1090 }
  0xdd   : > { %17128 = vst [vmem:[#allocation37_spill] sm:$0xff] %v11282_v47  ;;  %17129 = vst [vmem:[#allocation38_spill] sm:$0xff] %v11284_v18  ;;  %9177 = vmatmul.mubr.msk.f32.gmra.mrb[14].mxu0 %vm17037_vm0, %v303_v44 }
  0xe0   : > { %v11287_v19 = vpop.permute.xlu1 %1094  ;;  %v11289_v52 = vpop.permute.xlu0 %1098 }
  0xe1   : > { %17130 = vst [vmem:[#allocation39_spill] sm:$0xff] %v11287_v19  ;;  %17131 = vst [vmem:[#allocation40_spill] sm:$0xff] %v11289_v52 }
  0xe4   : > { %v11291_v53 = vpop.permute.xlu0 %1110 }
  0xe5   : > { %17132 = vst [vmem:[#allocation41_spill] sm:$0xff] %v11291_v53  ;;  %v11293_v54 = vpop.permute.xlu1 %466 }
  0xe6   : > { %17133 = vst [vmem:[#allocation42_spill] sm:$0xff] %v11293_v54  ;;  %v528_v57 = vmul.f32 %v11293_v54, %v11069_v28 }
  0xe9   : > { %v11297_v21 = vpop.permute.xlu0 %471 }
  0xea   : > { %17134 = vst [vmem:[#allocation43_spill] sm:$0xff] %v11297_v21  ;;  %v11299_v59 = vpop.permute.xlu1 %1102  ;;  %v529_v60 = vmul.f32 %v11297_v21, %v11075_v29 }
  0xeb   : > { %17135 = vst [vmem:[#allocation44_spill] sm:$0xff] %v11299_v59 }
  0xec   : > { %v10001_v63 = vpack.c.bf16 %v529_v60, %v528_v57  ;;  %v305_v60 = vld [vmem:[%s11008_s16 + $0xc8] sm:$0xff] }
  0xed   : > { %v11305_v23 = vpop.permute.xlu0 %476 }
  0xee   : > { %v11303_v0 = vpop.permute.xlu1 %1106  ;;  %10002 = vmatprep.subr.bf16.mxu1 %v10001_v63  ;;  %17137 = vst [vmem:[#allocation46_spill] sm:$0xff] %v11305_v23  ;;  %v530_v24 = vmul.f32 %v11305_v23, %v11081_v30 }
  0xef   : > { %17136 = vst [vmem:[#allocation45_spill] sm:$0xff] %v11303_v0  ;;  %10004 = vmatpush3.bf16.msra.mxu1 %v10001_v63  ;;  %v306_v63 = vld [vmem:[%s11008_s16 + $0xd0] sm:$0xff] }
  0xf1   : > { %v11315_v29 = vpop.permute.xlu0 %491 }
  0xf2   : > { %17140 = vst [vmem:[#allocation49_spill] sm:$0xff] %v11315_v29  ;;  %v533_v26 = vmul.f32 %v11315_v29, %v11086_v31  ;;  %v1213_v31 = vld [vmem:[%s16933_s2] sm:$0xff] }
  0xf3   : > { %v11309_v3 = vpop.permute.xlu1 %481  ;;  %9207 = vmatprep.subr.mxu0 %v1213_v31 }
  0xf4   : > { %17138 = vst [vmem:[#allocation47_spill] sm:$0xff] %v11309_v3  ;;  %v531_v28 = vmul.f32 %v11309_v3, %v11089_v32  ;;  %9208 = vmatpush3.msra.mxu0 %v1213_v31 }
  0xf5   : > { %v11327_v16 = vpop.permute.xlu0 %496 }
  0xf6   : > { %v10005_v6 = vpack.c.bf16 %v531_v28, %v530_v24  ;;  %17144 = vst [vmem:[#allocation53_spill] sm:$0xff] %v11327_v16  ;;  %v308_v24 = vld [vmem:[%s11008_s16 + $0xe0] sm:$0xff]  ;;  %v309_v28 = vld [vmem:[%s11008_s16 + $0xe8] sm:$0xff] }
  0xf8   : > { %v11313_v7 = vpop.permute.xlu1 %1114  ;;  %10006 = vmatprep.subr.bf16.mxu1 %v10005_v6 }
  0xf9   : > { %17139 = vst [vmem:[#allocation48_spill] sm:$0xff] %v11313_v7  ;;  %10008 = vmatpush3.bf16.msra.mxu1 %v10005_v6  ;;  %v310_v6 = vld [vmem:[%s11008_s16 + $0xf0] sm:$0xff] }
  0xfd   : > { %v11319_v9 = vpop.permute.xlu1 %486 }
  0xfe   : > { %17141 = vst [vmem:[#allocation50_spill] sm:$0xff] %v11319_v9  ;;  %v532_v30 = vmul.f32 %v11319_v9, %v11100_v34  ;;  %v534_v34 = vmul.f32 %v11327_v16, %v11094_v33  ;;  %v307_v33 = vld [vmem:[%s11008_s16 + $0xd8] sm:$0xff] }
 0x100   : > { %v10009_v14 = vpack.c.bf16 %v533_v26, %v532_v30 }
 0x102   : > { %v11323_v15 = vpop.permute.xlu1 %1118  ;;  %10010 = vmatprep.subr.bf16.mxu1 %v10009_v14 }
 0x103   : > { %17142 = vst [vmem:[#allocation51_spill] sm:$0xff] %v11323_v15  ;;  %10012 = vmatpush3.bf16.msra.mxu1 %v10009_v14 }
 0x106   : > { %v11325_v32 = vpop.permute.xlu1 %1122 }
 0x107   : > { %17143 = vst [vmem:[#allocation52_spill] sm:$0xff] %v11325_v32 }
 0x10b   : > { %v11334_v17 = vpop.permute.xlu1 %501 }
 0x10c   : > { %17145 = vst [vmem:[#allocation54_spill] sm:$0xff] %v11334_v17  ;;  %v535_v44 = vmul.f32 %v11334_v17, %v11111_v35  ;;  %v311_v35 = vld [vmem:[%s11008_s16 + $0xf8] sm:$0xff] }
 0x10e   : > { %v10013_v57 = vpack.c.bf16 %v535_v44, %v534_v34 }
 0x110   : > { %10014 = vmatprep.subr.bf16.mxu1 %v10013_v57 }
 0x111   : > { %10016 = vmatpush3.bf16.msra.mxu1 %v10013_v57 }
 0x114   : > { %9196 = vmatmul.mubr.msk.f32.vlgmr.msra.gmra.mrb[8].mxu1 %vm17037_vm0, %v305_v60 }
 0x115   : > { %9198 = vmatprep.mubr.msk.f32.mxu1 %vm17037_vm0, %v306_v63 }
 0x118   : > { %9199 = vmatmul.mubr.msk.f32.gmra.mrb[10].mxu1 %vm17037_vm0, %v307_v33 }
 0x119   : > { %9201 = vmatprep.mubr.msk.f32.mxu1 %vm17037_vm0, %v308_v24 }
 0x11c   : > { %9202 = vmatmul.mubr.msk.f32.gmra.mrb[12].mxu1 %vm17037_vm0, %v309_v28 }
 0x11d   : > { %9204 = vmatprep.mubr.msk.f32.mxu1 %vm17037_vm0, %v310_v6 }
 0x120   : > { %9205 = vmatmul.mubr.msk.f32.gmra.mrb[14].mxu1 %vm17037_vm0, %v311_v35 }
 0x187   : > { %v9113_v26 = vpop.f32.mrb[0].mxu0 }
 0x188   : > { %v627_v30 = vpop.f32.mrb[1].mxu0  ;;  %v1182_v31 = vmul.f32 %v9113_v26, %v11252_v8 }
 0x189   : > { %v1181_v14 = vmul.f32 %v11254_v25, %v627_v30 }
 0x18b   : > { %v9116_v34 = vpop.f32.mrb[2].mxu0  ;;  %9209 = vmatprep.mubr.msk.f32.mxu0 %vm17022_vm1, %v1181_v14 }
 0x18c   : > { %v637_v44 = vpop.f32.mrb[3].mxu0  ;;  %9210 = vmatmul.mubr.msk.f32.vlgmr.msra.gmra.mrb[16].mxu0 %vm17022_vm1, %v1182_v31  ;;  %v1184_v60 = vmul.f32 %v9116_v34, %v11261_v13 }
 0x18d   : > { %v1183_v57 = vmul.f32 %v11259_v10, %v637_v44 }
 0x18f   : > { %v9119_v63 = vpop.f32.mrb[4].mxu0  ;;  %9212 = vmatprep.mubr.msk.f32.mxu0 %vm17022_vm1, %v1183_v57 }
 0x190   : > { %v647_v33 = vpop.f32.mrb[5].mxu0  ;;  %9213 = vmatmul.mubr.msk.f32.gmra.mrb[18].mxu0 %vm17022_vm1, %v1184_v60  ;;  %v1186_v28 = vmul.f32 %v9119_v63, %v11269_v27 }
 0x191   : > { %v1185_v24 = vmul.f32 %v11267_v22, %v647_v33 }
 0x193   : > { %v9122_v6 = vpop.f32.mrb[6].mxu0  ;;  %v9141_v35 = vpop.f32.mrb[0].mxu1  ;;  %9215 = vmatprep.mubr.msk.f32.mxu0 %vm17022_vm1, %v1185_v24 }
 0x194   : > { %v657_v26 = vpop.f32.mrb[7].mxu0  ;;  %v756_v30 = vpop.f32.mrb[1].mxu1  ;;  %9216 = vmatmul.mubr.msk.f32.gmra.mrb[20].mxu0 %vm17022_vm1, %v1186_v28  ;;  %v1188_v31 = vmul.f32 %v9122_v6, %v11277_v43  ;;  %v1190_v60 = vmul.f32 %v9141_v35, %v11284_v18 }
 0x195   : > { %v1187_v14 = vmul.f32 %v11275_v42, %v657_v26  ;;  %v1189_v34 = vmul.f32 %v11282_v47, %v756_v30 }
 0x197   : > { %v9144_v44 = vpop.f32.mrb[2].mxu1  ;;  %9218 = vmatprep.mubr.msk.f32.mxu0 %vm17022_vm1, %v1187_v14 }
 0x198   : > { %v766_v57 = vpop.f32.mrb[3].mxu1  ;;  %9219 = vmatmul.mubr.msk.f32.gmra.mrb[22].mxu0 %vm17022_vm1, %v1188_v31  ;;  %v1192_v28 = vmul.f32 %v9144_v44, %v11289_v52 }
 0x199   : > { %9221 = vmatprep.mubr.msk.f32.mxu0 %vm17022_vm1, %v1189_v34  ;;  %v1191_v63 = vmul.f32 %v11287_v19, %v766_v57  ;;  %v11382_v57 = vpop.permute.xlu1 %1130 }
 0x19a   : > { %17146 = vst [vmem:[#allocation55_spill] sm:$0xff] %v11382_v57 }
 0x19b   : > { %v9147_v33 = vpop.f32.mrb[4].mxu1 }
 0x19c   : > { %v776_v24 = vpop.f32.mrb[5].mxu1  ;;  %9222 = vmatmul.mubr.msk.f32.gmra.mrb[24].mxu0 %vm17022_vm1, %v1190_v60  ;;  %v1194_v35 = vmul.f32 %v9147_v33, %v11303_v0 }
 0x19d   : > { %9224 = vmatprep.mubr.msk.f32.mxu0 %vm17022_vm1, %v1191_v63  ;;  %v1193_v6 = vmul.f32 %v11299_v59, %v776_v24  ;;  %v11387_v24 = vpop.permute.xlu0 %1126 }
 0x19e   : > { %17147 = vst [vmem:[#allocation56_spill] sm:$0xff] %v11387_v24 }
 0x19f   : > { %v9150_v26 = vpop.f32.mrb[6].mxu1 }
 0x1a0   : > { %v786_v30 = vpop.f32.mrb[7].mxu1  ;;  %9225 = vmatmul.mubr.msk.f32.gmra.mrb[26].mxu0 %vm17022_vm1, %v1192_v28  ;;  %v1196_v44 = vmul.f32 %v9150_v26, %v11313_v7 }
 0x1a1   : > { %9227 = vmatprep.mubr.msk.f32.mxu0 %vm17022_vm1, %v1193_v6  ;;  %v1195_v14 = vmul.f32 %v11291_v53, %v786_v30  ;;  %v11392_v30 = vpop.permute.xlu1 %1134 }
 0x1a2   : > { %17148 = vst [vmem:[#allocation57_spill] sm:$0xff] %v11392_v30 }
 0x1a4   : > { %v9169_v31 = vpop.f32.mrb[8].mxu0  ;;  %9228 = vmatmul.mubr.msk.f32.gmra.mrb[28].mxu0 %vm17022_vm1, %v1194_v35 }
 0x1a5   : > { %v885_v34 = vpop.f32.mrb[9].mxu0  ;;  %9230 = vmatprep.mubr.msk.f32.mxu0 %vm17022_vm1, %v1195_v14  ;;  %v1198_v28 = vmul.f32 %v9169_v31, %v11325_v32 }
 0x1a6   : > { %v1197_v60 = vmul.f32 %v11323_v15, %v885_v34  ;;  %v11397_v34 = vpop.permute.xlu0 %1138 }
 0x1a7   : > { %17149 = vst [vmem:[#allocation58_spill] sm:$0xff] %v11397_v34 }
 0x1a8   : > { %9231 = vmatmul.mubr.msk.f32.gmra.mrb[30].mxu0 %vm17022_vm1, %v1196_v44  ;;  %v9172_v63 = vpop.f32.mrb[10].mxu0 }
 0x1a9   : > { %9233 = vmatprep.mubr.msk.f32.mxu0 %vm17022_vm1, %v1197_v60  ;;  %v895_v33 = vpop.f32.mrb[11].mxu0  ;;  %v1200_v14 = vmul.f32 %v9172_v63, %v11382_v57 }
 0x1aa   : > { %v1199_v6 = vmul.f32 %v11387_v24, %v895_v33  ;;  %v11402_v33 = vpop.permute.xlu1 %1142 }
 0x1ab   : > { %17150 = vst [vmem:[#allocation59_spill] sm:$0xff] %v11402_v33 }
 0x1ac   : > { %v9175_v35 = vpop.f32.mrb[12].mxu0  ;;  %9234 = vmatmul.mubr.msk.f32.gmra.mrb[32].mxu0 %vm17022_vm1, %v1198_v28 }
 0x1ad   : > { %v905_v26 = vpop.f32.mrb[13].mxu0  ;;  %9236 = vmatprep.mubr.msk.f32.mxu0 %vm17022_vm1, %v1199_v6  ;;  %v1202_v24 = vmul.f32 %v9175_v35, %v11397_v34  ;;  %v11407_v6 = vpop.permute.xlu0 %1146 }
 0x1ae   : > { %v1201_v44 = vmul.f32 %v11392_v30, %v905_v26  ;;  %17151 = vst [vmem:[#allocation60_spill] sm:$0xff] %v11407_v6  ;;  %v11412_v26 = vpop.permute.xlu1 %1150 }
 0x1af   : > { %17152 = vst [vmem:[#allocation61_spill] sm:$0xff] %v11412_v26 }
 0x1b0   : > { %v9178_v60 = vpop.f32.mrb[14].mxu0  ;;  %9237 = vmatmul.mubr.msk.f32.gmra.mrb[34].mxu0 %vm17022_vm1, %v1200_v14 }
 0x1b1   : > { %v915_v31 = vpop.f32.mrb[15].mxu0  ;;  %9239 = vmatprep.mubr.msk.f32.mxu0 %vm17022_vm1, %v1201_v44  ;;  %v1204_v63 = vmul.f32 %v9178_v60, %v11407_v6  ;;  %v11414_v14 = vpop.permute.xlu0 %1154 }
 0x1b2   : > { %v1203_v28 = vmul.f32 %v11402_v33, %v915_v31  ;;  %17153 = vst [vmem:[#allocation62_spill] sm:$0xff] %v11414_v14  ;;  %v11416_v30 = vpop.permute.xlu1 %1158 }
 0x1b3   : > { %17154 = vst [vmem:[#allocation63_spill] sm:$0xff] %v11416_v30 }
 0x1b4   : > { %9240 = vmatmul.mubr.msk.f32.gmra.mrb[36].mxu0 %vm17022_vm1, %v1202_v24 }
 0x1b5   : > { %9242 = vmatprep.mubr.msk.f32.mxu0 %vm17022_vm1, %v1203_v28  ;;  %v11418_v34 = vpop.permute.xlu0 %1162 }
 0x1b6   : > { %17155 = vst [vmem:[#allocation64_spill] sm:$0xff] %v11418_v34 }
 0x1b8   : > { %9243 = vmatmul.mubr.msk.f32.gmra.mrb[38].mxu0 %vm17022_vm1, %v1204_v63  ;;  %v11425_v63 = vpop.permute.xlu1 %1166 }
 0x1b9   : > { %17156 = vst [vmem:[#allocation65_spill] sm:$0xff] %v11425_v63  ;;  %v11428_v57 = vpop.permute.xlu0 %1170 }
 0x1ba   : > { %17157 = vst [vmem:[#allocation66_spill] sm:$0xff] %v11428_v57 }
 0x1e7   : > { %v9197_v44 = vpop.f32.mrb[8].mxu1 }
 0x1e8   : > { %v1014_v35 = vpop.f32.mrb[9].mxu1  ;;  %v1206_v31 = vmul.f32 %v9197_v44, %v11414_v14  ;;  %v16956_v14 = vmov 0.0  }
 0x1e9   : > { %v1205_v24 = vmul.f32 %v11412_v26, %v1014_v35  ;;  %9273 = vmatprep.mubr.msk.f32.mxu1 %vm17025_vm2, %v16956_v14 }
 0x1eb   : > { %v9200_v33 = vpop.f32.mrb[10].mxu1  ;;  %9245 = vmatprep.mubr.msk.f32.mxu0 %vm17022_vm1, %v1205_v24 }
 0x1ec   : > { %v1024_v60 = vpop.f32.mrb[11].mxu1  ;;  %9246 = vmatmul.mubr.msk.f32.gmra.mrb[40].mxu0 %vm17022_vm1, %v1206_v31  ;;  %v1208_v6 = vmul.f32 %v9200_v33, %v11418_v34  ;;  %v11435_v31 = vpop.permute.xlu1 %1174 }
 0x1ed   : > { %v1207_v28 = vmul.f32 %v11416_v30, %v1024_v60  ;;  %17158 = vst [vmem:[#allocation67_spill] sm:$0xff] %v11435_v31  ;;  %v11438_v33 = vpop.permute.xlu0 %1178 }
 0x1ee   : > { %17159 = vst [vmem:[#allocation68_spill] sm:$0xff] %v11438_v33 }
 0x1ef   : > { %v9203_v15 = vpop.f32.mrb[12].mxu1  ;;  %9248 = vmatprep.mubr.msk.f32.mxu0 %vm17022_vm1, %v1207_v28 }
 0x1f0   : > { %v1034_v35 = vpop.f32.mrb[13].mxu1  ;;  %9249 = vmatmul.mubr.msk.f32.gmra.mrb[42].mxu0 %vm17022_vm1, %v1208_v6  ;;  %v1210_v24 = vmul.f32 %v9203_v15, %v11428_v57  ;;  %v16947_v6 = vmov 0.0|0.0  }
 0x1f1   : > { %v1209_v44 = vmul.f32 %v11425_v63, %v1034_v35  ;;  %10017 = vmatprep.subr.bf16.mxu1 %v16947_v6 }
 0x1f3   : > { %v9206_v26 = vpop.f32.mrb[14].mxu1  ;;  %9251 = vmatprep.mubr.msk.f32.mxu0 %vm17022_vm1, %v1209_v44 }
 0x1f4   : > { %v1044_v60 = vpop.f32.mrb[15].mxu1  ;;  %9252 = vmatmul.mubr.msk.f32.gmra.mrb[44].mxu0 %vm17022_vm1, %v1210_v24  ;;  %v1212_v28 = vmul.f32 %v9206_v26, %v11438_v33 }
 0x1f5   : > { %v1211_v30 = vmul.f32 %v11435_v31, %v1044_v60 }
 0x1f7   : > { %9254 = vmatprep.mubr.msk.f32.mxu0 %vm17022_vm1, %v1211_v30 }
 0x1f8   : > { %9255 = vmatmul.mubr.msk.f32.gmra.mrb[46].mxu0 %vm17022_vm1, %v1212_v28 }
 0x25f   : > { %v11445_v15 = vpop.f32.mrb[16].mxu0 }
 0x260   : > { %v1540_v35 = vmul.f32 %v11445_v15, %v11445_v15  ;;  %v11449_v44 = vpop.f32.mrb[17].mxu0 }
 0x261   : > { %v1539_v24 = vmul.f32 %v11449_v44, %v11449_v44 }
 0x263   : > { %v11453_v60 = vpop.f32.mrb[18].mxu0  ;;  %v10563_v26 = vpack.i.bf16 %v1540_v35, %v1539_v24 }
 0x264   : > { %v1542_v30 = vmul.f32 %v11453_v60, %v11453_v60  ;;  %v11457_v28 = vpop.f32.mrb[19].mxu0 }
 0x265   : > { %v1541_v6 = vmul.f32 %v11457_v28, %v11457_v28  ;;  %10564 = vrot.lane.b32.xlu1 %v10563_v26, %s10838_s19 }
 0x267   : > { %v11462_v31 = vpop.f32.mrb[20].mxu0  ;;  %v10568_v33 = vpack.i.bf16 %v1542_v30, %v1541_v6 }
 0x268   : > { %v1544_v63 = vmul.f32 %v11462_v31, %v11462_v31  ;;  %v11466_v57 = vpop.f32.mrb[21].mxu0 }
 0x269   : > { %v1543_v35 = vmul.f32 %v11466_v57, %v11466_v57  ;;  %10569 = vrot.lane.b32.xlu0 %v10568_v33, %s10838_s19 }
 0x26b   : > { %v11471_v24 = vpop.f32.mrb[22].mxu0  ;;  %v10573_v34 = vpack.i.bf16 %v1544_v63, %v1543_v35 }
 0x26c   : > { %v1546_v6 = vmul.f32 %v11471_v24, %v11471_v24  ;;  %v11477_v26 = vpop.f32.mrb[23].mxu0 }
 0x26d   : > { %v1545_v30 = vmul.f32 %v11477_v26, %v11477_v26  ;;  %10574 = vrot.lane.b32.xlu1 %v10573_v34, %s10838_s19 }
 0x26f   : > { %v11482_v32 = vpop.f32.mrb[24].mxu0  ;;  %v10578_v33 = vpack.i.bf16 %v1546_v6, %v1545_v30 }
 0x270   : > { %v1548_v63 = vmul.f32 %v11482_v32, %v11482_v32  ;;  %v11486_v35 = vpop.f32.mrb[25].mxu0 }
 0x271   : > { %v1547_v14 = vmul.f32 %v11486_v35, %v11486_v35  ;;  %10579 = vrot.lane.b32.xlu0 %v10578_v33, %s10838_s19 }
 0x273   : > { %v11491_v53 = vpop.f32.mrb[26].mxu0  ;;  %v10583_v7 = vpack.i.bf16 %v1548_v63, %v1547_v14 }
 0x274   : > { %v1550_v59 = vmul.f32 %v11491_v53, %v11491_v53  ;;  %v11495_v34 = vpop.f32.mrb[27].mxu0 }
 0x275   : > { %v1549_v6 = vmul.f32 %v11495_v34, %v11495_v34  ;;  %10584 = vrot.lane.b32.xlu1 %v10583_v7, %s10838_s19 }
 0x277   : > { %v11500_v30 = vpop.f32.mrb[28].mxu0  ;;  %v10588_v42 = vpack.i.bf16 %v1550_v59, %v1549_v6 }
 0x278   : > { %v1552_v43 = vmul.f32 %v11500_v30, %v11500_v30  ;;  %v11504_v33 = vpop.f32.mrb[29].mxu0 }
 0x279   : > { %v1551_v14 = vmul.f32 %v11504_v33, %v11504_v33  ;;  %10589 = vrot.lane.b32.xlu0 %v10588_v42, %s10838_s19 }
 0x27b   : > { %v11509_v63 = vpop.f32.mrb[30].mxu0  ;;  %v10593_v0 = vpack.i.bf16 %v1552_v43, %v1551_v14 }
 0x27c   : > { %v1554_v19 = vmul.f32 %v11509_v63, %v11509_v63  ;;  %v11513_v7 = vpop.f32.mrb[31].mxu0 }
 0x27d   : > { %v1553_v59 = vmul.f32 %v11513_v7, %v11513_v7  ;;  %10594 = vrot.lane.b32.xlu1 %v10593_v0, %s10838_s19 }
 0x27f   : > { %v11518_v6 = vpop.f32.mrb[32].mxu0  ;;  %v10598_v52 = vpack.i.bf16 %v1554_v19, %v1553_v59 }
 0x280   : > { %v1556_v22 = vmul.f32 %v11518_v6, %v11518_v6  ;;  %v11522_v42 = vpop.f32.mrb[33].mxu0 }
 0x281   : > { %v1555_v43 = vmul.f32 %v11522_v42, %v11522_v42  ;;  %10599 = vrot.lane.b32.xlu0 %v10598_v52, %s10838_s19 }
 0x283   : > { %v11527_v14 = vpop.f32.mrb[34].mxu0  ;;  %v10603_v27 = vpack.i.bf16 %v1556_v22, %v1555_v43 }
 0x284   : > { %v1558_v47 = vmul.f32 %v11527_v14, %v11527_v14  ;;  %v11531_v0 = vpop.f32.mrb[35].mxu0 }
 0x285   : > { %v1557_v19 = vmul.f32 %v11531_v0, %v11531_v0  ;;  %10604 = vrot.lane.b32.xlu1 %v10603_v27, %s10838_s19 }
 0x287   : > { %v11536_v59 = vpop.f32.mrb[36].mxu0  ;;  %v10608_v18 = vpack.i.bf16 %v1558_v47, %v1557_v19 }
 0x288   : > { %v1560_v10 = vmul.f32 %v11536_v59, %v11536_v59  ;;  %v11540_v52 = vpop.f32.mrb[37].mxu0 }
 0x289   : > { %v1559_v22 = vmul.f32 %v11540_v52, %v11540_v52  ;;  %10609 = vrot.lane.b32.xlu0 %v10608_v18, %s10838_s19 }
 0x28b   : > { %v11545_v43 = vpop.f32.mrb[38].mxu0  ;;  %v10613_v13 = vpack.i.bf16 %v1560_v10, %v1559_v22 }
 0x28c   : > { %v1562_v25 = vmul.f32 %v11545_v43, %v11545_v43  ;;  %v11549_v27 = vpop.f32.mrb[39].mxu0 }
 0x28d   : > { %v1561_v47 = vmul.f32 %v11549_v27, %v11549_v27  ;;  %10614 = vrot.lane.b32.xlu1 %v10613_v13, %s10838_s19 }
 0x28f   : > { %v10618_v19 = vpack.i.bf16 %v1562_v25, %v1561_v47 }
 0x291   : > { %10619 = vrot.lane.b32.xlu0 %v10618_v19, %s10838_s19 }
 0x2bf   : > { %v11555_v8 = vpop.f32.mrb[40].mxu0 }
 0x2c0   : > { %v1564_v18 = vmul.f32 %v11555_v8, %v11555_v8  ;;  %v11559_v16 = vpop.f32.mrb[41].mxu0 }
 0x2c1   : > { %v1563_v10 = vmul.f32 %v11559_v16, %v11559_v16 }
 0x2c3   : > { %v11563_v22 = vpop.f32.mrb[42].mxu0  ;;  %v10623_v17 = vpack.i.bf16 %v1564_v18, %v1563_v10 }
 0x2c4   : > { %v1566_v9 = vmul.f32 %v11563_v22, %v11563_v22  ;;  %v11567_v13 = vpop.f32.mrb[43].mxu0 }
 0x2c5   : > { %v1565_v25 = vmul.f32 %v11567_v13, %v11567_v13  ;;  %10624 = vrot.lane.b32.xlu1 %v10623_v17, %s10838_s19 }
 0x2c7   : > { %v11572_v47 = vpop.f32.mrb[44].mxu0  ;;  %v10628_v19 = vpack.i.bf16 %v1566_v9, %v1565_v25 }
 0x2c8   : > { %v1568_v29 = vmul.f32 %v11572_v47, %v11572_v47  ;;  %v11576_v23 = vpop.f32.mrb[45].mxu0 }
 0x2c9   : > { %v1567_v18 = vmul.f32 %v11576_v23, %v11576_v23  ;;  %10629 = vrot.lane.b32.xlu0 %v10628_v19, %s10838_s19 }
 0x2cb   : > { %v11581_v10 = vpop.f32.mrb[46].mxu0  ;;  %v10633_v3 = vpack.i.bf16 %v1568_v29, %v1567_v18 }
 0x2cc   : > { %v1570_v54 = vmul.f32 %v11581_v10, %v11581_v10  ;;  %v11585_v17 = vpop.f32.mrb[47].mxu0 }
 0x2cd   : > { %v1569_v9 = vmul.f32 %v11585_v17, %v11585_v17  ;;  %10634 = vrot.lane.b32.xlu1 %v10633_v3, %s10838_s19 }
 0x2cf   : > { %v10638_v25 = vpack.i.bf16 %v1570_v54, %v1569_v9  ;;  %v17160_v9 = vmov 0.0|0.0  }
 0x2d1   : > { %10639 = vrot.lane.b32.xlu0 %v10638_v25, %s10838_s19 }
 0x2d7   : > { %v10565_v21 = vpop.permute.xlu1 %10564 }
 0x2d8   : > { %v10567_v2 = vunpack.i.h.bf16 %v10565_v21  ;;  %v10566_v19 = vunpack.i.l.bf16 %v10565_v21 }
 0x2da   : > { %v1701_v29 = vsel %vm17023_vm3, %v11445_v15, %v10567_v2  ;;  %v1700_v18 = vsel %vm17023_vm3, %v11449_v44, %v10566_v19 }
 0x2db   : > { %v10570_v1 = vpop.permute.xlu0 %10569  ;;  %v10018_v20 = vpack.c.bf16 %v1701_v29, %v1700_v18 }
 0x2dc   : > { %v10572_v58 = vunpack.i.h.bf16 %v10570_v1  ;;  %v10571_v49 = vunpack.i.l.bf16 %v10570_v1 }
 0x2dd   : > { %10019 = vmatpush3.bf16.msra.mxu1 %v10018_v20 }
 0x2de   : > { %v1703_v54 = vsel %vm17023_vm3, %v11453_v60, %v10572_v58  ;;  %v1702_v3 = vsel %vm17023_vm3, %v11457_v28, %v10571_v49  ;;  %10020 = vmatprep.subr.bf16.mxu1 %v17160_v9 }
 0x2df   : > { %v10575_v21 = vpop.permute.xlu1 %10574  ;;  %v10021_v25 = vpack.c.bf16 %v1703_v54, %v1702_v3 }
 0x2e0   : > { %v10577_v48 = vunpack.i.h.bf16 %v10575_v21  ;;  %v10576_v2 = vunpack.i.l.bf16 %v10575_v21 }
 0x2e1   : > { %10022 = vmatpush3.bf16.msra.mxu1 %v10021_v25 }
 0x2e2   : > { %v1705_v19 = vsel %vm17023_vm3, %v11462_v31, %v10577_v48  ;;  %v1704_v1 = vsel %vm17023_vm3, %v11466_v57, %v10576_v2  ;;  %10023 = vmatprep.subr.bf16.mxu1 %v17160_v9 }
 0x2e3   : > { %v10580_v20 = vpop.permute.xlu0 %10579  ;;  %v10024_v58 = vpack.c.bf16 %v1705_v19, %v1704_v1 }
 0x2e4   : > { %v10582_v29 = vunpack.i.h.bf16 %v10580_v20  ;;  %v10581_v18 = vunpack.i.l.bf16 %v10580_v20 }
 0x2e5   : > { %10025 = vmatpush3.bf16.msra.mxu1 %v10024_v58 }
 0x2e6   : > { %v1707_v49 = vsel %vm17023_vm3, %v11471_v24, %v10582_v29  ;;  %v1706_v54 = vsel %vm17023_vm3, %v11477_v26, %v10581_v18  ;;  %10026 = vmatprep.subr.bf16.mxu1 %v17160_v9  ;;  %v16988_v18 = vmov 1.0  }
 0x2e7   : > { %v10585_v3 = vpop.permute.xlu1 %10584  ;;  %v10027_v48 = vpack.c.bf16 %v1707_v49, %v1706_v54  ;;  %v17161_v49 = vmov 0.0  }
 0x2e8   : > { %v10587_v21 = vunpack.i.h.bf16 %v10585_v3  ;;  %v10586_v25 = vunpack.i.l.bf16 %v10585_v3 }
 0x2e9   : > { %10028 = vmatpush3.bf16.msra.mxu1 %v10027_v48 }
 0x2ea   : > { %v1709_v2 = vsel %vm17023_vm3, %v11482_v32, %v10587_v21  ;;  %v1708_v19 = vsel %vm17023_vm3, %v11486_v35, %v10586_v25  ;;  %10029 = vmatprep.subr.bf16.mxu1 %v17160_v9 }
 0x2eb   : > { %v10590_v1 = vpop.permute.xlu0 %10589  ;;  %v10030_v20 = vpack.c.bf16 %v1709_v2, %v1708_v19 }
 0x2ec   : > { %v10592_v58 = vunpack.i.h.bf16 %v10590_v1  ;;  %v10591_v29 = vunpack.i.l.bf16 %v10590_v1  ;;  %9274 = vmatmul.mubr.msk.f32.vlgmr.msra.gmra.mrb[16].mxu1 %vm17037_vm0, %v16988_v18 }
 0x2ed   : > { %10031 = vmatpush3.bf16.msra.mxu1 %v10030_v20  ;;  %9292 = vmatprep.mubr.msk.f32.mxu1 %vm17025_vm2, %v17161_v49 }
 0x2ee   : > { %v1711_v54 = vsel %vm17023_vm3, %v11491_v53, %v10592_v58  ;;  %v1710_v3 = vsel %vm17023_vm3, %v11495_v34, %v10591_v29  ;;  %10032 = vmatprep.subr.bf16.mxu1 %v17160_v9 }
 0x2ef   : > { %v10595_v48 = vpop.permute.xlu1 %10594  ;;  %v10033_v21 = vpack.c.bf16 %v1711_v54, %v1710_v3 }
 0x2f0   : > { %v10597_v25 = vunpack.i.h.bf16 %v10595_v48  ;;  %v10596_v2 = vunpack.i.l.bf16 %v10595_v48 }
 0x2f1   : > { %10034 = vmatpush3.bf16.msra.mxu1 %v10033_v21 }
 0x2f2   : > { %v1713_v19 = vsel %vm17023_vm3, %v11500_v30, %v10597_v25  ;;  %v1712_v1 = vsel %vm17023_vm3, %v11504_v33, %v10596_v2  ;;  %10035 = vmatprep.subr.bf16.mxu1 %v17160_v9 }
 0x2f3   : > { %v10600_v20 = vpop.permute.xlu0 %10599  ;;  %v10036_v58 = vpack.c.bf16 %v1713_v19, %v1712_v1 }
 0x2f4   : > { %v10602_v18 = vunpack.i.h.bf16 %v10600_v20  ;;  %v10601_v41 = vunpack.i.l.bf16 %v10600_v20 }
 0x2f5   : > { %10037 = vmatpush3.bf16.msra.mxu1 %v10036_v58 }
 0x2f6   : > { %v1715_v29 = vsel %vm17023_vm3, %v11509_v63, %v10602_v18  ;;  %v1714_v54 = vsel %vm17023_vm3, %v11513_v7, %v10601_v41  ;;  %10038 = vmatprep.subr.bf16.mxu1 %v17160_v9  ;;  %v17162_v41 = vmov 1.0  }
 0x2f7   : > { %v10605_v3 = vpop.permute.xlu1 %10604  ;;  %v10039_v48 = vpack.c.bf16 %v1715_v29, %v1714_v54  ;;  %9349 = vmatprep.mubr.msk.f32.mxu0 %vm17024_vm12, %v17162_v41 }
 0x2f8   : > { %v10607_v21 = vunpack.i.h.bf16 %v10605_v3  ;;  %v10606_v25 = vunpack.i.l.bf16 %v10605_v3 }
 0x2f9   : > { %10040 = vmatpush3.bf16.msra.mxu1 %v10039_v48 }
 0x2fa   : > { %v1717_v2 = vsel %vm17023_vm3, %v11518_v6, %v10607_v21  ;;  %v1716_v19 = vsel %vm17023_vm3, %v11522_v42, %v10606_v25  ;;  %10041 = vmatprep.subr.bf16.mxu1 %v17160_v9 }
 0x2fb   : > { %v10610_v1 = vpop.permute.xlu0 %10609  ;;  %v10042_v18 = vpack.c.bf16 %v1717_v2, %v1716_v19 }
 0x2fc   : > { %v10612_v20 = vunpack.i.h.bf16 %v10610_v1  ;;  %v10611_v58 = vunpack.i.l.bf16 %v10610_v1  ;;  %9293 = vmatmul.mubr.msk.f32.vlgmr.msra.gmra.mrb[18].mxu1 %vm17037_vm0, %v17162_v41 }
 0x2fd   : > { %10043 = vmatpush3.bf16.msra.mxu1 %v10042_v18  ;;  %9311 = vmatprep.mubr.msk.f32.mxu1 %vm17025_vm2, %v17161_v49 }
 0x2fe   : > { %v1719_v29 = vsel %vm17023_vm3, %v11527_v14, %v10612_v20  ;;  %v1718_v54 = vsel %vm17023_vm3, %v11531_v0, %v10611_v58  ;;  %10044 = vmatprep.subr.bf16.mxu1 %v17160_v9 }
 0x2ff   : > { %v10615_v3 = vpop.permute.xlu1 %10614  ;;  %v10045_v48 = vpack.c.bf16 %v1719_v29, %v1718_v54 }
 0x300   : > { %v10617_v21 = vunpack.i.h.bf16 %v10615_v3  ;;  %v10616_v25 = vunpack.i.l.bf16 %v10615_v3 }
 0x301   : > { %10046 = vmatpush3.bf16.msra.mxu1 %v10045_v48 }
 0x302   : > { %v1721_v2 = vsel %vm17023_vm3, %v11536_v59, %v10617_v21  ;;  %v1720_v19 = vsel %vm17023_vm3, %v11540_v52, %v10616_v25  ;;  %10047 = vmatprep.subr.bf16.mxu1 %v17160_v9 }
 0x303   : > { %v10620_v1 = vpop.permute.xlu0 %10619  ;;  %v10048_v18 = vpack.c.bf16 %v1721_v2, %v1720_v19 }
 0x304   : > { %v10622_v20 = vunpack.i.h.bf16 %v10620_v1  ;;  %v10621_v40 = vunpack.i.l.bf16 %v10620_v1 }
 0x305   : > { %10049 = vmatpush3.bf16.msra.mxu1 %v10048_v18 }
 0x306   : > { %v1723_v58 = vsel %vm17023_vm3, %v11545_v43, %v10622_v20  ;;  %v1722_v29 = vsel %vm17023_vm3, %v11549_v27, %v10621_v40  ;;  %10050 = vmatprep.subr.bf16.mxu1 %v17160_v9 }
 0x307   : > { %v10051_v54 = vpack.c.bf16 %v1723_v58, %v1722_v29 }
 0x309   : > { %10052 = vmatpush3.bf16.msra.mxu1 %v10051_v54 }
 0x30a   : > { %10053 = vmatprep.subr.bf16.mxu1 %v17160_v9 }
 0x30c   : > { %9312 = vmatmul.mubr.msk.f32.vlgmr.msra.gmra.mrb[20].mxu1 %vm17037_vm0, %v17162_v41 }
 0x30d   : > { %9330 = vmatprep.mubr.msk.f32.mxu1 %vm17025_vm2, %v17161_v49 }
 0x337   : > { %v10625_v3 = vpop.permute.xlu1 %10624 }
 0x338   : > { %v10627_v48 = vunpack.i.h.bf16 %v10625_v3  ;;  %v10626_v21 = vunpack.i.l.bf16 %v10625_v3 }
 0x33a   : > { %v1725_v25 = vsel %vm17023_vm3, %v11555_v8, %v10627_v48  ;;  %v1724_v40 = vsel %vm17023_vm3, %v11559_v16, %v10626_v21 }
 0x33b   : > { %v10630_v2 = vpop.permute.xlu0 %10629  ;;  %v10054_v19 = vpack.c.bf16 %v1725_v25, %v1724_v40 }
 0x33c   : > { %v10632_v1 = vunpack.i.h.bf16 %v10630_v2  ;;  %v10631_v18 = vunpack.i.l.bf16 %v10630_v2 }
 0x33d   : > { %10055 = vmatpush3.bf16.msra.mxu1 %v10054_v19 }
 0x33e   : > { %v1727_v20 = vsel %vm17023_vm3, %v11563_v22, %v10632_v1  ;;  %v1726_v58 = vsel %vm17023_vm3, %v11567_v13, %v10631_v18  ;;  %10056 = vmatprep.subr.bf16.mxu1 %v17160_v9 }
 0x33f   : > { %v10635_v29 = vpop.permute.xlu1 %10634  ;;  %v10057_v54 = vpack.c.bf16 %v1727_v20, %v1726_v58 }
 0x340   : > { %v10637_v3 = vunpack.i.h.bf16 %v10635_v29  ;;  %v10636_v48 = vunpack.i.l.bf16 %v10635_v29  ;;  %v11687_v29 = vld [vmem:[%s16935_s4 + $0x2] sm:$0x1] }
 0x341   : > { %10058 = vmatpush3.bf16.msra.mxu1 %v10057_v54  ;;  %v2019_v54 = vmul.f32 2.0, %v11687_v29 }
 0x342   : > { %v1729_v21 = vsel %vm17023_vm3, %v11572_v47, %v10637_v3  ;;  %v1728_v25 = vsel %vm17023_vm3, %v11576_v23, %v10636_v48  ;;  %10059 = vmatprep.subr.bf16.mxu1 %v17160_v9  ;;  %v2020_v3 = vmul.f32 %v11687_v29, %v11687_v29 }
 0x343   : > { %v10640_v40 = vpop.permute.xlu0 %10639  ;;  %v10060_v2 = vpack.c.bf16 %v1729_v21, %v1728_v25 }
 0x344   : > { %v10642_v19 = vunpack.i.h.bf16 %v10640_v40  ;;  %v10641_v1 = vunpack.i.l.bf16 %v10640_v40  ;;  %v11692_v40 = vsub.f32 %v2019_v54, %v2020_v3 }
 0x345   : > { %10061 = vmatpush3.bf16.msra.mxu1 %v10060_v2 }
 0x346   : > { %v1731_v18 = vsel %vm17023_vm3, %v11581_v10, %v10642_v19  ;;  %v1730_v20 = vsel %vm17023_vm3, %v11585_v17, %v10641_v1  ;;  %10062 = vmatprep.subr.bf16.mxu1 %v17160_v9 }
 0x347   : > { %v10063_v58 = vpack.c.bf16 %v1731_v18, %v1730_v20 }
 0x349   : > { %10064 = vmatpush3.bf16.msra.mxu1 %v10063_v58 }
 0x34c   : > { %9331 = vmatmul.mubr.msk.f32.vlgmr.msra.gmra.mrb[22].mxu1 %vm17037_vm0, %v17162_v41 }
 0x34d   : > { %9377 = vmatprep.mubr.msk.f32.mxu1 %vm17024_vm12, %v17162_v41 }
 0x3bf   : > { %v1801_v48 = vpop.f32.mrb[16].mxu1 }
 0x3c0   : > { %v2015_v21 = vmul.f32 0.015625, %v1801_v48  ;;  %v9275_v25 = vpop.f32.mrb[17].mxu1 }
 0x3c2   : > { %v2022_v2 = vmul.f32 %v2015_v21, %v2015_v21 }
 0x3c4   : > { %v2026_v19 = vmul.f32 %v2022_v2, %v11692_v40 }
 0x3c6   : > { %2034 = vrot.lane.b32.xlu1 %v2026_v19, %s10838_s19 }
 0x3cf   : > { %v11696_v1 = vpop.f32.mrb[18].mxu1 }
 0x3d0   : > { %v9294_v18 = vpop.f32.mrb[19].mxu1 }
 0x3d1   : > { %v11707_v18 = vshrl.u32 %v16996_v5, 7 }
 0x3d3   : > { %17163 = vst [vmem:[#allocation69_spill] sm:$0xff] %v11707_v18 }
 0x3df   : > { %v1941_v20 = vpop.f32.mrb[20].mxu1 }
 0x3e0   : > { %v11698_v58 = vmul.f32 0.015625, %v1941_v20  ;;  %v9313_v12 = vpop.f32.mrb[21].mxu1 }
 0x3e1   : > { %v11710_v12 = vsub.s32 0, %v11707_v18 }
 0x3e2   : > { %v2024_v11 = vmul.f32 %v11698_v58, %v11698_v58 }
 0x3e3   : > { %17164 = vst [vmem:[#allocation70_spill] sm:$0xff] %v11710_v12 }
 0x3e4   : > { %v2028_v48 = vmul.f32 %v2024_v11, %v11692_v40 }
 0x3e6   : > { %2038 = vrot.lane.b32.xlu0 %v2028_v48, %s10838_s19 }
 0x41f   : > { %v11704_v54 = vpop.f32.mrb[22].mxu1 }
 0x420   : > { %v9332_v3 = vpop.f32.mrb[23].mxu1 }
 0x438   : > { %v2035_v25 = vpop.permute.xlu1 %2034 }
 0x439   : > { %v2046_v2 = vsub.f32 %v2015_v21, %v2035_v25 }
 0x43b   : > { %v2138_v19 = vadd.f32 1e-05, %v2046_v2 }
 0x43d   : > { %10723 = vrsqrt.f32 %v2138_v19  ;;  %v2050_v19 = vmul.f32 %v2015_v21, %v11687_v29 }
 0x43f   : > { %v2057_v5 = vrot.slane %v2050_v19, %v11710_v12  ;;  %v11739_v19 = vld [vmem:[%s16935_s4 + $0x1] ss:$0 sm:$0xff] }
 0x441   : > { %v2070_v62 = vsub.f32 %v11449_v44, %v2057_v5  ;;  %v2072_v61 = vsub.f32 %v11457_v28, %v2057_v5  ;;  %v2077_v21 = vsub.f32 %v11471_v24, %v2057_v5 }
 0x447   : > { %v10724_v20 = vpop.eup %10723 }
 0x448   : > { %v2149_v4 = vrot.slane %v10724_v20, %v11710_v12  ;;  %v2071_v20 = vsub.f32 %v11445_v15, %v2057_v5 }
 0x44a   : > { %2166 = vrot.lane.b32.xlu1 %v2149_v4, %s10842_s28  ;;  %v2073_v4 = vsub.f32 %v11453_v60, %v2057_v5 }
 0x458   : > { %v2039_v11 = vpop.permute.xlu0 %2038 }
 0x459   : > { %v2048_v48 = vsub.f32 %v11698_v58, %v2039_v11  ;;  %v11726_v11 = vld [vmem:[%s16935_s4] ss:$0 sm:$0xff] }
 0x45a   : > { %v2106_v44 = vmul.f32 %v11726_v11, %v2070_v62  ;;  %v2107_v15 = vmul.f32 %v11726_v11, %v2071_v20  ;;  %v2109_v60 = vmul.f32 %v11726_v11, %v2073_v4  ;;  %v2108_v28 = vmul.f32 %v11726_v11, %v2072_v61 }
 0x45b   : > { %v2140_v3 = vadd.f32 1e-05, %v2048_v48  ;;  %v2075_v48 = vsub.f32 %v11462_v31, %v2057_v5  ;;  %v2113_v4 = vmul.f32 %v11726_v11, %v2077_v21 }
 0x45d   : > { %10725 = vrsqrt.f32 %v2140_v3  ;;  %v2074_v3 = vsub.f32 %v11466_v57, %v2057_v5  ;;  %v2111_v57 = vmul.f32 %v11726_v11, %v2075_v48 }
 0x45f   : > { %v2110_v31 = vmul.f32 %v11726_v11, %v2074_v3 }
 0x467   : > { %v10726_v25 = vpop.eup %10725 }
 0x468   : > { %v2157_v2 = vrot.slane %v10726_v25, %v11710_v12  ;;  %v2076_v25 = vsub.f32 %v11477_v26, %v2057_v5 }
 0x46a   : > { %2170 = vrot.lane.b32.xlu0 %v2157_v2, %s10842_s28  ;;  %v2112_v61 = vmul.f32 %v11726_v11, %v2076_v25 }
 0x4bc   : > { %v2167_v2 = vpop.permute.xlu1 %2166 }
 0x4bd   : > { %v2178_v24 = vmul.f32 %v2167_v2, %v2106_v44  ;;  %v2179_v5 = vmul.f32 %v2167_v2, %v2107_v15  ;;  %v2181_v26 = vmul.f32 %v2167_v2, %v2109_v60  ;;  %v2180_v62 = vmul.f32 %v2167_v2, %v2108_v28 }
 0x4be   : > { %v2183_v56 = vmul.f32 %v2167_v2, %v2111_v57  ;;  %v2182_v20 = vmul.f32 %v2167_v2, %v2110_v31  ;;  %v2185_v15 = vmul.f32 %v2167_v2, %v2113_v4  ;;  %v2184_v60 = vmul.f32 %v2167_v2, %v2112_v61 }
 0x4bf   : > { %v2214_v55 = vadd.f32 %v11739_v19, %v2178_v24  ;;  %v2215_v51 = vadd.f32 %v11739_v19, %v2179_v5  ;;  %v2217_v50 = vadd.f32 %v11739_v19, %v2181_v26  ;;  %v2216_v48 = vadd.f32 %v11739_v19, %v2180_v62 }
 0x4c0   : > { %v2219_v3 = vadd.f32 %v11739_v19, %v2183_v56  ;;  %v2218_v44 = vadd.f32 %v11739_v19, %v2182_v20  ;;  %v2221_v2 = vadd.f32 %v11739_v19, %v2185_v15 }
 0x4c1   : > { %vm2246_vm4 = vcmp.gt.f32.partialorder %v2214_v55, 0.0  ;;  %v2278_v28 = vmul.f32 0.01, %v2214_v55  ;;  %vm2247_vm5 = vcmp.gt.f32.partialorder %v2215_v51, 0.0  ;;  %v2279_v21 = vmul.f32 0.01, %v2215_v51 }
 0x4c2   : > { %vm2249_vm6 = vcmp.gt.f32.partialorder %v2217_v50, 0.0  ;;  %v2281_v25 = vmul.f32 0.01, %v2217_v50  ;;  %vm2248_vm7 = vcmp.gt.f32.partialorder %v2216_v48, 0.0  ;;  %v2280_v57 = vmul.f32 0.01, %v2216_v48 }
 0x4c3   : > { %v11751_v31 = vsel %vm2246_vm4, %v2214_v55, %v2278_v28  ;;  %v11753_v24 = vsel %vm2247_vm5, %v2215_v51, %v2279_v21  ;;  %v2283_v20 = vmul.f32 0.01, %v2219_v3  ;;  %v2220_v55 = vadd.f32 %v11739_v19, %v2184_v60 }
 0x4c4   : > { %v2342_v5 = vsel %vm17023_vm3, %v11751_v31, -inf  ;;  %v2345_v56 = vsel %vm17023_vm3, %v11753_v24, -inf  ;;  %v11760_v26 = vsel %vm2249_vm6, %v2217_v50, %v2281_v25  ;;  %v11762_v62 = vsel %vm2248_vm7, %v2216_v48, %v2280_v57 }
 0x4c5   : > { %2343 = vmax.xlane.f32.xlu1 %v2342_v5  ;;  %2346 = vmax.xlane.f32.xlu0 %v2345_v56  ;;  %vm2251_vm8 = vcmp.gt.f32.partialorder %v2219_v3, 0.0  ;;  %vm2250_vm9 = vcmp.gt.f32.partialorder %v2218_v44, 0.0  ;;  %v2282_v51 = vmul.f32 0.01, %v2218_v44  ;;  %v2351_v4 = vsel %vm17023_vm3, %v11760_v26, -inf }
 0x4c6   : > { %v2348_v61 = vsel %vm17023_vm3, %v11762_v62, -inf  ;;  %v11769_v15 = vsel %vm2251_vm8, %v2219_v3, %v2283_v20  ;;  %v2285_v48 = vmul.f32 0.01, %v2221_v2  ;;  %v2284_v28 = vmul.f32 0.01, %v2220_v55 }
 0x4c7   : > { %17165 = vst [vmem:[#allocation71_spill] sm:$0xff] %v11769_v15  ;;  %v11771_v50 = vsel %vm2250_vm9, %v2218_v44, %v2282_v51  ;;  %vm2253_vm10 = vcmp.gt.f32.partialorder %v2221_v2, 0.0  ;;  %vm2252_vm11 = vcmp.gt.f32.partialorder %v2220_v55, 0.0  ;;  %v2357_v60 = vsel %vm17023_vm3, %v11769_v15, -inf  ;;  %vm11868_vm9 = vmpackc.low %vm17024_vm12, %vm17024_vm12 }
 0x4c8   : > { %v2354_v21 = vsel %vm17023_vm3, %v11771_v50, -inf  ;;  %v11777_v25 = vsel %vm2253_vm10, %v2221_v2, %v2285_v48  ;;  %v11779_v57 = vsel %vm2252_vm11, %v2220_v55, %v2284_v28  ;;  %v2052_v3 = vmul.f32 %v11698_v58, %v11687_v29 }
 0x4c9   : > { %2352 = vmax.xlane.f32.xlu1 %v2351_v4  ;;  %2349 = vmax.xlane.f32.xlu0 %v2348_v61  ;;  %17166 = vst [vmem:[#allocation72_spill] sm:$0xff] %v11777_v25  ;;  %17167 = vst [vmem:[#allocation73_spill] sm:$0xff] %v11779_v57  ;;  %v2363_v44 = vsel %vm17023_vm3, %v11777_v25, -inf  ;;  %v2360_v5 = vsel %vm17023_vm3, %v11779_v57, -inf }
 0x4ca   : > { %v2065_v56 = vrot.slane %v2052_v3, %v11710_v12 }
 0x4cc   : > { %v2087_v2 = vsub.f32 %v11518_v6, %v2065_v56  ;;  %v2086_v58 = vsub.f32 %v11522_v42, %v2065_v56  ;;  %v2089_v20 = vsub.f32 %v11527_v14, %v2065_v56  ;;  %v2088_v55 = vsub.f32 %v11531_v0, %v2065_v56 }
 0x4cd   : > { %2358 = vmax.xlane.f32.xlu1 %v2357_v60  ;;  %2355 = vmax.xlane.f32.xlu0 %v2354_v21  ;;  %v2091_v51 = vsub.f32 %v11536_v59, %v2065_v56  ;;  %v2090_v4 = vsub.f32 %v11540_v52, %v2065_v56  ;;  %v2093_v61 = vsub.f32 %v11545_v43, %v2065_v56 }
 0x4ce   : > { %v2092_v48 = vsub.f32 %v11549_v27, %v2065_v56  ;;  %v2123_v28 = vmul.f32 %v11726_v11, %v2087_v2  ;;  %v2122_v60 = vmul.f32 %v11726_v11, %v2086_v58  ;;  %v2125_v6 = vmul.f32 %v11726_v11, %v2089_v20 }
 0x4cf   : > { %v2124_v42 = vmul.f32 %v11726_v11, %v2088_v55  ;;  %v2127_v14 = vmul.f32 %v11726_v11, %v2091_v51  ;;  %v2126_v0 = vmul.f32 %v11726_v11, %v2090_v4  ;;  %v2129_v27 = vmul.f32 %v11726_v11, %v2093_v61 }
 0x4d0   : > { %v2128_v56 = vmul.f32 %v11726_v11, %v2092_v48 }
 0x4d1   : > { %2364 = vmax.xlane.f32.xlu1 %v2363_v44  ;;  %2361 = vmax.xlane.f32.xlu0 %v2360_v5 }
 0x4dc   : > { %v2171_v21 = vpop.permute.xlu0 %2170 }
 0x4dd   : > { %v2195_v59 = vmul.f32 %v2171_v21, %v2123_v28  ;;  %v2194_v3 = vmul.f32 %v2171_v21, %v2122_v60  ;;  %v2197_v52 = vmul.f32 %v2171_v21, %v2125_v6  ;;  %v2196_v44 = vmul.f32 %v2171_v21, %v2124_v42 }
 0x4de   : > { %v2199_v43 = vmul.f32 %v2171_v21, %v2127_v14  ;;  %v2198_v5 = vmul.f32 %v2171_v21, %v2126_v0  ;;  %v2201_v28 = vmul.f32 %v2171_v21, %v2129_v27  ;;  %v2200_v60 = vmul.f32 %v2171_v21, %v2128_v56 }
 0x4df   : > { %v2231_v2 = vadd.f32 %v11739_v19, %v2195_v59  ;;  %v2230_v58 = vadd.f32 %v11739_v19, %v2194_v3  ;;  %v2233_v20 = vadd.f32 %v11739_v19, %v2197_v52  ;;  %v2232_v55 = vadd.f32 %v11739_v19, %v2196_v44 }
 0x4e0   : > { %v2235_v51 = vadd.f32 %v11739_v19, %v2199_v43  ;;  %v2234_v4 = vadd.f32 %v11739_v19, %v2198_v5  ;;  %v2237_v21 = vadd.f32 %v11739_v19, %v2201_v28  ;;  %v2236_v5 = vadd.f32 %v11739_v19, %v2200_v60 }
 0x4e1   : > { %vm2263_vm13 = vcmp.gt.f32.partialorder %v2231_v2, 0.0  ;;  %v2295_v6 = vmul.f32 0.01, %v2231_v2  ;;  %vm2262_vm14 = vcmp.gt.f32.partialorder %v2230_v58, 0.0  ;;  %v2294_v61 = vmul.f32 0.01, %v2230_v58 }
 0x4e2   : > { %vm2265_vm15 = vcmp.gt.f32.partialorder %v2233_v20, 0.0  ;;  %v2297_v48 = vmul.f32 0.01, %v2233_v20  ;;  %vm2264_vm4 = vcmp.gt.f32.partialorder %v2232_v55, 0.0  ;;  %v2296_v42 = vmul.f32 0.01, %v2232_v55 }
 0x4e3   : > { %v11814_v14 = vsel %vm2263_vm13, %v2231_v2, %v2295_v6  ;;  %v11816_v0 = vsel %vm2262_vm14, %v2230_v58, %v2294_v61  ;;  %v2299_v43 = vmul.f32 0.01, %v2235_v51  ;;  %vm2267_vm5 = vcmp.gt.f32.partialorder %v2235_v51, 0.0 }
 0x4e4   : > { %v2393_v59 = vsel %vm17023_vm3, %v11814_v14, -inf  ;;  %v2390_v3 = vsel %vm17023_vm3, %v11816_v0, -inf  ;;  %v11823_v52 = vsel %vm2265_vm15, %v2233_v20, %v2297_v48  ;;  %v11825_v44 = vsel %vm2264_vm4, %v2232_v55, %v2296_v42 }
 0x4e5   : > { %2394 = vmax.xlane.f32.xlu1 %v2393_v59  ;;  %2391 = vmax.xlane.f32.xlu0 %v2390_v3  ;;  %vm2266_vm6 = vcmp.gt.f32.partialorder %v2234_v4, 0.0  ;;  %v2298_v27 = vmul.f32 0.01, %v2234_v4  ;;  %v2399_v56 = vsel %vm17023_vm3, %v11823_v52, -inf  ;;  %v2396_v2 = vsel %vm17023_vm3, %v11825_v44, -inf }
 0x4e6   : > { %v11832_v58 = vsel %vm2267_vm5, %v2235_v51, %v2299_v43  ;;  %v2301_v55 = vmul.f32 0.01, %v2237_v21  ;;  %v2300_v28 = vmul.f32 0.01, %v2236_v5  ;;  %vm2269_vm7 = vcmp.gt.f32.partialorder %v2237_v21, 0.0 }
 0x4e7   : > { %17168 = vst [vmem:[#allocation74_spill] sm:$0xff] %v11832_v58  ;;  %v11834_v20 = vsel %vm2266_vm6, %v2234_v4, %v2298_v27  ;;  %vm2268_vm8 = vcmp.gt.f32.partialorder %v2236_v5, 0.0  ;;  %v2405_v60 = vsel %vm17023_vm3, %v11832_v58, -inf  ;;  %v11849_v42 = vmul.f32 0.015625, %v11704_v54 }
 0x4e8   : > { %17169 = vst [vmem:[#allocation75_spill] sm:$0xff] %v11834_v20  ;;  %v2402_v6 = vsel %vm17023_vm3, %v11834_v20, -inf  ;;  %v11840_v61 = vsel %vm2269_vm7, %v2237_v21, %v2301_v55  ;;  %v11842_v48 = vsel %vm2268_vm8, %v2236_v5, %v2300_v28  ;;  %v11854_v3 = vmul.f32 0.015625, %v11696_v1 }
 0x4e9   : > { %2400 = vmax.xlane.f32.xlu1 %v2399_v56  ;;  %2397 = vmax.xlane.f32.xlu0 %v2396_v2  ;;  %17170 = vst [vmem:[#allocation76_spill] sm:$0xff] %v11840_v61  ;;  %17171 = vst [vmem:[#allocation77_spill] sm:$0xff] %v11842_v48  ;;  %v2411_v51 = vsel %vm17023_vm3, %v11840_v61, -inf  ;;  %v2408_v4 = vsel %vm17023_vm3, %v11842_v48, -inf  ;;  %v2025_v59 = vmul.f32 %v11849_v42, %v11849_v42  ;;  %v17172_v1 = vmov 0 }
 0x4ea   : > { %v2023_v43 = vmul.f32 %v11854_v3, %v11854_v3  ;;  %v17173_v1 = vsel %vm11868_vm9, 4294967295, %v17172_v1 }
 0x4eb   : > { %v2029_v21 = vmul.f32 %v2025_v59, %v11692_v40  ;;  %17174 = vst [vmem:[#allocation78_spill] sm:$0xff] %v17173_v1 }
 0x4ec   : > { %v2027_v5 = vmul.f32 %v2023_v43, %v11692_v40 }
 0x4ed   : > { %2406 = vmax.xlane.f32.xlu1 %v2405_v60  ;;  %2403 = vmax.xlane.f32.xlu0 %v2402_v6 }
 0x4f1   : > { %2412 = vmax.xlane.f32.xlu1 %v2411_v51  ;;  %2409 = vmax.xlane.f32.xlu0 %v2408_v4 }
 0x502   : > { %2040 = vrot.lane.b32.xlu1 %v2029_v21, %s10838_s19 }
 0x507   : > { %2036 = vrot.lane.b32.xlu0 %v2027_v5, %s10838_s19 }
 0x552   : > { %v11862_v27 = vpop.xlane.xlu1 %2343  ;;  %v11864_v54 = vpop.xlane.xlu0 %2346 }
 0x553   : > { %v10065_v56 = vpack.c.bf16 %v11864_v54, %v11862_v27 }
 0x555   : > { %10067 = vmatprep.subr.msk.bf16.mxu0 %vm11868_vm9, %v10065_v56 }
 0x556   : > { %v11876_v2 = vpop.xlane.xlu1 %2352  ;;  %10070 = vmatpush3.bf16.xpose.msk.msra.mxu0 %vm11868_vm9, %v10065_v56  ;;  %v11880_v40 = vpop.xlane.xlu0 %2349 }
 0x557   : > { %v10071_v55 = vpack.c.bf16 %v11876_v2, %v11880_v40 }
 0x559   : > { %10073 = vmatprep.subr.msk.bf16.mxu0 %vm11868_vm9, %v10071_v55 }
 0x55a   : > { %v11886_v28 = vpop.xlane.xlu1 %2358  ;;  %v11888_v60 = vpop.xlane.xlu0 %2355 }
 0x55b   : > { %v10077_v6 = vpack.c.bf16 %v11886_v28, %v11888_v60 }
 0x55e   : > { %10076 = vmatpush3.bf16.xpose.msk.msra.mxu0 %vm11868_vm9, %v10071_v55  ;;  %v11896_v51 = vpop.xlane.xlu1 %2364  ;;  %v11898_v4 = vpop.xlane.xlu0 %2361 }
 0x55f   : > { %10079 = vmatprep.subr.msk.bf16.mxu0 %vm11868_vm9, %v10077_v6  ;;  %v10083_v59 = vpack.c.bf16 %v11896_v51, %v11898_v4 }
 0x566   : > { %10082 = vmatpush3.bf16.xpose.msk.msra.mxu0 %vm11868_vm9, %v10077_v6 }
 0x567   : > { %10085 = vmatprep.subr.msk.bf16.mxu0 %vm11868_vm9, %v10083_v59 }
 0x56e   : > { %10088 = vmatpush3.bf16.xpose.msk.msra.mxu0 %vm11868_vm9, %v10083_v59 }
 0x572   : > { %v11908_v21 = vpop.xlane.xlu1 %2394  ;;  %v11910_v43 = vpop.xlane.xlu0 %2391 }
 0x573   : > { %v10113_v5 = vpack.c.bf16 %v11908_v21, %v11910_v43 }
 0x575   : > { %9350 = vmatmul.mubr.msk.f32.vlgmr.msra.gmra.mrb[48].mxu0 %vm17024_vm12, %v17162_v41  ;;  %10115 = vmatprep.subr.msk.bf16.mxu0 %vm11868_vm9, %v10113_v5 }
 0x576   : > { %v11918_v56 = vpop.xlane.xlu1 %2400  ;;  %10118 = vmatpush3.bf16.xpose.msk.msra.mxu0 %vm11868_vm9, %v10113_v5  ;;  %v11922_v55 = vpop.xlane.xlu0 %2397  ;;  %9352 = vmatprep.mubr.msk.f32.mxu0 %vm17024_vm12, %v17162_v41 }
 0x577   : > { %v10119_v6 = vpack.c.bf16 %v11918_v56, %v11922_v55 }
 0x579   : > { %9353 = vmatmul.mubr.msk.f32.gmra.mrb[50].mxu0 %vm17024_vm12, %v17162_v41  ;;  %10121 = vmatprep.subr.msk.bf16.mxu0 %vm11868_vm9, %v10119_v6 }
 0x57a   : > { %v11932_v59 = vpop.xlane.xlu1 %2406  ;;  %v11934_v46 = vpop.xlane.xlu0 %2403  ;;  %9355 = vmatprep.mubr.msk.f32.mxu0 %vm17024_vm12, %v17162_v41 }
 0x57b   : > { %v10125_v5 = vpack.c.bf16 %v11932_v59, %v11934_v46 }
 0x57d   : > { %9356 = vmatmul.mubr.msk.f32.gmra.mrb[52].mxu0 %vm17024_vm12, %v17162_v41 }
 0x57e   : > { %v11942_v45 = vpop.xlane.xlu1 %2412  ;;  %10124 = vmatpush3.bf16.xpose.msk.msra.mxu0 %vm11868_vm9, %v10119_v6  ;;  %v11946_v36 = vpop.xlane.xlu0 %2409  ;;  %9358 = vmatprep.mubr.msk.f32.mxu0 %vm17024_vm12, %v17162_v41 }
 0x57f   : > { %10127 = vmatprep.subr.msk.bf16.mxu0 %vm11868_vm9, %v10125_v5  ;;  %v10131_v61 = vpack.c.bf16 %v11942_v45, %v11946_v36 }
 0x581   : > { %9359 = vmatmul.mubr.msk.f32.gmra.mrb[54].mxu0 %vm17024_vm12, %v17162_v41 }
 0x582   : > { %v2037_v38 = vpop.permute.xlu0 %2036  ;;  %v2041_v37 = vpop.permute.xlu1 %2040  ;;  %9405 = vmatprep.mubr.msk.f32.mxu0 %vm17024_vm12, %v17162_v41 }
 0x583   : > { %v2047_v39 = vsub.f32 %v11854_v3, %v2037_v38  ;;  %v2049_v6 = vsub.f32 %v11849_v42, %v2041_v37 }
 0x585   : > { %v2139_v48 = vadd.f32 1e-05, %v2047_v39  ;;  %v2141_v58 = vadd.f32 1e-05, %v2049_v6  ;;  %v10162_v6 = vpack.c.bf16 %v11753_v24, %v11751_v31 }
 0x586   : > { %10130 = vmatpush3.bf16.xpose.msk.msra.mxu0 %vm11868_vm9, %v10125_v5 }
 0x587   : > { %10727 = vrsqrt.f32 %v2139_v48  ;;  %10133 = vmatprep.subr.msk.bf16.mxu0 %vm11868_vm9, %v10131_v61  ;;  %v2051_v48 = vmul.f32 %v11854_v3, %v11687_v29 }
 0x588   : > { %10729 = vrsqrt.f32 %v2141_v58  ;;  %v10165_v58 = vpack.c.bf16 %v11760_v26, %v11762_v62 }
 0x589   : > { %v2061_v5 = vrot.slane %v2051_v48, %v11710_v12 }
 0x58b   : > { %v2085_v3 = vsub.f32 %v11509_v63, %v2061_v5 }
 0x58e   : > { %10136 = vmatpush3.bf16.xpose.msk.msra.mxu0 %vm11868_vm9, %v10131_v61  ;;  %v10171_v61 = vpack.c.bf16 %v11777_v25, %v11779_v57  ;;  %v2084_v25 = vsub.f32 %v11513_v7, %v2061_v5  ;;  %v2121_v7 = vmul.f32 %v11726_v11, %v2085_v3 }
 0x58f   : > { %10161 = vmatprep.subr.bf16.mxu0 %v17160_v9 }
 0x591   : > { %v10728_v38 = vpop.eup %10727 }
 0x592   : > { %v10730_v37 = vpop.eup %10729  ;;  %v2153_v20 = vrot.slane %v10728_v38, %v11710_v12  ;;  %v2053_v38 = vmul.f32 %v11849_v42, %v11687_v29 }
 0x593   : > { %v2161_v39 = vrot.slane %v10730_v37, %v11710_v12  ;;  %v2079_v37 = vsub.f32 %v11482_v32, %v2061_v5 }
 0x594   : > { %2168 = vrot.lane.b32.xlu1 %v2153_v20, %s10842_s28  ;;  %v10168_v20 = vpack.c.bf16 %v11769_v15, %v11771_v50  ;;  %v12013_v48 = vrot.slane %v2053_v38, %v11710_v12 }
 0x595   : > { %2172 = vrot.lane.b32.xlu0 %v2161_v39, %s10842_s28  ;;  %9406 = vmatmul.mubr.msk.f32.vlgmr.msra.gmra.mrb[56].mxu0 %vm17024_vm12, %v17162_v41  ;;  %v2078_v39 = vsub.f32 %v11486_v35, %v2061_v5  ;;  %v2115_v29 = vmul.f32 %v11726_v11, %v2079_v37 }
 0x596   : > { %10163 = vmatpush3.bf16.msra.mxu0 %v10162_v6  ;;  %9408 = vmatprep.mubr.msk.f32.mxu0 %vm17024_vm12, %v17162_v41  ;;  %v2080_v6 = vsub.f32 %v11495_v34, %v2061_v5  ;;  %v2094_v42 = vsub.f32 %v11559_v16, %v12013_v48  ;;  %v2096_v38 = vsub.f32 %v11567_v13, %v12013_v48 }
 0x597   : > { %10164 = vmatprep.subr.bf16.mxu0 %v17160_v9  ;;  %v2114_v32 = vmul.f32 %v11726_v11, %v2078_v39  ;;  %v2097_v37 = vsub.f32 %v11563_v22, %v12013_v48 }
 0x598   : > { %v2116_v35 = vmul.f32 %v11726_v11, %v2080_v6 }
 0x599   : > { %9409 = vmatmul.mubr.msk.f32.gmra.mrb[58].mxu0 %vm17024_vm12, %v17162_v41 }
 0x59a   : > { %10166 = vmatpush3.bf16.msra.mxu0 %v10165_v58  ;;  %9411 = vmatprep.mubr.msk.f32.mxu0 %vm17024_vm12, %v17162_v41  ;;  %v2081_v58 = vsub.f32 %v11491_v53, %v2061_v5 }
 0x59b   : > { %10167 = vmatprep.subr.bf16.mxu0 %v17160_v9 }
 0x59c   : > { %v2117_v34 = vmul.f32 %v11726_v11, %v2081_v58 }
 0x59d   : > { %9412 = vmatmul.mubr.msk.f32.gmra.mrb[60].mxu0 %vm17024_vm12, %v17162_v41 }
 0x59e   : > { %10169 = vmatpush3.bf16.msra.mxu0 %v10168_v20  ;;  %9414 = vmatprep.mubr.msk.f32.mxu0 %vm17024_vm12, %v17162_v41  ;;  %v2082_v20 = vsub.f32 %v11504_v33, %v2061_v5 }
 0x59f   : > { %10170 = vmatprep.subr.bf16.mxu0 %v17160_v9 }
 0x5a0   : > { %v2118_v53 = vmul.f32 %v11726_v11, %v2082_v20 }
 0x5a1   : > { %9415 = vmatmul.mubr.msk.f32.gmra.mrb[62].mxu0 %vm17024_vm12, %v17162_v41 }
 0x5a2   : > { %10172 = vmatpush3.bf16.msra.mxu0 %v10171_v61  ;;  %9461 = vmatprep.mubr.msk.f32.mxu0 %vm17025_vm2, %v17161_v49  ;;  %v2083_v61 = vsub.f32 %v11500_v30, %v2061_v5  ;;  %v2120_v30 = vmul.f32 %v11726_v11, %v2084_v25  ;;  %v2095_v5 = vsub.f32 %v11555_v8, %v12013_v48 }
 0x5a3   : > { %10173 = vmatprep.subr.bf16.mxu0 %v17160_v9 }
 0x5a4   : > { %v2119_v33 = vmul.f32 %v11726_v11, %v2083_v61 }
 0x606   : > { %v2169_v63 = vpop.permute.xlu1 %2168 }
 0x607   : > { %v2187_v39 = vmul.f32 %v2169_v63, %v2115_v29  ;;  %v2186_v6 = vmul.f32 %v2169_v63, %v2114_v32  ;;  %v2188_v58 = vmul.f32 %v2169_v63, %v2116_v35  ;;  %v2189_v20 = vmul.f32 %v2169_v63, %v2117_v34 }
 0x608   : > { %v2190_v25 = vmul.f32 %v2169_v63, %v2118_v53  ;;  %v2191_v61 = vmul.f32 %v2169_v63, %v2119_v33  ;;  %v2192_v3 = vmul.f32 %v2169_v63, %v2120_v30  ;;  %v2193_v12 = vmul.f32 %v2169_v63, %v2121_v7 }
 0x609   : > { %v2223_v57 = vadd.f32 %v11739_v19, %v2187_v39  ;;  %v2222_v16 = vadd.f32 %v11739_v19, %v2186_v6  ;;  %v2224_v8 = vadd.f32 %v11739_v19, %v2188_v58  ;;  %v2225_v15 = vadd.f32 %v11739_v19, %v2189_v20  ;;  %v2173_v20 = vpop.permute.xlu0 %2172 }
 0x60a   : > { %v2226_v13 = vadd.f32 %v11739_v19, %v2190_v25  ;;  %v2227_v22 = vadd.f32 %v11739_v19, %v2191_v61  ;;  %v2228_v29 = vadd.f32 %v11739_v19, %v2192_v3  ;;  %v2098_v32 = vsub.f32 %v11576_v23, %v12013_v48 }
 0x60b   : > { %vm2255_vm10 = vcmp.gt.f32.partialorder %v2223_v57, 0.0  ;;  %v2287_v35 = vmul.f32 0.01, %v2223_v57  ;;  %vm2254_vm11 = vcmp.gt.f32.partialorder %v2222_v16, 0.0  ;;  %v2286_v34 = vmul.f32 0.01, %v2222_v16 }
 0x60c   : > { %vm2256_vm13 = vcmp.gt.f32.partialorder %v2224_v8, 0.0  ;;  %v2288_v53 = vmul.f32 0.01, %v2224_v8  ;;  %vm2257_vm14 = vcmp.gt.f32.partialorder %v2225_v15, 0.0  ;;  %v2289_v33 = vmul.f32 0.01, %v2225_v15 }
 0x60d   : > { %v12040_v30 = vsel %vm2255_vm10, %v2223_v57, %v2287_v35  ;;  %v12042_v7 = vsel %vm2254_vm11, %v2222_v16, %v2286_v34  ;;  %v2290_v63 = vmul.f32 0.01, %v2226_v13  ;;  %v2229_v39 = vadd.f32 %v11739_v19, %v2193_v12 }
 0x60e   : > { %v2369_v6 = vsel %vm17023_vm3, %v12040_v30, -inf  ;;  %v2366_v23 = vsel %vm17023_vm3, %v12042_v7, -inf  ;;  %v12049_v58 = vsel %vm2256_vm13, %v2224_v8, %v2288_v53  ;;  %vm2258_vm15 = vcmp.gt.f32.partialorder %v2226_v13, 0.0 }
 0x60f   : > { %2370 = vmax.xlane.f32.xlu0 %v2369_v6  ;;  %2367 = vmax.xlane.f32.xlu1 %v2366_v23  ;;  %v12051_v25 = vsel %vm2257_vm14, %v2225_v15, %v2289_v33  ;;  %vm2259_vm4 = vcmp.gt.f32.partialorder %v2227_v22, 0.0  ;;  %v2130_v57 = vmul.f32 %v11726_v11, %v2094_v42  ;;  %v2099_v12 = vsub.f32 %v11572_v47, %v12013_v48 }
 0x610   : > { %v2372_v61 = vsel %vm17023_vm3, %v12049_v58, -inf  ;;  %v2291_v3 = vmul.f32 0.01, %v2227_v22  ;;  %v2131_v16 = vmul.f32 %v11726_v11, %v2095_v5  ;;  %v2132_v8 = vmul.f32 %v11726_v11, %v2096_v38 }
 0x611   : > { %v2375_v35 = vsel %vm17023_vm3, %v12051_v25, -inf  ;;  %v12062_v34 = vsel %vm2258_vm15, %v2226_v13, %v2290_v63  ;;  %v2292_v15 = vmul.f32 0.01, %v2228_v29  ;;  %v2293_v53 = vmul.f32 0.01, %v2229_v39 }
 0x612   : > { %v12064_v33 = vsel %vm2259_vm4, %v2227_v22, %v2291_v3  ;;  %v2202_v42 = vmul.f32 %v2173_v20, %v2130_v57  ;;  %v2203_v6 = vmul.f32 %v2173_v20, %v2131_v16  ;;  %v2204_v47 = vmul.f32 %v2173_v20, %v2132_v8 }
 0x613   : > { %2373 = vmax.xlane.f32.xlu0 %v2372_v61  ;;  %2376 = vmax.xlane.f32.xlu1 %v2375_v35  ;;  %vm2260_vm5 = vcmp.gt.f32.partialorder %v2228_v29, 0.0  ;;  %vm2261_vm6 = vcmp.gt.f32.partialorder %v2229_v39, 0.0  ;;  %v2133_v5 = vmul.f32 %v11726_v11, %v2097_v37  ;;  %v2100_v38 = vsub.f32 %v11585_v17, %v12013_v48 }
 0x614   : > { %v2238_v23 = vadd.f32 %v11739_v19, %v2202_v42  ;;  %v2134_v13 = vmul.f32 %v11726_v11, %v2098_v32  ;;  %v2135_v63 = vmul.f32 %v11726_v11, %v2099_v12  ;;  %v2101_v22 = vsub.f32 %v11581_v10, %v12013_v48 }
 0x615   : > { %v2378_v57 = vsel %vm17023_vm3, %v12062_v34, -inf  ;;  %v2381_v61 = vsel %vm17023_vm3, %v12064_v33, -inf  ;;  %v2239_v37 = vadd.f32 %v11739_v19, %v2203_v6  ;;  %v2205_v3 = vmul.f32 %v2173_v20, %v2133_v5 }
 0x616   : > { %v12079_v16 = vsel %vm2260_vm5, %v2228_v29, %v2292_v15  ;;  %v12081_v17 = vsel %vm2261_vm6, %v2229_v39, %v2293_v53  ;;  %v2302_v8 = vmul.f32 0.01, %v2238_v23  ;;  %v2240_v32 = vadd.f32 %v11739_v19, %v2204_v47 }
 0x617   : > { %2379 = vmax.xlane.f32.xlu0 %v2378_v57  ;;  %2382 = vmax.xlane.f32.xlu1 %v2381_v61  ;;  %vm2270_vm7 = vcmp.gt.f32.partialorder %v2238_v23, 0.0  ;;  %v2303_v10 = vmul.f32 0.01, %v2239_v37  ;;  %v2206_v48 = vmul.f32 %v2173_v20, %v2134_v13  ;;  %v2207_v12 = vmul.f32 %v2173_v20, %v2135_v63 }
 0x618   : > { %vm2271_vm8 = vcmp.gt.f32.partialorder %v2239_v37, 0.0  ;;  %v2241_v35 = vadd.f32 %v11739_v19, %v2205_v3  ;;  %v2136_v42 = vmul.f32 %v11726_v11, %v2100_v38  ;;  %v2384_v29 = vsel %vm17023_vm3, %v12079_v16, -inf }
 0x619   : > { %v2387_v39 = vsel %vm17023_vm3, %v12081_v17, -inf  ;;  %v2137_v15 = vmul.f32 %v11726_v11, %v2101_v22  ;;  %v12091_v53 = vsel %vm2270_vm7, %v2238_v23, %v2302_v8  ;;  %vm2272_vm10 = vcmp.gt.f32.partialorder %v2240_v32, 0.0 }
 0x61a   : > { %v2304_v6 = vmul.f32 0.01, %v2240_v32  ;;  %v2208_v47 = vmul.f32 %v2173_v20, %v2136_v42  ;;  %v12093_v5 = vsel %vm2271_vm8, %v2239_v37, %v2303_v10  ;;  %v2305_v13 = vmul.f32 0.01, %v2241_v35 }
 0x61b   : > { %2385 = vmax.xlane.f32.xlu0 %v2384_v29  ;;  %2388 = vmax.xlane.f32.xlu1 %v2387_v39  ;;  %v2242_v38 = vadd.f32 %v11739_v19, %v2206_v48  ;;  %v2243_v63 = vadd.f32 %v11739_v19, %v2207_v12  ;;  %vm2273_vm11 = vcmp.gt.f32.partialorder %v2241_v35, 0.0  ;;  %v2209_v57 = vmul.f32 %v2173_v20, %v2137_v15 }
 0x61c   : > { %v2414_v61 = vsel %vm17023_vm3, %v12091_v53, -inf  ;;  %v2417_v11 = vsel %vm17023_vm3, %v12093_v5, -inf  ;;  %v12101_v23 = vsel %vm2272_vm10, %v2240_v32, %v2304_v6  ;;  %v2244_v22 = vadd.f32 %v11739_v19, %v2208_v47 }
 0x61d   : > { %v12104_v37 = vsel %vm2273_vm11, %v2241_v35, %v2305_v13  ;;  %v2306_v3 = vmul.f32 0.01, %v2242_v38  ;;  %v2307_v8 = vmul.f32 0.01, %v2243_v63  ;;  %v2245_v10 = vadd.f32 %v11739_v19, %v2209_v57 }
 0x61e   : > { %vm2274_vm13 = vcmp.gt.f32.partialorder %v2242_v38, 0.0  ;;  %vm2275_vm14 = vcmp.gt.f32.partialorder %v2243_v63, 0.0  ;;  %v2420_v20 = vsel %vm17023_vm3, %v12101_v23, -inf  ;;  %v2423_v48 = vsel %vm17023_vm3, %v12104_v37, -inf }
 0x61f   : > { %2415 = vmax.xlane.f32.xlu0 %v2414_v61  ;;  %2418 = vmax.xlane.f32.xlu1 %v2417_v11  ;;  %v12111_v32 = vsel %vm2274_vm13, %v2242_v38, %v2306_v3  ;;  %v12113_v12 = vsel %vm2275_vm14, %v2243_v63, %v2307_v8  ;;  %v2308_v35 = vmul.f32 0.01, %v2244_v22  ;;  %v2309_v42 = vmul.f32 0.01, %v2245_v10 }
 0x620   : > { %vm2276_vm15 = vcmp.gt.f32.partialorder %v2244_v22, 0.0  ;;  %vm2277_vm4 = vcmp.gt.f32.partialorder %v2245_v10, 0.0  ;;  %v2426_v19 = vsel %vm17023_vm3, %v12111_v32, -inf  ;;  %v2429_v29 = vsel %vm17023_vm3, %v12113_v12, -inf }
 0x621   : > { %v12119_v39 = vsel %vm2276_vm15, %v2244_v22, %v2308_v35  ;;  %v12121_v15 = vsel %vm2277_vm4, %v2245_v10, %v2309_v42  ;;  %v2959_v13 = vadd.s32 8, %v11707_v18  ;;  %v17175_v38 = vlaneseq }
 0x622   : > { %v2432_v6 = vsel %vm17023_vm3, %v12119_v39, -inf  ;;  %v2435_v47 = vsel %vm17023_vm3, %v12121_v15, -inf  ;;  %v17177_v57 = vmov 0  ;;  %v2961_v61 = vadd.s32 24, %v11707_v18 }
 0x623   : > { %2421 = vmax.xlane.f32.xlu0 %v2420_v20  ;;  %2424 = vmax.xlane.f32.xlu1 %v2423_v48  ;;  %v12129_v63 = vand.u32 127, %v17175_v38  ;;  %v2960_v22 = vadd.s32 16, %v11707_v18  ;;  %v17179_v8 = vmov 0  ;;  %v17181_v10 = vmov 0 }
 0x624   : > { %v17183_v35 = vmov 0 }
 0x625   : > { %17176 = vst [vmem:[#allocation79_spill] sm:$0xff] %v12129_v63  ;;  %vm12132_vm5 = vcmp.lt.s32.totalorder %v2959_v13, %v12129_v63  ;;  %vm12142_vm8 = vcmp.lt.s32.totalorder %v11707_v18, %v12129_v63  ;;  %vm12151_vm15 = vcmp.lt.s32.totalorder %v2961_v61, %v12129_v63  ;;  %v2964_v61 = vadd.s32 48, %v11707_v18 }
 0x626   : > { %v17178_v57 = vsel %vm12132_vm5, 4294967295, %v17177_v57  ;;  %v17180_v8 = vsel %vm12142_vm8, 4294967295, %v17179_v8  ;;  %v17182_v10 = vsel %vm12151_vm15, 4294967295, %v17181_v10 }
 0x627   : > { %2427 = vmax.xlane.f32.xlu0 %v2426_v19  ;;  %2430 = vmax.xlane.f32.xlu1 %v2429_v29  ;;  %v2962_v19 = vadd.s32 32, %v11707_v18 }
 0x62b   : > { %2433 = vmax.xlane.f32.xlu0 %v2432_v6  ;;  %2436 = vmax.xlane.f32.xlu1 %v2435_v47  ;;  %v17185_v47 = vmov 0 }
 0x648   : > { %v9351_v11 = vpop.f32.mrb[48].mxu0 }
 0x649   : > { %vm2969_vm6 = vcmp.gt.f32.partialorder %v11864_v54, %v9351_v11  ;;  %vm3001_vm7 = vcmp.eq.f32.partialorder %v11864_v54, %v9351_v11  ;;  %v2531_v3 = vpop.f32.mrb[49].mxu0  ;;  %v2963_v54 = vadd.s32 40, %v11707_v18  ;;  %v17188_v11 = vmov 0 }
 0x64a   : > { %vm3041_vm10 = vmand %vm3001_vm7, %vm12132_vm5  ;;  %vm2968_vm11 = vcmp.gt.f32.partialorder %v11862_v27, %v2531_v3  ;;  %vm3000_vm13 = vcmp.eq.f32.partialorder %v11862_v27, %v2531_v3  ;;  %vm12160_vm7 = vcmp.lt.s32.totalorder %v2960_v22, %v12129_v63 }
 0x64b   : > { %vm3073_vm14 = vmor %vm2969_vm6, %vm3041_vm10  ;;  %v17184_v35 = vsel %vm12160_vm7, 4294967295, %v17183_v35 }
 0x64c   : > { %v3105_v20 = vsel %vm3073_vm14, 1.0, %v17161_v49  ;;  %vm3040_vm4 = vmand %vm3000_vm13, %vm12142_vm8  ;;  %v9354_v48 = vpop.f32.mrb[50].mxu0 }
 0x64d   : > { %v3137_v27 = vsel %vm17037_vm0, %v3105_v20, 0.0  ;;  %vm3072_vm6 = vmor %vm2968_vm11, %vm3040_vm4  ;;  %vm2971_vm10 = vcmp.gt.f32.partialorder %v11876_v2, %v9354_v48  ;;  %vm3003_vm1 = vcmp.eq.f32.partialorder %v11876_v2, %v9354_v48  ;;  %v2541_v42 = vpop.f32.mrb[51].mxu0  ;;  %vm12175_vm11 = vcmp.lt.s32.totalorder %v2963_v54, %v12129_v63 }
 0x64e   : > { %v3104_v29 = vsel %vm3072_vm6, 1.0, %v17161_v49  ;;  %vm3043_vm13 = vmand %vm3003_vm1, %vm12151_vm15  ;;  %vm2970_vm14 = vcmp.gt.f32.partialorder %v11880_v40, %v2541_v42  ;;  %vm3002_vm3 = vcmp.eq.f32.partialorder %v11880_v40, %v2541_v42  ;;  %v17186_v47 = vsel %vm12175_vm11, 4294967295, %v17185_v47 }
 0x64f   : > { %v3136_v6 = vsel %vm17037_vm0, %v3104_v29, 0.0  ;;  %vm3075_vm12 = vmor %vm2971_vm10, %vm3043_vm13  ;;  %17187 = vst [vmem:[#allocation80_spill] sm:$0xff] %v17186_v47  ;;  %v2965_v2 = vadd.s32 56, %v11707_v18  ;;  %vm12186_vm10 = vcmp.lt.s32.totalorder %v2962_v19, %v12129_v63 }
 0x650   : > { %v3138_v13 = vadd.f32 %v3137_v27, %v3136_v6  ;;  %vm3042_vm4 = vmand %vm3002_vm3, %vm12160_vm7  ;;  %v9357_v38 = vpop.f32.mrb[52].mxu0  ;;  %v17189_v11 = vsel %vm12186_vm10, 4294967295, %v17188_v11  ;;  %v3107_v22 = vsel %vm3075_vm12, 1.0, %v17161_v49  ;;  %v17194_v27 = vmov 0 }
 0x651   : > { %vm3074_vm1 = vmor %vm2970_vm14, %vm3042_vm4  ;;  %vm2973_vm6 = vcmp.gt.f32.partialorder %v11886_v28, %v9357_v38  ;;  %vm3005_vm2 = vcmp.eq.f32.partialorder %v11886_v28, %v9357_v38  ;;  %v2551_v40 = vpop.f32.mrb[53].mxu0  ;;  %17190 = vst [vmem:[#allocation81_spill] sm:$0xff] %v17189_v11  ;;  %vm12198_vm9 = vcmp.lt.s32.totalorder %v2965_v2, %v12129_v63  ;;  %v17191_v28 = vmov 0 }
 0x652   : > { %v3106_v3 = vsel %vm3074_vm1, 1.0, %v17161_v49  ;;  %vm3045_vm3 = vmand %vm3005_vm2, %vm12175_vm11  ;;  %vm2972_vm13 = vcmp.gt.f32.partialorder %v11888_v60, %v2551_v40  ;;  %vm3004_vm14 = vcmp.eq.f32.partialorder %v11888_v60, %v2551_v40  ;;  %v17192_v28 = vsel %vm12198_vm9, 4294967295, %v17191_v28 }
 0x653   : > { %v3139_v54 = vsel %vm17037_vm0, %v3106_v3, 0.0  ;;  %vm3077_vm4 = vmor %vm2973_vm6, %vm3045_vm3  ;;  %17193 = vst [vmem:[#allocation82_spill] sm:$0xff] %v17192_v28  ;;  %vm12205_vm1 = vcmp.lt.s32.totalorder %v2964_v61, %v12129_v63  ;;  %v3141_v60 = vsel %vm17037_vm0, %v3107_v22, 0.0  ;;  %v17226_v63 = vld [vmem:[#allocation76_spill] sm:$0xff] }
 0x654   : > { %v3140_v20 = vadd.f32 %v3139_v54, %v3138_v13  ;;  %vm3044_vm12 = vmand %vm3004_vm14, %vm12186_vm10  ;;  %v9360_v48 = vpop.f32.mrb[54].mxu0  ;;  %v17195_v27 = vsel %vm12205_vm1, 4294967295, %v17194_v27  ;;  %v3109_v42 = vsel %vm3077_vm4, 1.0, %v17161_v49 }
 0x655   : > { %17196 = vst [vmem:[#allocation83_spill] sm:$0xff] %v17195_v27  ;;  %vm3076_vm2 = vmor %vm2972_vm13, %vm3044_vm12  ;;  %vm2975_vm6 = vcmp.gt.f32.partialorder %v11896_v51, %v9360_v48  ;;  %vm3007_vm3 = vcmp.eq.f32.partialorder %v11896_v51, %v9360_v48  ;;  %v2561_v19 = vpop.f32.mrb[55].mxu0  ;;  %v3145_v51 = vsel %vm17037_vm0, %v3109_v42, 0.0 }
 0x656   : > { %v3108_v29 = vsel %vm3076_vm2, 1.0, %v17161_v49  ;;  %v3142_v6 = vadd.f32 %v3141_v60, %v3140_v20  ;;  %vm3047_vm14 = vmand %vm3007_vm3, %vm12198_vm9  ;;  %vm2974_vm10 = vcmp.gt.f32.partialorder %v11898_v4, %v2561_v19  ;;  %vm3006_vm11 = vcmp.eq.f32.partialorder %v11898_v4, %v2561_v19 }
 0x657   : > { %v3143_v2 = vsel %vm17037_vm0, %v3108_v29, 0.0  ;;  %vm3079_vm7 = vmor %vm2975_vm6, %vm3047_vm14 }
 0x658   : > { %v3144_v13 = vadd.f32 %v3143_v2, %v3142_v6  ;;  %vm3046_vm13 = vmand %vm3006_vm11, %vm12205_vm1  ;;  %v3111_v38 = vsel %vm3079_vm7, 1.0, %v17161_v49 }
 0x659   : > { %vm3078_vm4 = vmor %vm2974_vm10, %vm3046_vm13  ;;  %v3149_v4 = vsel %vm17037_vm0, %v3111_v38, 0.0 }
 0x65a   : > { %v3110_v61 = vsel %vm3078_vm4, 1.0, %v17161_v49  ;;  %v3146_v40 = vadd.f32 %v3145_v51, %v3144_v13 }
 0x65b   : > { %v3147_v22 = vsel %vm17037_vm0, %v3110_v61, 0.0 }
 0x65c   : > { %v3148_v3 = vadd.f32 %v3147_v22, %v3146_v40 }
 0x65e   : > { %v3150_v54 = vadd.f32 %v3149_v4, %v3148_v3 }
 0x660   : > { %v3151_v20 = vrot.slane %v3150_v54, 4 }
 0x662   : > { %v3152_v48 = vadd.f32 %v3151_v20, %v3150_v54 }
 0x664   : > { %v3153_v60 = vrot.slane %v3152_v48, 2 }
 0x666   : > { %v3154_v19 = vadd.f32 %v3153_v60, %v3152_v48 }
 0x668   : > { %v3155_v29 = vrot.slane %v3154_v19, 1  ;;  %v9407_v6 = vpop.f32.mrb[56].mxu0 }
 0x669   : > { %vm2985_vm11 = vcmp.gt.f32.partialorder %v11908_v21, %v9407_v6  ;;  %vm3017_vm10 = vcmp.eq.f32.partialorder %v11908_v21, %v9407_v6  ;;  %v2789_v42 = vpop.f32.mrb[57].mxu0 }
 0x66a   : > { %vm3057_vm7 = vmand %vm3017_vm10, %vm12132_vm5  ;;  %vm2984_vm12 = vcmp.gt.f32.partialorder %v11910_v43, %v2789_v42  ;;  %vm3016_vm2 = vcmp.eq.f32.partialorder %v11910_v43, %v2789_v42  ;;  %v3156_v2 = vadd.f32 %v3155_v29, %v3154_v19 }
 0x66b   : > { %vm3089_vm6 = vmor %vm2985_vm11, %vm3057_vm7 }
 0x66c   : > { %v3121_v13 = vsel %vm3089_vm6, 1.0, %v17161_v49  ;;  %vm3056_vm3 = vmand %vm3016_vm2, %vm12142_vm8  ;;  %v9410_v51 = vpop.f32.mrb[58].mxu0  ;;  %v10473_v38 = vtrunc.f32 %v3156_v2  ;;  %vm17201_vm8 = vmmov 0  }
 0x66d   : > { %v3179_v61 = vsel %vm17037_vm0, %v3121_v13, 0.0  ;;  %vm3088_vm14 = vmor %vm2984_vm12, %vm3056_vm3  ;;  %vm2987_vm13 = vcmp.gt.f32.partialorder %v11918_v56, %v9410_v51  ;;  %vm3019_vm4 = vcmp.eq.f32.partialorder %v11918_v56, %v9410_v51  ;;  %v2799_v21 = vpop.f32.mrb[59].mxu0  ;;  %vm17197_vm12 = vnez %v17184_v35 }
 0x66e   : > { %v3120_v40 = vsel %vm3088_vm14, 1.0, %v17161_v49  ;;  %vm3059_vm11 = vmand %vm3019_vm4, %vm12151_vm15  ;;  %vm2986_vm10 = vcmp.gt.f32.partialorder %v11922_v55, %v2799_v21  ;;  %vm3018_vm7 = vcmp.eq.f32.partialorder %v11922_v55, %v2799_v21  ;;  %v10474_v43 = vcvt.f32.s32 %v10473_v38 }
 0x66f   : > { %v3178_v22 = vsel %vm17037_vm0, %v3120_v40, 0.0  ;;  %vm3091_vm2 = vmor %vm2987_vm13, %vm3059_vm11  ;;  %v10174_v56 = vpack.c.bf16 %v12040_v30, %v12042_v7  ;;  %vm17198_vm13 = vnez %v17186_v47 }
 0x670   : > { %v3180_v3 = vadd.f32 %v3179_v61, %v3178_v22  ;;  %vm3058_vm6 = vmand %vm3018_vm7, %vm17197_vm12  ;;  %v9413_v4 = vpop.f32.mrb[60].mxu0  ;;  %vm3224_vm3 = vcmp.eq.s32.totalorder %v10474_v43, %v11707_v18  ;;  %v3123_v20 = vsel %vm3091_vm2, 1.0, %v17161_v49  ;;  %vm17199_vm12 = vcmask 523264  }
 0x671   : > { %vm3090_vm14 = vmor %vm2986_vm10, %vm3058_vm6  ;;  %vm2989_vm4 = vcmp.gt.f32.partialorder %v11932_v59, %v9413_v4  ;;  %vm3021_vm15 = vcmp.eq.f32.partialorder %v11932_v59, %v9413_v4  ;;  %v2809_v55 = vpop.f32.mrb[61].mxu0  ;;  %v3228_v54 = vsel %vm3224_vm3, 1.0, %v17161_v49  ;;  %v10177_v59 = vpack.c.bf16 %v12051_v25, %v12049_v58 }
 0x672   : > { %v3122_v48 = vsel %vm3090_vm14, 1.0, %v17161_v49  ;;  %vm3061_vm11 = vmand %vm3021_vm15, %vm17198_vm13  ;;  %vm2988_vm7 = vcmp.gt.f32.partialorder %v11934_v46, %v2809_v55  ;;  %vm3020_vm0 = vcmp.eq.f32.partialorder %v11934_v46, %v2809_v55  ;;  %9462 = vmatmul.mubr.msk.f32.vlgmr.msra.gmra.mrb[64].mxu0 %vm17199_vm12, %v3228_v54  ;;  %vm17202_vm2 = vnez %v17189_v11 }
 0x673   : > { %vm17200_vm10 = vmmov %vm17199_vm12  ;;  %10175 = vmatpush3.bf16.msra.mxu0 %v10174_v56  ;;  %9480 = vmatprep.mubr.msk.f32.mxu0 %vm17201_vm8, %v17161_v49 }
 0x674   : > { %v3181_v60 = vsel %vm17200_vm10, %v3122_v48, 0.0  ;;  %vm3093_vm6 = vmor %vm2989_vm4, %vm3061_vm11  ;;  %v9416_v29 = vpop.f32.mrb[62].mxu0  ;;  %10176 = vmatprep.subr.bf16.mxu0 %v17160_v9 }
 0x675   : > { %v3182_v19 = vadd.f32 %v3181_v60, %v3180_v3  ;;  %vm3060_vm15 = vmand %vm3020_vm0, %vm17202_vm2  ;;  %v3125_v6 = vsel %vm3093_vm6, 1.0, %v17161_v49  ;;  %vm2991_vm14 = vcmp.gt.f32.partialorder %v11942_v45, %v9416_v29  ;;  %vm3023_vm4 = vcmp.eq.f32.partialorder %v11942_v45, %v9416_v29  ;;  %v2819_v42 = vpop.f32.mrb[63].mxu0 }
 0x676   : > { %vm17203_vm3 = vmmov %vm17200_vm10  ;;  %vm2990_vm0 = vcmp.gt.f32.partialorder %v11946_v36, %v2819_v42  ;;  %vm3022_vm10 = vcmp.eq.f32.partialorder %v11946_v36, %v2819_v42  ;;  %v10180_v45 = vpack.c.bf16 %v12064_v33, %v12062_v34  ;;  %v10183_v3 = vpack.c.bf16 %v12081_v17, %v12079_v16 }
 0x677   : > { %v3183_v46 = vsel %vm17203_vm3, %v3123_v20, 0.0  ;;  %vm3092_vm12 = vmor %vm2988_vm7, %vm3060_vm15  ;;  %10178 = vmatpush3.bf16.msra.mxu0 %v10177_v59 }
 0x678   : > { %v3124_v2 = vsel %vm3092_vm12, 1.0, %v17161_v49  ;;  %v3184_v13 = vadd.f32 %v3183_v46, %v3182_v19  ;;  %vm3063_vm11 = vmand %vm3023_vm4, %vm12198_vm9  ;;  %10179 = vmatprep.subr.bf16.mxu0 %v17160_v9  ;;  %vm17208_vm4 = vcmask 7168  }
 0x679   : > { %vm17204_vm2 = vmmov %vm17203_vm3 }
 0x67a   : > { %v3185_v51 = vsel %vm17204_vm2, %v3124_v2, 0.0  ;;  %vm3095_vm3 = vmor %vm2991_vm14, %vm3063_vm11  ;;  %vm17207_vm14 = vnez %v17173_v1 }
 0x67b   : > { %v3186_v38 = vadd.f32 %v3185_v51, %v3184_v13  ;;  %vm3062_vm7 = vmand %vm3022_vm10, %vm12205_vm1  ;;  %v3127_v21 = vsel %vm3095_vm3, 1.0, %v17161_v49  ;;  %10181 = vmatpush3.bf16.msra.mxu0 %v10180_v45 }
 0x67c   : > { %vm17205_vm6 = vmmov %vm17204_vm2  ;;  %10182 = vmatprep.subr.bf16.mxu0 %v17160_v9 }
 0x67d   : > { %v3187_v61 = vsel %vm17205_vm6, %v3125_v6, 0.0  ;;  %vm3094_vm15 = vmor %vm2990_vm0, %vm3062_vm7 }
 0x67e   : > { %v3126_v36 = vsel %vm3094_vm15, 1.0, %v17161_v49  ;;  %v3188_v40 = vadd.f32 %v3187_v61, %v3186_v38  ;;  %vm17206_vm12 = vmmov %vm17204_vm2 }
 0x67f   : > { %v3189_v43 = vsel %vm17204_vm2, %v3126_v36, 0.0  ;;  %v3191_v4 = vsel %vm17206_vm12, %v3127_v21, 0.0  ;;  %10184 = vmatpush3.bf16.msra.mxu0 %v10183_v3  ;;  %vm17209_vm11 = vmmov %vm17208_vm4 }
 0x680   : > { %v3190_v22 = vadd.f32 %v3189_v43, %v3188_v40  ;;  %10197 = vmatprep.subr.bf16.mxu0 %v17160_v9  ;;  %vm17210_vm0 = vmmov %vm17208_vm4 }
 0x681   : > { %vm17211_vm10 = vmmov %vm17210_vm0 }
 0x682   : > { %v3192_v56 = vadd.f32 %v3191_v4, %v3190_v22  ;;  %vm17212_vm3 = vmmov %vm17210_vm0 }
 0x683   : > { %vm17213_vm7 = vmmov %vm17210_vm0 }
 0x684   : > { %v3193_v22 = vrot.slane %v3192_v56, 4  ;;  %vm17214_vm6 = vmmov %vm17210_vm0 }
 0x685   : > { %vm17217_vm15 = vmmov %vm17210_vm0 }
 0x686   : > { %vm17218_vm2 = vmmov %vm17210_vm0 }
 0x687   : > { %vm17219_vm12 = vmmov %vm17210_vm0 }
 0x69c   : > { %v12291_v55 = vpop.xlane.xlu0 %2370  ;;  %v12293_v54 = vpop.xlane.xlu1 %2367 }
 0x69d   : > { %v10089_v20 = vpack.c.bf16 %v12291_v55, %v12293_v54 }
 0x69f   : > { %10091 = vmatprep.subr.msk.bf16.mxu1 %vm17207_vm14, %v10089_v20 }
 0x6a0   : > { %v12299_v48 = vpop.xlane.xlu0 %2373  ;;  %10094 = vmatpush3.bf16.xpose.msk.msra.mxu1 %vm17207_vm14, %v10089_v20  ;;  %v12303_v60 = vpop.xlane.xlu1 %2376  ;;  %v3194_v20 = vadd.f32 %v3193_v22, %v3192_v56  ;;  %v10186_v56 = vpack.c.bf16 %v11814_v14, %v11816_v0 }
 0x6a1   : > { %v10095_v59 = vpack.c.bf16 %v12303_v60, %v12299_v48 }
 0x6a3   : > { %10097 = vmatprep.subr.msk.bf16.mxu1 %vm17207_vm14, %v10095_v59 }
 0x6a4   : > { %v12309_v19 = vpop.xlane.xlu0 %2379  ;;  %v12311_v29 = vpop.xlane.xlu1 %2382 }
 0x6a5   : > { %v10101_v46 = vpack.c.bf16 %v12311_v29, %v12309_v19 }
 0x6a8   : > { %10100 = vmatpush3.bf16.xpose.msk.msra.mxu1 %vm17207_vm14, %v10095_v59  ;;  %v12319_v6 = vpop.xlane.xlu0 %2385  ;;  %v12321_v42 = vpop.xlane.xlu1 %2388 }
 0x6a9   : > { %10103 = vmatprep.subr.msk.bf16.mxu1 %vm17207_vm14, %v10101_v46  ;;  %v10107_v2 = vpack.c.bf16 %v12321_v42, %v12319_v6 }
 0x6ac   : > { %v12329_v13 = vpop.xlane.xlu0 %2415  ;;  %v12331_v51 = vpop.xlane.xlu1 %2418 }
 0x6ad   : > { %v10137_v38 = vpack.c.bf16 %v12331_v51, %v12329_v13 }
 0x6b0   : > { %10106 = vmatpush3.bf16.xpose.msk.msra.mxu1 %vm17207_vm14, %v10101_v46  ;;  %v12339_v45 = vpop.xlane.xlu0 %2421  ;;  %v12341_v61 = vpop.xlane.xlu1 %2424  ;;  %v3195_v46 = vrot.slane %v3194_v20, 2 }
 0x6b1   : > { %10109 = vmatprep.subr.msk.bf16.mxu1 %vm17207_vm14, %v10107_v2  ;;  %v10143_v21 = vpack.c.bf16 %v12341_v61, %v12339_v45 }
 0x6b4   : > { %v12355_v36 = vpop.xlane.xlu0 %2427  ;;  %v12357_v40 = vpop.xlane.xlu1 %2430 }
 0x6b5   : > { %v10149_v43 = vpack.c.bf16 %v12357_v40, %v12355_v36 }
 0x6b8   : > { %10112 = vmatpush3.bf16.xpose.msk.msra.mxu1 %vm17207_vm14, %v10107_v2  ;;  %v12373_v3 = vpop.xlane.xlu0 %2433  ;;  %v12375_v4 = vpop.xlane.xlu1 %2436  ;;  %v3196_v2 = vadd.f32 %v3195_v46, %v3194_v20  ;;  %v17222_v20 = vld [vmem:[#allocation75_spill] sm:$0xff] }
 0x6b9   : > { %10139 = vmatprep.subr.msk.bf16.mxu1 %vm17207_vm14, %v10137_v38  ;;  %17215 = vst [vmem:[#allocation84_spill] sm:$0xff] %v12373_v3  ;;  %17216 = vst [vmem:[#allocation85_spill] sm:$0xff] %v12375_v4  ;;  %v10155_v59 = vpack.c.bf16 %v12375_v4, %v12373_v3  ;;  %v4531_v3 = vld [vmem:[%s16934_s3 + $0x10] sm:$0xff]  ;;  %v4532_v4 = vld [vmem:[%s16934_s3 + $0x18] sm:$0xff] }
 0x6bf   : > { %9378 = vmatmul.mubr.msk.f32.vlgmr.msra.gmra.mrb[24].mxu1 %vm17208_vm4, %v17162_v41  ;;  %vm17220_vm4 = vmmov %vm17210_vm0 }
 0x6c0   : > { %10142 = vmatpush3.bf16.xpose.msk.msra.mxu1 %vm17207_vm14, %v10137_v38  ;;  %9380 = vmatprep.mubr.msk.f32.mxu1 %vm17209_vm11, %v17162_v41  ;;  %v3197_v38 = vrot.slane %v3196_v2, 1  ;;  %vm17221_vm11 = vmmov %vm17210_vm0 }
 0x6c1   : > { %10145 = vmatprep.subr.msk.bf16.mxu1 %vm17207_vm14, %v10143_v21 }
 0x6c3   : > { %9381 = vmatmul.mubr.msk.f32.gmra.mrb[26].mxu1 %vm17210_vm0, %v17162_v41 }
 0x6c4   : > { %9383 = vmatprep.mubr.msk.f32.mxu1 %vm17211_vm10, %v17162_v41  ;;  %vm17224_vm10 = vmmov %vm17210_vm0 }
 0x6c7   : > { %9384 = vmatmul.mubr.msk.f32.gmra.mrb[28].mxu1 %vm17212_vm3, %v17162_v41  ;;  %vm17227_vm3 = vmmov %vm17210_vm0 }
 0x6c8   : > { %10148 = vmatpush3.bf16.xpose.msk.msra.mxu1 %vm17207_vm14, %v10143_v21  ;;  %9386 = vmatprep.mubr.msk.f32.mxu1 %vm17213_vm7, %v17162_v41  ;;  %v3198_v21 = vadd.f32 %v3197_v38, %v3196_v2  ;;  %v4529_v2 = vld [vmem:[%s16934_s3] sm:$0xff]  ;;  %v4530_v38 = vld [vmem:[%s16934_s3 + $0x8] sm:$0xff] }
 0x6c9   : > { %10151 = vmatprep.subr.msk.bf16.mxu1 %vm17207_vm14, %v10149_v43 }
 0x6ca   : > { %v10477_v22 = vtrunc.f32 %v3198_v21  ;;  %v10209_v21 = vpack.c.bf16 %v4530_v38, %v4529_v2 }
 0x6cb   : > { %9387 = vmatmul.mubr.msk.f32.gmra.mrb[30].mxu1 %vm17214_vm6, %v17162_v41  ;;  %vm17228_vm6 = vcmask 523264  }
 0x6cc   : > { %9433 = vmatprep.mubr.msk.f32.mxu1 %vm17217_vm15, %v17162_v41  ;;  %vm17229_vm15 = vcmask 261120  }
 0x6d0   : > { %10154 = vmatpush3.bf16.xpose.msk.msra.mxu1 %vm17207_vm14, %v10149_v43  ;;  %v10189_v43 = vpack.c.bf16 %v11823_v52, %v11825_v44 }
 0x6d1   : > { %10157 = vmatprep.subr.msk.bf16.mxu1 %vm17207_vm14, %v10155_v59 }
 0x6d8   : > { %10160 = vmatpush3.bf16.xpose.msk.msra.mxu1 %vm17207_vm14, %v10155_v59  ;;  %v17223_v59 = vld [vmem:[#allocation74_spill] sm:$0xff] }
 0x6d9   : > { %10185 = vmatprep.subr.bf16.mxu1 %v17160_v9  ;;  %v10192_v46 = vpack.c.bf16 %v17223_v59, %v17222_v20 }
 0x6df   : > { %9434 = vmatmul.mubr.msk.f32.vlgmr.msra.gmra.mrb[32].mxu1 %vm17218_vm2, %v17162_v41  ;;  %vm17230_vm2 = vmmov %vm17229_vm15 }
 0x6e0   : > { %10187 = vmatpush3.bf16.msra.mxu1 %v10186_v56  ;;  %9436 = vmatprep.mubr.msk.f32.mxu1 %vm17219_vm12, %v17162_v41  ;;  %v10478_v56 = vcvt.f32.s32 %v10477_v22  ;;  %v10213_v22 = vpack.c.bf16 %v4532_v4, %v4531_v3  ;;  %vm17231_vm12 = vmmov %vm17230_vm2  ;;  %v17236_v3 = vld [vmem:[#allocation73_spill] sm:$0xff] }
 0x6e1   : > { %10188 = vmatprep.subr.bf16.mxu1 %v17160_v9 }
 0x6e2   : > { %vm3226_vm7 = vcmp.eq.s32.totalorder %v10478_v56, %v11707_v18 }
 0x6e3   : > { %9437 = vmatmul.mubr.msk.f32.gmra.mrb[34].mxu1 %vm17220_vm4, %v17162_v41  ;;  %vm17232_vm4 = vmmov %vm17230_vm2 }
 0x6e4   : > { %10190 = vmatpush3.bf16.msra.mxu1 %v10189_v43  ;;  %9439 = vmatprep.mubr.msk.f32.mxu1 %vm17221_vm11, %v17162_v41  ;;  %v17225_v43 = vld [vmem:[#allocation77_spill] sm:$0xff]  ;;  %vm17233_vm11 = vmmov %vm17230_vm2 }
 0x6e5   : > { %10191 = vmatprep.subr.bf16.mxu1 %v17160_v9  ;;  %v10195_v1 = vpack.c.bf16 %v17226_v63, %v17225_v43 }
 0x6e7   : > { %9440 = vmatmul.mubr.msk.f32.gmra.mrb[36].mxu1 %vm17210_vm0, %v17162_v41  ;;  %vm17235_vm0 = vmmov %vm17230_vm2 }
 0x6e8   : > { %10193 = vmatpush3.bf16.msra.mxu1 %v10192_v46  ;;  %9442 = vmatprep.mubr.msk.f32.mxu1 %vm17224_vm10, %v17162_v41  ;;  %v3230_v46 = vsel %vm3226_vm7, 1.0, %v17161_v49  ;;  %vm17237_vm10 = vmmov %vm17235_vm0 }
 0x6e9   : > { %10194 = vmatprep.subr.bf16.mxu1 %v17160_v9  ;;  %vm17240_vm7 = vmmov %vm17235_vm0 }
 0x6eb   : > { %9443 = vmatmul.mubr.msk.f32.gmra.mrb[38].mxu1 %vm17227_vm3, %v17162_v41  ;;  %vm17239_vm3 = vmmov %vm17235_vm0 }
 0x6ec   : > { %10196 = vmatpush3.bf16.msra.mxu1 %v10195_v1  ;;  %9499 = vmatprep.mubr.msk.f32.mxu1 %vm17201_vm8, %v17161_v49  ;;  %v17234_v1 = vld [vmem:[#allocation71_spill] sm:$0xff] }
 0x6ed   : > { %10210 = vmatprep.subr.bf16.mxu1 %v10209_v21 }
 0x6ef   : > { %9500 = vmatmul.mubr.msk.f32.vlgmr.msra.gmra.mrb[40].mxu1 %vm17228_vm6, %v3230_v46  ;;  %vm17241_vm6 = vmmov %vm17235_vm0 }
 0x6f0   : > { %10212 = vmatpush3.bf16.msra.mxu1 %v10209_v21  ;;  %9529 = vmatprep.mubr.msk.f32.mxu1 %vm17229_vm15, %v11751_v31  ;;  %v17238_v31 = vld [vmem:[#allocation72_spill] sm:$0xff]  ;;  %vm17242_vm15 = vmmov %vm17235_vm0 }
 0x6f1   : > { %10214 = vmatprep.subr.bf16.mxu1 %v10213_v22 }
 0x6f4   : > { %10216 = vmatpush3.bf16.msra.mxu1 %v10213_v22 }
 0x6f7   : > { %9530 = vmatmul.mubr.msk.f32.vlgmr.msra.gmra.mrb[42].mxu1 %vm17230_vm2, %v11753_v24  ;;  %vm17243_vm2 = vmmov %vm17235_vm0  ;;  %v10739_v24 = vld [vmem:[%s11008_s16 + $0xc0] sm:$0xff] }
 0x6f8   : > { %9532 = vmatprep.mubr.msk.f32.mxu1 %vm17231_vm12, %v11762_v62  ;;  %vm17244_vm12 = vmmov %vm17235_vm0 }
 0x6fb   : > { %9533 = vmatmul.mubr.msk.f32.gmra.mrb[44].mxu1 %vm17232_vm4, %v11760_v26  ;;  %vm17245_vm4 = vmmov %vm17235_vm0 }
 0x6fc   : > { %9535 = vmatprep.mubr.msk.f32.mxu1 %vm17233_vm11, %v11771_v50  ;;  %vm17246_vm11 = vmmov %vm17235_vm0 }
 0x6ff   : > { %9536 = vmatmul.mubr.msk.f32.gmra.mrb[46].mxu1 %vm17235_vm0, %v17234_v1 }
 0x700   : > { %9538 = vmatprep.mubr.msk.f32.mxu1 %vm17237_vm10, %v17236_v3  ;;  %vm17247_vm10 = vmmov %vm17235_vm0 }
 0x703   : > { %9539 = vmatmul.mubr.msk.f32.gmra.mrb[48].mxu1 %vm17239_vm3, %v17238_v31  ;;  %vm17248_vm3 = vmmov %vm17235_vm0 }
 0x704   : > { %9541 = vmatprep.mubr.msk.f32.mxu1 %vm17240_vm7, %v12042_v7  ;;  %vm17249_vm7 = vmmov %vm17235_vm0 }
 0x707   : > { %9542 = vmatmul.mubr.msk.f32.gmra.mrb[50].mxu1 %vm17241_vm6, %v12040_v30  ;;  %vm17250_vm6 = vmmov %vm17235_vm0 }
 0x708   : > { %9544 = vmatprep.mubr.msk.f32.mxu1 %vm17242_vm15, %v12049_v58  ;;  %vm17251_vm15 = vmmov %vm17235_vm0 }
 0x70b   : > { %9545 = vmatmul.mubr.msk.f32.gmra.mrb[52].mxu1 %vm17243_vm2, %v12051_v25  ;;  %vm17252_vm2 = vmmov %vm17235_vm0 }
 0x70c   : > { %9547 = vmatprep.mubr.msk.f32.mxu1 %vm17244_vm12, %v12062_v34  ;;  %vm17253_vm12 = vmmov %vm17235_vm0 }
 0x70f   : > { %9548 = vmatmul.mubr.msk.f32.gmra.mrb[54].mxu1 %vm17245_vm4, %v12064_v33  ;;  %vm17254_vm4 = vmmov %vm17235_vm0 }
 0x710   : > { %9550 = vmatprep.mubr.msk.f32.mxu1 %vm17246_vm11, %v12079_v16  ;;  %vm17255_vm11 = vmmov %vm17235_vm0 }
 0x713   : > { %9551 = vmatmul.mubr.msk.f32.gmra.mrb[56].mxu1 %vm17235_vm0, %v12081_v17 }
 0x714   : > { %9553 = vmatprep.mubr.msk.f32.mxu1 %vm17247_vm10, %v11816_v0  ;;  %vm17256_vm10 = vmmov %vm17235_vm0 }
 0x717   : > { %9554 = vmatmul.mubr.msk.f32.gmra.mrb[58].mxu1 %vm17248_vm3, %v11814_v14  ;;  %vm17257_vm3 = vmmov %vm17235_vm0 }
 0x718   : > { %9556 = vmatprep.mubr.msk.f32.mxu1 %vm17249_vm7, %v11825_v44  ;;  %vm17258_vm7 = vmmov %vm17235_vm0 }
 0x71b   : > { %9557 = vmatmul.mubr.msk.f32.gmra.mrb[60].mxu1 %vm17250_vm6, %v11823_v52  ;;  %vm17259_vm6 = vmmov %vm17235_vm0 }
 0x71c   : > { %9559 = vmatprep.mubr.msk.f32.mxu1 %vm17251_vm15, %v17222_v20  ;;  %vm17260_vm15 = vmmov %vm17235_vm0 }
 0x71f   : > { %9560 = vmatmul.mubr.msk.f32.gmra.mrb[62].mxu1 %vm17252_vm2, %v17223_v59  ;;  %vm17261_vm2 = vmmov %vm17235_vm0 }
 0x720   : > { %9562 = vmatprep.mubr.msk.f32.mxu1 %vm17253_vm12, %v17225_v43  ;;  %vm17262_vm12 = vcmask 523264  }
 0x723   : > { %9563 = vmatmul.mubr.msk.f32.gmra.mrb[64].mxu1 %vm17254_vm4, %v17226_v63 }
 0x724   : > { %9565 = vmatprep.mubr.msk.f32.mxu1 %vm17255_vm11, %v12091_v53 }
 0x727   : > { %9566 = vmatmul.mubr.msk.f32.gmra.mrb[66].mxu1 %vm17235_vm0, %v12093_v5 }
 0x728   : > { %9568 = vmatprep.mubr.msk.f32.mxu1 %vm17256_vm10, %v12101_v23 }
 0x72b   : > { %9569 = vmatmul.mubr.msk.f32.gmra.mrb[68].mxu1 %vm17257_vm3, %v12104_v37 }
 0x72c   : > { %9571 = vmatprep.mubr.msk.f32.mxu1 %vm17258_vm7, %v12111_v32 }
 0x72f   : > { %9572 = vmatmul.mubr.msk.f32.gmra.mrb[70].mxu1 %vm17259_vm6, %v12113_v12  ;;  %vm17263_vm6 = vnez %v17180_v8 }
 0x730   : > { %9574 = vmatprep.mubr.msk.f32.mxu1 %vm17260_vm15, %v12119_v39 }
 0x733   : > { %9575 = vmatmul.mubr.msk.f32.gmra.mrb[72].mxu1 %vm17261_vm2, %v12121_v15  ;;  %vm17264_vm2 = vmmov %vm17262_vm12 }
 0x734   : > { %9677 = vmatprep.mubr.msk.f32.mxu1 %vm17262_vm12, %v10739_v24 }
 0x745   : > { %v12496_v26 = vpop.f32.mrb[64].mxu0 }
 0x746   : > { %v9463_v62 = vpop.f32.mrb[65].mxu0 }
 0x792   : > { %v9379_v50 = vpop.f32.mrb[24].mxu1 }
 0x793   : > { %vm2977_vm4 = vcmp.gt.f32.partialorder %v12291_v55, %v9379_v50  ;;  %vm3009_vm11 = vcmp.eq.f32.partialorder %v12291_v55, %v9379_v50  ;;  %v2660_v14 = vpop.f32.mrb[25].mxu1 }
 0x794   : > { %vm3049_vm0 = vmand %vm3009_vm11, %vm12132_vm5  ;;  %vm2976_vm10 = vcmp.gt.f32.partialorder %v12293_v54, %v2660_v14  ;;  %vm3008_vm3 = vcmp.eq.f32.partialorder %v12293_v54, %v2660_v14  ;;  %vm17265_vm11 = vnez %v17182_v10 }
 0x795   : > { %vm3081_vm7 = vmor %vm2977_vm4, %vm3049_vm0 }
 0x796   : > { %v3113_v0 = vsel %vm3081_vm7, 1.0, %v17161_v49  ;;  %vm3048_vm15 = vmand %vm3008_vm3, %vm17263_vm6  ;;  %v9382_v52 = vpop.f32.mrb[26].mxu1 }
 0x797   : > { %v3158_v44 = vsel %vm17264_vm2, %v3113_v0, 0.0  ;;  %vm3080_vm12 = vmor %vm2976_vm10, %vm3048_vm15  ;;  %vm2979_vm14 = vcmp.gt.f32.partialorder %v12303_v60, %v9382_v52  ;;  %vm3011_vm8 = vcmp.eq.f32.partialorder %v12303_v60, %v9382_v52  ;;  %v2670_v30 = vpop.f32.mrb[27].mxu1  ;;  %vm17267_vm10 = vnez %v17184_v35 }
 0x798   : > { %v3112_v7 = vsel %vm3080_vm12, 1.0, %v17161_v49  ;;  %vm3051_vm5 = vmand %vm3011_vm8, %vm17265_vm11  ;;  %vm2978_vm4 = vcmp.gt.f32.partialorder %v12299_v48, %v2670_v30  ;;  %vm3010_vm0 = vcmp.eq.f32.partialorder %v12299_v48, %v2670_v30 }
 0x799   : > { %vm17266_vm7 = vmmov %vm17264_vm2 }
 0x79a   : > { %v3157_v58 = vsel %vm17266_vm7, %v3112_v7, 0.0  ;;  %vm3083_vm3 = vmor %vm2979_vm14, %vm3051_vm5  ;;  %v9385_v34 = vpop.f32.mrb[28].mxu1 }
 0x79b   : > { %v3159_v25 = vadd.f32 %v3158_v44, %v3157_v58  ;;  %vm3050_vm15 = vmand %vm3010_vm0, %vm17267_vm10  ;;  %vm2981_vm6 = vcmp.gt.f32.partialorder %v12311_v29, %v9385_v34  ;;  %vm3013_vm12 = vcmp.eq.f32.partialorder %v12311_v29, %v9385_v34  ;;  %v2680_v33 = vpop.f32.mrb[29].mxu1  ;;  %v3115_v16 = vsel %vm3083_vm3, 1.0, %v17161_v49 }
 0x79c   : > { %vm3082_vm2 = vmor %vm2978_vm4, %vm3050_vm15  ;;  %vm2980_vm5 = vcmp.gt.f32.partialorder %v12309_v19, %v2680_v33  ;;  %vm3012_vm14 = vcmp.eq.f32.partialorder %v12309_v19, %v2680_v33  ;;  %vm17268_vm4 = vnez %v17189_v11 }
 0x79d   : > { %v3114_v17 = vsel %vm3082_vm2, 1.0, %v17161_v49  ;;  %vm3053_vm8 = vmand %vm3013_vm12, %vm17198_vm13 }
 0x79e   : > { %v3160_v63 = vsel %vm17266_vm7, %v3114_v17, 0.0  ;;  %vm3085_vm0 = vmor %vm2981_vm6, %vm3053_vm8  ;;  %v9388_v54 = vpop.f32.mrb[30].mxu1 }
 0x79f   : > { %v3161_v55 = vadd.f32 %v3160_v63, %v3159_v25  ;;  %vm3052_vm15 = vmand %vm3012_vm14, %vm17268_vm4  ;;  %v3117_v60 = vsel %vm3085_vm0, 1.0, %v17161_v49  ;;  %vm2983_vm2 = vcmp.gt.f32.partialorder %v12321_v42, %v9388_v54  ;;  %vm3015_vm12 = vcmp.eq.f32.partialorder %v12321_v42, %v9388_v54  ;;  %v2690_v29 = vpop.f32.mrb[31].mxu1  ;;  %v17280_v54 = vld [vmem:[#allocation85_spill] sm:$0xff] }
 0x7a0   : > { %vm17269_vm10 = vmmov %vm17266_vm7  ;;  %vm2982_vm8 = vcmp.gt.f32.partialorder %v12319_v6, %v2690_v29  ;;  %vm3014_vm14 = vcmp.eq.f32.partialorder %v12319_v6, %v2690_v29 }
 0x7a1   : > { %v3162_v48 = vsel %vm17269_vm10, %v3115_v16, 0.0  ;;  %vm3084_vm3 = vmor %vm2980_vm5, %vm3052_vm15 }
 0x7a2   : > { %v3116_v19 = vsel %vm3084_vm3, 1.0, %v17161_v49  ;;  %v3163_v4 = vadd.f32 %v3162_v48, %v3161_v55  ;;  %vm3055_vm6 = vmand %vm3015_vm12, %vm12198_vm9 }
 0x7a3   : > { %v3164_v20 = vsel %vm17266_vm7, %v3116_v19, 0.0  ;;  %vm3087_vm10 = vmor %vm2983_vm2, %vm3055_vm6 }
 0x7a4   : > { %v3165_v59 = vadd.f32 %v3164_v20, %v3163_v4  ;;  %vm3054_vm5 = vmand %vm3014_vm14, %vm12205_vm1  ;;  %v3119_v2 = vsel %vm3087_vm10, 1.0, %v17161_v49  ;;  %v10204_v20 = vpack.c.bf16 %v12113_v12, %v12111_v32 }
 0x7a5   : > { %vm17270_vm0 = vmmov %vm17266_vm7 }
 0x7a6   : > { %v3166_v42 = vsel %vm17270_vm0, %v3117_v60, 0.0  ;;  %vm3086_vm15 = vmor %vm2982_vm8, %vm3054_vm5  ;;  %vm17273_vm8 = vnez %v17178_v57 }
 0x7a7   : > { %v3118_v38 = vsel %vm3086_vm15, 1.0, %v17161_v49  ;;  %v3167_v56 = vadd.f32 %v3166_v42, %v3165_v59  ;;  %vm17271_vm3 = vmmov %vm17270_vm0 }
 0x7a8   : > { %v3168_v21 = vsel %vm17271_vm3, %v3118_v38, 0.0  ;;  %vm17272_vm12 = vmmov %vm17270_vm0  ;;  %vm17274_vm0 = vnez %v17180_v8 }
 0x7a9   : > { %v3169_v43 = vadd.f32 %v3168_v21, %v3167_v56  ;;  %v3170_v6 = vsel %vm17272_vm12, %v3119_v2, 0.0 }
 0x7ab   : > { %v3171_v22 = vadd.f32 %v3170_v6, %v3169_v43  ;;  %v10207_v6 = vpack.c.bf16 %v12121_v15, %v12119_v39 }
 0x7ad   : > { %v3172_v46 = vrot.slane %v3171_v22, 4 }
 0x7af   : > { %v3173_v1 = vadd.f32 %v3172_v46, %v3171_v22 }
 0x7b1   : > { %v3174_v3 = vrot.slane %v3173_v1, 2 }
 0x7b2   : > { %v9435_v24 = vpop.f32.mrb[32].mxu1 }
 0x7b3   : > { %v3175_v31 = vadd.f32 %v3174_v3, %v3173_v1  ;;  %vm2993_vm2 = vcmp.gt.f32.partialorder %v12331_v51, %v9435_v24  ;;  %vm3025_vm6 = vcmp.eq.f32.partialorder %v12331_v51, %v9435_v24  ;;  %v2918_v50 = vpop.f32.mrb[33].mxu1  ;;  %v17287_v1 = vld [vmem:[#allocation8_spill] sm:$0xff] }
 0x7b4   : > { %vm3065_vm14 = vmand %vm3025_vm6, %vm17273_vm8  ;;  %vm2992_vm7 = vcmp.gt.f32.partialorder %v12329_v13, %v2918_v50  ;;  %vm3024_vm10 = vcmp.eq.f32.partialorder %v12329_v13, %v2918_v50 }
 0x7b5   : > { %v3176_v62 = vrot.slane %v3175_v31, 1  ;;  %vm3097_vm5 = vmor %vm2993_vm2, %vm3065_vm14 }
 0x7b6   : > { %v3129_v0 = vsel %vm3097_vm5, 1.0, %v17161_v49  ;;  %vm3064_vm15 = vmand %vm3024_vm10, %vm17274_vm0  ;;  %v9438_v52 = vpop.f32.mrb[34].mxu1 }
 0x7b7   : > { %v3177_v14 = vadd.f32 %v3176_v62, %v3175_v31  ;;  %v3200_v30 = vsel %vm17271_vm3, %v3129_v0, 0.0  ;;  %vm3096_vm12 = vmor %vm2992_vm7, %vm3064_vm15  ;;  %vm2995_vm1 = vcmp.gt.f32.partialorder %v12341_v61, %v9438_v52  ;;  %vm3027_vm6 = vcmp.eq.f32.partialorder %v12341_v61, %v9438_v52  ;;  %v2928_v51 = vpop.f32.mrb[35].mxu1  ;;  %v17288_v62 = vld [vmem:[#allocation6_spill] sm:$0xff] }
 0x7b8   : > { %v3128_v7 = vsel %vm3096_vm12, 1.0, %v17161_v49  ;;  %vm3067_vm2 = vmand %vm3027_vm6, %vm17265_vm11  ;;  %vm2994_vm14 = vcmp.gt.f32.partialorder %v12339_v45, %v2928_v51  ;;  %vm3026_vm5 = vcmp.eq.f32.partialorder %v12339_v45, %v2928_v51  ;;  %vm17276_vm7 = vnez %v17184_v35 }
 0x7b9   : > { %v10475_v44 = vtrunc.f32 %v3177_v14  ;;  %vm17275_vm10 = vmmov %vm17271_vm3  ;;  %v10198_v61 = vpack.c.bf16 %v12093_v5, %v12091_v53  ;;  %v10201_v5 = vpack.c.bf16 %v12104_v37, %v12101_v23  ;;  %v17281_v37 = vld [vmem:[#allocation84_spill] sm:$0xff] }
 0x7ba   : > { %v3199_v58 = vsel %vm17275_vm10, %v3128_v7, 0.0  ;;  %vm3099_vm0 = vmor %vm2995_vm1, %vm3067_vm2  ;;  %v9441_v34 = vpop.f32.mrb[36].mxu1  ;;  %v17290_v7 = vld [vmem:[#allocation5_spill] sm:$0xff] }
 0x7bb   : > { %v10476_v13 = vcvt.f32.s32 %v10475_v44  ;;  %v3201_v25 = vadd.f32 %v3200_v30, %v3199_v58  ;;  %vm3066_vm15 = vmand %vm3026_vm5, %vm17276_vm7  ;;  %vm2997_vm6 = vcmp.gt.f32.partialorder %v12357_v40, %v9441_v34  ;;  %vm3029_vm11 = vcmp.eq.f32.partialorder %v12357_v40, %v9441_v34  ;;  %v2938_v45 = vpop.f32.mrb[37].mxu1  ;;  %v17289_v44 = vld [vmem:[#allocation7_spill] sm:$0xff]  ;;  %v17291_v34 = vld [vmem:[#allocation9_spill] sm:$0xff] }
 0x7bc   : > { %vm3098_vm12 = vmor %vm2994_vm14, %vm3066_vm15  ;;  %v3131_v16 = vsel %vm3099_vm0, 1.0, %v17161_v49  ;;  %vm2996_vm2 = vcmp.gt.f32.partialorder %v12355_v36, %v2938_v45  ;;  %vm3028_vm5 = vcmp.eq.f32.partialorder %v12355_v36, %v2938_v45  ;;  %vm17278_vm7 = vmmov 0  }
 0x7bd   : > { %vm3225_vm3 = vcmp.eq.s32.totalorder %v10476_v13, %v11707_v18  ;;  %v3130_v17 = vsel %vm3098_vm12, 1.0, %v17161_v49  ;;  %vm3069_vm1 = vmand %vm3029_vm11, %vm17198_vm13 }
 0x7be   : > { %v3229_v33 = vsel %vm3225_vm3, 1.0, %v17161_v49  ;;  %vm17277_vm14 = vmmov %vm17275_vm10  ;;  %v9444_v63 = vpop.f32.mrb[38].mxu1 }
 0x7bf   : > { %9481 = vmatmul.mubr.msk.f32.vlgmr.msra.gmra.mrb[66].mxu0 %vm17275_vm10, %v3229_v33  ;;  %v3202_v53 = vsel %vm17277_vm14, %v3130_v17, 0.0  ;;  %vm3101_vm15 = vmor %vm2997_vm6, %vm3069_vm1  ;;  %vm2999_vm12 = vcmp.gt.f32.partialorder %v17280_v54, %v9444_v63  ;;  %vm3031_vm6 = vcmp.eq.f32.partialorder %v17280_v54, %v9444_v63  ;;  %v2948_v48 = vpop.f32.mrb[39].mxu1  ;;  %v17292_v33 = vld [vmem:[#allocation10_spill] sm:$0xff]  ;;  %v17293_v63 = vld [vmem:[#allocation11_spill] sm:$0xff] }
 0x7c0   : > { %10199 = vmatpush3.bf16.msra.mxu0 %v10198_v61  ;;  %9518 = vmatprep.mubr.msk.f32.mxu0 %vm17278_vm7, %v17161_v49  ;;  %v3203_v40 = vadd.f32 %v3202_v53, %v3201_v25  ;;  %vm3068_vm11 = vmand %vm3028_vm5, %vm17268_vm4  ;;  %v3133_v55 = vsel %vm3101_vm15, 1.0, %v17161_v49  ;;  %vm2998_vm5 = vcmp.gt.f32.partialorder %v17281_v37, %v2948_v48  ;;  %v17294_v54 = vld [vmem:[#allocation12_spill] sm:$0xff] }
 0x7c1   : > { %10200 = vmatprep.subr.bf16.mxu0 %v17160_v9  ;;  %vm17279_vm0 = vmmov %vm17275_vm10  ;;  %vm3030_vm10 = vcmp.eq.f32.partialorder %v17281_v37, %v2948_v48 }
 0x7c2   : > { %v3204_v36 = vsel %vm17279_vm0, %v3131_v16, 0.0  ;;  %vm3100_vm3 = vmor %vm2996_vm2, %vm3068_vm11  ;;  %vm17283_vm2 = vnez %v17195_v27  ;;  %v12599_v4 = vpop.f32.mrb[40].mxu1 }
 0x7c3   : > { %v3132_v60 = vsel %vm3100_vm3, 1.0, %v17161_v49  ;;  %v3205_v23 = vadd.f32 %v3204_v36, %v3203_v40  ;;  %vm3071_vm1 = vmand %vm3031_vm6, %vm12198_vm9  ;;  %v9501_v42 = vpop.f32.mrb[41].mxu1 }
 0x7c4   : > { %vm17282_vm14 = vmmov %vm17279_vm0  ;;  %10202 = vmatpush3.bf16.msra.mxu0 %v10201_v5  ;;  %v17297_v42 = vld [vmem:[#allocation14_spill] sm:$0xff] }
 0x7c5   : > { %v3206_v29 = vsel %vm17282_vm14, %v3132_v60, 0.0  ;;  %vm3103_vm0 = vmor %vm2999_vm12, %vm3071_vm1  ;;  %10203 = vmatprep.subr.bf16.mxu0 %v17160_v9 }
 0x7c6   : > { %v3207_v19 = vadd.f32 %v3206_v29, %v3205_v23  ;;  %vm3070_vm15 = vmand %vm3030_vm10, %vm17283_vm2  ;;  %v3135_v2 = vsel %vm3103_vm0, 1.0, %v17161_v49  ;;  %v17295_v29 = vld [vmem:[#allocation13_spill] sm:$0xff] }
 0x7c7   : > { %vm17284_vm11 = vmmov %vm17282_vm14 }
 0x7c8   : > { %v3208_v59 = vsel %vm17284_vm11, %v3133_v55, 0.0  ;;  %vm3102_vm3 = vmor %vm2998_vm5, %vm3070_vm15  ;;  %10205 = vmatpush3.bf16.msra.mxu0 %v10204_v20 }
 0x7c9   : > { %v3134_v38 = vsel %vm3102_vm3, 1.0, %v17161_v49  ;;  %v3209_v56 = vadd.f32 %v3208_v59, %v3207_v19  ;;  %vm17285_vm12 = vmmov %vm17284_vm11  ;;  %10206 = vmatprep.subr.bf16.mxu0 %v17160_v9 }
 0x7ca   : > { %v3210_v21 = vsel %vm17285_vm12, %v3134_v38, 0.0  ;;  %vm17286_vm6 = vmmov %vm17284_vm11  ;;  %v9531_v46 = vpop.f32.mrb[42].mxu1  ;;  %v10740_v38 = vld [vmem:[%s11008_s16] sm:$0xff] }
 0x7cb   : > { %v3211_v43 = vadd.f32 %v3210_v21, %v3209_v56  ;;  %v3212_v32 = vsel %vm17286_vm6, %v3135_v2, 0.0  ;;  %v4855_v3 = vmul.f32 %v9531_v46, %v17287_v1  ;;  %v4695_v31 = vpop.f32.mrb[43].mxu1  ;;  %vm17296_vm5 = vmmov %vm17286_vm6 }
 0x7cc   : > { %10208 = vmatpush3.bf16.msra.mxu0 %v10207_v6  ;;  %v4854_v50 = vmul.f32 %v4695_v31, %v17288_v62  ;;  %vm17298_vm10 = vmmov %vm17296_vm5  ;;  %v17302_v62 = vld [vmem:[#allocation18_spill] sm:$0xff] }
 0x7cd   : > { %v3213_v12 = vadd.f32 %v3212_v32, %v3211_v43  ;;  %v17299_v43 = vld [vmem:[#allocation15_spill] sm:$0xff]  ;;  %vm17306_vm14 = vmmov %vm17296_vm5 }
 0x7ce   : > { %v10217_v0 = vpack.c.bf16 %v4855_v3, %v4854_v50  ;;  %v9534_v52 = vpop.f32.mrb[44].mxu1  ;;  %v17301_v3 = vld [vmem:[#allocation17_spill] sm:$0xff]  ;;  %vm17308_vm0 = vmmov %vm17296_vm5 }
 0x7cf   : > { %v3214_v22 = vrot.slane %v3213_v12, 4  ;;  %v4857_v30 = vmul.f32 %v9534_v52, %v17289_v44  ;;  %v4705_v51 = vpop.f32.mrb[45].mxu1  ;;  %v17303_v52 = vld [vmem:[#allocation19_spill] sm:$0xff]  ;;  %vm17310_vm15 = vmmov %vm17308_vm0 }
 0x7d0   : > { %v4856_v39 = vmul.f32 %v4705_v51, %v17290_v7  ;;  %10218 = vmatprep.subr.bf16.mxu0 %v10217_v0  ;;  %v17304_v51 = vld [vmem:[#allocation20_spill] sm:$0xff]  ;;  %vm17312_vm11 = vmmov %vm17308_vm0 }
 0x7d1   : > { %v3215_v24 = vadd.f32 %v3214_v22, %v3213_v12  ;;  %v17300_v12 = vld [vmem:[#allocation16_spill] sm:$0xff]  ;;  %vm17314_vm3 = vmmov %vm17308_vm0 }
 0x7d2   : > { %v10221_v13 = vpack.c.bf16 %v4857_v30, %v4856_v39  ;;  %v9537_v58 = vpop.f32.mrb[46].mxu1  ;;  %vm17316_vm12 = vmmov %vm17308_vm0 }
 0x7d3   : > { %v3216_v14 = vrot.slane %v3215_v24, 2  ;;  %v4859_v61 = vmul.f32 %v9537_v58, %v17291_v34  ;;  %v4715_v45 = vpop.f32.mrb[47].mxu1  ;;  %v10741_v34 = vld [vmem:[%s11008_s16 + $0x8] sm:$0xff]  ;;  %vm17318_vm6 = vmmov %vm17308_vm0 }
 0x7d4   : > { %v4858_v16 = vmul.f32 %v4715_v45, %v17292_v33  ;;  %v10742_v33 = vld [vmem:[%s11008_s16 + $0x10] sm:$0xff] }
 0x7d5   : > { %v3217_v15 = vadd.f32 %v3216_v14, %v3215_v24 }
 0x7d6   : > { %v10225_v53 = vpack.c.bf16 %v4859_v61, %v4858_v16  ;;  %v9540_v5 = vpop.f32.mrb[48].mxu1  ;;  %v17307_v61 = vld [vmem:[#allocation22_spill] sm:$0xff] }
 0x7d7   : > { %v3218_v25 = vrot.slane %v3217_v15, 1  ;;  %v4861_v36 = vmul.f32 %v9540_v5, %v17293_v63  ;;  %v4725_v55 = vpop.f32.mrb[49].mxu1  ;;  %v10743_v63 = vld [vmem:[%s11008_s16 + $0x18] sm:$0xff] }
 0x7d8   : > { %v4860_v48 = vmul.f32 %v4725_v55, %v17294_v54  ;;  %v10744_v54 = vld [vmem:[%s11008_s16 + $0x20] sm:$0xff] }
 0x7d9   : > { %v3219_v17 = vadd.f32 %v3218_v25, %v3217_v15 }
 0x7da   : > { %v10229_v23 = vpack.c.bf16 %v4861_v36, %v4860_v48  ;;  %v9543_v37 = vpop.f32.mrb[50].mxu1  ;;  %v17311_v36 = vld [vmem:[#allocation24_spill] sm:$0xff] }
 0x7db   : > { %v10479_v40 = vtrunc.f32 %v3219_v17  ;;  %v4863_v19 = vmul.f32 %v9543_v37, %v17295_v29  ;;  %v4735_v59 = vpop.f32.mrb[51].mxu1 }
 0x7dc   : > { %v4862_v2 = vmul.f32 %v4735_v59, %v17297_v42  ;;  %v10746_v42 = vld [vmem:[%s11008_s16 + $0x30] sm:$0xff] }
 0x7dd   : > { %v10480_v60 = vcvt.f32.s32 %v10479_v40 }
 0x7de   : > { %v10233_v56 = vpack.c.bf16 %v4863_v19, %v4862_v2  ;;  %v9546_v21 = vpop.f32.mrb[52].mxu1  ;;  %v10745_v19 = vld [vmem:[%s11008_s16 + $0x28] sm:$0xff] }
 0x7df   : > { %vm3227_vm1 = vcmp.eq.s32.totalorder %v10480_v60, %v11707_v18  ;;  %v4865_v6 = vmul.f32 %v9546_v21, %v17299_v43  ;;  %v4745_v32 = vpop.f32.mrb[53].mxu1 }
 0x7e0   : > { %v3231_v20 = vsel %vm3227_vm1, 1.0, %v17161_v49  ;;  %v4864_v22 = vmul.f32 %v4745_v32, %v17300_v12  ;;  %v17319_v32 = vld [vmem:[#allocation28_spill] sm:$0xff]  ;;  %vm17320_vm1 = vmmov %vm17308_vm0 }
 0x7e1   : > { %9519 = vmatmul.mubr.msk.f32.vlgmr.msra.gmra.mrb[68].mxu0 %vm17296_vm5, %v3231_v20  ;;  %v17315_v20 = vld [vmem:[#allocation26_spill] sm:$0xff]  ;;  %vm17322_vm5 = vmmov %vm17308_vm0 }
 0x7e2   : > { %10220 = vmatpush3.bf16.msra.mxu0 %v10217_v0  ;;  %9593 = vmatprep.mubr.msk.f32.mxu0 %vm17298_vm10, %v10740_v38  ;;  %v10237_v46 = vpack.c.bf16 %v4865_v6, %v4864_v22  ;;  %v9549_v1 = vpop.f32.mrb[54].mxu1  ;;  %v10747_v6 = vld [vmem:[%s11008_s16 + $0x38] sm:$0xff]  ;;  %v10748_v22 = vld [vmem:[%s11008_s16 + $0x40] sm:$0xff]  ;;  %vm17324_vm10 = vmmov %vm17308_vm0 }
 0x7e3   : > { %10222 = vmatprep.subr.bf16.mxu0 %v10221_v13  ;;  %v4867_v31 = vmul.f32 %v9549_v1, %v17301_v3  ;;  %v4755_v24 = vpop.f32.mrb[55].mxu1  ;;  %v17321_v3 = vld [vmem:[#allocation43_spill] sm:$0xff] }
 0x7e4   : > { %v4866_v50 = vmul.f32 %v4755_v24, %v17302_v62  ;;  %v10749_v62 = vld [vmem:[%s11008_s16 + $0x48] sm:$0xff] }
 0x7e6   : > { %10224 = vmatpush3.bf16.msra.mxu0 %v10221_v13  ;;  %v10241_v14 = vpack.c.bf16 %v4867_v31, %v4866_v50  ;;  %v9552_v0 = vpop.f32.mrb[56].mxu1  ;;  %v17305_v13 = vld [vmem:[#allocation21_spill] sm:$0xff]  ;;  %v17323_v50 = vld [vmem:[#allocation42_spill] sm:$0xff] }
 0x7e7   : > { %10226 = vmatprep.subr.bf16.mxu0 %v10225_v53  ;;  %v4869_v44 = vmul.f32 %v9552_v0, %v17303_v52  ;;  %v4765_v30 = vpop.f32.mrb[57].mxu1  ;;  %v10750_v0 = vld [vmem:[%s11008_s16 + $0x50] sm:$0xff] }
 0x7e8   : > { %v4868_v7 = vmul.f32 %v4765_v30, %v17304_v51  ;;  %v17325_v30 = vld [vmem:[#allocation47_spill] sm:$0xff] }
 0x7ea   : > { %10228 = vmatpush3.bf16.msra.mxu0 %v10225_v53  ;;  %v10245_v39 = vpack.c.bf16 %v4869_v44, %v4868_v7  ;;  %v9555_v15 = vpop.f32.mrb[58].mxu1  ;;  %v17309_v53 = vld [vmem:[#allocation23_spill] sm:$0xff] }
 0x7eb   : > { %10230 = vmatprep.subr.bf16.mxu0 %v10229_v23  ;;  %v4871_v58 = vmul.f32 %v9555_v15, %v17305_v13  ;;  %v4775_v25 = vpop.f32.mrb[59].mxu1  ;;  %v17327_v15 = vld [vmem:[#allocation46_spill] sm:$0xff] }
 0x7ec   : > { %v4870_v45 = vmul.f32 %v4775_v25, %v17307_v61  ;;  %v17328_v61 = vld [vmem:[#allocation49_spill] sm:$0xff] }
 0x7ee   : > { %10232 = vmatpush3.bf16.msra.mxu0 %v10229_v23  ;;  %v10249_v16 = vpack.c.bf16 %v4871_v58, %v4870_v45  ;;  %v9558_v17 = vpop.f32.mrb[60].mxu1  ;;  %v17313_v23 = vld [vmem:[#allocation25_spill] sm:$0xff]  ;;  %v10752_v58 = vld [vmem:[%s11008_s16 + $0x60] sm:$0xff] }
 0x7ef   : > { %10234 = vmatprep.subr.bf16.mxu0 %v10233_v56  ;;  %v4873_v5 = vmul.f32 %v9558_v17, %v17309_v53  ;;  %v4785_v40 = vpop.f32.mrb[61].mxu1  ;;  %v17330_v17 = vld [vmem:[#allocation50_spill] sm:$0xff] }
 0x7f0   : > { %v4872_v55 = vmul.f32 %v4785_v40, %v17311_v36  ;;  %v17332_v36 = vld [vmem:[#allocation54_spill] sm:$0xff] }
 0x7f1   : > { %9594 = vmatmul.mubr.msk.f32.vlgmr.msra.gmra.mrb[70].mxu0 %vm17306_vm14, %v10741_v34  ;;  %vm17326_vm14 = vmmov %vm17308_vm0 }
 0x7f2   : > { %10236 = vmatpush3.bf16.msra.mxu0 %v10233_v56  ;;  %9596 = vmatprep.mubr.msk.f32.mxu0 %vm17308_vm0, %v10742_v33  ;;  %v10253_v48 = vpack.c.bf16 %v4873_v5, %v4872_v55  ;;  %v9561_v60 = vpop.f32.mrb[62].mxu1  ;;  %v17317_v56 = vld [vmem:[#allocation27_spill] sm:$0xff]  ;;  %v10754_v5 = vld [vmem:[%s11008_s16 + $0x70] sm:$0xff] }
 0x7f3   : > { %10238 = vmatprep.subr.bf16.mxu0 %v10237_v46  ;;  %v4875_v37 = vmul.f32 %v9561_v60, %v17313_v23  ;;  %v4795_v29 = vpop.f32.mrb[63].mxu1  ;;  %v17334_v60 = vld [vmem:[#allocation53_spill] sm:$0xff] }
 0x7f4   : > { %v4874_v59 = vmul.f32 %v4795_v29, %v17315_v20  ;;  %v10758_v20 = vld [vmem:[%s11008_s16 + $0x90] sm:$0xff] }
 0x7f5   : > { %9597 = vmatmul.mubr.msk.f32.gmra.mrb[72].mxu0 %vm17310_vm15, %v10743_v63  ;;  %vm17329_vm15 = vmmov %vm17308_vm0 }
 0x7f6   : > { %10240 = vmatpush3.bf16.msra.mxu0 %v10237_v46  ;;  %9599 = vmatprep.mubr.msk.f32.mxu0 %vm17312_vm11, %v10744_v54  ;;  %v10257_v2 = vpack.c.bf16 %v4875_v37, %v4874_v59  ;;  %v9564_v38 = vpop.f32.mrb[64].mxu1  ;;  %vm17331_vm11 = vmmov %vm17308_vm0  ;;  %v10756_v37 = vld [vmem:[%s11008_s16 + $0x80] sm:$0xff]  ;;  %v10759_v59 = vld [vmem:[%s11008_s16 + $0x98] sm:$0xff] }
 0x7f7   : > { %10242 = vmatprep.subr.bf16.mxu0 %v10241_v14  ;;  %v4877_v21 = vmul.f32 %v9564_v38, %v17317_v56  ;;  %v4805_v43 = vpop.f32.mrb[65].mxu1  ;;  %v10762_v38 = vld [vmem:[%s11008_s16 + $0xd0] sm:$0xff]  ;;  %v10763_v56 = vld [vmem:[%s11008_s16 + $0xa8] sm:$0xff] }
 0x7f8   : > { %v4876_v12 = vmul.f32 %v4805_v43, %v17319_v32  ;;  %v10765_v43 = vld [vmem:[%s11008_s16 + $0xb0] sm:$0xff]  ;;  %v10767_v32 = vld [vmem:[%s11008_s16 + $0xb8] sm:$0xff] }
 0x7f9   : > { %9600 = vmatmul.mubr.msk.f32.gmra.mrb[74].mxu0 %vm17314_vm3, %v10745_v19  ;;  %vm17333_vm3 = vmmov %vm17308_vm0  ;;  %v10757_v19 = vld [vmem:[%s11008_s16 + $0x88] sm:$0xff] }
 0x7fa   : > { %10244 = vmatpush3.bf16.msra.mxu0 %v10241_v14  ;;  %9602 = vmatprep.mubr.msk.f32.mxu0 %vm17316_vm12, %v10746_v42  ;;  %v10261_v46 = vpack.c.bf16 %v4877_v21, %v4876_v12  ;;  %v9567_v1 = vpop.f32.mrb[66].mxu1  ;;  %vm17335_vm12 = vmmov %vm17308_vm0  ;;  %v10760_v42 = vld [vmem:[%s11008_s16 + $0xc8] sm:$0xff]  ;;  %v10764_v21 = vld [vmem:[%s11008_s16 + $0xd8] sm:$0xff] }
 0x7fb   : > { %10246 = vmatprep.subr.bf16.mxu0 %v10245_v39  ;;  %v4879_v31 = vmul.f32 %v9567_v1, %v17321_v3  ;;  %v4815_v24 = vpop.f32.mrb[67].mxu1  ;;  %v10768_v12 = vld [vmem:[%s11008_s16 + $0xe8] sm:$0xff] }
 0x7fc   : > { %v4878_v14 = vmul.f32 %v4815_v24, %v17323_v50  ;;  %v17349_v50 = vld [vmem:[#allocation29_spill] sm:$0xff] }
 0x7fd   : > { %9603 = vmatmul.mubr.msk.f32.gmra.mrb[76].mxu0 %vm17318_vm6, %v10747_v6  ;;  %vm17336_vm6 = vmmov %vm17308_vm0  ;;  %v10766_v6 = vld [vmem:[%s11008_s16 + $0xe0] sm:$0xff] }
 0x7fe   : > { %10248 = vmatpush3.bf16.msra.mxu0 %v10245_v39  ;;  %9621 = vmatprep.mubr.msk.f32.mxu0 %vm17320_vm1, %v10748_v22  ;;  %v10265_v52 = vpack.c.bf16 %v4879_v31, %v4878_v14  ;;  %v9570_v44 = vpop.f32.mrb[68].mxu1  ;;  %v10751_v39 = vld [vmem:[%s11008_s16 + $0x58] sm:$0xff]  ;;  %vm17337_vm1 = vmmov %vm17308_vm0  ;;  %v10769_v22 = vld [vmem:[%s11008_s16 + $0xf0] sm:$0xff] }
 0x7ff   : > { %10250 = vmatprep.subr.bf16.mxu0 %v10249_v16  ;;  %v4881_v51 = vmul.f32 %v9570_v44, %v17325_v30  ;;  %v4825_v7 = vpop.f32.mrb[69].mxu1 }
 0x800   : > { %v4880_v13 = vmul.f32 %v4825_v7, %v17327_v15  ;;  %10266 = vmatprep.subr.bf16.mxu1 %v10265_v52 }
 0x801   : > { %9622 = vmatmul.mubr.msk.f32.vlgmr.msra.gmra.mrb[78].mxu0 %vm17322_vm5, %v10749_v62  ;;  %10268 = vmatpush3.bf16.msra.mxu1 %v10265_v52  ;;  %vm17338_vm5 = vmmov %vm17308_vm0  ;;  %v17350_v52 = vld [vmem:[#allocation30_spill] sm:$0xff] }
 0x802   : > { %10252 = vmatpush3.bf16.msra.mxu0 %v10249_v16  ;;  %9624 = vmatprep.mubr.msk.f32.mxu0 %vm17324_vm10, %v10750_v0  ;;  %v10269_v25 = vpack.c.bf16 %v4881_v51, %v4880_v13  ;;  %v9573_v34 = vpop.f32.mrb[70].mxu1  ;;  %v10753_v16 = vld [vmem:[%s11008_s16 + $0x68] sm:$0xff]  ;;  %vm17339_vm10 = vmmov %vm17308_vm0 }
 0x803   : > { %10254 = vmatprep.subr.bf16.mxu0 %v10253_v48  ;;  %v4883_v45 = vmul.f32 %v9573_v34, %v17328_v61  ;;  %v4835_v33 = vpop.f32.mrb[71].mxu1  ;;  %v17351_v61 = vld [vmem:[#allocation32_spill] sm:$0xff] }
 0x804   : > { %v4882_v53 = vmul.f32 %v4835_v33, %v17330_v17  ;;  %10270 = vmatprep.subr.bf16.mxu1 %v10269_v25 }
 0x805   : > { %9625 = vmatmul.mubr.msk.f32.gmra.mrb[80].mxu0 %vm17326_vm14, %v10751_v39  ;;  %10272 = vmatpush3.bf16.msra.mxu1 %v10269_v25  ;;  %vm17340_vm14 = vmmov %vm17308_vm0 }
 0x806   : > { %10256 = vmatpush3.bf16.msra.mxu0 %v10253_v48  ;;  %9627 = vmatprep.mubr.msk.f32.mxu0 %vm17308_vm0, %v10752_v58  ;;  %v10273_v40 = vpack.c.bf16 %v4883_v45, %v4882_v53  ;;  %v9576_v63 = vpop.f32.mrb[72].mxu1  ;;  %v10755_v48 = vld [vmem:[%s11008_s16 + $0x78] sm:$0xff] }
 0x807   : > { %10258 = vmatprep.subr.bf16.mxu0 %v10257_v2  ;;  %v4885_v55 = vmul.f32 %v9576_v63, %v17332_v36  ;;  %v4845_v54 = vpop.f32.mrb[73].mxu1  ;;  %v17353_v53 = vld [vmem:[#allocation38_spill] sm:$0xff]  ;;  %v17354_v63 = vld [vmem:[#allocation37_spill] sm:$0xff] }
 0x808   : > { %v4884_v23 = vmul.f32 %v4845_v54, %v17334_v60  ;;  %10274 = vmatprep.subr.bf16.mxu1 %v10273_v40 }
 0x809   : > { %9628 = vmatmul.mubr.msk.f32.gmra.mrb[82].mxu0 %vm17329_vm15, %v10753_v16  ;;  %10276 = vmatpush3.bf16.msra.mxu1 %v10273_v40  ;;  %vm17341_vm15 = vmmov %vm17308_vm0  ;;  %v17352_v16 = vld [vmem:[#allocation31_spill] sm:$0xff] }
 0x80a   : > { %10260 = vmatpush3.bf16.msra.mxu0 %v10257_v2  ;;  %9630 = vmatprep.mubr.msk.f32.mxu0 %vm17331_vm11, %v10754_v5  ;;  %v10277_v29 = vpack.c.bf16 %v4885_v55, %v4884_v23  ;;  %v10761_v2 = vld [vmem:[%s11008_s16 + $0xa0] sm:$0xff]  ;;  %vm17342_vm11 = vmmov %vm17308_vm0 }
 0x80b   : > { %10262 = vmatprep.subr.bf16.mxu0 %v10261_v46 }
 0x80c   : > { %10278 = vmatprep.subr.bf16.mxu1 %v10277_v29 }
 0x80d   : > { %9631 = vmatmul.mubr.msk.f32.gmra.mrb[84].mxu0 %vm17333_vm3, %v10755_v48  ;;  %10280 = vmatpush3.bf16.msra.mxu1 %v10277_v29  ;;  %vm17343_vm3 = vmmov %vm17308_vm0 }
 0x80e   : > { %10264 = vmatpush3.bf16.msra.mxu0 %v10261_v46  ;;  %9649 = vmatprep.mubr.msk.f32.mxu0 %vm17335_vm12, %v10756_v37  ;;  %vm17344_vm12 = vmmov %vm17308_vm0  ;;  %v10770_v46 = vld [vmem:[%s11008_s16 + $0xf8] sm:$0xff]  ;;  %s10843_s16 = smov 8  }
 0x80f   : > { %10281 = vmatprep.subr.bf16.mxu0 %v17160_v9  ;;  %10293 = vmatprep.subr.bf16.mxu1 %v17160_v9  ;;  %v17355_v37 = vld [vmem:[#allocation34_spill] sm:$0xff] }
 0x810   : > { %9678 = vmatmul.mubr.msk.f32.vlgmr.msra.gmra.mrb[74].mxu1 %vm17339_vm10, %v10760_v42  ;;  %vm17348_vm10 = vmmov %vm17308_vm0 }
 0x811   : > { %9650 = vmatmul.mubr.msk.f32.vlgmr.msra.gmra.mrb[86].mxu0 %vm17336_vm6, %v10757_v19  ;;  %9680 = vmatprep.mubr.msk.f32.mxu1 %vm17308_vm0, %v10762_v38  ;;  %vm17345_vm6 = vmmov %vm17308_vm0  ;;  %v17356_v19 = vld [vmem:[#allocation33_spill] sm:$0xff] }
 0x812   : > { %9652 = vmatprep.mubr.msk.f32.mxu0 %vm17337_vm1, %v10758_v20  ;;  %vm17346_vm1 = vmmov %vm17308_vm0 }
 0x814   : > { %9681 = vmatmul.mubr.msk.f32.gmra.mrb[76].mxu1 %vm17342_vm11, %v10764_v21 }
 0x815   : > { %9653 = vmatmul.mubr.msk.f32.gmra.mrb[88].mxu0 %vm17338_vm5, %v10759_v59  ;;  %9683 = vmatprep.mubr.msk.f32.mxu1 %vm17344_vm12, %v10766_v6  ;;  %vm17347_vm5 = vmmov %vm17308_vm0  ;;  %v17357_v59 = vld [vmem:[#allocation40_spill] sm:$0xff] }
 0x816   : > { %9655 = vmatprep.mubr.msk.f32.mxu0 %vm17340_vm14, %v10761_v2  ;;  %vm17381_vm14 = vcmask 64512  }
 0x817   : > { %vm17382_vm0 = vmmov %vm17381_vm14 }
 0x818   : > { %9684 = vmatmul.mubr.msk.f32.gmra.mrb[78].mxu1 %vm17346_vm1, %v10768_v12  ;;  %vm17384_vm11 = vmmov %vm17382_vm0 }
 0x819   : > { %9656 = vmatmul.mubr.msk.f32.gmra.mrb[90].mxu0 %vm17341_vm15, %v10763_v56  ;;  %9686 = vmatprep.mubr.msk.f32.mxu1 %vm17347_vm5, %v10769_v22  ;;  %v17358_v56 = vld [vmem:[#allocation39_spill] sm:$0xff]  ;;  %vm17383_vm15 = vmmov %vm17382_vm0 }
 0x81a   : > { %9658 = vmatprep.mubr.msk.f32.mxu0 %vm17343_vm3, %v10765_v43  ;;  %vm17385_vm3 = vmmov %vm17382_vm0 }
 0x81b   : > { %vm17386_vm12 = vmmov %vm17382_vm0 }
 0x81c   : > { %9687 = vmatmul.mubr.msk.f32.gmra.mrb[80].mxu1 %vm17348_vm10, %v10770_v46  ;;  %vm17388_vm1 = vmmov %vm17382_vm0 }
 0x81d   : > { %9659 = vmatmul.mubr.msk.f32.gmra.mrb[92].mxu0 %vm17345_vm6, %v10767_v32  ;;  %9724 = vmatprep.mubr.msk.f32.mxu1 %vm17278_vm7, %v17161_v49  ;;  %vm17387_vm6 = vmmov %vm17382_vm0 }
 0x81e   : > { %9705 = vmatprep.mubr.msk.f32.mxu0 %vm17278_vm7, %v17161_v49  ;;  %vm17389_vm5 = vmmov %vm17382_vm0 }
 0x81f   : > { %vm17390_vm10 = vmmov %vm17382_vm0 }
 0x892   : > { %v12715_v1 = vpop.f32.mrb[66].mxu0 }
 0x893   : > { %v9482_v3 = vpop.f32.mrb[67].mxu0 }
 0x894   : > { %v17359_v3 = vld [vmem:[#allocation45_spill] sm:$0xff] }
 0x8b4   : > { %v12717_v31 = vpop.f32.mrb[68].mxu0 }
 0x8b5   : > { %v9520_v24 = vpop.f32.mrb[69].mxu0 }
 0x8c4   : > { %v9595_v62 = vpop.f32.mrb[70].mxu0 }
 0x8c5   : > { %v12720_v14 = vmul.f32 %v9595_v62, %v17349_v50  ;;  %v4952_v0 = vpop.f32.mrb[71].mxu0  ;;  %v17360_v50 = vld [vmem:[#allocation36_spill] sm:$0xff] }
 0x8c6   : > { %v12723_v44 = vmul.f32 %v4952_v0, %v17350_v52  ;;  %v17361_v52 = vld [vmem:[#allocation35_spill] sm:$0xff] }
 0x8c7   : > { %v5342_v30 = vmul.f32 %v12720_v14, %v12720_v14 }
 0x8c8   : > { %v5341_v51 = vmul.f32 %v12723_v44, %v12723_v44  ;;  %v9598_v7 = vpop.f32.mrb[72].mxu0 }
 0x8c9   : > { %v4962_v39 = vpop.f32.mrb[73].mxu0  ;;  %v12731_v45 = vmul.f32 %v9598_v7, %v17351_v61  ;;  %v17362_v7 = vld [vmem:[#allocation44_spill] sm:$0xff] }
 0x8ca   : > { %v10643_v15 = vpack.i.bf16 %v5342_v30, %v5341_v51  ;;  %v12734_v17 = vmul.f32 %v4962_v39, %v17352_v16  ;;  %v17363_v61 = vld [vmem:[#allocation48_spill] sm:$0xff] }
 0x8cb   : > { %v5344_v54 = vmul.f32 %v12731_v45, %v12731_v45 }
 0x8cc   : > { %10644 = vrot.lane.b32.xlu0 %v10643_v15, %s10843_s16  ;;  %v9601_v13 = vpop.f32.mrb[74].mxu0  ;;  %v5343_v23 = vmul.f32 %v12734_v17, %v12734_v17 }
 0x8cd   : > { %v4972_v58 = vpop.f32.mrb[75].mxu0  ;;  %v12751_v29 = vmul.f32 %v9601_v13, %v17355_v37 }
 0x8ce   : > { %v12754_v20 = vmul.f32 %v4972_v58, %v17356_v19  ;;  %v10653_v12 = vpack.i.bf16 %v5344_v54, %v5343_v23  ;;  %v17365_v23 = vld [vmem:[#allocation52_spill] sm:$0xff] }
 0x8cf   : > { %v5346_v22 = vmul.f32 %v12751_v29, %v12751_v29 }
 0x8d0   : > { %v9604_v25 = vpop.f32.mrb[76].mxu0  ;;  %v5345_v46 = vmul.f32 %v12754_v20, %v12754_v20 }
 0x8d1   : > { %v4982_v34 = vpop.f32.mrb[77].mxu0  ;;  %v12775_v0 = vmul.f32 %v9604_v25, %v17360_v50  ;;  %v17368_v50 = vld [vmem:[#allocation56_spill] sm:$0xff] }
 0x8d2   : > { %v12778_v30 = vmul.f32 %v4982_v34, %v17361_v52  ;;  %v10658_v25 = vpack.i.bf16 %v5346_v22, %v5345_v46 }
 0x8d3   : > { %v5348_v16 = vmul.f32 %v12775_v0, %v12775_v0 }
 0x8d4   : > { %v9623_v33 = vpop.f32.mrb[78].mxu0 }
 0x8d5   : > { %v12737_v5 = vmul.f32 %v9623_v33, %v17353_v53  ;;  %v5057_v40 = vpop.f32.mrb[79].mxu0  ;;  %v5347_v53 = vmul.f32 %v12778_v30, %v12778_v30 }
 0x8d6   : > { %v12740_v36 = vmul.f32 %v5057_v40, %v17354_v63  ;;  %v17364_v63 = vld [vmem:[#allocation41_spill] sm:$0xff] }
 0x8d7   : > { %v5350_v55 = vmul.f32 %v12737_v5, %v12737_v5 }
 0x8d8   : > { %v5349_v48 = vmul.f32 %v12740_v36, %v12740_v36  ;;  %v9626_v60 = vpop.f32.mrb[80].mxu0 }
 0x8d9   : > { %v12757_v42 = vmul.f32 %v9626_v60, %v17357_v59  ;;  %v5067_v2 = vpop.f32.mrb[81].mxu0  ;;  %v10663_v59 = vpack.i.bf16 %v5348_v16, %v5347_v53 }
 0x8da   : > { %v10648_v38 = vpack.i.bf16 %v5350_v55, %v5349_v48  ;;  %v12760_v21 = vmul.f32 %v5067_v2, %v17358_v56 }
 0x8db   : > { %v5352_v43 = vmul.f32 %v12757_v42, %v12757_v42 }
 0x8dc   : > { %v5351_v6 = vmul.f32 %v12760_v21, %v12760_v21  ;;  %10649 = vrot.lane.b32.xlu1 %v10648_v38, %s10843_s16  ;;  %v9629_v32 = vpop.f32.mrb[82].mxu0  ;;  %v17366_v38 = vld [vmem:[#allocation51_spill] sm:$0xff] }
 0x8dd   : > { %v12772_v24 = vmul.f32 %v9629_v32, %v17359_v3  ;;  %v5077_v62 = vpop.f32.mrb[83].mxu0 }
 0x8de   : > { %v10668_v51 = vpack.i.bf16 %v5352_v43, %v5351_v6  ;;  %v12781_v39 = vmul.f32 %v5077_v62, %v17362_v7 }
 0x8df   : > { %v5354_v15 = vmul.f32 %v12772_v24, %v12772_v24 }
 0x8e0   : > { %v5353_v13 = vmul.f32 %v12781_v39, %v12781_v39  ;;  %10654 = vrot.lane.b32.xlu1 %v10653_v12, %s10843_s16  ;;  %10669 = vrot.lane.b32.xlu0 %v10668_v51, %s10843_s16  ;;  %v9632_v58 = vpop.f32.mrb[84].mxu0  ;;  %v17367_v12 = vld [vmem:[#allocation55_spill] sm:$0xff]  ;;  %v17369_v51 = vld [vmem:[#allocation62_spill] sm:$0xff] }
 0x8e1   : > { %v12790_v33 = vmul.f32 %v9632_v58, %v17363_v61  ;;  %v5087_v34 = vpop.f32.mrb[85].mxu0  ;;  %v17370_v58 = vld [vmem:[#allocation61_spill] sm:$0xff] }
 0x8e2   : > { %v10673_v40 = vpack.i.bf16 %v5354_v15, %v5353_v13  ;;  %v12797_v55 = vmul.f32 %v5087_v34, %v17364_v63 }
 0x8e3   : > { %v5356_v54 = vmul.f32 %v12790_v33, %v12790_v33  ;;  %v9679_v3 = vpop.f32.mrb[74].mxu1 }
 0x8e4   : > { %v5355_v48 = vmul.f32 %v12797_v55, %v12797_v55  ;;  %10659 = vrot.lane.b32.xlu1 %v10658_v25, %s10843_s16  ;;  %10674 = vrot.lane.b32.xlu0 %v10673_v40, %s10843_s16  ;;  %v9651_v60 = vpop.f32.mrb[86].mxu0  ;;  %v12824_v7 = vmul.f32 %v9679_v3, %v17369_v51  ;;  %v5267_v15 = vpop.f32.mrb[75].mxu1  ;;  %v17371_v40 = vld [vmem:[#allocation58_spill] sm:$0xff]  ;;  %v17375_v51 = vld [vmem:[#allocation60_spill] sm:$0xff] }
 0x8e5   : > { %v12806_v37 = vmul.f32 %v9651_v60, %v17365_v23  ;;  %v5162_v19 = vpop.f32.mrb[87].mxu0  ;;  %v12829_v25 = vmul.f32 %v5267_v15, %v17370_v58  ;;  %v17372_v23 = vld [vmem:[#allocation57_spill] sm:$0xff] }
 0x8e6   : > { %v10678_v2 = vpack.i.bf16 %v5356_v54, %v5355_v48  ;;  %v12809_v56 = vmul.f32 %v5162_v19, %v17366_v38  ;;  %v5366_v34 = vmul.f32 %v12824_v7, %v12824_v7 }
 0x8e7   : > { %v5358_v43 = vmul.f32 %v12806_v37, %v12806_v37  ;;  %v5365_v53 = vmul.f32 %v12829_v25, %v12829_v25  ;;  %v9682_v48 = vpop.f32.mrb[76].mxu1 }
 0x8e8   : > { %v5357_v6 = vmul.f32 %v12809_v56, %v12809_v56  ;;  %10664 = vrot.lane.b32.xlu1 %v10663_v59, %s10843_s16  ;;  %10679 = vrot.lane.b32.xlu0 %v10678_v2, %s10843_s16  ;;  %v9654_v32 = vpop.f32.mrb[88].mxu0  ;;  %v17373_v59 = vld [vmem:[#allocation64_spill] sm:$0xff]  ;;  %v5277_v38 = vpop.f32.mrb[77].mxu1 }
 0x8e9   : > { %v12818_v22 = vmul.f32 %v9654_v32, %v17367_v12  ;;  %v5172_v46 = vpop.f32.mrb[89].mxu0  ;;  %v12845_v2 = vmul.f32 %v9682_v48, %v17373_v59  ;;  %v17374_v32 = vld [vmem:[#allocation63_spill] sm:$0xff] }
 0x8ea   : > { %v10683_v62 = vpack.i.bf16 %v5358_v43, %v5357_v6  ;;  %v12821_v52 = vmul.f32 %v5172_v46, %v17368_v50  ;;  %v10703_v43 = vpack.i.bf16 %v5366_v34, %v5365_v53  ;;  %v12850_v12 = vmul.f32 %v5277_v38, %v17374_v32  ;;  %v17376_v34 = vld [vmem:[#allocation59_spill] sm:$0xff]  ;;  %v17377_v53 = vld [vmem:[#allocation66_spill] sm:$0xff] }
 0x8eb   : > { %v5360_v13 = vmul.f32 %v12818_v22, %v12818_v22  ;;  %v5368_v3 = vmul.f32 %v12845_v2, %v12845_v2  ;;  %v9685_v58 = vpop.f32.mrb[78].mxu1 }
 0x8ec   : > { %v5359_v61 = vmul.f32 %v12821_v52, %v12821_v52  ;;  %10684 = vrot.lane.b32.xlu1 %v10683_v62, %s10843_s16  ;;  %v9657_v16 = vpop.f32.mrb[90].mxu0  ;;  %v5367_v50 = vmul.f32 %v12850_v12, %v12850_v12  ;;  %10704 = vrot.lane.b32.xlu0 %v10703_v43, %s10843_s16 }
 0x8ed   : > { %v12839_v63 = vmul.f32 %v9657_v16, %v17371_v40  ;;  %v5182_v54 = vpop.f32.mrb[91].mxu0  ;;  %v12867_v40 = vmul.f32 %v9685_v58, %v17377_v53 }
 0x8ee   : > { %v10688_v60 = vpack.i.bf16 %v5360_v13, %v5359_v61  ;;  %v12842_v19 = vmul.f32 %v5182_v54, %v17372_v23  ;;  %v5287_v54 = vpop.f32.mrb[79].mxu1  ;;  %v10708_v48 = vpack.i.bf16 %v5368_v3, %v5367_v50  ;;  %v17378_v23 = vld [vmem:[#allocation65_spill] sm:$0xff]  ;;  %v17379_v3 = vld [vmem:[#allocation68_spill] sm:$0xff] }
 0x8ef   : > { %v5362_v6 = vmul.f32 %v12839_v63, %v12839_v63  ;;  %v12872_v59 = vmul.f32 %v5287_v54, %v17378_v23  ;;  %v5370_v43 = vmul.f32 %v12867_v40, %v12867_v40  ;;  %v9688_v32 = vpop.f32.mrb[80].mxu1 }
 0x8f0   : > { %v5361_v46 = vmul.f32 %v12842_v19, %v12842_v19  ;;  %10689 = vrot.lane.b32.xlu1 %v10688_v60, %s10843_s16  ;;  %v9660_v62 = vpop.f32.mrb[92].mxu0  ;;  %10709 = vrot.lane.b32.xlu0 %v10708_v48, %s10843_s16  ;;  %v5297_v50 = vpop.f32.mrb[81].mxu1 }
 0x8f1   : > { %v12860_v15 = vmul.f32 %v9660_v62, %v17375_v51  ;;  %v5192_v13 = vpop.f32.mrb[93].mxu0  ;;  %v12883_v62 = vmul.f32 %v9688_v32, %v17379_v3 }
 0x8f2   : > { %v10693_v61 = vpack.i.bf16 %v5362_v6, %v5361_v46  ;;  %v12864_v16 = vmul.f32 %v5192_v13, %v17376_v34  ;;  %v5369_v6 = vmul.f32 %v12872_v59, %v12872_v59  ;;  %v17380_v13 = vld [vmem:[#allocation67_spill] sm:$0xff] }
 0x8f3   : > { %v5364_v60 = vmul.f32 %v12860_v15, %v12860_v15  ;;  %v12886_v58 = vmul.f32 %v5297_v50, %v17380_v13  ;;  %v5372_v34 = vmul.f32 %v12883_v62, %v12883_v62 }
 0x8f4   : > { %v5363_v38 = vmul.f32 %v12864_v16, %v12864_v16  ;;  %10694 = vrot.lane.b32.xlu1 %v10693_v61, %s10843_s16  ;;  %v10713_v51 = vpack.i.bf16 %v5370_v43, %v5369_v6 }
 0x8f5   : > { %v5371_v61 = vmul.f32 %v12886_v58, %v12886_v58 }
 0x8f6   : > { %v10698_v46 = vpack.i.bf16 %v5364_v60, %v5363_v38  ;;  %10714 = vrot.lane.b32.xlu0 %v10713_v51, %s10843_s16 }
 0x8f7   : > { %v10718_v53 = vpack.i.bf16 %v5372_v34, %v5371_v61 }
 0x8f8   : > { %10699 = vrot.lane.b32.xlu1 %v10698_v46, %s10843_s16 }
 0x8fa   : > { %10719 = vrot.lane.b32.xlu0 %v10718_v53, %s10843_s16 }
 0x93e   : > { %v10645_v54 = vpop.permute.xlu0 %10644 }
 0x93f   : > { %v10647_v48 = vunpack.i.h.bf16 %v10645_v54  ;;  %v10646_v60 = vunpack.i.l.bf16 %v10645_v54 }
 0x941   : > { %v5502_v23 = vsel %vm17381_vm14, %v12720_v14, %v10647_v48  ;;  %v5501_v38 = vsel %vm17382_vm0, %v12723_v44, %v10646_v60  ;;  %vm17391_vm14 = vmmov %vm17382_vm0 }
 0x942   : > { %v10282_v43 = vpack.c.bf16 %v5502_v23, %v5501_v38 }
 0x944   : > { %10283 = vmatpush3.bf16.msra.mxu0 %v10282_v43 }
 0x945   : > { %10284 = vmatprep.subr.bf16.mxu0 %v17160_v9 }
 0x94e   : > { %v10650_v6 = vpop.permute.xlu1 %10649 }
 0x94f   : > { %v10652_v32 = vunpack.i.h.bf16 %v10650_v6  ;;  %v10651_v46 = vunpack.i.l.bf16 %v10650_v6 }
 0x951   : > { %v5510_v3 = vsel %vm17383_vm15, %v12737_v5, %v10652_v32  ;;  %v5509_v50 = vsel %vm17384_vm11, %v12740_v36, %v10651_v46  ;;  %vm17392_vm15 = vmmov %vm17382_vm0 }
 0x952   : > { %v10655_v51 = vpop.permute.xlu1 %10654  ;;  %v10670_v13 = vpop.permute.xlu0 %10669  ;;  %v10294_v34 = vpack.c.bf16 %v5510_v3, %v5509_v50  ;;  %vm17393_vm11 = vmmov %vm17382_vm0 }
 0x953   : > { %v10657_v61 = vunpack.i.h.bf16 %v10655_v51  ;;  %v10656_v53 = vunpack.i.l.bf16 %v10655_v51  ;;  %v10672_v54 = vunpack.i.h.bf16 %v10670_v13  ;;  %v10671_v48 = vunpack.i.l.bf16 %v10670_v13 }
 0x954   : > { %10295 = vmatpush3.bf16.msra.mxu1 %v10294_v34 }
 0x955   : > { %v5504_v60 = vsel %vm17385_vm3, %v12731_v45, %v10657_v61  ;;  %v5503_v23 = vsel %vm17386_vm12, %v12734_v17, %v10656_v53  ;;  %v5512_v38 = vsel %vm17387_vm6, %v12757_v42, %v10672_v54  ;;  %v5511_v43 = vsel %vm17388_vm1, %v12760_v21, %v10671_v48  ;;  %10296 = vmatprep.subr.bf16.mxu1 %v17160_v9  ;;  %vm17394_vm3 = vmmov %vm17382_vm0 }
 0x956   : > { %v10660_v6 = vpop.permute.xlu1 %10659  ;;  %v10675_v32 = vpop.permute.xlu0 %10674  ;;  %v10285_v46 = vpack.c.bf16 %v5504_v60, %v5503_v23  ;;  %v10297_v3 = vpack.c.bf16 %v5512_v38, %v5511_v43  ;;  %vm17395_vm12 = vmmov %vm17382_vm0 }
 0x957   : > { %v10662_v50 = vunpack.i.h.bf16 %v10660_v6  ;;  %v10661_v51 = vunpack.i.l.bf16 %v10660_v6  ;;  %v10677_v13 = vunpack.i.h.bf16 %v10675_v32  ;;  %v10676_v34 = vunpack.i.l.bf16 %v10675_v32  ;;  %vm17396_vm6 = vmmov %vm17382_vm0 }
 0x958   : > { %10286 = vmatpush3.bf16.msra.mxu0 %v10285_v46  ;;  %10298 = vmatpush3.bf16.msra.mxu1 %v10297_v3  ;;  %vm17397_vm1 = vmmov %vm17382_vm0 }
 0x959   : > { %v5506_v61 = vsel %vm17389_vm5, %v12751_v29, %v10662_v50  ;;  %v5505_v53 = vsel %vm17390_vm10, %v12754_v20, %v10661_v51  ;;  %v5514_v54 = vsel %vm17391_vm14, %v12772_v24, %v10677_v13  ;;  %v5513_v48 = vsel %vm17382_vm0, %v12781_v39, %v10676_v34  ;;  %10287 = vmatprep.subr.bf16.mxu0 %v17160_v9  ;;  %vm17400_vm14 = vmmov %vm17382_vm0 }
 0x95a   : > { %v10665_v60 = vpop.permute.xlu1 %10664  ;;  %v10680_v23 = vpop.permute.xlu0 %10679  ;;  %10299 = vmatprep.subr.bf16.mxu1 %v17160_v9  ;;  %v10288_v38 = vpack.c.bf16 %v5506_v61, %v5505_v53  ;;  %v10300_v43 = vpack.c.bf16 %v5514_v54, %v5513_v48  ;;  %vm17398_vm5 = vcmask 523264  }
 0x95b   : > { %v10667_v6 = vunpack.i.h.bf16 %v10665_v60  ;;  %v10666_v32 = vunpack.i.l.bf16 %v10665_v60  ;;  %v10682_v46 = vunpack.i.h.bf16 %v10680_v23  ;;  %v10681_v3 = vunpack.i.l.bf16 %v10680_v23  ;;  %vm17399_vm10 = vmmov %vm17398_vm5 }
 0x95c   : > { %10289 = vmatpush3.bf16.msra.mxu0 %v10288_v38  ;;  %10301 = vmatpush3.bf16.msra.mxu1 %v10300_v43 }
 0x95d   : > { %v5508_v50 = vsel %vm17392_vm15, %v12775_v0, %v10667_v6  ;;  %v5507_v51 = vsel %vm17393_vm11, %v12778_v30, %v10666_v32  ;;  %v5516_v13 = vsel %vm17394_vm3, %v12790_v33, %v10682_v46  ;;  %v5515_v34 = vsel %vm17395_vm12, %v12797_v55, %v10681_v3  ;;  %10290 = vmatprep.subr.bf16.mxu0 %v17160_v9  ;;  %vm17401_vm15 = vmmov %vm17382_vm0 }
 0x95e   : > { %v10685_v61 = vpop.permute.xlu1 %10684  ;;  %10302 = vmatprep.subr.bf16.mxu1 %v17160_v9  ;;  %v10291_v53 = vpack.c.bf16 %v5508_v50, %v5507_v51  ;;  %v10303_v54 = vpack.c.bf16 %v5516_v13, %v5515_v34  ;;  %v10705_v3 = vpop.permute.xlu0 %10704  ;;  %vm17402_vm11 = vmmov %vm17382_vm0 }
 0x95f   : > { %v10687_v48 = vunpack.i.h.bf16 %v10685_v61  ;;  %v10686_v60 = vunpack.i.l.bf16 %v10685_v61  ;;  %v10707_v50 = vunpack.i.h.bf16 %v10705_v3  ;;  %v10706_v51 = vunpack.i.l.bf16 %v10705_v3  ;;  %vm17403_vm3 = vmmov %vm17382_vm0 }
 0x960   : > { %10292 = vmatpush3.bf16.msra.mxu0 %v10291_v53  ;;  %10304 = vmatpush3.bf16.msra.mxu1 %v10303_v54  ;;  %vm17404_vm12 = vmmov %vm17382_vm0 }
 0x961   : > { %v5518_v23 = vsel %vm17396_vm6, %v12806_v37, %v10687_v48  ;;  %v5517_v38 = vsel %vm17397_vm1, %v12809_v56, %v10686_v60  ;;  %10305 = vmatprep.subr.bf16.mxu0 %v17160_v9  ;;  %10317 = vmatprep.subr.bf16.mxu1 %v17160_v9  ;;  %v5526_v61 = vsel %vm17401_vm15, %v12824_v7, %v10707_v50  ;;  %vm17405_vm6 = vmmov %vm17382_vm0 }
 0x962   : > { %v10690_v43 = vpop.permute.xlu1 %10689  ;;  %v10306_v6 = vpack.c.bf16 %v5518_v23, %v5517_v38  ;;  %v5525_v53 = vsel %vm17402_vm11, %v12829_v25, %v10706_v51  ;;  %v10710_v38 = vpop.permute.xlu0 %10709  ;;  %vm17406_vm1 = vmmov %vm17382_vm0 }
 0x963   : > { %v10692_v32 = vunpack.i.h.bf16 %v10690_v43  ;;  %v10691_v46 = vunpack.i.l.bf16 %v10690_v43  ;;  %9706 = vmatmul.mubr.msk.f32.vlgmr.msra.gmra.mrb[94].mxu0 %vm17398_vm5, %v17162_v41  ;;  %9725 = vmatmul.mubr.msk.f32.vlgmr.msra.gmra.mrb[82].mxu1 %vm17399_vm10, %v17162_v41  ;;  %v10318_v43 = vpack.c.bf16 %v5526_v61, %v5525_v53  ;;  %vm17407_vm5 = vmmov %vm17382_vm0 }
 0x964   : > { %10307 = vmatpush3.bf16.msra.mxu0 %v10306_v6  ;;  %9743 = vmatprep.mubr.msk.f32.mxu0 %vm17278_vm7, %v17161_v49  ;;  %v10712_v6 = vunpack.i.h.bf16 %v10710_v38  ;;  %vm17408_vm10 = vmmov %vm17382_vm0 }
 0x965   : > { %v5520_v13 = vsel %vm17400_vm14, %v12818_v22, %v10692_v32  ;;  %v5519_v34 = vsel %vm17382_vm0, %v12821_v52, %v10691_v46  ;;  %10308 = vmatprep.subr.bf16.mxu0 %v17160_v9  ;;  %9762 = vmatprep.mubr.msk.f32.mxu1 %vm17278_vm7, %v17161_v49  ;;  %v10711_v32 = vunpack.i.l.bf16 %v10710_v38  ;;  %vm17409_vm14 = vmmov %vm17382_vm0 }
 0x966   : > { %v10695_v54 = vpop.permute.xlu1 %10694  ;;  %v10309_v48 = vpack.c.bf16 %v5520_v13, %v5519_v34  ;;  %10319 = vmatpush3.bf16.msra.mxu1 %v10318_v43  ;;  %v5528_v50 = vsel %vm17405_vm6, %v12845_v2, %v10712_v6  ;;  %vm17410_vm15 = vmmov %vm17382_vm0 }
 0x967   : > { %v10697_v60 = vunpack.i.h.bf16 %v10695_v54  ;;  %v10696_v23 = vunpack.i.l.bf16 %v10695_v54  ;;  %v5527_v51 = vsel %vm17406_vm1, %v12850_v12, %v10711_v32  ;;  %10320 = vmatprep.subr.bf16.mxu1 %v17160_v9  ;;  %vm17411_vm11 = vmmov %vm17382_vm0 }
 0x968   : > { %10310 = vmatpush3.bf16.msra.mxu0 %v10309_v48  ;;  %v10715_v54 = vpop.permute.xlu0 %10714  ;;  %v10321_v48 = vpack.c.bf16 %v5528_v50, %v5527_v51 }
 0x969   : > { %v5522_v46 = vsel %vm17403_vm3, %v12839_v63, %v10697_v60  ;;  %v5521_v3 = vsel %vm17404_vm12, %v12842_v19, %v10696_v23  ;;  %10311 = vmatprep.subr.bf16.mxu0 %v17160_v9  ;;  %v10717_v60 = vunpack.i.h.bf16 %v10715_v54  ;;  %v10716_v38 = vunpack.i.l.bf16 %v10715_v54  ;;  %v12992_v54 = vld [vmem:[%s16936_s5 + $0x2] sm:$0x1] }
 0x96a   : > { %v10700_v13 = vpop.permute.xlu1 %10699  ;;  %v10312_v34 = vpack.c.bf16 %v5522_v46, %v5521_v3  ;;  %10322 = vmatpush3.bf16.msra.mxu1 %v10321_v48  ;;  %vm17412_vm3 = vcmask 523264   ;;  %vm17413_vm12 = vcmask 7168   ;;  %v5817_v48 = vmul.f32 2.0, %v12992_v54 }
 0x96b   : > { %v10702_v61 = vunpack.i.h.bf16 %v10700_v13  ;;  %v10701_v53 = vunpack.i.l.bf16 %v10700_v13  ;;  %v5530_v6 = vsel %vm17409_vm14, %v12867_v40, %v10717_v60  ;;  %v5529_v32 = vsel %vm17382_vm0, %v12872_v59, %v10716_v38  ;;  %10323 = vmatprep.subr.bf16.mxu1 %v17160_v9  ;;  %vm17414_vm6 = vmmov %vm17412_vm3 }
 0x96c   : > { %10313 = vmatpush3.bf16.msra.mxu0 %v10312_v34  ;;  %v10720_v3 = vpop.permute.xlu0 %10719  ;;  %v10324_v50 = vpack.c.bf16 %v5530_v6, %v5529_v32  ;;  %vm17415_vm1 = vmmov %vm17413_vm12  ;;  %v5818_v60 = vmul.f32 %v12992_v54, %v12992_v54 }
 0x96d   : > { %v5524_v23 = vsel %vm17407_vm5, %v12860_v15, %v10702_v61  ;;  %v5523_v43 = vsel %vm17408_vm10, %v12864_v16, %v10701_v53  ;;  %10314 = vmatprep.subr.bf16.mxu0 %v17160_v9  ;;  %v10722_v51 = vunpack.i.h.bf16 %v10720_v3  ;;  %v10721_v13 = vunpack.i.l.bf16 %v10720_v3 }
 0x96e   : > { %v10315_v46 = vpack.c.bf16 %v5524_v23, %v5523_v43  ;;  %10325 = vmatpush3.bf16.msra.mxu1 %v10324_v50  ;;  %v5819_v6 = vsub.f32 %v5817_v48, %v5818_v60 }
 0x96f   : > { %v5532_v34 = vsel %vm17410_vm15, %v12883_v62, %v10722_v51  ;;  %v5531_v61 = vsel %vm17411_vm11, %v12886_v58, %v10721_v13  ;;  %10326 = vmatprep.subr.bf16.mxu1 %v17160_v9 }
 0x970   : > { %10316 = vmatpush3.bf16.msra.mxu0 %v10315_v46  ;;  %v10327_v53 = vpack.c.bf16 %v5532_v34, %v5531_v61 }
 0x972   : > { %10328 = vmatpush3.bf16.msra.mxu1 %v10327_v53 }
 0x973   : > { %9744 = vmatmul.mubr.msk.f32.vlgmr.msra.gmra.mrb[96].mxu0 %vm17412_vm3, %v17162_v41  ;;  %vm17417_vm3 = vmmov %vm17411_vm11 }
 0x974   : > { %9781 = vmatprep.mubr.msk.f32.mxu0 %vm17413_vm12, %v17162_v41 }
 0x975   : > { %9763 = vmatmul.mubr.msk.f32.vlgmr.msra.gmra.mrb[84].mxu1 %vm17414_vm6, %v17162_v41 }
 0x976   : > { %9809 = vmatprep.mubr.msk.f32.mxu1 %vm17415_vm1, %v17162_v41  ;;  %vm17418_vm1 = vmmov %vm17417_vm3 }
 0xa36   : > { %v5599_v38 = vpop.f32.mrb[94].mxu0  ;;  %v5669_v23 = vpop.f32.mrb[82].mxu1 }
 0xa37   : > { %v5813_v43 = vmul.f32 0.015625, %v5599_v38  ;;  %v5814_v32 = vmul.f32 0.015625, %v5669_v23  ;;  %v9707_v46 = vpop.f32.mrb[95].mxu0  ;;  %v9726_v3 = vpop.f32.mrb[83].mxu1 }
 0xa39   : > { %v5820_v50 = vmul.f32 %v5813_v43, %v5813_v43  ;;  %v5821_v51 = vmul.f32 %v5814_v32, %v5814_v32 }
 0xa3b   : > { %v5824_v13 = vmul.f32 %v5820_v50, %v5819_v6  ;;  %v5825_v34 = vmul.f32 %v5821_v51, %v5819_v6 }
 0xa3d   : > { %5834 = vrot.lane.b32.xlu0 %v5825_v34, %s10843_s16  ;;  %5832 = vrot.lane.b32.xlu1 %v5824_v13, %s10843_s16 }
 0xa46   : > { %v5739_v61 = vpop.f32.mrb[96].mxu0 }
 0xa47   : > { %v5815_v53 = vmul.f32 0.015625, %v5739_v61  ;;  %v9745_v18 = vpop.f32.mrb[97].mxu0  ;;  %v17416_v61 = vld [vmem:[#allocation70_spill] sm:$0xff] }
 0xa48   : > { %v5809_v11 = vpop.f32.mrb[84].mxu1 }
 0xa49   : > { %v5822_v27 = vmul.f32 %v5815_v53, %v5815_v53  ;;  %v5816_v47 = vmul.f32 0.015625, %v5809_v11  ;;  %v9764_v38 = vpop.f32.mrb[85].mxu1 }
 0xa4b   : > { %v5826_v28 = vmul.f32 %v5822_v27, %v5819_v6  ;;  %v5823_v48 = vmul.f32 %v5816_v47, %v5816_v47 }
 0xa4d   : > { %5836 = vrot.lane.b32.xlu1 %v5826_v28, %s10843_s16  ;;  %v5827_v60 = vmul.f32 %v5823_v48, %v5819_v6 }
 0xa4f   : > { %5838 = vrot.lane.b32.xlu0 %v5827_v60, %s10843_s16 }
 0xaaf   : > { %v5835_v23 = vpop.permute.xlu0 %5834  ;;  %v5833_v46 = vpop.permute.xlu1 %5832 }
 0xab0   : > { %v5845_v3 = vsub.f32 %v5814_v32, %v5835_v23  ;;  %v5844_v50 = vsub.f32 %v5813_v43, %v5833_v46 }
 0xab2   : > { %v5937_v51 = vadd.f32 1e-05, %v5845_v3  ;;  %v5936_v13 = vadd.f32 1e-05, %v5844_v50 }
 0xab4   : > { %10731 = vrsqrt.f32 %v5937_v51 }
 0xab5   : > { %10733 = vrsqrt.f32 %v5936_v13  ;;  %v5848_v13 = vmul.f32 %v5813_v43, %v12992_v54 }
 0xabe   : > { %v10732_v18 = vpop.eup %10731 }
 0xabf   : > { %v10734_v34 = vpop.eup %10733  ;;  %v5837_v27 = vpop.permute.xlu1 %5836  ;;  %v5951_v11 = vrot.slane %v10732_v18, %v17416_v61  ;;  %v5849_v18 = vmul.f32 %v5814_v32, %v12992_v54 }
 0xac0   : > { %v5846_v38 = vsub.f32 %v5815_v53, %v5837_v27  ;;  %v5947_v28 = vrot.slane %v10734_v34, %v17416_v61  ;;  %v5855_v34 = vrot.slane %v5848_v13, %v17416_v61 }
 0xac1   : > { %5966 = vrot.lane.b32.xlu0 %v5951_v11, %s10844_s10  ;;  %v5839_v48 = vpop.permute.xlu0 %5838  ;;  %v5859_v27 = vrot.slane %v5849_v18, %v17416_v61 }
 0xac2   : > { %v5938_v6 = vadd.f32 1e-05, %v5846_v38  ;;  %5964 = vrot.lane.b32.xlu1 %v5947_v28, %s10844_s10  ;;  %v5847_v60 = vsub.f32 %v5816_v47, %v5839_v48  ;;  %v5869_v11 = vsub.f32 %v12720_v14, %v5855_v34  ;;  %v5850_v38 = vmul.f32 %v5815_v53, %v12992_v54  ;;  %v13018_v28 = vld [vmem:[%s16936_s5] ss:$0 sm:$0xff] }
 0xac3   : > { %v5876_v48 = vsub.f32 %v12740_v36, %v5859_v27  ;;  %v5877_v43 = vsub.f32 %v12737_v5, %v5859_v27  ;;  %v5870_v32 = vsub.f32 %v12734_v17, %v5855_v34  ;;  %v5851_v14 = vmul.f32 %v5816_v47, %v12992_v54 }
 0xac4   : > { %10735 = vrsqrt.f32 %v5938_v6  ;;  %v5939_v23 = vadd.f32 1e-05, %v5847_v60  ;;  %v5868_v6 = vsub.f32 %v12723_v44, %v5855_v34  ;;  %v5871_v60 = vsub.f32 %v12731_v45, %v5855_v34 }
 0xac5   : > { %v5905_v53 = vmul.f32 %v13018_v28, %v5869_v11  ;;  %v5863_v44 = vrot.slane %v5850_v38, %v17416_v61  ;;  %v5912_v5 = vmul.f32 %v13018_v28, %v5876_v48  ;;  %v5873_v17 = vsub.f32 %v12751_v29, %v5855_v34 }
 0xac6   : > { %10737 = vrsqrt.f32 %v5939_v23  ;;  %v5878_v23 = vsub.f32 %v12760_v21, %v5859_v27  ;;  %v5904_v36 = vmul.f32 %v13018_v28, %v5868_v6  ;;  %v5913_v45 = vmul.f32 %v13018_v28, %v5877_v43 }
 0xac7   : > { %v5906_v21 = vmul.f32 %v13018_v28, %v5870_v32  ;;  %v5907_v47 = vmul.f32 %v13018_v28, %v5871_v60  ;;  %v13043_v13 = vrot.slane %v5851_v14, %v17416_v61  ;;  %v5882_v11 = vsub.f32 %v12797_v55, %v5859_v27 }
 0xac8   : > { %v5914_v54 = vmul.f32 %v13018_v28, %v5878_v23  ;;  %v13051_v38 = vmul.f32 %v13018_v28, %v5873_v17  ;;  %v5888_v6 = vsub.f32 %v12842_v19, %v5863_v44 }
 0xac9   : > { %v13079_v19 = vmul.f32 %v13018_v28, %v5882_v11  ;;  %v5895_v60 = vsub.f32 %v12845_v2, %v13043_v13  ;;  %v5894_v23 = vsub.f32 %v12850_v12, %v13043_v13  ;;  %v5897_v14 = vsub.f32 %v12867_v40, %v13043_v13 }
 0xace   : > { %v10736_v46 = vpop.eup %10735 }
 0xacf   : > { %v5955_v3 = vrot.slane %v10736_v46, %v17416_v61  ;;  %v5879_v46 = vsub.f32 %v12757_v42, %v5859_v27  ;;  %v5880_v42 = vsub.f32 %v12781_v39, %v5859_v27  ;;  %v5883_v39 = vsub.f32 %v12790_v33, %v5859_v27 }
 0xad0   : > { %v10738_v50 = vpop.eup %10737 }
 0xad1   : > { %5968 = vrot.lane.b32.xlu1 %v5955_v3, %s10844_s10  ;;  %v5959_v51 = vrot.slane %v10738_v50, %v17416_v61  ;;  %v5872_v3 = vsub.f32 %v12754_v20, %v5855_v34  ;;  %v5881_v20 = vsub.f32 %v12772_v24, %v5859_v27  ;;  %v5874_v50 = vsub.f32 %v12778_v30, %v5855_v34 }
 0xad2   : > { %v5915_v29 = vmul.f32 %v13018_v28, %v5879_v46  ;;  %v5885_v24 = vsub.f32 %v12806_v37, %v5863_v44  ;;  %v5884_v30 = vsub.f32 %v12809_v56, %v5863_v44  ;;  %v5886_v61 = vsub.f32 %v12821_v52, %v5863_v44 }
 0xad3   : > { %5970 = vrot.lane.b32.xlu0 %v5959_v51, %s10844_s10  ;;  %v5875_v51 = vsub.f32 %v12775_v0, %v5855_v34  ;;  %v13047_v18 = vmul.f32 %v13018_v28, %v5872_v3  ;;  %v5887_v0 = vsub.f32 %v12818_v22, %v5863_v44  ;;  %v5889_v34 = vsub.f32 %v12839_v63, %v5863_v44 }
 0xad4   : > { %v13061_v48 = vmul.f32 %v13018_v28, %v5880_v42  ;;  %v13064_v55 = vmul.f32 %v13018_v28, %v5881_v20  ;;  %v13067_v33 = vmul.f32 %v13018_v28, %v5874_v50  ;;  %v5893_v56 = vsub.f32 %v12824_v7, %v13043_v13 }
 0xad5   : > { %v13070_v37 = vmul.f32 %v13018_v28, %v5875_v51  ;;  %v5892_v22 = vsub.f32 %v12829_v25, %v13043_v13  ;;  %v5891_v52 = vsub.f32 %v12860_v15, %v5863_v44  ;;  %v5890_v63 = vsub.f32 %v12864_v16, %v5863_v44  ;;  %v13115_v44 = vld [vmem:[%s16936_s5 + $0x1] ss:$0 sm:$0xff] }
 0xad6   : > { %v13082_v27 = vmul.f32 %v13018_v28, %v5883_v39  ;;  %v13085_v43 = vmul.f32 %v13018_v28, %v5885_v24  ;;  %v13088_v32 = vmul.f32 %v13018_v28, %v5884_v30  ;;  %v13091_v7 = vmul.f32 %v13018_v28, %v5887_v0 }
 0xad7   : > { %v13094_v25 = vmul.f32 %v13018_v28, %v5886_v61  ;;  %v13097_v15 = vmul.f32 %v13018_v28, %v5889_v34  ;;  %v13100_v16 = vmul.f32 %v13018_v28, %v5888_v6  ;;  %v5896_v46 = vsub.f32 %v12872_v59, %v13043_v13 }
 0xad8   : > { %v13118_v17 = vmul.f32 %v13018_v28, %v5893_v56  ;;  %v13121_v2 = vmul.f32 %v13018_v28, %v5892_v22  ;;  %v13124_v12 = vmul.f32 %v13018_v28, %v5891_v52  ;;  %v13127_v42 = vmul.f32 %v13018_v28, %v5890_v63 }
 0xb33   : > { %v13110_v3 = vpop.permute.xlu0 %5966 }
 0xb34   : > { %v13129_v20 = vpop.permute.xlu1 %5964  ;;  %v5984_v50 = vmul.f32 %v13110_v3, %v5912_v5  ;;  %v5985_v51 = vmul.f32 %v13110_v3, %v5913_v45  ;;  %v5986_v11 = vmul.f32 %v13110_v3, %v5914_v54  ;;  %v5987_v39 = vmul.f32 %v13110_v3, %v5915_v29 }
 0xb35   : > { %v5977_v24 = vmul.f32 %v13129_v20, %v5905_v53  ;;  %v5976_v30 = vmul.f32 %v13129_v20, %v5904_v36  ;;  %v5978_v0 = vmul.f32 %v13129_v20, %v5906_v21  ;;  %v5979_v61 = vmul.f32 %v13129_v20, %v5907_v47 }
 0xb36   : > { %v6020_v34 = vadd.f32 %v13115_v44, %v5984_v50  ;;  %v6021_v6 = vadd.f32 %v13115_v44, %v5985_v51  ;;  %v6022_v5 = vadd.f32 %v13115_v44, %v5986_v11  ;;  %v6023_v45 = vadd.f32 %v13115_v44, %v5987_v39 }
 0xb37   : > { %v6013_v54 = vadd.f32 %v13115_v44, %v5977_v24  ;;  %v6012_v29 = vadd.f32 %v13115_v44, %v5976_v30  ;;  %v6014_v53 = vadd.f32 %v13115_v44, %v5978_v0  ;;  %v6015_v36 = vadd.f32 %v13115_v44, %v5979_v61 }
 0xb38   : > { %vm6052_vm5 = vcmp.gt.f32.partialorder %v6020_v34, 0.0  ;;  %v6084_v21 = vmul.f32 0.01, %v6020_v34  ;;  %vm6053_vm10 = vcmp.gt.f32.partialorder %v6021_v6, 0.0  ;;  %v6085_v47 = vmul.f32 0.01, %v6021_v6 }
 0xb39   : > { %vm6045_vm14 = vcmp.gt.f32.partialorder %v6013_v54, 0.0  ;;  %v6077_v56 = vmul.f32 0.01, %v6013_v54  ;;  %vm6044_vm0 = vcmp.gt.f32.partialorder %v6012_v29, 0.0  ;;  %v6076_v22 = vmul.f32 0.01, %v6012_v29 }
 0xb3a   : > { %v13147_v52 = vsel %vm6052_vm5, %v6020_v34, %v6084_v21  ;;  %v13149_v63 = vsel %vm6053_vm10, %v6021_v6, %v6085_v47  ;;  %vm6046_vm15 = vcmp.gt.f32.partialorder %v6014_v53, 0.0  ;;  %v6078_v50 = vmul.f32 0.01, %v6014_v53  ;;  %vm17419_vm10 = vmmov %vm17418_vm1 }
 0xb3b   : > { %v13151_v51 = vsel %vm6045_vm14, %v6013_v54, %v6077_v56  ;;  %v13153_v11 = vsel %vm6044_vm0, %v6012_v29, %v6076_v22  ;;  %v13156_v39 = vmul.f32 %v13018_v28, %v5895_v60  ;;  %v13159_v24 = vmul.f32 %v13018_v28, %v5894_v23  ;;  %vm17420_vm14 = vmmov %vm17418_vm1 }
 0xb3c   : > { %v6143_v30 = vsel %vm17411_vm11, %v13151_v51, -inf  ;;  %v6140_v0 = vsel %vm17417_vm3, %v13153_v11, -inf  ;;  %v13169_v6 = vsel %vm6046_vm15, %v6014_v53, %v6078_v50  ;;  %vm6047_vm12 = vcmp.gt.f32.partialorder %v6015_v36, 0.0  ;;  %vm17421_vm0 = vmmov %vm17418_vm1 }
 0xb3d   : > { %6144 = vmax.xlane.f32.xlu0 %v6143_v30  ;;  %6141 = vmax.xlane.f32.xlu1 %v6140_v0  ;;  %v6079_v60 = vmul.f32 0.01, %v6015_v36  ;;  %vm6054_vm6 = vcmp.gt.f32.partialorder %v6022_v5, 0.0  ;;  %v6164_v23 = vsel %vm17418_vm1, %v13147_v52, -inf  ;;  %v6086_v54 = vmul.f32 0.01, %v6022_v5 }
 0xb3e   : > { %vm6055_vm5 = vcmp.gt.f32.partialorder %v6023_v45, 0.0  ;;  %v6087_v29 = vmul.f32 0.01, %v6023_v45  ;;  %v5980_v47 = vmul.f32 %v13129_v20, %v13047_v18  ;;  %v5981_v56 = vmul.f32 %v13129_v20, %v13051_v38 }
 0xb3f   : > { %v13173_v21 = vsel %vm6047_vm12, %v6015_v36, %v6079_v60  ;;  %v5988_v53 = vmul.f32 %v13110_v3, %v13061_v48  ;;  %v6167_v22 = vsel %vm17419_vm10, %v13149_v63, -inf  ;;  %v13185_v30 = vsel %vm6054_vm6, %v6022_v5, %v6086_v54  ;;  %vm17422_vm12 = vmmov %vm17421_vm0 }
 0xb40   : > { %v13187_v0 = vsel %vm6055_vm5, %v6023_v45, %v6087_v29  ;;  %v6146_v18 = vsel %vm17420_vm14, %v13169_v6, -inf  ;;  %v6149_v38 = vsel %vm17421_vm0, %v13173_v21, -inf  ;;  %v6016_v36 = vadd.f32 %v13115_v44, %v5980_v47  ;;  %vm17423_vm6 = vmmov %vm17421_vm0 }
 0xb41   : > { %6165 = vmax.xlane.f32.xlu0 %v6164_v23  ;;  %6168 = vmax.xlane.f32.xlu1 %v6167_v22  ;;  %v6017_v60 = vadd.f32 %v13115_v44, %v5981_v56  ;;  %v6024_v5 = vadd.f32 %v13115_v44, %v5988_v53  ;;  %v5989_v45 = vmul.f32 %v13110_v3, %v13064_v55  ;;  %vm17424_vm14 = vmmov %vm17421_vm0 }
 0xb42   : > { %v5982_v23 = vmul.f32 %v13129_v20, %v13067_v33  ;;  %vm6048_vm15 = vcmp.gt.f32.partialorder %v6016_v36, 0.0  ;;  %v6080_v54 = vmul.f32 0.01, %v6016_v36  ;;  %v5983_v29 = vmul.f32 %v13129_v20, %v13070_v37 }
 0xb43   : > { %v5990_v22 = vmul.f32 %v13110_v3, %v13079_v19  ;;  %vm6049_vm11 = vcmp.gt.f32.partialorder %v6017_v60, 0.0  ;;  %v6081_v47 = vmul.f32 0.01, %v6017_v60  ;;  %vm6056_vm3 = vcmp.gt.f32.partialorder %v6024_v5, 0.0  ;;  %v13210_v48 = vpop.permute.xlu1 %5968 }
 0xb44   : > { %v6088_v56 = vmul.f32 0.01, %v6024_v5  ;;  %v13206_v53 = vsel %vm6048_vm15, %v6016_v36, %v6080_v54  ;;  %v6025_v55 = vadd.f32 %v13115_v44, %v5989_v45  ;;  %v6018_v33 = vadd.f32 %v13115_v44, %v5982_v23 }
 0xb45   : > { %6147 = vmax.xlane.f32.xlu0 %v6146_v18  ;;  %6150 = vmax.xlane.f32.xlu1 %v6149_v38  ;;  %v6170_v37 = vsel %vm17422_vm12, %v13185_v30, -inf  ;;  %v13214_v20 = vsel %vm6049_vm11, %v6017_v60, %v6081_v47  ;;  %v6019_v19 = vadd.f32 %v13115_v44, %v5983_v29  ;;  %v13221_v18 = vmul.f32 %v13018_v28, %v5897_v14  ;;  %v13229_v23 = vpop.permute.xlu0 %5970  ;;  %vm17425_vm11 = vmmov %vm17421_vm0 }
 0xb46   : > { %v6173_v38 = vsel %vm17423_vm6, %v13187_v0, -inf  ;;  %v13227_v45 = vsel %vm6056_vm3, %v6024_v5, %v6088_v56  ;;  %vm6057_vm1 = vcmp.gt.f32.partialorder %v6025_v55, 0.0  ;;  %v6089_v60 = vmul.f32 0.01, %v6025_v55  ;;  %vm17426_vm3 = vmmov %vm17421_vm0 }
 0xb47   : > { %vm6050_vm5 = vcmp.gt.f32.partialorder %v6018_v33, 0.0  ;;  %v6082_v54 = vmul.f32 0.01, %v6018_v33  ;;  %vm6051_vm10 = vcmp.gt.f32.partialorder %v6019_v19, 0.0  ;;  %v6083_v40 = vmul.f32 0.01, %v6019_v19 }
 0xb48   : > { %v6026_v14 = vadd.f32 %v13115_v44, %v5990_v22  ;;  %v5991_v29 = vmul.f32 %v13110_v3, %v13082_v27  ;;  %v5993_v47 = vmul.f32 %v13210_v48, %v13085_v43  ;;  %v13236_v5 = vsel %vm6057_vm1, %v6025_v55, %v6089_v60 }
 0xb49   : > { %6171 = vmax.xlane.f32.xlu0 %v6170_v37  ;;  %6174 = vmax.xlane.f32.xlu1 %v6173_v38  ;;  %v13238_v56 = vsel %vm6050_vm5, %v6018_v33, %v6082_v54  ;;  %v5992_v36 = vmul.f32 %v13210_v48, %v13088_v32  ;;  %v6001_v37 = vmul.f32 %v13229_v23, %v13118_v17  ;;  %v6152_v38 = vsel %vm17424_vm14, %v13206_v53, -inf  ;;  %vm17428_vm14 = vmmov %vm17421_vm0 }
 0xb4a   : > { %v13248_v27 = vsel %vm6051_vm10, %v6019_v19, %v6083_v40  ;;  %v13254_v43 = vmul.f32 %v13018_v28, %v5896_v46  ;;  %v6155_v32 = vsel %vm17421_vm0, %v13214_v20, -inf  ;;  %vm6058_vm15 = vcmp.gt.f32.partialorder %v6026_v14, 0.0  ;;  %vm17427_vm10 = vmmov %vm17421_vm0 }
 0xb4b   : > { %v6090_v17 = vmul.f32 0.01, %v6026_v14  ;;  %v6176_v55 = vsel %vm17425_vm11, %v13227_v45, -inf  ;;  %v6027_v33 = vadd.f32 %v13115_v44, %v5991_v29  ;;  %v6029_v59 = vadd.f32 %v13115_v44, %v5993_v47  ;;  %vm17430_vm11 = vmmov %vm17426_vm3 }
 0xb4c   : > { %v6028_v46 = vadd.f32 %v13115_v44, %v5992_v36  ;;  %v6179_v19 = vsel %vm17426_vm3, %v13236_v5, -inf  ;;  %v6037_v60 = vadd.f32 %v13115_v44, %v6001_v37  ;;  %v6000_v54 = vmul.f32 %v13229_v23, %v13121_v2 }
 0xb4d   : > { %6153 = vmax.xlane.f32.xlu0 %v6152_v38  ;;  %6156 = vmax.xlane.f32.xlu1 %v6155_v32  ;;  %v5995_v40 = vmul.f32 %v13210_v48, %v13091_v7  ;;  %v13272_v38 = vsel %vm6058_vm15, %v6026_v14, %v6090_v17  ;;  %vm6059_vm12 = vcmp.gt.f32.partialorder %v6027_v33, 0.0  ;;  %v6091_v32 = vmul.f32 0.01, %v6027_v33 }
 0xb4e   : > { %vm6061_vm6 = vcmp.gt.f32.partialorder %v6029_v59, 0.0  ;;  %v6093_v29 = vmul.f32 0.01, %v6029_v59  ;;  %vm6060_vm1 = vcmp.gt.f32.partialorder %v6028_v46, 0.0  ;;  %v6092_v47 = vmul.f32 0.01, %v6028_v46 }
 0xb4f   : > { %vm6069_vm5 = vcmp.gt.f32.partialorder %v6037_v60, 0.0  ;;  %v13274_v36 = vsel %vm6059_vm12, %v6027_v33, %v6091_v32  ;;  %v6101_v37 = vmul.f32 0.01, %v6037_v60  ;;  %v6036_v22 = vadd.f32 %v13115_v44, %v6000_v54 }
 0xb50   : > { %v6031_v2 = vadd.f32 %v13115_v44, %v5995_v40  ;;  %v13280_v14 = vsel %vm6061_vm6, %v6029_v59, %v6093_v29  ;;  %v13282_v17 = vsel %vm6060_vm1, %v6028_v46, %v6092_v47  ;;  %v5899_v3 = vsub.f32 %v12883_v62, %v13043_v13 }
 0xb51   : > { %6177 = vmax.xlane.f32.xlu0 %v6176_v55  ;;  %6180 = vmax.xlane.f32.xlu1 %v6179_v19  ;;  %v6158_v55 = vsel %vm17427_vm10, %v13238_v56, -inf  ;;  %v6161_v33 = vsel %vm17428_vm14, %v13248_v27, -inf  ;;  %v5898_v54 = vsub.f32 %v12886_v58, %v13043_v13  ;;  %v13294_v40 = vsel %vm6069_vm5, %v6037_v60, %v6101_v37  ;;  %vm17431_vm5 = vmmov %vm17426_vm3 }
 0xb52   : > { %vm6068_vm0 = vcmp.gt.f32.partialorder %v6036_v22, 0.0  ;;  %v6100_v59 = vmul.f32 0.01, %v6036_v22  ;;  %vm6063_vm15 = vcmp.gt.f32.partialorder %v6031_v2, 0.0  ;;  %v6095_v62 = vmul.f32 0.01, %v6031_v2  ;;  %vm17432_vm14 = vmmov %vm17426_vm3 }
 0xb53   : > { %v5994_v46 = vmul.f32 %v13210_v48, %v13094_v25  ;;  %v6003_v32 = vmul.f32 %v13229_v23, %v13156_v39  ;;  %v6002_v29 = vmul.f32 %v13229_v23, %v13159_v24  ;;  %v5997_v58 = vmul.f32 %v13210_v48, %v13097_v15 }
 0xb54   : > { %v13302_v47 = vsel %vm6068_vm0, %v6036_v22, %v6100_v59  ;;  %v5996_v13 = vmul.f32 %v13210_v48, %v13100_v16  ;;  %v6005_v60 = vmul.f32 %v13229_v23, %v13221_v18  ;;  %v6182_v25 = vsel %vm17430_vm11, %v13272_v38, -inf  ;;  %vm17437_vm11 = vmmov %vm17426_vm3 }
 0xb55   : > { %6159 = vmax.xlane.f32.xlu0 %v6158_v55  ;;  %6162 = vmax.xlane.f32.xlu1 %v6161_v33  ;;  %17429 = vst [vmem:[#allocation75_spill] sm:$0xff] %v13302_v47  ;;  %v6185_v39 = vsel %vm17426_vm3, %v13274_v36, -inf  ;;  %v6030_v22 = vadd.f32 %v13115_v44, %v5994_v46  ;;  %v13317_v37 = vsel %vm6063_vm15, %v6031_v2, %v6095_v62  ;;  %v6191_v2 = vsel %vm17431_vm5, %v13280_v14, -inf  ;;  %vm17435_vm15 = vmmov %vm17426_vm3 }
 0xb56   : > { %v6039_v15 = vadd.f32 %v13115_v44, %v6003_v32  ;;  %v6038_v16 = vadd.f32 %v13115_v44, %v6002_v29  ;;  %v6033_v55 = vadd.f32 %v13115_v44, %v5997_v58  ;;  %v6032_v33 = vadd.f32 %v13115_v44, %v5996_v13 }
 0xb57   : > { %vm6062_vm12 = vcmp.gt.f32.partialorder %v6030_v22, 0.0  ;;  %v6094_v18 = vmul.f32 0.01, %v6030_v22  ;;  %v6041_v59 = vadd.f32 %v13115_v44, %v6005_v60  ;;  %v6188_v29 = vsel %vm17432_vm14, %v13282_v17, -inf }
 0xb58   : > { %vm6071_vm6 = vcmp.gt.f32.partialorder %v6039_v15, 0.0  ;;  %v6103_v24 = vmul.f32 0.01, %v6039_v15  ;;  %vm6070_vm1 = vcmp.gt.f32.partialorder %v6038_v16, 0.0  ;;  %v6102_v46 = vmul.f32 0.01, %v6038_v16 }
 0xb59   : > { %6183 = vmax.xlane.f32.xlu0 %v6182_v25  ;;  %6186 = vmax.xlane.f32.xlu1 %v6185_v39  ;;  %v13326_v62 = vsel %vm6062_vm12, %v6030_v22, %v6094_v18  ;;  %vm6065_vm10 = vcmp.gt.f32.partialorder %v6033_v55, 0.0  ;;  %v6097_v32 = vmul.f32 0.01, %v6033_v55  ;;  %vm6064_vm0 = vcmp.gt.f32.partialorder %v6032_v33, 0.0  ;;  %vm17439_vm12 = vmmov %vm17431_vm5 }
 0xb5a   : > { %v13332_v13 = vsel %vm6071_vm6, %v6039_v15, %v6103_v24  ;;  %v13334_v60 = vsel %vm6070_vm1, %v6038_v16, %v6102_v46  ;;  %v5935_v39 = vmul.f32 %v13018_v28, %v5899_v3  ;;  %v5934_v22 = vmul.f32 %v13018_v28, %v5898_v54  ;;  %vm17440_vm6 = vmmov %vm17431_vm5 }
 0xb5b   : > { %17433 = vst [vmem:[#allocation74_spill] sm:$0xff] %v13332_v13  ;;  %17434 = vst [vmem:[#allocation77_spill] sm:$0xff] %v13334_v60  ;;  %v6215_v18 = vsel %vm17435_vm15, %v13294_v40, -inf  ;;  %v13342_v19 = vsel %vm6065_vm10, %v6033_v55, %v6097_v32  ;;  %v6096_v58 = vmul.f32 0.01, %v6032_v33  ;;  %v6004_v15 = vmul.f32 %v13229_v23, %v13254_v43 }
 0xb5c   : > { %17436 = vst [vmem:[#allocation76_spill] sm:$0xff] %v13342_v19  ;;  %v6105_v24 = vmul.f32 0.01, %v6041_v59  ;;  %v5999_v16 = vmul.f32 %v13210_v48, %v13124_v12  ;;  %v5998_v46 = vmul.f32 %v13210_v48, %v13127_v42  ;;  %v6007_v3 = vmul.f32 %v13229_v23, %v5935_v39  ;;  %vm17445_vm15 = vmmov %vm17440_vm6 }
 0xb5d   : > { %6192 = vmax.xlane.f32.xlu1 %v6191_v2  ;;  %6189 = vmax.xlane.f32.xlu0 %v6188_v29  ;;  %v6212_v28 = vsel %vm17437_vm11, %v13302_v47, -inf  ;;  %v13353_v54 = vsel %vm6064_vm0, %v6032_v33, %v6096_v58  ;;  %vm6073_vm3 = vcmp.gt.f32.partialorder %v6041_v59, 0.0  ;;  %v6006_v55 = vmul.f32 %v13229_v23, %v5934_v22  ;;  %vm17446_vm11 = vmmov %vm17440_vm6 }
 0xb5e   : > { %17438 = vst [vmem:[#allocation71_spill] sm:$0xff] %v13353_v54  ;;  %v6197_v43 = vsel %vm17439_vm12, %v13317_v37, -inf  ;;  %v6040_v42 = vadd.f32 %v13115_v44, %v6004_v15  ;;  %v6194_v48 = vsel %vm17440_vm6, %v13326_v62, -inf  ;;  %v6035_v2 = vadd.f32 %v13115_v44, %v5999_v16 }
 0xb5f   : > { %v6034_v33 = vadd.f32 %v13115_v44, %v5998_v46  ;;  %v6043_v32 = vadd.f32 %v13115_v44, %v6007_v3  ;;  %v13366_v23 = vsel %vm6073_vm3, %v6041_v59, %v6105_v24  ;;  %v6042_v58 = vadd.f32 %v13115_v44, %v6006_v55  ;;  %vm17449_vm3 = vmmov %vm17440_vm6 }
 0xb60   : > { %17441 = vst [vmem:[#allocation73_spill] sm:$0xff] %v13366_v23  ;;  %vm6072_vm1 = vcmp.gt.f32.partialorder %v6040_v42, 0.0  ;;  %v6104_v29 = vmul.f32 0.01, %v6040_v42  ;;  %vm6067_vm5 = vcmp.gt.f32.partialorder %v6035_v2, 0.0  ;;  %v6221_v24 = vsel %vm17445_vm15, %v13332_v13, -inf  ;;  %vm17450_vm12 = vmmov %vm17449_vm3 }
 0xb61   : > { %6216 = vmax.xlane.f32.xlu1 %v6215_v18  ;;  %6213 = vmax.xlane.f32.xlu0 %v6212_v28  ;;  %v6099_v39 = vmul.f32 0.01, %v6035_v2  ;;  %vm6066_vm10 = vcmp.gt.f32.partialorder %v6034_v33, 0.0  ;;  %v6098_v22 = vmul.f32 0.01, %v6034_v33  ;;  %vm6075_vm14 = vcmp.gt.f32.partialorder %v6043_v32, 0.0  ;;  %vm17451_vm6 = vmmov %vm17449_vm3 }
 0xb62   : > { %v13369_v18 = vsel %vm6072_vm1, %v6040_v42, %v6104_v29  ;;  %v6107_v15 = vmul.f32 0.01, %v6043_v32  ;;  %vm6074_vm0 = vcmp.gt.f32.partialorder %v6042_v58, 0.0  ;;  %v6218_v3 = vsel %vm17446_vm11, %v13334_v60, -inf  ;;  %vm17452_vm1 = vmmov %vm17449_vm3 }
 0xb63   : > { %17442 = vst [vmem:[#allocation72_spill] sm:$0xff] %v13369_v18  ;;  %v13373_v46 = vsel %vm6067_vm5, %v6035_v2, %v6099_v39  ;;  %v13375_v59 = vsel %vm6066_vm10, %v6034_v33, %v6098_v22  ;;  %v6106_v55 = vmul.f32 0.01, %v6042_v58  ;;  %v6200_v2 = vsel %vm17450_vm12, %v13353_v54, -inf  ;;  %vm17453_vm5 = vmmov %vm17452_vm1 }
 0xb64   : > { %17443 = vst [vmem:[#allocation85_spill] sm:$0xff] %v13373_v46  ;;  %17444 = vst [vmem:[#allocation84_spill] sm:$0xff] %v13375_v59  ;;  %v13383_v28 = vsel %vm6075_vm14, %v6043_v32, %v6107_v15  ;;  %v6227_v33 = vsel %vm17451_vm6, %v13366_v23, -inf  ;;  %v6224_v32 = vsel %vm17452_vm1, %v13369_v18, -inf  ;;  %v6209_v29 = vsel %vm17453_vm5, %v13373_v46, -inf }
 0xb65   : > { %6198 = vmax.xlane.f32.xlu1 %v6197_v43  ;;  %6195 = vmax.xlane.f32.xlu0 %v6194_v48  ;;  %17447 = vst [vmem:[#allocation8_spill] sm:$0xff] %v13383_v28  ;;  %v13385_v43 = vsel %vm6074_vm0, %v6042_v58, %v6106_v55  ;;  %v6203_v48 = vsel %vm17449_vm3, %v13342_v19, -inf  ;;  %vm17454_vm10 = vmmov %vm17452_vm1  ;;  %vm17457_vm15 = vcmask 261120  }
 0xb66   : > { %17448 = vst [vmem:[#allocation6_spill] sm:$0xff] %v13385_v43  ;;  %v6206_v58 = vsel %vm17454_vm10, %v13375_v59, -inf  ;;  %vm17455_vm14 = vmmov %vm17452_vm1  ;;  %v13407_v15 = vsel %vm17457_vm15, %v12496_v26, 3e+38 }
 0xb67   : > { %v6233_v39 = vsel %vm17455_vm14, %v13383_v28, -inf  ;;  %vm17456_vm0 = vmmov %vm17452_vm1  ;;  %17458 = vst [vmem:[#allocation7_spill] sm:$0xff] %v13407_v15  ;;  %vm17467_vm1 = vcmask 7168  }
 0xb68   : > { %v6230_v22 = vsel %vm17456_vm0, %v13385_v43, -inf  ;;  %vm17459_vm11 = vmmov %vm17457_vm15 }
 0xb69   : > { %6222 = vmax.xlane.f32.xlu1 %v6221_v24  ;;  %6219 = vmax.xlane.f32.xlu0 %v6218_v3  ;;  %v13413_v24 = vsel %vm17459_vm11, %v12715_v1, 3e+38  ;;  %vm17461_vm3 = vmmov %vm17459_vm11 }
 0xb6a   : > { %17460 = vst [vmem:[#allocation5_spill] sm:$0xff] %v13413_v24  ;;  %v13421_v3 = vsel %vm17461_vm3, %v12599_v4, 3e+38  ;;  %vm17463_vm12 = vmmov %vm17461_vm3 }
 0xb6b   : > { %17462 = vst [vmem:[#allocation9_spill] sm:$0xff] %v13421_v3  ;;  %v13429_v26 = vsel %vm17463_vm12, %v12717_v31, 3e+38  ;;  %vm17468_vm5 = vmmov %vm17467_vm1 }
 0xb6c   : > { %17464 = vst [vmem:[#allocation10_spill] sm:$0xff] %v13429_v26  ;;  %vm17469_vm10 = vmmov %vm17467_vm1 }
 0xb6d   : > { %6204 = vmax.xlane.f32.xlu1 %v6203_v48  ;;  %6201 = vmax.xlane.f32.xlu0 %v6200_v2  ;;  %v17465_v48 = vld [vmem:[#allocation78_spill] sm:$0xff]  ;;  %vm17470_vm14 = vmmov %vm17467_vm1 }
 0xb6e   : > { %vm17466_vm6 = vnez %v17465_v48  ;;  %vm17471_vm0 = vmmov %vm17467_vm1 }
 0xb6f   : > { %vm17472_vm15 = vmmov %vm17471_vm0 }
 0xb70   : > { %vm17473_vm11 = vmmov %vm17471_vm0 }
 0xb71   : > { %6228 = vmax.xlane.f32.xlu1 %v6227_v33  ;;  %6225 = vmax.xlane.f32.xlu0 %v6224_v32  ;;  %vm17474_vm3 = vmmov %vm17471_vm0 }
 0xb72   : > { %vm17475_vm12 = vmmov %vm17471_vm0 }
 0xb75   : > { %6210 = vmax.xlane.f32.xlu1 %v6209_v29  ;;  %6207 = vmax.xlane.f32.xlu0 %v6206_v58 }
 0xb79   : > { %6234 = vmax.xlane.f32.xlu1 %v6233_v39  ;;  %6231 = vmax.xlane.f32.xlu0 %v6230_v22 }
 0xb8a   : > { %3540 = vrot.lane.b32.xlu1 %v13407_v15, %s10845_s15 }
 0xb8e   : > { %3534 = vrot.lane.b32.xlu1 %v13413_v24, %s10846_s17 }
 0xb8f   : > { %3532 = vrot.lane.b32.xlu0 %v13407_v15, %s10846_s17 }
 0xb92   : > { %3542 = vrot.lane.b32.xlu1 %v13413_v24, %s10845_s15 }
 0xb93   : > { %3536 = vrot.lane.b32.xlu0 %v13421_v3, %s10846_s17 }
 0xb96   : > { %3538 = vrot.lane.b32.xlu1 %v13429_v26, %s10846_s17 }
 0xb97   : > { %3544 = vrot.lane.b32.xlu0 %v13421_v3, %s10845_s15 }
 0xb9b   : > { %3546 = vrot.lane.b32.xlu0 %v13429_v26, %s10845_s15 }
 0xbca   : > { %v13437_v4 = vpop.xlane.xlu0 %6144  ;;  %v13439_v1 = vpop.xlane.xlu1 %6141 }
 0xbcb   : > { %v10329_v55 = vpack.c.bf16 %v13437_v4, %v13439_v1 }
 0xbcd   : > { %10331 = vmatprep.subr.msk.bf16.mxu0 %vm17466_vm6, %v10329_v55 }
 0xbce   : > { %v13445_v31 = vpop.xlane.xlu0 %6165  ;;  %10334 = vmatpush3.bf16.xpose.msk.msra.mxu0 %vm17466_vm6, %v10329_v55  ;;  %v13449_v2 = vpop.xlane.xlu1 %6168 }
 0xbcf   : > { %v10353_v33 = vpack.c.bf16 %v13449_v2, %v13445_v31 }
 0xbd1   : > { %10355 = vmatprep.subr.msk.bf16.mxu1 %vm17466_vm6, %v10353_v33 }
 0xbd2   : > { %v13455_v32 = vpop.xlane.xlu0 %6147  ;;  %10358 = vmatpush3.bf16.xpose.msk.msra.mxu1 %vm17466_vm6, %v10353_v33  ;;  %v13459_v29 = vpop.xlane.xlu1 %6150 }
 0xbd3   : > { %v10335_v58 = vpack.c.bf16 %v13459_v29, %v13455_v32 }
 0xbd5   : > { %10337 = vmatprep.subr.msk.bf16.mxu0 %vm17466_vm6, %v10335_v58 }
 0xbd6   : > { %v13465_v39 = vpop.xlane.xlu0 %6171  ;;  %10340 = vmatpush3.bf16.xpose.msk.msra.mxu0 %vm17466_vm6, %v10335_v58  ;;  %v13469_v22 = vpop.xlane.xlu1 %6174 }
 0xbd7   : > { %v10359_v55 = vpack.c.bf16 %v13469_v22, %v13465_v39 }
 0xbd9   : > { %10361 = vmatprep.subr.msk.bf16.mxu1 %vm17466_vm6, %v10359_v55 }
 0xbda   : > { %v13475_v33 = vpop.xlane.xlu0 %6153  ;;  %10364 = vmatpush3.bf16.xpose.msk.msra.mxu1 %vm17466_vm6, %v10359_v55  ;;  %v13479_v42 = vpop.xlane.xlu1 %6156 }
 0xbdb   : > { %v10341_v16 = vpack.c.bf16 %v13479_v42, %v13475_v33 }
 0xbdd   : > { %10343 = vmatprep.subr.msk.bf16.mxu0 %vm17466_vm6, %v10341_v16 }
 0xbde   : > { %v13485_v58 = vpop.xlane.xlu0 %6177  ;;  %10346 = vmatpush3.bf16.xpose.msk.msra.mxu0 %vm17466_vm6, %v10341_v16  ;;  %v13489_v44 = vpop.xlane.xlu1 %6180 }
 0xbdf   : > { %v10365_v25 = vpack.c.bf16 %v13489_v44, %v13485_v58 }
 0xbe1   : > { %10367 = vmatprep.subr.msk.bf16.mxu1 %vm17466_vm6, %v10365_v25 }
 0xbe2   : > { %v13495_v55 = vpop.xlane.xlu0 %6159  ;;  %10370 = vmatpush3.bf16.xpose.msk.msra.mxu1 %vm17466_vm6, %v10365_v25  ;;  %v13499_v12 = vpop.xlane.xlu1 %6162 }
 0xbe3   : > { %v10347_v7 = vpack.c.bf16 %v13499_v12, %v13495_v55 }
 0xbe5   : > { %10349 = vmatprep.subr.msk.bf16.mxu0 %vm17466_vm6, %v10347_v7 }
 0xbe6   : > { %v13505_v16 = vpop.xlane.xlu0 %6183  ;;  %10352 = vmatpush3.bf16.xpose.msk.msra.mxu0 %vm17466_vm6, %v10347_v7  ;;  %v13509_v34 = vpop.xlane.xlu1 %6186 }
 0xbe7   : > { %v10371_v50 = vpack.c.bf16 %v13509_v34, %v13505_v16 }
 0xbe9   : > { %10373 = vmatprep.subr.msk.bf16.mxu1 %vm17466_vm6, %v10371_v50 }
 0xbea   : > { %v13515_v25 = vpop.xlane.xlu0 %6189  ;;  %10376 = vmatpush3.bf16.xpose.msk.msra.mxu1 %vm17466_vm6, %v10371_v50  ;;  %v13519_v61 = vpop.xlane.xlu1 %6192 }
 0xbeb   : > { %v10377_v26 = vpack.c.bf16 %v13519_v61, %v13515_v25 }
 0xbed   : > { %9782 = vmatmul.mubr.msk.f32.vlgmr.msra.gmra.mrb[98].mxu0 %vm17467_vm1, %v17162_v41  ;;  %10379 = vmatprep.subr.msk.bf16.mxu0 %vm17466_vm6, %v10377_v26  ;;  %vm17476_vm1 = vmmov %vm17471_vm0 }
 0xbee   : > { %v13527_v7 = vpop.xlane.xlu0 %6213  ;;  %10382 = vmatpush3.bf16.xpose.msk.msra.mxu0 %vm17466_vm6, %v10377_v26  ;;  %v13531_v3 = vpop.xlane.xlu1 %6216  ;;  %9784 = vmatprep.mubr.msk.f32.mxu0 %vm17468_vm5, %v17162_v41  ;;  %vm17477_vm5 = vmmov %vm17471_vm0 }
 0xbef   : > { %v10401_v50 = vpack.c.bf16 %v13531_v3, %v13527_v7 }
 0xbf1   : > { %9785 = vmatmul.mubr.msk.f32.gmra.mrb[100].mxu0 %vm17469_vm10, %v17162_v41  ;;  %9810 = vmatmul.mubr.msk.f32.vlgmr.msra.gmra.mrb[86].mxu1 %vm17470_vm14, %v17162_v41  ;;  %vm17478_vm10 = vmmov %vm17471_vm0 }
 0xbf2   : > { %10403 = vmatprep.subr.msk.bf16.mxu1 %vm17466_vm6, %v10401_v50  ;;  %v13543_v24 = vpop.xlane.xlu0 %6195  ;;  %v13545_v26 = vpop.xlane.xlu1 %6198  ;;  %9787 = vmatprep.mubr.msk.f32.mxu0 %vm17471_vm0, %v17162_v41  ;;  %vm17479_vm14 = vmmov %vm17471_vm0 }
 0xbf3   : > { %10406 = vmatpush3.bf16.xpose.msk.msra.mxu1 %vm17466_vm6, %v10401_v50  ;;  %v10383_v15 = vpack.c.bf16 %v13545_v26, %v13543_v24  ;;  %9812 = vmatprep.mubr.msk.f32.mxu1 %vm17472_vm15, %v17162_v41  ;;  %vm17480_vm15 = vmmov %vm17471_vm0 }
 0xbf5   : > { %9788 = vmatmul.mubr.msk.f32.gmra.mrb[102].mxu0 %vm17473_vm11, %v17162_v41  ;;  %9813 = vmatmul.mubr.msk.f32.gmra.mrb[88].mxu1 %vm17474_vm3, %v17162_v41  ;;  %vm17481_vm11 = vmmov %vm17471_vm0 }
 0xbf6   : > { %10385 = vmatprep.subr.msk.bf16.mxu0 %vm17466_vm6, %v10383_v15  ;;  %v13561_v43 = vpop.xlane.xlu0 %6219  ;;  %v13563_v28 = vpop.xlane.xlu1 %6222  ;;  %9790 = vmatprep.mubr.msk.f32.mxu0 %vm17475_vm12, %v17162_v41  ;;  %vm17482_vm3 = vmmov %vm17471_vm0 }
 0xbf7   : > { %10388 = vmatpush3.bf16.xpose.msk.msra.mxu0 %vm17466_vm6, %v10383_v15  ;;  %v10407_v50 = vpack.c.bf16 %v13563_v28, %v13561_v43  ;;  %9815 = vmatprep.mubr.msk.f32.mxu1 %vm17476_vm1, %v17162_v41  ;;  %vm17484_vm12 = vmmov %vm17471_vm0 }
 0xbf8   : > { %vm17485_vm1 = vmmov %vm17471_vm0 }
 0xbf9   : > { %9791 = vmatmul.mubr.msk.f32.gmra.mrb[104].mxu0 %vm17477_vm5, %v17162_v41  ;;  %9816 = vmatmul.mubr.msk.f32.gmra.mrb[90].mxu1 %vm17478_vm10, %v17162_v41  ;;  %vm17486_vm5 = vmmov %vm17471_vm0 }
 0xbfa   : > { %10409 = vmatprep.subr.msk.bf16.mxu1 %vm17466_vm6, %v10407_v50  ;;  %v13579_v18 = vpop.xlane.xlu0 %6201  ;;  %v13581_v23 = vpop.xlane.xlu1 %6204  ;;  %9818 = vmatprep.mubr.msk.f32.mxu1 %vm17479_vm14, %v17162_v41  ;;  %vm17490_vm10 = vmmov %vm17471_vm0 }
 0xbfb   : > { %10412 = vmatpush3.bf16.xpose.msk.msra.mxu1 %vm17466_vm6, %v10407_v50  ;;  %v10389_v15 = vpack.c.bf16 %v13581_v23, %v13579_v18  ;;  %9837 = vmatprep.mubr.msk.f32.mxu0 %vm17471_vm0, %v17162_v41  ;;  %vm17491_vm14 = vmmov %vm17471_vm0 }
 0xbfd   : > { %9819 = vmatmul.mubr.msk.f32.gmra.mrb[92].mxu1 %vm17480_vm15, %v17162_v41  ;;  %10391 = vmatprep.subr.msk.bf16.mxu0 %vm17466_vm6, %v10389_v15  ;;  %vm17494_vm15 = vmmov %vm17471_vm0 }
 0xbfe   : > { %v13595_v59 = vpop.xlane.xlu0 %6225  ;;  %v13597_v46 = vpop.xlane.xlu1 %6228  ;;  %9865 = vmatprep.mubr.msk.f32.mxu1 %vm17481_vm11, %v17162_v41  ;;  %vm17495_vm11 = vmmov %vm17471_vm0 }
 0xbff   : > { %10394 = vmatpush3.bf16.xpose.msk.msra.mxu0 %vm17466_vm6, %v10389_v15  ;;  %v10413_v50 = vpack.c.bf16 %v13597_v46, %v13595_v59 }
 0xc01   : > { %10415 = vmatprep.subr.msk.bf16.mxu1 %vm17466_vm6, %v10413_v50 }
 0xc02   : > { %v13607_v60 = vpop.xlane.xlu0 %6207  ;;  %v13609_v13 = vpop.xlane.xlu1 %6210 }
 0xc03   : > { %10418 = vmatpush3.bf16.xpose.msk.msra.mxu1 %vm17466_vm6, %v10413_v50  ;;  %v10395_v54 = vpack.c.bf16 %v13609_v13, %v13607_v60  ;;  %v17483_v50 = vpack.c.bf16 %v13151_v51, %v13153_v11  ;;  %v17498_v51 = vpack.c.bf16 %v13248_v27, %v13238_v56  ;;  %v17499_v11 = vpack.c.bf16 %v13236_v5, %v13227_v45 }
 0xc05   : > { %10397 = vmatprep.subr.msk.bf16.mxu0 %vm17466_vm6, %v10395_v54 }
 0xc06   : > { %v13617_v15 = vpop.xlane.xlu0 %6231  ;;  %v13619_v19 = vpop.xlane.xlu1 %6234 }
 0xc07   : > { %10400 = vmatpush3.bf16.xpose.msk.msra.mxu0 %vm17466_vm6, %v10395_v54  ;;  %v10419_v47 = vpack.c.bf16 %v13619_v19, %v13617_v15  ;;  %v17488_v54 = vpack.c.bf16 %v13149_v63, %v13147_v52  ;;  %v17492_v52 = vpack.c.bf16 %v13214_v20, %v13206_v53  ;;  %v17493_v63 = vpack.c.bf16 %v13187_v0, %v13185_v30 }
 0xc08   : > { %10425 = vmatprep.subr.bf16.mxu0 %v17160_v9 }
 0xc09   : > { %10421 = vmatprep.subr.msk.bf16.mxu1 %vm17466_vm6, %v10419_v47 }
 0xc0b   : > { %10424 = vmatpush3.bf16.xpose.msk.msra.mxu1 %vm17466_vm6, %v10419_v47  ;;  %v17487_v47 = vpack.c.bf16 %v13173_v21, %v13169_v6  ;;  %vm17489_vm6 = vmmov %vm17471_vm0  ;;  %v17502_v6 = vpack.c.bf16 %v13274_v36, %v13272_v38  ;;  %v17519_v38 = vld [vmem:[#allocation82_spill] sm:$0xff] }
 0xc0c   : > { %10437 = vmatprep.subr.bf16.mxu1 %v17160_v9 }
 0xc0e   : > { %9838 = vmatmul.mubr.msk.f32.vlgmr.msra.gmra.mrb[106].mxu0 %vm17482_vm3, %v17162_v41  ;;  %vm17496_vm3 = vmmov %vm17471_vm0 }
 0xc0f   : > { %10427 = vmatpush3.bf16.msra.mxu0 %v17483_v50  ;;  %9840 = vmatprep.mubr.msk.f32.mxu0 %vm17484_vm12, %v17162_v41  ;;  %vm17497_vm12 = vmmov %vm17471_vm0 }
 0xc10   : > { %10428 = vmatprep.subr.bf16.mxu0 %v17160_v9 }
 0xc12   : > { %9841 = vmatmul.mubr.msk.f32.gmra.mrb[108].mxu0 %vm17485_vm1, %v17162_v41  ;;  %9866 = vmatmul.mubr.msk.f32.vlgmr.msra.gmra.mrb[94].mxu1 %vm17486_vm5, %v17162_v41  ;;  %vm17500_vm1 = vmmov %vm17471_vm0 }
 0xc13   : > { %10430 = vmatpush3.bf16.msra.mxu0 %v17487_v47  ;;  %10439 = vmatpush3.bf16.msra.mxu1 %v17488_v54  ;;  %vm17501_vm5 = vmmov %vm17471_vm0 }
 0xc14   : > { %9843 = vmatprep.mubr.msk.f32.mxu0 %vm17489_vm6, %v17162_v41  ;;  %9868 = vmatprep.mubr.msk.f32.mxu1 %vm17490_vm10, %v17162_v41 }
 0xc15   : > { %10431 = vmatprep.subr.bf16.mxu0 %v17160_v9  ;;  %10440 = vmatprep.subr.bf16.mxu1 %v17160_v9 }
 0xc16   : > { %9844 = vmatmul.mubr.msk.f32.gmra.mrb[110].mxu0 %vm17491_vm14, %v17162_v41  ;;  %9869 = vmatmul.mubr.msk.f32.gmra.mrb[96].mxu1 %vm17471_vm0, %v17162_v41 }
 0xc17   : > { %10433 = vmatpush3.bf16.msra.mxu0 %v17492_v52  ;;  %10442 = vmatpush3.bf16.msra.mxu1 %v17493_v63 }
 0xc18   : > { %9846 = vmatprep.mubr.msk.f32.mxu0 %vm17494_vm15, %v17162_v41  ;;  %9871 = vmatprep.mubr.msk.f32.mxu1 %vm17495_vm11, %v17162_v41 }
 0xc19   : > { %10434 = vmatprep.subr.bf16.mxu0 %v17160_v9  ;;  %10443 = vmatprep.subr.bf16.mxu1 %v17160_v9 }
 0xc1a   : > { %9847 = vmatmul.mubr.msk.f32.gmra.mrb[112].mxu0 %vm17496_vm3, %v17162_v41  ;;  %9872 = vmatmul.mubr.msk.f32.gmra.mrb[98].mxu1 %vm17497_vm12, %v17162_v41  ;;  %vm17503_vm3 = vnez %v17180_v8 }
 0xc1b   : > { %10436 = vmatpush3.bf16.msra.mxu0 %v17498_v51  ;;  %10445 = vmatpush3.bf16.msra.mxu1 %v17499_v11 }
 0xc1c   : > { %9874 = vmatprep.mubr.msk.f32.mxu1 %vm17500_vm1, %v17162_v41  ;;  %10446 = vmatprep.subr.bf16.mxu1 %v17160_v9  ;;  %vm17504_vm1 = vcmask 523264  }
 0xc1d   : > { %9893 = vmatprep.mubr.msk.f32.mxu0 %vm17278_vm7, %v17161_v49  ;;  %10449 = vmatprep.subr.bf16.mxu0 %v17160_v9 }
 0xc1e   : > { %9875 = vmatmul.mubr.msk.f32.gmra.mrb[100].mxu1 %vm17501_vm5, %v17162_v41 }
 0xc1f   : > { %9912 = vmatprep.mubr.msk.f32.mxu1 %vm17278_vm7, %v17161_v49  ;;  %10448 = vmatpush3.bf16.msra.mxu1 %v17502_v6 }
 0xc20   : > { %10461 = vmatprep.subr.bf16.mxu1 %v17160_v9 }
 0xcc0   : > { %v9783_v21 = vpop.f32.mrb[98].mxu0 }
 0xcc1   : > { %vm6753_vm6 = vcmp.gt.f32.partialorder %v13437_v4, %v9783_v21  ;;  %vm6785_vm10 = vcmp.eq.f32.partialorder %v13437_v4, %v9783_v21  ;;  %v6326_v30 = vpop.f32.mrb[99].mxu0  ;;  %v17512_v21 = vld [vmem:[#allocation80_spill] sm:$0xff] }
 0xcc2   : > { %vm6817_vm14 = vmand %vm6785_vm10, %vm17273_vm8  ;;  %vm6752_vm0 = vcmp.gt.f32.partialorder %v13439_v1, %v6326_v30  ;;  %vm6784_vm15 = vcmp.eq.f32.partialorder %v13439_v1, %v6326_v30 }
 0xcc3   : > { %vm6849_vm11 = vmor %vm6753_vm6, %vm6817_vm14  ;;  %vm17505_vm6 = vnez %v17182_v10 }
 0xcc4   : > { %v6881_v41 = vsel %vm6849_vm11, 1.0, %v17161_v49  ;;  %vm6816_vm12 = vmand %vm6784_vm15, %vm17503_vm3  ;;  %v9786_v0 = vpop.f32.mrb[100].mxu0  ;;  %v9811_v53 = vpop.f32.mrb[86].mxu1 }
 0xcc5   : > { %v6913_v20 = vsel %vm17504_vm1, %v6881_v41, 0.0  ;;  %vm6848_vm5 = vmor %vm6752_vm0, %vm6816_vm12  ;;  %vm6755_vm7 = vcmp.gt.f32.partialorder %v13459_v29, %v9786_v0  ;;  %vm6787_vm2 = vcmp.eq.f32.partialorder %v13459_v29, %v9786_v0  ;;  %v6336_v45 = vpop.f32.mrb[101].mxu0  ;;  %v6455_v5 = vpop.f32.mrb[87].mxu1  ;;  %vm6761_vm14 = vcmp.gt.f32.partialorder %v13449_v2, %v9811_v53 }
 0xcc6   : > { %v6880_v56 = vsel %vm6848_vm5, 1.0, %v17161_v49  ;;  %vm6819_vm10 = vmand %vm6787_vm2, %vm17505_vm6  ;;  %vm6793_vm15 = vcmp.eq.f32.partialorder %v13449_v2, %v9811_v53  ;;  %vm6786_vm0 = vcmp.eq.f32.partialorder %v13455_v32, %v6336_v45  ;;  %vm6792_vm5 = vcmp.eq.f32.partialorder %v13445_v31, %v6455_v5 }
 0xcc7   : > { %vm17506_vm11 = vmmov %vm17504_vm1  ;;  %vm6754_vm1 = vcmp.gt.f32.partialorder %v13455_v32, %v6336_v45  ;;  %v17516_v45 = vld [vmem:[#allocation81_spill] sm:$0xff] }
 0xcc8   : > { %v6912_v27 = vsel %vm17506_vm11, %v6880_v56, 0.0  ;;  %vm13713_vm9 = vmor %vm6755_vm7, %vm6819_vm10  ;;  %v9789_v4 = vpop.f32.mrb[102].mxu0  ;;  %v9814_v1 = vpop.f32.mrb[88].mxu1  ;;  %vm17509_vm7 = vnez %v17184_v35  ;;  %vm6760_vm11 = vcmp.gt.f32.partialorder %v13445_v31, %v6455_v5 }
 0xcc9   : > { %v6914_v36 = vadd.f32 %v6913_v20, %v6912_v27  ;;  %vm6825_vm12 = vmand %vm6793_vm15, %vm17273_vm8  ;;  %v6346_v48 = vpop.f32.mrb[103].mxu0  ;;  %v6465_v2 = vpop.f32.mrb[89].mxu1  ;;  %vm6789_vm6 = vcmp.eq.f32.partialorder %v13479_v42, %v9789_v4  ;;  %v6883_v32 = vsel %vm13713_vm9, 1.0, %v17161_v49  ;;  %vm6757_vm15 = vcmp.gt.f32.partialorder %v13479_v42, %v9789_v4 }
 0xcca   : > { %vm6857_vm2 = vmor %vm6761_vm14, %vm6825_vm12  ;;  %vm17510_vm12 = vcmask 523264   ;;  %vm6762_vm8 = vcmp.gt.f32.partialorder %v13465_v39, %v6465_v2 }
 0xccb   : > { %v6889_v29 = vsel %vm6857_vm2, 1.0, %v17161_v49  ;;  %vm6818_vm10 = vmand %vm6786_vm0, %vm17509_vm7  ;;  %vm6795_vm2 = vcmp.eq.f32.partialorder %v13469_v22, %v9814_v1 }
 0xccc   : > { %vm6850_vm4 = vmor %vm6754_vm1, %vm6818_vm10  ;;  %v9792_v47 = vpop.f32.mrb[104].mxu0  ;;  %v9817_v54 = vpop.f32.mrb[90].mxu1  ;;  %v6934_v52 = vsel %vm17510_vm12, %v6889_v29, 0.0 }
 0xccd   : > { %v6882_v50 = vsel %vm6850_vm4, 1.0, %v17161_v49  ;;  %vm6824_vm14 = vmand %vm6792_vm5, %vm17503_vm3  ;;  %v6356_v63 = vpop.f32.mrb[105].mxu0  ;;  %v6475_v51 = vpop.f32.mrb[91].mxu1  ;;  %vm6763_vm4 = vcmp.gt.f32.partialorder %v13469_v22, %v9814_v1  ;;  %vm6794_vm3 = vcmp.eq.f32.partialorder %v13465_v39, %v6465_v2 }
 0xcce   : > { %vm17511_vm0 = vmmov %vm17510_vm12  ;;  %vm17515_vm12 = vnez %v17182_v10 }
 0xccf   : > { %v6915_v31 = vsel %vm17511_vm0, %v6882_v50, 0.0  ;;  %vm6856_vm1 = vmor %vm6760_vm11, %vm6824_vm14  ;;  %vm6788_vm14 = vcmp.eq.f32.partialorder %v13475_v33, %v6346_v48 }
 0xcd0   : > { %v6916_v11 = vadd.f32 %v6915_v31, %v6914_v36  ;;  %v6888_v6 = vsel %vm6856_vm1, 1.0, %v17161_v49  ;;  %vm6821_vm9 = vmand %vm6789_vm6, %vm17198_vm13  ;;  %vm6756_vm1 = vcmp.gt.f32.partialorder %v13475_v33, %v6346_v48  ;;  %v9820_v20 = vpop.f32.mrb[92].mxu1  ;;  %vm6797_vm13 = vcmp.eq.f32.partialorder %v13489_v44, %v9817_v54 }
 0xcd1   : > { %vm17513_vm5 = vmmov %vm17511_vm0  ;;  %v6485_v22 = vpop.f32.mrb[93].mxu1 }
 0xcd2   : > { %v6917_v30 = vsel %vm17513_vm5, %v6883_v32, 0.0  ;;  %vm17514_vm10 = vmmov %vm17511_vm0  ;;  %vm17517_vm5 = vnez %v17516_v45 }
 0xcd3   : > { %v6933_v41 = vsel %vm17514_vm10, %v6888_v6, 0.0  ;;  %vm6853_vm11 = vmor %vm6757_vm15, %vm6821_vm9  ;;  %v6918_v53 = vadd.f32 %v6917_v30, %v6916_v11  ;;  %vm6791_vm9 = vcmp.eq.f32.partialorder %v13499_v12, %v9792_v47 }
 0xcd4   : > { %v6935_v0 = vadd.f32 %v6934_v52, %v6933_v41  ;;  %vm6827_vm0 = vmand %vm6795_vm2, %vm17515_vm12  ;;  %v6885_v42 = vsel %vm6853_vm11, 1.0, %v17161_v49 }
 0xcd5   : > { %vm6859_vm6 = vmor %vm6763_vm4, %vm6827_vm0  ;;  %vm6759_vm4 = vcmp.gt.f32.partialorder %v13499_v12, %v9792_v47  ;;  %vm17518_vm0 = vcmask 523264  }
 0xcd6   : > { %vm6820_vm10 = vmand %vm6788_vm14, %vm17517_vm5  ;;  %v6891_v56 = vsel %vm6859_vm6, 1.0, %v17161_v49  ;;  %vm17520_vm14 = vnez %v17519_v38  ;;  %vm6758_vm6 = vcmp.gt.f32.partialorder %v13495_v55, %v6356_v63 }
 0xcd7   : > { %vm6852_vm15 = vmor %vm6756_vm1, %vm6820_vm10  ;;  %vm6765_vm1 = vcmp.gt.f32.partialorder %v13489_v44, %v9817_v54  ;;  %v17525_v44 = vld [vmem:[#allocation83_spill] sm:$0xff] }
 0xcd8   : > { %v6884_v5 = vsel %vm6852_vm15, 1.0, %v17161_v49  ;;  %vm6826_vm2 = vmand %vm6794_vm3, %vm17509_vm7 }
 0xcd9   : > { %v6919_v33 = vsel %vm17518_vm0, %v6884_v5, 0.0  ;;  %vm6858_vm12 = vmor %vm6762_vm8, %vm6826_vm2  ;;  %vm17523_vm8 = vnez %v17512_v21  ;;  %v17564_v21 = vld [vmem:[#allocation75_spill] sm:$0xff] }
 0xcda   : > { %v6920_v39 = vadd.f32 %v6919_v33, %v6918_v53  ;;  %v6890_v27 = vsel %vm6858_vm12, 1.0, %v17161_v49  ;;  %vm6823_vm11 = vmand %vm6791_vm9, %vm17520_vm14  ;;  %vm6796_vm9 = vcmp.eq.f32.partialorder %v13485_v58, %v6475_v51  ;;  %vm17526_vm14 = vnez %v17525_v44 }
 0xcdb   : > { %vm17521_vm10 = vmmov %vm17518_vm0 }
 0xcdc   : > { %v6921_v36 = vsel %vm17521_vm10, %v6885_v42, 0.0  ;;  %vm17522_vm3 = vmmov %vm17518_vm0  ;;  %vm6790_vm0 = vcmp.eq.f32.partialorder %v13495_v55, %v6356_v63 }
 0xcdd   : > { %v6936_v4 = vsel %vm17522_vm3, %v6890_v27, 0.0  ;;  %vm6855_vm15 = vmor %vm6759_vm4, %vm6823_vm11  ;;  %v6922_v1 = vadd.f32 %v6921_v36, %v6920_v39  ;;  %vm6799_vm11 = vcmp.eq.f32.partialorder %v13509_v34, %v9820_v20 }
 0xcde   : > { %v6937_v12 = vadd.f32 %v6936_v4, %v6935_v0  ;;  %vm6829_vm2 = vmand %vm6797_vm13, %vm17523_vm8  ;;  %v6887_v29 = vsel %vm6855_vm15, 1.0, %v17161_v49 }
 0xcdf   : > { %vm17524_vm12 = vmmov %vm17522_vm3  ;;  %vm6764_vm3 = vcmp.gt.f32.partialorder %v13485_v58, %v6475_v51 }
 0xce0   : > { %v6938_v48 = vsel %vm17524_vm12, %v6891_v56, 0.0  ;;  %vm6861_vm7 = vmor %vm6765_vm1, %vm6829_vm2  ;;  %vm6767_vm1 = vcmp.gt.f32.partialorder %v13509_v34, %v9820_v20 }
 0xce1   : > { %vm6822_vm10 = vmand %vm6790_vm0, %vm17526_vm14  ;;  %v6939_v2 = vadd.f32 %v6938_v48, %v6937_v12  ;;  %vm6798_vm0 = vcmp.eq.f32.partialorder %v13505_v16, %v6485_v22  ;;  %v6893_v58 = vsel %vm6861_vm7, 1.0, %v17161_v49  ;;  %v9839_v11 = vpop.f32.mrb[106].mxu0 }
 0xce2   : > { %vm6854_vm4 = vmor %vm6758_vm6, %vm6822_vm10  ;;  %vm17528_vm6 = vnez %v17519_v38  ;;  %vm6766_vm10 = vcmp.gt.f32.partialorder %v13505_v16, %v6485_v22  ;;  %v6584_v41 = vpop.f32.mrb[107].mxu0 }
 0xce3   : > { %v6886_v32 = vsel %vm6854_vm4, 1.0, %v17161_v49  ;;  %vm6828_vm13 = vmand %vm6796_vm9, %vm17517_vm5 }
 0xce4   : > { %vm17527_vm2 = vmmov %vm17524_vm12 }
 0xce5   : > { %v6923_v55 = vsel %vm17527_vm2, %v6886_v32, 0.0  ;;  %vm6860_vm12 = vmor %vm6764_vm3, %vm6828_vm13  ;;  %v9842_v42 = vpop.f32.mrb[108].mxu0  ;;  %v9867_v5 = vpop.f32.mrb[94].mxu1 }
 0xce6   : > { %v6924_v50 = vadd.f32 %v6923_v55, %v6922_v1  ;;  %v6892_v47 = vsel %vm6860_vm12, 1.0, %v17161_v49  ;;  %vm6831_vm15 = vmand %vm6799_vm11, %vm17528_vm6  ;;  %vm6769_vm11 = vcmp.gt.f32.partialorder %v13519_v61, %v9839_v11  ;;  %vm6800_vm12 = vcmp.eq.f32.partialorder %v13515_v25, %v6584_v41  ;;  %v6713_v27 = vpop.f32.mrb[95].mxu1 }
 0xce7   : > { %vm17529_vm4 = vmmov %vm17527_vm2 }
 0xce8   : > { %v6925_v54 = vsel %vm17529_vm4, %v6887_v29, 0.0  ;;  %vm17530_vm9 = vmmov %vm17527_vm2 }
 0xce9   : > { %v6940_v52 = vsel %vm17530_vm9, %v6892_v47, 0.0  ;;  %vm6863_vm5 = vmor %vm6767_vm1, %vm6831_vm15  ;;  %v6926_v34 = vadd.f32 %v6925_v54, %v6924_v50  ;;  %vm6801_vm1 = vcmp.eq.f32.partialorder %v13519_v61, %v9839_v11  ;;  %vm6768_vm15 = vcmp.gt.f32.partialorder %v13515_v25, %v6584_v41  ;;  %v6594_v61 = vpop.f32.mrb[109].mxu0 }
 0xcea   : > { %v6941_v31 = vadd.f32 %v6940_v52, %v6939_v2  ;;  %vm6830_vm3 = vmand %vm6798_vm0, %vm17526_vm14  ;;  %v6895_v51 = vsel %vm6863_vm5, 1.0, %v17161_v49  ;;  %vm17532_vm0 = vnez %v17178_v57  ;;  %vm17534_vm9 = vnez %v17180_v8  ;;  %v9870_v2 = vpop.f32.mrb[96].mxu1 }
 0xceb   : > { %vm17531_vm13 = vmmov %vm17527_vm2  ;;  %v6927_v6 = vrot.slane %v6926_v34, 4 }
 0xcec   : > { %v6942_v63 = vsel %vm17531_vm13, %v6893_v58, 0.0  ;;  %vm6862_vm7 = vmor %vm6766_vm10, %vm6830_vm3  ;;  %vm6771_vm13 = vcmp.gt.f32.partialorder %v13545_v26, %v9842_v42 }
 0xced   : > { %v6894_v30 = vsel %vm6862_vm7, 1.0, %v17161_v49  ;;  %v6943_v16 = vadd.f32 %v6942_v63, %v6941_v31  ;;  %v6928_v53 = vadd.f32 %v6927_v6, %v6926_v34  ;;  %vm6833_vm5 = vmand %vm6801_vm1, %vm17532_vm0  ;;  %vm6803_vm1 = vcmp.eq.f32.partialorder %v13545_v26, %v9842_v42  ;;  %v9845_v26 = vpop.f32.mrb[110].mxu0 }
 0xcee   : > { %v6944_v0 = vsel %vm17527_vm2, %v6894_v30, 0.0  ;;  %vm17533_vm10 = vmmov %vm17527_vm2  ;;  %v6604_v58 = vpop.f32.mrb[111].mxu0 }
 0xcef   : > { %v6945_v20 = vadd.f32 %v6944_v0, %v6943_v16  ;;  %v6946_v22 = vsel %vm17533_vm10, %v6895_v51, 0.0  ;;  %vm6865_vm4 = vmor %vm6769_vm11, %vm6833_vm5  ;;  %v6929_v33 = vrot.slane %v6928_v53, 2  ;;  %vm6809_vm11 = vcmp.eq.f32.partialorder %v13531_v3, %v9867_v5 }
 0xcf0   : > { %v6897_v39 = vsel %vm6865_vm4, 1.0, %v17161_v49  ;;  %vm6832_vm3 = vmand %vm6800_vm12, %vm17534_vm9  ;;  %vm17536_vm5 = vnez %v17182_v10  ;;  %vm6777_vm12 = vcmp.gt.f32.partialorder %v13531_v3, %v9867_v5  ;;  %v6723_v3 = vpop.f32.mrb[97].mxu1  ;;  %v17550_v10 = vld [vmem:[#allocation69_spill] sm:$0xff] }
 0xcf1   : > { %v6947_v56 = vadd.f32 %v6946_v22, %v6945_v20  ;;  %vm17535_vm7 = vmmov %vm17527_vm2  ;;  %v6930_v25 = vadd.f32 %v6929_v33, %v6928_v53  ;;  %v13836_v54 = vpop.f32.mrb[98].mxu1 }
 0xcf2   : > { %v6955_v36 = vsel %vm17535_vm7, %v6897_v39, 0.0  ;;  %vm6864_vm2 = vmor %vm6768_vm15, %vm6832_vm3  ;;  %vm6802_vm15 = vcmp.eq.f32.partialorder %v13543_v24, %v6594_v61  ;;  %v13844_v51 = vpop.f32.mrb[99].mxu1 }
 0xcf3   : > { %v6948_v4 = vrot.slane %v6947_v56, 4  ;;  %v6896_v12 = vsel %vm6864_vm2, 1.0, %v17161_v49  ;;  %vm6835_vm10 = vmand %vm6803_vm1, %vm17536_vm5  ;;  %v6931_v29 = vrot.slane %v6930_v25, 1  ;;  %vm17540_vm1 = vnez %v17184_v35  ;;  %v13866_v20 = vpop.f32.mrb[100].mxu1 }
 0xcf4   : > { %vm17537_vm4 = vmmov %vm17535_vm7  ;;  %vm6770_vm7 = vcmp.gt.f32.partialorder %v13543_v24, %v6594_v61  ;;  %v9848_v24 = vpop.f32.mrb[112].mxu0  ;;  %v13871_v33 = vpop.f32.mrb[101].mxu1 }
 0xcf5   : > { %v6954_v1 = vsel %vm17537_vm4, %v6896_v12, 0.0  ;;  %vm13819_vm14 = vmor %vm6771_vm13, %vm6835_vm10  ;;  %v6949_v32 = vadd.f32 %v6948_v4, %v6947_v56  ;;  %vm6808_vm13 = vcmp.eq.f32.partialorder %v13527_v7, %v6713_v27  ;;  %vm6776_vm4 = vcmp.gt.f32.partialorder %v13527_v7, %v6713_v27  ;;  %v13842_v63 = vpop.f32.mrb[113].mxu0 }
 0xcf6   : > { %v6956_v55 = vadd.f32 %v6955_v36, %v6954_v1  ;;  %vm6841_vm3 = vmand %vm6809_vm11, %vm17532_vm0  ;;  %v6899_v57 = vsel %vm13819_vm14, 1.0, %v17161_v49  ;;  %vm6805_vm11 = vcmp.eq.f32.partialorder %v13581_v23, %v9845_v26  ;;  %v6932_v31 = vadd.f32 %v6931_v29, %v6930_v25 }
 0xcf7   : > { %vm6873_vm2 = vmor %vm6777_vm12, %vm6841_vm3  ;;  %v6950_v50 = vrot.slane %v6949_v32, 2  ;;  %vm17541_vm14 = vcmask 523264   ;;  %v17553_v27 = vpack.c.bf16 %v13280_v14, %v13282_v17  ;;  %v17565_v29 = vpack.c.bf16 %v13294_v40, %v17564_v21 }
 0xcf8   : > { %v6905_v47 = vsel %vm6873_vm2, 1.0, %v17161_v49  ;;  %vm6834_vm10 = vmand %vm6802_vm15, %vm17540_vm1  ;;  %vm6773_vm15 = vcmp.gt.f32.partialorder %v13581_v23, %v9845_v26  ;;  %vm6779_vm2 = vcmp.gt.f32.partialorder %v13563_v28, %v9870_v2  ;;  %v10481_v41 = vtrunc.f32 %v6932_v31  ;;  %v17578_v31 = vld [vmem:[#allocation84_spill] sm:$0xff] }
 0xcf9   : > { %vm6866_vm0 = vmor %vm6770_vm7, %vm6834_vm10  ;;  %v6951_v52 = vadd.f32 %v6950_v50, %v6949_v32  ;;  %v6976_v11 = vsel %vm17541_vm14, %v6905_v47, 0.0  ;;  %vm6811_vm10 = vcmp.eq.f32.partialorder %v13563_v28, %v9870_v2  ;;  %v17569_v32 = vld [vmem:[#allocation71_spill] sm:$0xff]  ;;  %v17572_v50 = vld [vmem:[#allocation77_spill] sm:$0xff] }
 0xcfa   : > { %v6898_v34 = vsel %vm6866_vm0, 1.0, %v17161_v49  ;;  %vm6840_vm12 = vmand %vm6808_vm13, %vm17534_vm9  ;;  %v10482_v5 = vcvt.f32.s32 %v10481_v41  ;;  %v17591_v2 = vld [vmem:[#allocation79_spill] sm:$0xff] }
 0xcfb   : > { %vm17542_vm3 = vmmov %vm17541_vm14  ;;  %v6952_v8 = vrot.slane %v6951_v52, 1 }
 0xcfc   : > { %v6957_v6 = vsel %vm17542_vm3, %v6898_v34, 0.0  ;;  %vm6872_vm7 = vmor %vm6776_vm4, %vm6840_vm12  ;;  %vm6804_vm12 = vcmp.eq.f32.partialorder %v13579_v18, %v6604_v58  ;;  %v17577_v34 = vld [vmem:[#allocation85_spill] sm:$0xff] }
 0xcfd   : > { %v6958_v30 = vadd.f32 %v6957_v6, %v6956_v55  ;;  %v6904_v16 = vsel %vm6872_vm7, 1.0, %v17161_v49  ;;  %vm6837_vm9 = vmand %vm6805_vm11, %vm17523_vm8  ;;  %vm6772_vm11 = vcmp.gt.f32.partialorder %v13579_v18, %v6604_v58  ;;  %v6953_v56 = vadd.f32 %v6952_v8, %v6951_v52 }
 0xcfe   : > { %vm17543_vm13 = vmmov %vm17542_vm3  ;;  %vm17549_vm7 = vnez %v17516_v45 }
 0xcff   : > { %v6959_v0 = vsel %vm17543_vm13, %v6899_v57, 0.0  ;;  %vm17544_vm0 = vmmov %vm17542_vm3  ;;  %vm6810_vm3 = vcmp.eq.f32.partialorder %v13561_v43, %v6723_v3  ;;  %v10483_v28 = vtrunc.f32 %v6953_v56 }
 0xd00   : > { %v6975_v53 = vsel %vm17544_vm0, %v6904_v16, 0.0  ;;  %vm13861_vm4 = vmor %vm6773_vm15, %vm6837_vm9  ;;  %v6960_v42 = vadd.f32 %v6959_v0, %v6958_v30  ;;  %vm6807_vm0 = vcmp.eq.f32.partialorder %v13609_v13, %v9848_v24  ;;  %v17580_v30 = vld [vmem:[#allocation73_spill] sm:$0xff]  ;;  %v17581_v16 = vld [vmem:[#allocation72_spill] sm:$0xff] }
 0xd01   : > { %v6977_v22 = vadd.f32 %v6976_v11, %v6975_v53  ;;  %vm6843_vm14 = vmand %vm6811_vm10, %vm17536_vm5  ;;  %vm6778_vm5 = vcmp.gt.f32.partialorder %v13561_v43, %v6723_v3  ;;  %vm7000_vm10 = vcmp.eq.s32.totalorder %v10482_v5, %v17550_v10  ;;  %v6901_v39 = vsel %vm13861_vm4, 1.0, %v17161_v49 }
 0xd02   : > { %vm13875_vm15 = vmor %vm6779_vm2, %vm6843_vm14  ;;  %v7004_v18 = vsel %vm7000_vm10, 1.0, %v17161_v49  ;;  %vm6775_vm14 = vcmp.gt.f32.partialorder %v13609_v13, %v9848_v24  ;;  %v10484_v36 = vcvt.f32.s32 %v10483_v28  ;;  %vm17554_vm4 = vmmov 0  }
 0xd03   : > { %vm6836_vm9 = vmand %vm6804_vm12, %vm17549_vm7  ;;  %vm17551_vm12 = vcmask 523264   ;;  %v6907_v35 = vsel %vm13875_vm15, 1.0, %v17161_v49  ;;  %vm6806_vm10 = vcmp.eq.f32.partialorder %v13607_v60, %v13842_v63 }
 0xd04   : > { %vm6868_vm13 = vmor %vm6772_vm11, %vm6836_vm9  ;;  %9894 = vmatmul.mubr.msk.f32.vlgmr.msra.gmra.mrb[114].mxu0 %vm17551_vm12, %v7004_v18  ;;  %vm6813_vm9 = vcmp.eq.f32.partialorder %v13597_v46, %v13836_v54 }
 0xd05   : > { %v6900_v61 = vsel %vm6868_vm13, 1.0, %v17161_v49  ;;  %vm6842_vm2 = vmand %vm6810_vm3, %vm17540_vm1  ;;  %10451 = vmatpush3.bf16.msra.mxu0 %v17553_v27  ;;  %9931 = vmatprep.mubr.msk.f32.mxu0 %vm17554_vm4, %v17161_v49  ;;  %vm6781_vm3 = vcmp.gt.f32.partialorder %v13597_v46, %v13836_v54  ;;  %vm7001_vm13 = vcmp.eq.s32.totalorder %v10484_v36, %v17550_v10  ;;  %v17562_v46 = vpack.c.bf16 %v13317_v37, %v13326_v62 }
 0xd06   : > { %vm17552_vm7 = vmmov %vm17551_vm12  ;;  %10452 = vmatprep.subr.bf16.mxu0 %v17160_v9  ;;  %v7005_v48 = vsel %vm7001_vm13, 1.0, %v17161_v49 }
 0xd07   : > { %v6961_v43 = vsel %vm17552_vm7, %v6900_v61, 0.0  ;;  %vm6874_vm11 = vmor %vm6778_vm5, %vm6842_vm2  ;;  %v6963_v14 = vsel %vm17552_vm7, %v6901_v39, 0.0  ;;  %vm6774_vm2 = vcmp.gt.f32.partialorder %v13607_v60, %v13842_v63  ;;  %v17579_v63 = vpack.c.bf16 %v17577_v34, %v17578_v31  ;;  %v17601_v34 = vld [vmem:[#allocation5_spill] sm:$0xff] }
 0xd08   : > { %v6962_v25 = vadd.f32 %v6961_v43, %v6960_v42  ;;  %v6906_v4 = vsel %vm6874_vm11, 1.0, %v17161_v49  ;;  %vm6839_vm1 = vmand %vm6807_vm0, %vm17528_vm6  ;;  %vm6812_vm11 = vcmp.eq.f32.partialorder %v13595_v59, %v13844_v51  ;;  %v17586_v42 = vld [vmem:[#allocation6_spill] sm:$0xff] }
 0xd09   : > { %vm17555_vm5 = vmmov %vm17552_vm7  ;;  %10454 = vmatpush3.bf16.msra.mxu0 %v17562_v46  ;;  %vm6780_vm7 = vcmp.gt.f32.partialorder %v13595_v59, %v13844_v51  ;;  %v17568_v59 = vld [vmem:[#allocation76_spill] sm:$0xff]  ;;  %v3528_v46 = vand.u32 1, %v17591_v2 }
 0xd0a   : > { %v6978_v17 = vsel %vm17555_vm5, %v6906_v4, 0.0  ;;  %vm13917_vm15 = vmor %vm6775_vm14, %vm6839_vm1  ;;  %v6964_v13 = vadd.f32 %v6963_v14, %v6962_v25  ;;  %10455 = vmatprep.subr.bf16.mxu0 %v17160_v9  ;;  %v17570_v55 = vpack.c.bf16 %v17568_v59, %v17569_v32 }
 0xd0b   : > { %v6979_v1 = vadd.f32 %v6978_v17, %v6977_v22  ;;  %vm6845_vm0 = vmand %vm6813_vm9, %vm17523_vm8  ;;  %vm17563_vm8 = vnez %v17525_v44  ;;  %v6903_v37 = vsel %vm13917_vm15, 1.0, %v17161_v49  ;;  %vm6782_vm15 = vcmp.gt.f32.partialorder %v13617_v15, %v13871_v33  ;;  %v17585_v22 = vld [vmem:[#allocation8_spill] sm:$0xff] }
 0xd0c   : > { %vm17558_vm12 = vmmov %vm17555_vm5  ;;  %v17582_v44 = vpack.c.bf16 %v17580_v30, %v17581_v16  ;;  %v17587_v5 = vpack.c.bf16 %v17585_v22, %v17586_v42 }
 0xd0d   : > { %v6980_v26 = vsel %vm17558_vm12, %v6907_v35, 0.0  ;;  %vm13933_vm14 = vmor %vm6781_vm3, %vm6845_vm0  ;;  %vm6783_vm0 = vcmp.gt.f32.partialorder %v13619_v19, %v13866_v20  ;;  %10457 = vmatpush3.bf16.msra.mxu0 %v17570_v55 }
 0xd0e   : > { %vm17561_vm1 = vmmov %vm17555_vm5  ;;  %v6981_v60 = vadd.f32 %v6980_v26, %v6979_v1  ;;  %vm6815_vm5 = vcmp.eq.f32.partialorder %v13619_v19, %v13866_v20  ;;  %v6909_v58 = vsel %vm13933_vm14, 1.0, %v17161_v49  ;;  %v17571_v19 = vld [vmem:[#allocation74_spill] sm:$0xff]  ;;  %10458 = vmatprep.subr.bf16.mxu0 %v17160_v9  ;;  %v3533_v26 = vpop.permute.xlu0 %3532 }
 0xd0f   : > { %9913 = vmatmul.mubr.msk.f32.vlgmr.msra.gmra.mrb[102].mxu1 %vm17561_vm1, %v7005_v48  ;;  %vm6838_vm9 = vmand %vm6806_vm10, %vm17563_vm8  ;;  %vm17566_vm10 = vnez %v17516_v45  ;;  %v17573_v47 = vpack.c.bf16 %v17571_v19, %v17572_v50 }
 0xd10   : > { %10463 = vmatpush3.bf16.msra.mxu1 %v17565_v29  ;;  %vm6870_vm3 = vmor %vm6774_vm2, %vm6838_vm9  ;;  %9950 = vmatprep.mubr.msk.f32.mxu1 %vm17554_vm4, %v17161_v49 }
 0xd11   : > { %10464 = vmatprep.subr.bf16.mxu1 %v17160_v9  ;;  %v6902_v62 = vsel %vm6870_vm3, 1.0, %v17161_v49  ;;  %vm6844_vm13 = vmand %vm6812_vm11, %vm17566_vm10  ;;  %10460 = vmatpush3.bf16.msra.mxu0 %v17579_v63 }
 0xd12   : > { %vm17567_vm2 = vmmov %vm17561_vm1  ;;  %vm6814_vm1 = vcmp.eq.f32.partialorder %v13617_v15, %v13871_v33 }
 0xd13   : > { %v6965_v40 = vsel %vm17567_vm2, %v6902_v62, 0.0  ;;  %vm6876_vm12 = vmor %vm6780_vm7, %vm6844_vm13  ;;  %v3537_v62 = vpop.permute.xlu0 %3536 }
 0xd14   : > { %v6966_v3 = vadd.f32 %v6965_v40, %v6964_v13  ;;  %v6908_v45 = vsel %vm6876_vm12, 1.0, %v17161_v49  ;;  %vm6847_vm4 = vmand %vm6815_vm5, %vm17528_vm6  ;;  %10466 = vmatpush3.bf16.msra.mxu1 %v17573_v47  ;;  %vm17589_vm12 = vcmask 64512  }
 0xd15   : > { %vm17574_vm11 = vmmov %vm17567_vm2  ;;  %10467 = vmatprep.subr.bf16.mxu1 %v17160_v9 }
 0xd16   : > { %v6967_v57 = vsel %vm17574_vm11, %v6903_v37, 0.0  ;;  %vm17575_vm9 = vmmov %vm17567_vm2 }
 0xd17   : > { %v6982_v24 = vsel %vm17575_vm9, %v6908_v45, 0.0  ;;  %vm6879_vm14 = vmor %vm6783_vm0, %vm6847_vm4  ;;  %v6968_v54 = vadd.f32 %v6967_v57, %v6966_v3  ;;  %vm14027_vm4 = vcmp.eq.s32.totalorder %v3528_v46, 0  ;;  %v17597_v45 = vld [vmem:[#allocation7_spill] sm:$0xff]  ;;  %v3545_v47 = vpop.permute.xlu0 %3544 }
 0xd18   : > { %v6983_v52 = vadd.f32 %v6982_v24, %v6981_v60  ;;  %vm6846_vm6 = vmand %vm6814_vm1, %vm17563_vm8  ;;  %v6911_v11 = vsel %vm6879_vm14, 1.0, %v17161_v49  ;;  %10469 = vmatpush3.bf16.msra.mxu1 %v17582_v44  ;;  %v3530_v60 = vand.u32 2, %v17591_v2 }
 0xd19   : > { %vm17576_vm7 = vmmov %vm17567_vm2  ;;  %v6969_v51 = vrot.slane %v6968_v54, 4  ;;  %10470 = vmatprep.subr.bf16.mxu1 %v17160_v9 }
 0xd1a   : > { %v6984_v38 = vsel %vm17576_vm7, %v6909_v58, 0.0  ;;  %vm6878_vm3 = vmor %vm6782_vm15, %vm6846_vm6  ;;  %vm14036_vm11 = vcmp.eq.s32.totalorder %v3530_v60, 0  ;;  %vm10847_vm6 = vmmov 1  }
 0xd1b   : > { %v6910_v6 = vsel %vm6878_vm3, 1.0, %v17161_v49  ;;  %v6985_v8 = vadd.f32 %v6984_v38, %v6983_v52  ;;  %vm17583_vm5 = vmmov %vm17567_vm2  ;;  %v6970_v41 = vadd.f32 %v6969_v51, %v6968_v54  ;;  %v3550_v38 = vsel %vm14027_vm4, %v3537_v62, %v3545_v47  ;;  %v3547_v30 = vpop.permute.xlu0 %3546 }
 0xd1c   : > { %v6986_v15 = vsel %vm17583_vm5, %v6910_v6, 0.0  ;;  %vm17584_vm8 = vmmov %vm17567_vm2  ;;  %10472 = vmatpush3.bf16.msra.mxu1 %v17587_v5 }
 0xd1d   : > { %v6987_v0 = vadd.f32 %v6986_v15, %v6985_v8  ;;  %v6988_v53 = vsel %vm17584_vm8, %v6911_v11, 0.0  ;;  %v6971_v7 = vrot.slane %v6970_v41, 2  ;;  %vm17588_vm13 = vmmov %vm17567_vm2  ;;  %v17602_v11 = vld [vmem:[#allocation9_spill] sm:$0xff] }
 0xd1e   : > { %vm17590_vm1 = vmmov %vm17589_vm12  ;;  %v3556_v6 = vmin.f32 %v17602_v11, %v3550_v38  ;;  %v3560_v8 = vmax.f32 %v17602_v11, %v3550_v38 }
 0xd1f   : > { %v6989_v20 = vadd.f32 %v6988_v53, %v6987_v0  ;;  %v6972_v23 = vadd.f32 %v6971_v7, %v6970_v41  ;;  %vm17594_vm15 = vmmov %vm17590_vm1  ;;  %v17603_v0 = vld [vmem:[#allocation10_spill] sm:$0xff] }
 0xd20   : > { %vm3552_vm9 = vmxor %vm14027_vm4, %vm14036_vm11 }
 0xd21   : > { %v6990_v33 = vrot.slane %v6989_v20, 4  ;;  %v6973_v18 = vrot.slane %v6972_v23, 1  ;;  %vm17598_vm14 = vmmov %vm17590_vm1 }
 0xd22   : > { %vm14058_vm7 = vmxor %vm3552_vm9, %vm10847_vm6 }
 0xd23   : > { %v6991_v56 = vadd.f32 %v6990_v33, %v6989_v20  ;;  %v6974_v39 = vadd.f32 %v6973_v18, %v6972_v23  ;;  %v14088_v41 = vsel %vm14058_vm7, %v3556_v6, %v3560_v8 }
 0xd25   : > { %v6992_v28 = vrot.slane %v6991_v56, 2  ;;  %v10485_v61 = vtrunc.f32 %v6974_v39 }
 0xd27   : > { %v6993_v43 = vadd.f32 %v6992_v28, %v6991_v56  ;;  %v10486_v27 = vcvt.f32.s32 %v10485_v61 }
 0xd29   : > { %v6994_v9 = vrot.slane %v6993_v43, 1  ;;  %vm7002_vm10 = vcmp.eq.s32.totalorder %v10486_v27, %v17550_v10 }
 0xd2a   : > { %v7006_v35 = vsel %vm7002_vm10, 1.0, %v17161_v49 }
 0xd2b   : > { %v6995_v36 = vadd.f32 %v6994_v9, %v6993_v43  ;;  %9932 = vmatmul.mubr.msk.f32.vlgmr.msra.gmra.mrb[116].mxu0 %vm17588_vm13, %v7006_v35 }
 0xd2d   : > { %v10487_v25 = vtrunc.f32 %v6995_v36  ;;  %v3566_v36 = vand.u32 4, %v17591_v2 }
 0xd2f   : > { %v10488_v4 = vcvt.f32.s32 %v10487_v25  ;;  %vm14135_vm3 = vcmp.eq.s32.totalorder %v3566_v36, 0 }
 0xd30   : > { %vm3588_vm5 = vmxor %vm14036_vm11, %vm14135_vm3 }
 0xd31   : > { %vm7003_vm0 = vcmp.eq.s32.totalorder %v10488_v4, %v17550_v10  ;;  %vm14164_vm8 = vmxor %vm3588_vm5, %vm10847_vm6 }
 0xd32   : > { %v7007_v14 = vsel %vm7003_vm0, 1.0, %v17161_v49  ;;  %v3541_v49 = vpop.permute.xlu1 %3540  ;;  %vm3622_vm10 = vmxor %vm14027_vm4, %vm14135_vm3 }
 0xd33   : > { %9951 = vmatmul.mubr.msk.f32.vlgmr.msra.gmra.mrb[104].mxu1 %vm17567_vm2, %v7007_v14  ;;  %v3548_v55 = vsel %vm14027_vm4, %v3533_v26, %v3541_v49  ;;  %vm14269_vm13 = vmxor %vm3622_vm10, %vm10847_vm6 }
 0xd34   : > { %v3554_v19 = vmin.f32 %v17597_v45, %v3548_v55  ;;  %v3558_v50 = vmax.f32 %v17597_v45, %v3548_v55 }
 0xd36   : > { %v3535_v21 = vpop.permute.xlu1 %3534  ;;  %v14070_v51 = vsel %vm14058_vm7, %v3554_v19, %v3558_v50 }
 0xd3a   : > { %v3543_v58 = vpop.permute.xlu1 %3542 }
 0xd3b   : > { %v3549_v54 = vsel %vm14027_vm4, %v3535_v21, %v3543_v58 }
 0xd3c   : > { %v3555_v31 = vmin.f32 %v17601_v34, %v3549_v54  ;;  %v3559_v63 = vmax.f32 %v17601_v34, %v3549_v54 }
 0xd3e   : > { %v3539_v16 = vpop.permute.xlu1 %3538  ;;  %v14080_v44 = vsel %vm14058_vm7, %v3555_v31, %v3559_v63 }
 0xd3f   : > { %v3551_v15 = vsel %vm14027_vm4, %v3539_v16, %v3547_v30 }
 0xd40   : > { %v3557_v53 = vmin.f32 %v17603_v0, %v3551_v15  ;;  %v3561_v7 = vmax.f32 %v17603_v0, %v3551_v15 }
 0xd42   : > { %v14100_v20 = vsel %vm14058_vm7, %v3557_v53, %v3561_v7 }
 0xdd7   : > { %v7077_v17 = vpop.f32.mrb[114].mxu0 }
 0xdd8   : > { %v14012_v12 = vsel %vm17589_vm12, %v7077_v17, 3e+38  ;;  %v9895_v1 = vpop.f32.mrb[115].mxu0 }
 0xdd9   : > { %7312 = vrot.lane.b32.xlu0 %v14012_v12, %s10845_s15  ;;  %7304 = vrot.lane.b32.xlu1 %v14012_v12, %s10846_s17 }
 0xde2   : > { %v7150_v13 = vpop.f32.mrb[102].mxu1 }
 0xde3   : > { %v14019_v48 = vsel %vm17590_vm1, %v7150_v13, 3e+38  ;;  %v9914_v10 = vpop.f32.mrb[103].mxu1 }
 0xde4   : > { %7306 = vrot.lane.b32.xlu1 %v14019_v48, %s10846_s17 }
 0xde8   : > { %7314 = vrot.lane.b32.xlu1 %v14019_v48, %s10845_s15 }
 0xdfe   : > { %v7223_v29 = vpop.f32.mrb[116].mxu0 }
 0xdff   : > { %v14032_v40 = vsel %vm17594_vm15, %v7223_v29, 3e+38  ;;  %v9933_v59 = vpop.f32.mrb[117].mxu0 }
 0xe00   : > { %7308 = vrot.lane.b32.xlu0 %v14032_v40, %s10846_s17 }
 0xe04   : > { %7316 = vrot.lane.b32.xlu0 %v14032_v40, %s10845_s15 }
 0xe06   : > { %v7296_v3 = vpop.f32.mrb[104].mxu1 }
 0xe07   : > { %v14051_v57 = vsel %vm17598_vm14, %v7296_v3, 3e+38  ;;  %v9952_v24 = vpop.f32.mrb[105].mxu1 }
 0xe08   : > { %7310 = vrot.lane.b32.xlu1 %v14051_v57, %s10846_s17  ;;  %7318 = vrot.lane.b32.xlu0 %v14051_v57, %s10845_s15 }
 0xe0c   : > { %3568 = vrot.lane.b32.xlu1 %v14070_v51, %s10848_s18  ;;  %3576 = vrot.lane.b32.xlu0 %v14070_v51, %s10849_s20 }
 0xe10   : > { %3570 = vrot.lane.b32.xlu1 %v14080_v44, %s10848_s18  ;;  %3572 = vrot.lane.b32.xlu0 %v14088_v41, %s10848_s18 }
 0xe14   : > { %3578 = vrot.lane.b32.xlu1 %v14080_v44, %s10849_s20  ;;  %3580 = vrot.lane.b32.xlu0 %v14088_v41, %s10849_s20 }
 0xe18   : > { %3574 = vrot.lane.b32.xlu1 %v14100_v20, %s10848_s18  ;;  %3582 = vrot.lane.b32.xlu0 %v14100_v20, %s10849_s20 }
 0xe4b   : > { %v7313_v22 = vpop.permute.xlu0 %7312  ;;  %v7305_v42 = vpop.permute.xlu1 %7304 }
 0xe4c   : > { %v7320_v5 = vsel %vm14027_vm4, %v7305_v42, %v7313_v22 }
 0xe4d   : > { %v7324_v33 = vmin.f32 %v14012_v12, %v7320_v5  ;;  %v7328_v23 = vmax.f32 %v14012_v12, %v7320_v5 }
 0xe4f   : > { %v14112_v56 = vsel %vm14058_vm7, %v7324_v33, %v7328_v23 }
 0xe50   : > { %7336 = vrot.lane.b32.xlu1 %v14112_v56, %s10848_s18  ;;  %7344 = vrot.lane.b32.xlu0 %v14112_v56, %s10849_s20 }
 0xe56   : > { %v7307_v18 = vpop.permute.xlu1 %7306 }
 0xe5a   : > { %v7315_v28 = vpop.permute.xlu1 %7314 }
 0xe5b   : > { %v7321_v39 = vsel %vm14027_vm4, %v7307_v18, %v7315_v28 }
 0xe5c   : > { %v7325_v61 = vmin.f32 %v14019_v48, %v7321_v39  ;;  %v7329_v43 = vmax.f32 %v14019_v48, %v7321_v39 }
 0xe5e   : > { %v14124_v27 = vsel %vm14058_vm7, %v7325_v61, %v7329_v43 }
 0xe5f   : > { %7338 = vrot.lane.b32.xlu1 %v14124_v27, %s10848_s18 }
 0xe63   : > { %7346 = vrot.lane.b32.xlu1 %v14124_v27, %s10849_s20 }
 0xe72   : > { %v7309_v9 = vpop.permute.xlu0 %7308 }
 0xe76   : > { %v7317_v35 = vpop.permute.xlu0 %7316 }
 0xe77   : > { %v7322_v25 = vsel %vm14027_vm4, %v7309_v9, %v7317_v35 }
 0xe78   : > { %v7326_v14 = vmin.f32 %v14032_v40, %v7322_v25  ;;  %v7330_v17 = vmax.f32 %v14032_v40, %v7322_v25 }
 0xe7a   : > { %v7311_v4 = vpop.permute.xlu1 %7310  ;;  %v7319_v1 = vpop.permute.xlu0 %7318  ;;  %v14141_v13 = vsel %vm14058_vm7, %v7326_v14, %v7330_v17 }
 0xe7b   : > { %v7323_v48 = vsel %vm14027_vm4, %v7311_v4, %v7319_v1  ;;  %7340 = vrot.lane.b32.xlu0 %v14141_v13, %s10848_s18 }
 0xe7c   : > { %v7327_v49 = vmin.f32 %v14051_v57, %v7323_v48  ;;  %v7331_v26 = vmax.f32 %v14051_v57, %v7323_v48 }
 0xe7e   : > { %v3569_v10 = vpop.permute.xlu1 %3568  ;;  %v3577_v46 = vpop.permute.xlu0 %3576  ;;  %v14155_v60 = vsel %vm14058_vm7, %v7327_v49, %v7331_v26 }
 0xe7f   : > { %v3584_v21 = vsel %vm14036_vm11, %v3569_v10, %v3577_v46  ;;  %7348 = vrot.lane.b32.xlu0 %v14141_v13, %s10849_s20  ;;  %7342 = vrot.lane.b32.xlu1 %v14155_v60, %s10848_s18 }
 0xe80   : > { %v3590_v40 = vmin.f32 %v14070_v51, %v3584_v21  ;;  %v3594_v59 = vmax.f32 %v14070_v51, %v3584_v21 }
 0xe82   : > { %v3571_v62 = vpop.permute.xlu1 %3570  ;;  %v3573_v55 = vpop.permute.xlu0 %3572  ;;  %v14172_v58 = vsel %vm14164_vm8, %v3590_v40, %v3594_v59 }
 0xe83   : > { %7350 = vrot.lane.b32.xlu0 %v14155_v60, %s10849_s20  ;;  %3602 = vrot.lane.b32.xlu1 %v14172_v58, %s10846_s17 }
 0xe86   : > { %v3579_v3 = vpop.permute.xlu1 %3578  ;;  %v3581_v47 = vpop.permute.xlu0 %3580 }
 0xe87   : > { %v3585_v45 = vsel %vm14036_vm11, %v3571_v62, %v3579_v3  ;;  %v3586_v57 = vsel %vm14036_vm11, %v3573_v55, %v3581_v47  ;;  %3610 = vrot.lane.b32.xlu0 %v14172_v58, %s10845_s15 }
 0xe88   : > { %v3591_v19 = vmin.f32 %v14080_v44, %v3585_v45  ;;  %v3595_v50 = vmax.f32 %v14080_v44, %v3585_v45  ;;  %v3592_v24 = vmin.f32 %v14088_v41, %v3586_v57  ;;  %v3596_v54 = vmax.f32 %v14088_v41, %v3586_v57 }
 0xe8a   : > { %v14190_v52 = vsel %vm14164_vm8, %v3591_v19, %v3595_v50  ;;  %v3575_v38 = vpop.permute.xlu1 %3574  ;;  %v3583_v34 = vpop.permute.xlu0 %3582  ;;  %v14196_v31 = vsel %vm14164_vm8, %v3592_v24, %v3596_v54 }
 0xe8b   : > { %3604 = vrot.lane.b32.xlu1 %v14190_v52, %s10846_s17  ;;  %v3587_v63 = vsel %vm14036_vm11, %v3575_v38, %v3583_v34  ;;  %3606 = vrot.lane.b32.xlu0 %v14196_v31, %s10846_s17 }
 0xe8c   : > { %v3593_v51 = vmin.f32 %v14100_v20, %v3587_v63  ;;  %v3597_v11 = vmax.f32 %v14100_v20, %v3587_v63 }
 0xe8e   : > { %v14208_v6 = vsel %vm14164_vm8, %v3593_v51, %v3597_v11 }
 0xe8f   : > { %3612 = vrot.lane.b32.xlu1 %v14190_v52, %s10845_s15  ;;  %3614 = vrot.lane.b32.xlu0 %v14196_v31, %s10845_s15 }
 0xe93   : > { %3608 = vrot.lane.b32.xlu1 %v14208_v6, %s10846_s17  ;;  %3616 = vrot.lane.b32.xlu0 %v14208_v6, %s10845_s15 }
 0xec2   : > { %v7337_v8 = vpop.permute.xlu1 %7336  ;;  %v7345_v30 = vpop.permute.xlu0 %7344 }
 0xec3   : > { %v7352_v16 = vsel %vm14036_vm11, %v7337_v8, %v7345_v30 }
 0xec4   : > { %v7356_v44 = vmin.f32 %v14112_v56, %v7352_v16  ;;  %v7360_v15 = vmax.f32 %v14112_v56, %v7352_v16  ;;  %v3636_v16 = vand.u32 8, %v17591_v2 }
 0xec6   : > { %v14222_v41 = vsel %vm14164_vm8, %v7356_v44, %v7360_v15  ;;  %vm14350_vm0 = vcmp.eq.s32.totalorder %v3636_v16, 0 }
 0xec7   : > { %7376 = vrot.lane.b32.xlu0 %v14222_v41, %s10845_s15  ;;  %7368 = vrot.lane.b32.xlu1 %v14222_v41, %s10846_s17  ;;  %vm3658_vm2 = vmxor %vm14135_vm3, %vm14350_vm0 }
 0xec8   : > { %vm14379_vm12 = vmxor %vm3658_vm2, %vm10847_vm6 }
 0xec9   : > { %vm3692_vm1 = vmxor %vm14036_vm11, %vm14350_vm0 }
 0xeca   : > { %vm14484_vm15 = vmxor %vm3692_vm1, %vm10847_vm6 }
 0xecb   : > { %vm3726_vm9 = vmxor %vm14027_vm4, %vm14350_vm0 }
 0xecc   : > { %vm14589_vm14 = vmxor %vm3726_vm9, %vm10847_vm6 }
 0xed1   : > { %v7339_v0 = vpop.permute.xlu1 %7338 }
 0xed5   : > { %v7347_v53 = vpop.permute.xlu1 %7346 }
 0xed6   : > { %v7353_v7 = vsel %vm14036_vm11, %v7339_v0, %v7347_v53 }
 0xed7   : > { %v7357_v20 = vmin.f32 %v14124_v27, %v7353_v7  ;;  %v7361_v22 = vmax.f32 %v14124_v27, %v7353_v7 }
 0xed9   : > { %v14234_v42 = vsel %vm14164_vm8, %v7357_v20, %v7361_v22 }
 0xeda   : > { %7370 = vrot.lane.b32.xlu1 %v14234_v42, %s10846_s17 }
 0xede   : > { %7378 = vrot.lane.b32.xlu1 %v14234_v42, %s10845_s15 }
 0xeed   : > { %v7341_v5 = vpop.permute.xlu0 %7340 }
 0xef1   : > { %v7343_v33 = vpop.permute.xlu1 %7342  ;;  %v7349_v23 = vpop.permute.xlu0 %7348 }
 0xef2   : > { %v7354_v56 = vsel %vm14036_vm11, %v7341_v5, %v7349_v23 }
 0xef3   : > { %v7358_v18 = vmin.f32 %v14141_v13, %v7354_v56  ;;  %v7362_v28 = vmax.f32 %v14141_v13, %v7354_v56 }
 0xef5   : > { %v3603_v39 = vpop.permute.xlu1 %3602  ;;  %v7351_v61 = vpop.permute.xlu0 %7350  ;;  %v14246_v43 = vsel %vm14164_vm8, %v7358_v18, %v7362_v28 }
 0xef6   : > { %v7355_v27 = vsel %vm14036_vm11, %v7343_v33, %v7351_v61  ;;  %7372 = vrot.lane.b32.xlu0 %v14246_v43, %s10846_s17 }
 0xef7   : > { %v7359_v9 = vmin.f32 %v14155_v60, %v7355_v27  ;;  %v7363_v36 = vmax.f32 %v14155_v60, %v7355_v27 }
 0xef9   : > { %v3611_v35 = vpop.permute.xlu0 %3610  ;;  %v14260_v25 = vsel %vm14164_vm8, %v7359_v9, %v7363_v36 }
 0xefa   : > { %v3618_v4 = vsel %vm14027_vm4, %v3603_v39, %v3611_v35  ;;  %7380 = vrot.lane.b32.xlu0 %v14246_v43, %s10845_s15  ;;  %7374 = vrot.lane.b32.xlu1 %v14260_v25, %s10846_s17 }
 0xefb   : > { %v3624_v1 = vmin.f32 %v14172_v58, %v3618_v4  ;;  %v3628_v13 = vmax.f32 %v14172_v58, %v3618_v4 }
 0xefd   : > { %v3605_v17 = vpop.permute.xlu1 %3604  ;;  %v3607_v48 = vpop.permute.xlu0 %3606  ;;  %v14277_v10 = vsel %vm14269_vm13, %v3624_v1, %v3628_v13 }
 0xefe   : > { %7382 = vrot.lane.b32.xlu0 %v14260_v25, %s10845_s15  ;;  %3638 = vrot.lane.b32.xlu1 %v14277_v10, %s10850_s26 }
 0xf01   : > { %v3613_v49 = vpop.permute.xlu1 %3612  ;;  %v3615_v21 = vpop.permute.xlu0 %3614 }
 0xf02   : > { %v3619_v26 = vsel %vm14027_vm4, %v3605_v17, %v3613_v49  ;;  %v3620_v29 = vsel %vm14027_vm4, %v3607_v48, %v3615_v21  ;;  %3646 = vrot.lane.b32.xlu0 %v14277_v10, %s10851_s29 }
 0xf03   : > { %v3625_v46 = vmin.f32 %v14190_v52, %v3619_v26  ;;  %v3629_v60 = vmax.f32 %v14190_v52, %v3619_v26  ;;  %v3626_v62 = vmin.f32 %v14196_v31, %v3620_v29  ;;  %v3630_v40 = vmax.f32 %v14196_v31, %v3620_v29 }
 0xf05   : > { %v14295_v59 = vsel %vm14269_vm13, %v3625_v46, %v3629_v60  ;;  %v3609_v55 = vpop.permute.xlu1 %3608  ;;  %v3617_v58 = vpop.permute.xlu0 %3616  ;;  %v14301_v3 = vsel %vm14269_vm13, %v3626_v62, %v3630_v40 }
 0xf06   : > { %3640 = vrot.lane.b32.xlu1 %v14295_v59, %s10850_s26  ;;  %v3621_v45 = vsel %vm14027_vm4, %v3609_v55, %v3617_v58  ;;  %3642 = vrot.lane.b32.xlu0 %v14301_v3, %s10850_s26 }
 0xf07   : > { %v3627_v19 = vmin.f32 %v14208_v6, %v3621_v45  ;;  %v3631_v50 = vmax.f32 %v14208_v6, %v3621_v45 }
 0xf09   : > { %v14313_v47 = vsel %vm14269_vm13, %v3627_v19, %v3631_v50 }
 0xf0a   : > { %3648 = vrot.lane.b32.xlu1 %v14295_v59, %s10851_s29  ;;  %3650 = vrot.lane.b32.xlu0 %v14301_v3, %s10851_s29 }
 0xf0e   : > { %3644 = vrot.lane.b32.xlu1 %v14313_v47, %s10850_s26  ;;  %3652 = vrot.lane.b32.xlu0 %v14313_v47, %s10851_s29 }
 0xf39   : > { %v7369_v57 = vpop.permute.xlu1 %7368  ;;  %v7377_v24 = vpop.permute.xlu0 %7376 }
 0xf3a   : > { %v7384_v54 = vsel %vm14027_vm4, %v7369_v57, %v7377_v24 }
 0xf3b   : > { %v7388_v52 = vmin.f32 %v14222_v41, %v7384_v54  ;;  %v7392_v38 = vmax.f32 %v14222_v41, %v7384_v54 }
 0xf3d   : > { %v14327_v34 = vsel %vm14269_vm13, %v7388_v52, %v7392_v38 }
 0xf3e   : > { %7408 = vrot.lane.b32.xlu0 %v14327_v34, %s10851_s29  ;;  %7400 = vrot.lane.b32.xlu1 %v14327_v34, %s10850_s26 }
 0xf4c   : > { %v7371_v31 = vpop.permute.xlu1 %7370 }
 0xf50   : > { %v7379_v63 = vpop.permute.xlu1 %7378 }
 0xf51   : > { %v7385_v51 = vsel %vm14027_vm4, %v7371_v31, %v7379_v63 }
 0xf52   : > { %v7389_v11 = vmin.f32 %v14234_v42, %v7385_v51  ;;  %v7393_v6 = vmax.f32 %v14234_v42, %v7385_v51 }
 0xf54   : > { %v14339_v8 = vsel %vm14269_vm13, %v7389_v11, %v7393_v6 }
 0xf55   : > { %7402 = vrot.lane.b32.xlu1 %v14339_v8, %s10850_s26 }
 0xf59   : > { %7410 = vrot.lane.b32.xlu1 %v14339_v8, %s10851_s29 }
 0xf68   : > { %v7373_v30 = vpop.permute.xlu0 %7372 }
 0xf6c   : > { %v7375_v44 = vpop.permute.xlu1 %7374  ;;  %v7381_v15 = vpop.permute.xlu0 %7380 }
 0xf6d   : > { %v7386_v41 = vsel %vm14027_vm4, %v7373_v30, %v7381_v15 }
 0xf6e   : > { %v7390_v0 = vmin.f32 %v14246_v43, %v7386_v41  ;;  %v7394_v53 = vmax.f32 %v14246_v43, %v7386_v41 }
 0xf70   : > { %v3639_v20 = vpop.permute.xlu1 %3638  ;;  %v7383_v22 = vpop.permute.xlu0 %7382  ;;  %v14356_v42 = vsel %vm14269_vm13, %v7390_v0, %v7394_v53 }
 0xf71   : > { %v7387_v5 = vsel %vm14027_vm4, %v7375_v44, %v7383_v22  ;;  %7404 = vrot.lane.b32.xlu0 %v14356_v42, %s10850_s26 }
 0xf72   : > { %v7391_v33 = vmin.f32 %v14260_v25, %v7387_v5  ;;  %v7395_v23 = vmax.f32 %v14260_v25, %v7387_v5 }
 0xf74   : > { %v3647_v56 = vpop.permute.xlu0 %3646  ;;  %v14370_v18 = vsel %vm14269_vm13, %v7391_v33, %v7395_v23 }
 0xf75   : > { %v3654_v28 = vsel %vm14135_vm3, %v3639_v20, %v3647_v56  ;;  %7412 = vrot.lane.b32.xlu0 %v14356_v42, %s10851_s29  ;;  %7406 = vrot.lane.b32.xlu1 %v14370_v18, %s10850_s26 }
 0xf76   : > { %v3660_v43 = vmin.f32 %v14277_v10, %v3654_v28  ;;  %v3664_v27 = vmax.f32 %v14277_v10, %v3654_v28 }
 0xf78   : > { %v3641_v61 = vpop.permute.xlu1 %3640  ;;  %v3643_v9 = vpop.permute.xlu0 %3642  ;;  %v14387_v36 = vsel %vm14379_vm12, %v3660_v43, %v3664_v27 }
 0xf79   : > { %7414 = vrot.lane.b32.xlu0 %v14370_v18, %s10851_s29  ;;  %3672 = vrot.lane.b32.xlu1 %v14387_v36, %s10848_s18 }
 0xf7c   : > { %v3649_v35 = vpop.permute.xlu1 %3648  ;;  %v3651_v17 = vpop.permute.xlu0 %3650 }
 0xf7d   : > { %v3655_v25 = vsel %vm14135_vm3, %v3641_v61, %v3649_v35  ;;  %v3656_v1 = vsel %vm14135_vm3, %v3643_v9, %v3651_v17  ;;  %3680 = vrot.lane.b32.xlu0 %v14387_v36, %s10849_s20 }
 0xf7e   : > { %v3661_v4 = vmin.f32 %v14295_v59, %v3655_v25  ;;  %v3665_v14 = vmax.f32 %v14295_v59, %v3655_v25  ;;  %v3662_v13 = vmin.f32 %v14301_v3, %v3656_v1  ;;  %v3666_v48 = vmax.f32 %v14301_v3, %v3656_v1 }
 0xf80   : > { %v14405_v10 = vsel %vm14379_vm12, %v3661_v4, %v3665_v14  ;;  %v3645_v49 = vpop.permute.xlu1 %3644  ;;  %v3653_v26 = vpop.permute.xlu0 %3652  ;;  %v14411_v46 = vsel %vm14379_vm12, %v3662_v13, %v3666_v48 }
 0xf81   : > { %3674 = vrot.lane.b32.xlu1 %v14405_v10, %s10848_s18  ;;  %v3657_v60 = vsel %vm14135_vm3, %v3645_v49, %v3653_v26  ;;  %3676 = vrot.lane.b32.xlu0 %v14411_v46, %s10848_s18 }
 0xf82   : > { %v3663_v21 = vmin.f32 %v14313_v47, %v3657_v60  ;;  %v3667_v29 = vmax.f32 %v14313_v47, %v3657_v60 }
 0xf84   : > { %v14423_v62 = vsel %vm14379_vm12, %v3663_v21, %v3667_v29 }
 0xf85   : > { %3682 = vrot.lane.b32.xlu1 %v14405_v10, %s10849_s20  ;;  %3684 = vrot.lane.b32.xlu0 %v14411_v46, %s10849_s20 }
 0xf89   : > { %3678 = vrot.lane.b32.xlu1 %v14423_v62, %s10848_s18  ;;  %3686 = vrot.lane.b32.xlu0 %v14423_v62, %s10849_s20 }
 0xfb0   : > { %v7401_v40 = vpop.permute.xlu1 %7400  ;;  %v7409_v59 = vpop.permute.xlu0 %7408 }
 0xfb1   : > { %v7416_v55 = vsel %vm14135_vm3, %v7401_v40, %v7409_v59 }
 0xfb2   : > { %v7420_v58 = vmin.f32 %v14327_v34, %v7416_v55  ;;  %v7424_v3 = vmax.f32 %v14327_v34, %v7416_v55 }
 0xfb4   : > { %v14437_v45 = vsel %vm14379_vm12, %v7420_v58, %v7424_v3 }
 0xfb5   : > { %7440 = vrot.lane.b32.xlu0 %v14437_v45, %s10849_s20  ;;  %7432 = vrot.lane.b32.xlu1 %v14437_v45, %s10848_s18 }
 0xfc7   : > { %v7403_v19 = vpop.permute.xlu1 %7402 }
 0xfcb   : > { %v7411_v50 = vpop.permute.xlu1 %7410 }
 0xfcc   : > { %v7417_v47 = vsel %vm14135_vm3, %v7403_v19, %v7411_v50 }
 0xfcd   : > { %v7421_v57 = vmin.f32 %v14339_v8, %v7417_v47  ;;  %v7425_v24 = vmax.f32 %v14339_v8, %v7417_v47 }
 0xfcf   : > { %v14449_v54 = vsel %vm14379_vm12, %v7421_v57, %v7425_v24 }
 0xfd0   : > { %7434 = vrot.lane.b32.xlu1 %v14449_v54, %s10848_s18 }
 0xfd4   : > { %7442 = vrot.lane.b32.xlu1 %v14449_v54, %s10849_s20 }
 0xfe3   : > { %v7405_v52 = vpop.permute.xlu0 %7404 }
 0xfe7   : > { %v7407_v38 = vpop.permute.xlu1 %7406  ;;  %v7413_v34 = vpop.permute.xlu0 %7412 }
 0xfe8   : > { %v7418_v31 = vsel %vm14135_vm3, %v7405_v52, %v7413_v34 }
 0xfe9   : > { %v7422_v63 = vmin.f32 %v14356_v42, %v7418_v31  ;;  %v7426_v51 = vmax.f32 %v14356_v42, %v7418_v31 }
 0xfeb   : > { %v3673_v11 = vpop.permute.xlu1 %3672  ;;  %v7415_v6 = vpop.permute.xlu0 %7414  ;;  %v14461_v8 = vsel %vm14379_vm12, %v7422_v63, %v7426_v51 }
 0xfec   : > { %v7419_v30 = vsel %vm14135_vm3, %v7407_v38, %v7415_v6  ;;  %7436 = vrot.lane.b32.xlu0 %v14461_v8, %s10848_s18 }
 0xfed   : > { %v7423_v16 = vmin.f32 %v14370_v18, %v7419_v30  ;;  %v7427_v44 = vmax.f32 %v14370_v18, %v7419_v30 }
 0xfef   : > { %v3681_v15 = vpop.permute.xlu0 %3680  ;;  %v14475_v41 = vsel %vm14379_vm12, %v7423_v16, %v7427_v44 }
 0xff0   : > { %v3688_v0 = vsel %vm14036_vm11, %v3673_v11, %v3681_v15  ;;  %7444 = vrot.lane.b32.xlu0 %v14461_v8, %s10849_s20  ;;  %7438 = vrot.lane.b32.xlu1 %v14475_v41, %s10848_s18 }
 0xff1   : > { %v3694_v22 = vmin.f32 %v14387_v36, %v3688_v0  ;;  %v3698_v42 = vmax.f32 %v14387_v36, %v3688_v0 }
 0xff3   : > { %v3675_v20 = vpop.permute.xlu1 %3674  ;;  %v3677_v5 = vpop.permute.xlu0 %3676  ;;  %v14492_v33 = vsel %vm14484_vm15, %v3694_v22, %v3698_v42 }
 0xff4   : > { %7446 = vrot.lane.b32.xlu0 %v14475_v41, %s10849_s20  ;;  %3706 = vrot.lane.b32.xlu1 %v14492_v33, %s10846_s17 }
 0xff7   : > { %v3683_v23 = vpop.permute.xlu1 %3682  ;;  %v3685_v39 = vpop.permute.xlu0 %3684 }
 0xff8   : > { %v3689_v56 = vsel %vm14036_vm11, %v3675_v20, %v3683_v23  ;;  %v3690_v61 = vsel %vm14036_vm11, %v3677_v5, %v3685_v39  ;;  %3714 = vrot.lane.b32.xlu0 %v14492_v33, %s10845_s15 }
 0xff9   : > { %v3695_v18 = vmin.f32 %v14405_v10, %v3689_v56  ;;  %v3699_v28 = vmax.f32 %v14405_v10, %v3689_v56  ;;  %v3696_v43 = vmin.f32 %v14411_v46, %v3690_v61  ;;  %v3700_v27 = vmax.f32 %v14411_v46, %v3690_v61 }
 0xffb   : > { %v14510_v9 = vsel %vm14484_vm15, %v3695_v18, %v3699_v28  ;;  %v3679_v36 = vpop.permute.xlu1 %3678  ;;  %v3687_v35 = vpop.permute.xlu0 %3686  ;;  %v14516_v25 = vsel %vm14484_vm15, %v3696_v43, %v3700_v27 }
 0xffc   : > { %3708 = vrot.lane.b32.xlu1 %v14510_v9, %s10846_s17  ;;  %v3691_v4 = vsel %vm14036_vm11, %v3679_v36, %v3687_v35  ;;  %3710 = vrot.lane.b32.xlu0 %v14516_v25, %s10846_s17 }
 0xffd   : > { %v3697_v14 = vmin.f32 %v14423_v62, %v3691_v4  ;;  %v3701_v17 = vmax.f32 %v14423_v62, %v3691_v4 }
 0xfff   : > { %v14528_v1 = vsel %vm14484_vm15, %v3697_v14, %v3701_v17 }
0x1000   : > { %3716 = vrot.lane.b32.xlu1 %v14510_v9, %s10845_s15  ;;  %3718 = vrot.lane.b32.xlu0 %v14516_v25, %s10845_s15 }
0x1004   : > { %3712 = vrot.lane.b32.xlu1 %v14528_v1, %s10846_s17  ;;  %3720 = vrot.lane.b32.xlu0 %v14528_v1, %s10845_s15 }
0x1027   : > { %v7433_v13 = vpop.permute.xlu1 %7432  ;;  %v7441_v48 = vpop.permute.xlu0 %7440 }
0x1028   : > { %v7448_v10 = vsel %vm14036_vm11, %v7433_v13, %v7441_v48 }
0x1029   : > { %v7452_v49 = vmin.f32 %v14437_v45, %v7448_v10  ;;  %v7456_v26 = vmax.f32 %v14437_v45, %v7448_v10 }
0x102b   : > { %v14542_v46 = vsel %vm14484_vm15, %v7452_v49, %v7456_v26  ;;  %v3740_v49 = vand.u32 16, %v17591_v2 }
0x102c   : > { %7472 = vrot.lane.b32.xlu0 %v14542_v46, %s10845_s15  ;;  %7464 = vrot.lane.b32.xlu1 %v14542_v46, %s10846_s17 }
0x102d   : > { %vm14670_vm7 = vcmp.eq.s32.totalorder %v3740_v49, 0 }
0x102e   : > { %vm3762_vm5 = vmxor %vm14350_vm0, %vm14670_vm7 }
0x102f   : > { %vm14699_vm8 = vmxor %vm3762_vm5, %vm10847_vm6 }
0x1030   : > { %vm3796_vm10 = vmxor %vm14135_vm3, %vm14670_vm7 }
0x1031   : > { %vm14804_vm13 = vmxor %vm3796_vm10, %vm10847_vm6 }
0x1032   : > { %vm3830_vm2 = vmxor %vm14036_vm11, %vm14670_vm7 }
0x1033   : > { %vm14909_vm12 = vmxor %vm3830_vm2, %vm10847_vm6 }
0x1034   : > { %vm3864_vm1 = vmxor %vm14027_vm4, %vm14670_vm7 }
0x1042   : > { %v7435_v60 = vpop.permute.xlu1 %7434 }
0x1046   : > { %v7443_v21 = vpop.permute.xlu1 %7442 }
0x1047   : > { %v7449_v29 = vsel %vm14036_vm11, %v7435_v60, %v7443_v21 }
0x1048   : > { %v7453_v62 = vmin.f32 %v14449_v54, %v7449_v29  ;;  %v7457_v40 = vmax.f32 %v14449_v54, %v7449_v29 }
0x104a   : > { %v14554_v59 = vsel %vm14484_vm15, %v7453_v62, %v7457_v40 }
0x104b   : > { %7466 = vrot.lane.b32.xlu1 %v14554_v59, %s10846_s17 }
0x104f   : > { %7474 = vrot.lane.b32.xlu1 %v14554_v59, %s10845_s15 }
0x105e   : > { %v7437_v55 = vpop.permute.xlu0 %7436 }
0x1062   : > { %v7439_v58 = vpop.permute.xlu1 %7438  ;;  %v7445_v3 = vpop.permute.xlu0 %7444 }
0x1063   : > { %v7450_v45 = vsel %vm14036_vm11, %v7437_v55, %v7445_v3 }
0x1064   : > { %v7454_v19 = vmin.f32 %v14461_v8, %v7450_v45  ;;  %v7458_v50 = vmax.f32 %v14461_v8, %v7450_v45 }
0x1066   : > { %v3707_v47 = vpop.permute.xlu1 %3706  ;;  %v7447_v57 = vpop.permute.xlu0 %7446  ;;  %v14566_v24 = vsel %vm14484_vm15, %v7454_v19, %v7458_v50 }
0x1067   : > { %v7451_v54 = vsel %vm14036_vm11, %v7439_v58, %v7447_v57  ;;  %7468 = vrot.lane.b32.xlu0 %v14566_v24, %s10846_s17 }
0x1068   : > { %v7455_v52 = vmin.f32 %v14475_v41, %v7451_v54  ;;  %v7459_v38 = vmax.f32 %v14475_v41, %v7451_v54 }
0x106a   : > { %v3715_v34 = vpop.permute.xlu0 %3714  ;;  %v14580_v31 = vsel %vm14484_vm15, %v7455_v52, %v7459_v38  ;;  %vm15014_vm15 = vmxor %vm3864_vm1, %vm10847_vm6 }
0x106b   : > { %v3722_v63 = vsel %vm14027_vm4, %v3707_v47, %v3715_v34  ;;  %7476 = vrot.lane.b32.xlu0 %v14566_v24, %s10845_s15  ;;  %7470 = vrot.lane.b32.xlu1 %v14580_v31, %s10846_s17 }
0x106c   : > { %v3728_v6 = vmin.f32 %v14492_v33, %v3722_v63  ;;  %v3732_v8 = vmax.f32 %v14492_v33, %v3722_v63 }
0x106e   : > { %v3709_v11 = vpop.permute.xlu1 %3708  ;;  %v3711_v30 = vpop.permute.xlu0 %3710  ;;  %v14597_v16 = vsel %vm14589_vm14, %v3728_v6, %v3732_v8 }
0x106f   : > { %7478 = vrot.lane.b32.xlu0 %v14580_v31, %s10845_s15  ;;  %3742 = vrot.lane.b32.xlu1 %v14597_v16, %s10844_s10 }
0x1072   : > { %v3717_v44 = vpop.permute.xlu1 %3716  ;;  %v3719_v53 = vpop.permute.xlu0 %3718 }
0x1073   : > { %v3723_v15 = vsel %vm14027_vm4, %v3709_v11, %v3717_v44  ;;  %v3724_v20 = vsel %vm14027_vm4, %v3711_v30, %v3719_v53  ;;  %3750 = vrot.lane.b32.xlu0 %v14597_v16, %s10843_s16 }
0x1074   : > { %v3729_v41 = vmin.f32 %v14510_v9, %v3723_v15  ;;  %v3733_v0 = vmax.f32 %v14510_v9, %v3723_v15  ;;  %v3730_v22 = vmin.f32 %v14516_v25, %v3724_v20  ;;  %v3734_v42 = vmax.f32 %v14516_v25, %v3724_v20 }
0x1076   : > { %v14615_v5 = vsel %vm14589_vm14, %v3729_v41, %v3733_v0  ;;  %v3713_v33 = vpop.permute.xlu1 %3712  ;;  %v3721_v23 = vpop.permute.xlu0 %3720  ;;  %v14621_v56 = vsel %vm14589_vm14, %v3730_v22, %v3734_v42 }
0x1077   : > { %3744 = vrot.lane.b32.xlu1 %v14615_v5, %s10844_s10  ;;  %v3725_v18 = vsel %vm14027_vm4, %v3713_v33, %v3721_v23  ;;  %3746 = vrot.lane.b32.xlu0 %v14621_v56, %s10844_s10 }
0x1078   : > { %v3731_v28 = vmin.f32 %v14528_v1, %v3725_v18  ;;  %v3735_v39 = vmax.f32 %v14528_v1, %v3725_v18 }
0x107a   : > { %v14633_v61 = vsel %vm14589_vm14, %v3731_v28, %v3735_v39 }
0x107b   : > { %3752 = vrot.lane.b32.xlu1 %v14615_v5, %s10843_s16  ;;  %3754 = vrot.lane.b32.xlu0 %v14621_v56, %s10843_s16 }
0x107f   : > { %3748 = vrot.lane.b32.xlu1 %v14633_v61, %s10844_s10  ;;  %3756 = vrot.lane.b32.xlu0 %v14633_v61, %s10843_s16 }
0x109e   : > { %v7465_v43 = vpop.permute.xlu1 %7464  ;;  %v7473_v27 = vpop.permute.xlu0 %7472 }
0x109f   : > { %v7480_v9 = vsel %vm14027_vm4, %v7465_v43, %v7473_v27 }
0x10a0   : > { %v7484_v36 = vmin.f32 %v14542_v46, %v7480_v9  ;;  %v7488_v35 = vmax.f32 %v14542_v46, %v7480_v9 }
0x10a2   : > { %v14647_v25 = vsel %vm14589_vm14, %v7484_v36, %v7488_v35 }
0x10a3   : > { %7504 = vrot.lane.b32.xlu0 %v14647_v25, %s10843_s16  ;;  %7496 = vrot.lane.b32.xlu1 %v14647_v25, %s10844_s10 }
0x10bd   : > { %v7467_v4 = vpop.permute.xlu1 %7466 }
0x10c1   : > { %v7475_v14 = vpop.permute.xlu1 %7474 }
0x10c2   : > { %v7481_v17 = vsel %vm14027_vm4, %v7467_v4, %v7475_v14 }
0x10c3   : > { %v7485_v1 = vmin.f32 %v14554_v59, %v7481_v17  ;;  %v7489_v13 = vmax.f32 %v14554_v59, %v7481_v17 }
0x10c5   : > { %v14659_v48 = vsel %vm14589_vm14, %v7485_v1, %v7489_v13 }
0x10c6   : > { %7498 = vrot.lane.b32.xlu1 %v14659_v48, %s10844_s10 }
0x10ca   : > { %7506 = vrot.lane.b32.xlu1 %v14659_v48, %s10843_s16 }
0x10d9   : > { %v7469_v10 = vpop.permute.xlu0 %7468 }
0x10dd   : > { %v7471_v26 = vpop.permute.xlu1 %7470  ;;  %v7477_v46 = vpop.permute.xlu0 %7476 }
0x10de   : > { %v7482_v60 = vsel %vm14027_vm4, %v7469_v10, %v7477_v46 }
0x10df   : > { %v7486_v21 = vmin.f32 %v14566_v24, %v7482_v60  ;;  %v7490_v29 = vmax.f32 %v14566_v24, %v7482_v60 }
0x10e1   : > { %v3743_v40 = vpop.permute.xlu1 %3742  ;;  %v7479_v59 = vpop.permute.xlu0 %7478  ;;  %v14676_v55 = vsel %vm14589_vm14, %v7486_v21, %v7490_v29 }
0x10e2   : > { %v7483_v58 = vsel %vm14027_vm4, %v7471_v26, %v7479_v59  ;;  %7500 = vrot.lane.b32.xlu0 %v14676_v55, %s10844_s10 }
0x10e3   : > { %v7487_v3 = vmin.f32 %v14580_v31, %v7483_v58  ;;  %v7491_v45 = vmax.f32 %v14580_v31, %v7483_v58 }
0x10e5   : > { %v3751_v19 = vpop.permute.xlu0 %3750  ;;  %v14690_v50 = vsel %vm14589_vm14, %v7487_v3, %v7491_v45 }
0x10e6   : > { %v3758_v47 = vsel %vm14350_vm0, %v3743_v40, %v3751_v19  ;;  %7508 = vrot.lane.b32.xlu0 %v14676_v55, %s10843_s16  ;;  %7502 = vrot.lane.b32.xlu1 %v14690_v50, %s10844_s10 }
0x10e7   : > { %v3764_v54 = vmin.f32 %v14597_v16, %v3758_v47  ;;  %v3768_v52 = vmax.f32 %v14597_v16, %v3758_v47 }
0x10e9   : > { %v3745_v24 = vpop.permute.xlu1 %3744  ;;  %v3747_v38 = vpop.permute.xlu0 %3746  ;;  %v14707_v34 = vsel %vm14699_vm8, %v3764_v54, %v3768_v52 }
0x10ea   : > { %7510 = vrot.lane.b32.xlu0 %v14690_v50, %s10843_s16  ;;  %3776 = vrot.lane.b32.xlu1 %v14707_v34, %s10850_s26 }
0x10ed   : > { %v3753_v31 = vpop.permute.xlu1 %3752  ;;  %v3755_v6 = vpop.permute.xlu0 %3754 }
0x10ee   : > { %v3759_v63 = vsel %vm14350_vm0, %v3745_v24, %v3753_v31  ;;  %v3760_v8 = vsel %vm14350_vm0, %v3747_v38, %v3755_v6  ;;  %3784 = vrot.lane.b32.xlu0 %v14707_v34, %s10851_s29 }
0x10ef   : > { %v3765_v51 = vmin.f32 %v14615_v5, %v3759_v63  ;;  %v3769_v11 = vmax.f32 %v14615_v5, %v3759_v63  ;;  %v3766_v30 = vmin.f32 %v14621_v56, %v3760_v8  ;;  %v3770_v16 = vmax.f32 %v14621_v56, %v3760_v8 }
0x10f1   : > { %v14725_v44 = vsel %vm14699_vm8, %v3765_v51, %v3769_v11  ;;  %v3749_v15 = vpop.permute.xlu1 %3748  ;;  %v3757_v41 = vpop.permute.xlu0 %3756  ;;  %v14731_v0 = vsel %vm14699_vm8, %v3766_v30, %v3770_v16 }
0x10f2   : > { %3778 = vrot.lane.b32.xlu1 %v14725_v44, %s10850_s26  ;;  %v3761_v53 = vsel %vm14350_vm0, %v3749_v15, %v3757_v41  ;;  %3780 = vrot.lane.b32.xlu0 %v14731_v0, %s10850_s26 }
0x10f3   : > { %v3767_v20 = vmin.f32 %v14633_v61, %v3761_v53  ;;  %v3771_v22 = vmax.f32 %v14633_v61, %v3761_v53 }
0x10f5   : > { %v14743_v42 = vsel %vm14699_vm8, %v3767_v20, %v3771_v22 }
0x10f6   : > { %3786 = vrot.lane.b32.xlu1 %v14725_v44, %s10851_s29  ;;  %3788 = vrot.lane.b32.xlu0 %v14731_v0, %s10851_s29 }
0x10fa   : > { %3782 = vrot.lane.b32.xlu1 %v14743_v42, %s10850_s26  ;;  %3790 = vrot.lane.b32.xlu0 %v14743_v42, %s10851_s29 }
0x1115   : > { %v7497_v5 = vpop.permute.xlu1 %7496  ;;  %v7505_v33 = vpop.permute.xlu0 %7504 }
0x1116   : > { %v7512_v23 = vsel %vm14350_vm0, %v7497_v5, %v7505_v33 }
0x1117   : > { %v7516_v56 = vmin.f32 %v14647_v25, %v7512_v23  ;;  %v7520_v18 = vmax.f32 %v14647_v25, %v7512_v23 }
0x1119   : > { %v14757_v28 = vsel %vm14699_vm8, %v7516_v56, %v7520_v18 }
0x111a   : > { %7536 = vrot.lane.b32.xlu0 %v14757_v28, %s10851_s29  ;;  %7528 = vrot.lane.b32.xlu1 %v14757_v28, %s10850_s26 }
0x1138   : > { %v7499_v39 = vpop.permute.xlu1 %7498 }
0x113c   : > { %v7507_v61 = vpop.permute.xlu1 %7506 }
0x113d   : > { %v7513_v43 = vsel %vm14350_vm0, %v7499_v39, %v7507_v61 }
0x113e   : > { %v7517_v27 = vmin.f32 %v14659_v48, %v7513_v43  ;;  %v7521_v9 = vmax.f32 %v14659_v48, %v7513_v43 }
0x1140   : > { %v14769_v36 = vsel %vm14699_vm8, %v7517_v27, %v7521_v9 }
0x1141   : > { %7530 = vrot.lane.b32.xlu1 %v14769_v36, %s10850_s26 }
0x1145   : > { %7538 = vrot.lane.b32.xlu1 %v14769_v36, %s10851_s29 }
0x1154   : > { %v7501_v35 = vpop.permute.xlu0 %7500 }
0x1158   : > { %v7503_v25 = vpop.permute.xlu1 %7502  ;;  %v7509_v4 = vpop.permute.xlu0 %7508 }
0x1159   : > { %v7514_v14 = vsel %vm14350_vm0, %v7501_v35, %v7509_v4 }
0x115a   : > { %v7518_v17 = vmin.f32 %v14676_v55, %v7514_v14  ;;  %v7522_v1 = vmax.f32 %v14676_v55, %v7514_v14 }
0x115c   : > { %v3777_v13 = vpop.permute.xlu1 %3776  ;;  %v7511_v48 = vpop.permute.xlu0 %7510  ;;  %v14781_v10 = vsel %vm14699_vm8, %v7518_v17, %v7522_v1 }
0x115d   : > { %v7515_v49 = vsel %vm14350_vm0, %v7503_v25, %v7511_v48  ;;  %7532 = vrot.lane.b32.xlu0 %v14781_v10, %s10850_s26 }
0x115e   : > { %v7519_v26 = vmin.f32 %v14690_v50, %v7515_v49  ;;  %v7523_v46 = vmax.f32 %v14690_v50, %v7515_v49 }
0x1160   : > { %v3785_v60 = vpop.permute.xlu0 %3784  ;;  %v14795_v21 = vsel %vm14699_vm8, %v7519_v26, %v7523_v46 }
0x1161   : > { %v3792_v29 = vsel %vm14135_vm3, %v3777_v13, %v3785_v60  ;;  %7540 = vrot.lane.b32.xlu0 %v14781_v10, %s10851_s29  ;;  %7534 = vrot.lane.b32.xlu1 %v14795_v21, %s10850_s26 }
0x1162   : > { %v3798_v55 = vmin.f32 %v14707_v34, %v3792_v29  ;;  %v3802_v58 = vmax.f32 %v14707_v34, %v3792_v29 }
0x1164   : > { %v3779_v59 = vpop.permute.xlu1 %3778  ;;  %v3781_v3 = vpop.permute.xlu0 %3780  ;;  %v14812_v45 = vsel %vm14804_vm13, %v3798_v55, %v3802_v58 }
0x1165   : > { %7542 = vrot.lane.b32.xlu0 %v14795_v21, %s10851_s29  ;;  %3810 = vrot.lane.b32.xlu1 %v14812_v45, %s10848_s18 }
0x1168   : > { %v3787_v19 = vpop.permute.xlu1 %3786  ;;  %v3789_v24 = vpop.permute.xlu0 %3788 }
0x1169   : > { %v3793_v50 = vsel %vm14135_vm3, %v3779_v59, %v3787_v19  ;;  %v3794_v54 = vsel %vm14135_vm3, %v3781_v3, %v3789_v24  ;;  %3818 = vrot.lane.b32.xlu0 %v14812_v45, %s10849_s20 }
0x116a   : > { %v3799_v47 = vmin.f32 %v14725_v44, %v3793_v50  ;;  %v3803_v57 = vmax.f32 %v14725_v44, %v3793_v50  ;;  %v3800_v52 = vmin.f32 %v14731_v0, %v3794_v54  ;;  %v3804_v38 = vmax.f32 %v14731_v0, %v3794_v54 }
0x116c   : > { %v14830_v34 = vsel %vm14804_vm13, %v3799_v47, %v3803_v57  ;;  %v3783_v31 = vpop.permute.xlu1 %3782  ;;  %v3791_v63 = vpop.permute.xlu0 %3790  ;;  %v14836_v51 = vsel %vm14804_vm13, %v3800_v52, %v3804_v38 }
0x116d   : > { %3812 = vrot.lane.b32.xlu1 %v14830_v34, %s10848_s18  ;;  %v3795_v11 = vsel %vm14135_vm3, %v3783_v31, %v3791_v63  ;;  %3814 = vrot.lane.b32.xlu0 %v14836_v51, %s10848_s18 }
0x116e   : > { %v3801_v6 = vmin.f32 %v14743_v42, %v3795_v11  ;;  %v3805_v8 = vmax.f32 %v14743_v42, %v3795_v11 }
0x1170   : > { %v14848_v30 = vsel %vm14804_vm13, %v3801_v6, %v3805_v8 }
0x1171   : > { %3820 = vrot.lane.b32.xlu1 %v14830_v34, %s10849_s20  ;;  %3822 = vrot.lane.b32.xlu0 %v14836_v51, %s10849_s20 }
0x1175   : > { %3816 = vrot.lane.b32.xlu1 %v14848_v30, %s10848_s18  ;;  %3824 = vrot.lane.b32.xlu0 %v14848_v30, %s10849_s20 }
0x118c   : > { %v7529_v16 = vpop.permute.xlu1 %7528  ;;  %v7537_v44 = vpop.permute.xlu0 %7536 }
0x118d   : > { %v7544_v15 = vsel %vm14135_vm3, %v7529_v16, %v7537_v44 }
0x118e   : > { %v7548_v41 = vmin.f32 %v14757_v28, %v7544_v15  ;;  %v7552_v0 = vmax.f32 %v14757_v28, %v7544_v15 }
0x1190   : > { %v14862_v53 = vsel %vm14804_vm13, %v7548_v41, %v7552_v0 }
0x1191   : > { %7568 = vrot.lane.b32.xlu0 %v14862_v53, %s10849_s20  ;;  %7560 = vrot.lane.b32.xlu1 %v14862_v53, %s10848_s18 }
0x11b3   : > { %v7531_v20 = vpop.permute.xlu1 %7530 }
0x11b7   : > { %v7539_v22 = vpop.permute.xlu1 %7538 }
0x11b8   : > { %v7545_v42 = vsel %vm14135_vm3, %v7531_v20, %v7539_v22 }
0x11b9   : > { %v7549_v5 = vmin.f32 %v14769_v36, %v7545_v42  ;;  %v7553_v33 = vmax.f32 %v14769_v36, %v7545_v42 }
0x11bb   : > { %v14874_v23 = vsel %vm14804_vm13, %v7549_v5, %v7553_v33 }
0x11bc   : > { %7562 = vrot.lane.b32.xlu1 %v14874_v23, %s10848_s18 }
0x11c0   : > { %7570 = vrot.lane.b32.xlu1 %v14874_v23, %s10849_s20 }
0x11cf   : > { %v7533_v56 = vpop.permute.xlu0 %7532 }
0x11d3   : > { %v7535_v18 = vpop.permute.xlu1 %7534  ;;  %v7541_v28 = vpop.permute.xlu0 %7540 }
0x11d4   : > { %v7546_v39 = vsel %vm14135_vm3, %v7533_v56, %v7541_v28 }
0x11d5   : > { %v7550_v61 = vmin.f32 %v14781_v10, %v7546_v39  ;;  %v7554_v43 = vmax.f32 %v14781_v10, %v7546_v39 }
0x11d7   : > { %v3811_v27 = vpop.permute.xlu1 %3810  ;;  %v7543_v9 = vpop.permute.xlu0 %7542  ;;  %v14886_v36 = vsel %vm14804_vm13, %v7550_v61, %v7554_v43 }
0x11d8   : > { %v7547_v35 = vsel %vm14135_vm3, %v7535_v18, %v7543_v9  ;;  %7564 = vrot.lane.b32.xlu0 %v14886_v36, %s10848_s18 }
0x11d9   : > { %v7551_v25 = vmin.f32 %v14795_v21, %v7547_v35  ;;  %v7555_v4 = vmax.f32 %v14795_v21, %v7547_v35 }
0x11db   : > { %v3819_v14 = vpop.permute.xlu0 %3818  ;;  %v14900_v17 = vsel %vm14804_vm13, %v7551_v25, %v7555_v4 }
0x11dc   : > { %v3826_v1 = vsel %vm14036_vm11, %v3811_v27, %v3819_v14  ;;  %7572 = vrot.lane.b32.xlu0 %v14886_v36, %s10849_s20  ;;  %7566 = vrot.lane.b32.xlu1 %v14900_v17, %s10848_s18 }
0x11dd   : > { %v3832_v10 = vmin.f32 %v14812_v45, %v3826_v1  ;;  %v3836_v49 = vmax.f32 %v14812_v45, %v3826_v1 }
0x11df   : > { %v3813_v48 = vpop.permute.xlu1 %3812  ;;  %v3815_v26 = vpop.permute.xlu0 %3814  ;;  %v14917_v46 = vsel %vm14909_vm12, %v3832_v10, %v3836_v49 }
0x11e0   : > { %7574 = vrot.lane.b32.xlu0 %v14900_v17, %s10849_s20  ;;  %3844 = vrot.lane.b32.xlu1 %v14917_v46, %s10846_s17 }
0x11e3   : > { %v3821_v60 = vpop.permute.xlu1 %3820  ;;  %v3823_v59 = vpop.permute.xlu0 %3822 }
0x11e4   : > { %v3827_v21 = vsel %vm14036_vm11, %v3813_v48, %v3821_v60  ;;  %v3828_v55 = vsel %vm14036_vm11, %v3815_v26, %v3823_v59  ;;  %3852 = vrot.lane.b32.xlu0 %v14917_v46, %s10845_s15 }
0x11e5   : > { %v3833_v29 = vmin.f32 %v14830_v34, %v3827_v21  ;;  %v3837_v40 = vmax.f32 %v14830_v34, %v3827_v21  ;;  %v3834_v58 = vmin.f32 %v14836_v51, %v3828_v55  ;;  %v3838_v3 = vmax.f32 %v14836_v51, %v3828_v55 }
0x11e7   : > { %v14935_v45 = vsel %vm14909_vm12, %v3833_v29, %v3837_v40  ;;  %v3817_v19 = vpop.permute.xlu1 %3816  ;;  %v3825_v50 = vpop.permute.xlu0 %3824  ;;  %v14941_v47 = vsel %vm14909_vm12, %v3834_v58, %v3838_v3 }
0x11e8   : > { %3846 = vrot.lane.b32.xlu1 %v14935_v45, %s10846_s17  ;;  %v3829_v57 = vsel %vm14036_vm11, %v3817_v19, %v3825_v50  ;;  %3848 = vrot.lane.b32.xlu0 %v14941_v47, %s10846_s17 }
0x11e9   : > { %v3835_v24 = vmin.f32 %v14848_v30, %v3829_v57  ;;  %v3839_v54 = vmax.f32 %v14848_v30, %v3829_v57 }
0x11eb   : > { %v14953_v52 = vsel %vm14909_vm12, %v3835_v24, %v3839_v54 }
0x11ec   : > { %3854 = vrot.lane.b32.xlu1 %v14935_v45, %s10845_s15  ;;  %3856 = vrot.lane.b32.xlu0 %v14941_v47, %s10845_s15 }
0x11f0   : > { %3850 = vrot.lane.b32.xlu1 %v14953_v52, %s10846_s17  ;;  %3858 = vrot.lane.b32.xlu0 %v14953_v52, %s10845_s15 }
0x1203   : > { %v7561_v38 = vpop.permute.xlu1 %7560  ;;  %v7569_v34 = vpop.permute.xlu0 %7568 }
0x1204   : > { %v7576_v31 = vsel %vm14036_vm11, %v7561_v38, %v7569_v34 }
0x1205   : > { %v7580_v63 = vmin.f32 %v14862_v53, %v7576_v31  ;;  %v7584_v51 = vmax.f32 %v14862_v53, %v7576_v31 }
0x1207   : > { %v14967_v11 = vsel %vm14909_vm12, %v7580_v63, %v7584_v51  ;;  %v3878_v51 = vand.u32 32, %v17591_v2 }
0x1208   : > { %7600 = vrot.lane.b32.xlu0 %v14967_v11, %s10845_s15  ;;  %7592 = vrot.lane.b32.xlu1 %v14967_v11, %s10846_s17 }
0x1209   : > { %vm15095_vm9 = vcmp.eq.s32.totalorder %v3878_v51, 0 }
0x120a   : > { %vm3900_vm14 = vmxor %vm14670_vm7, %vm15095_vm9 }
0x120b   : > { %vm15124_vm5 = vmxor %vm3900_vm14, %vm10847_vm6 }
0x120c   : > { %vm3934_vm8 = vmxor %vm14350_vm0, %vm15095_vm9 }
0x120d   : > { %vm15229_vm10 = vmxor %vm3934_vm8, %vm10847_vm6 }
0x120e   : > { %vm3968_vm13 = vmxor %vm14135_vm3, %vm15095_vm9 }
0x120f   : > { %vm15334_vm2 = vmxor %vm3968_vm13, %vm10847_vm6 }
0x122e   : > { %v7563_v6 = vpop.permute.xlu1 %7562 }
0x1232   : > { %v7571_v8 = vpop.permute.xlu1 %7570 }
0x1233   : > { %v7577_v30 = vsel %vm14036_vm11, %v7563_v6, %v7571_v8 }
0x1234   : > { %v7581_v16 = vmin.f32 %v14874_v23, %v7577_v30  ;;  %v7585_v44 = vmax.f32 %v14874_v23, %v7577_v30 }
0x1236   : > { %v14979_v15 = vsel %vm14909_vm12, %v7581_v16, %v7585_v44 }
0x1237   : > { %7594 = vrot.lane.b32.xlu1 %v14979_v15, %s10846_s17 }
0x123b   : > { %7602 = vrot.lane.b32.xlu1 %v14979_v15, %s10845_s15 }
0x124a   : > { %v7565_v41 = vpop.permute.xlu0 %7564 }
0x124e   : > { %v7567_v0 = vpop.permute.xlu1 %7566  ;;  %v7573_v53 = vpop.permute.xlu0 %7572 }
0x124f   : > { %v7578_v20 = vsel %vm14036_vm11, %v7565_v41, %v7573_v53 }
0x1250   : > { %v7582_v22 = vmin.f32 %v14886_v36, %v7578_v20  ;;  %v7586_v42 = vmax.f32 %v14886_v36, %v7578_v20 }
0x1252   : > { %v3845_v5 = vpop.permute.xlu1 %3844  ;;  %v7575_v33 = vpop.permute.xlu0 %7574  ;;  %v14991_v23 = vsel %vm14909_vm12, %v7582_v22, %v7586_v42 }
0x1253   : > { %v7579_v56 = vsel %vm14036_vm11, %v7567_v0, %v7575_v33  ;;  %7596 = vrot.lane.b32.xlu0 %v14991_v23, %s10846_s17 }
0x1254   : > { %v7583_v18 = vmin.f32 %v14900_v17, %v7579_v56  ;;  %v7587_v28 = vmax.f32 %v14900_v17, %v7579_v56 }
0x1256   : > { %v3853_v39 = vpop.permute.xlu0 %3852  ;;  %v15005_v61 = vsel %vm14909_vm12, %v7583_v18, %v7587_v28  ;;  %vm4002_vm12 = vmxor %vm14036_vm11, %vm15095_vm9 }
0x1257   : > { %v3860_v43 = vsel %vm14027_vm4, %v3845_v5, %v3853_v39  ;;  %7604 = vrot.lane.b32.xlu0 %v14991_v23, %s10845_s15  ;;  %7598 = vrot.lane.b32.xlu1 %v15005_v61, %s10846_s17  ;;  %vm15439_vm1 = vmxor %vm4002_vm12, %vm10847_vm6 }
0x1258   : > { %v3866_v36 = vmin.f32 %v14917_v46, %v3860_v43  ;;  %v3870_v35 = vmax.f32 %v14917_v46, %v3860_v43 }
0x125a   : > { %v3847_v9 = vpop.permute.xlu1 %3846  ;;  %v3849_v25 = vpop.permute.xlu0 %3848  ;;  %v15022_v4 = vsel %vm15014_vm15, %v3866_v36, %v3870_v35 }
0x125b   : > { %7606 = vrot.lane.b32.xlu0 %v15005_v61, %s10845_s15  ;;  %3880 = vrot.lane.b32.xlu1 %v15022_v4, %s10852_s9 }
0x125e   : > { %v3855_v14 = vpop.permute.xlu1 %3854  ;;  %v3857_v48 = vpop.permute.xlu0 %3856 }
0x125f   : > { %v3861_v17 = vsel %vm14027_vm4, %v3847_v9, %v3855_v14  ;;  %v3862_v10 = vsel %vm14027_vm4, %v3849_v25, %v3857_v48  ;;  %3888 = vrot.lane.b32.xlu0 %v15022_v4, %s10853_s11 }
0x1260   : > { %v3867_v1 = vmin.f32 %v14935_v45, %v3861_v17  ;;  %v3871_v13 = vmax.f32 %v14935_v45, %v3861_v17  ;;  %v3868_v49 = vmin.f32 %v14941_v47, %v3862_v10  ;;  %v3872_v26 = vmax.f32 %v14941_v47, %v3862_v10 }
0x1262   : > { %v15040_v46 = vsel %vm15014_vm15, %v3867_v1, %v3871_v13  ;;  %v3851_v60 = vpop.permute.xlu1 %3850  ;;  %v3859_v21 = vpop.permute.xlu0 %3858  ;;  %v15046_v29 = vsel %vm15014_vm15, %v3868_v49, %v3872_v26 }
0x1263   : > { %3882 = vrot.lane.b32.xlu1 %v15040_v46, %s10852_s9  ;;  %v3863_v40 = vsel %vm14027_vm4, %v3851_v60, %v3859_v21  ;;  %3884 = vrot.lane.b32.xlu0 %v15046_v29, %s10852_s9 }
0x1264   : > { %v3869_v59 = vmin.f32 %v14953_v52, %v3863_v40  ;;  %v3873_v55 = vmax.f32 %v14953_v52, %v3863_v40 }
0x1266   : > { %v15058_v58 = vsel %vm15014_vm15, %v3869_v59, %v3873_v55 }
0x1267   : > { %3890 = vrot.lane.b32.xlu1 %v15040_v46, %s10853_s11  ;;  %3892 = vrot.lane.b32.xlu0 %v15046_v29, %s10853_s11 }
0x126b   : > { %3886 = vrot.lane.b32.xlu1 %v15058_v58, %s10852_s9  ;;  %3894 = vrot.lane.b32.xlu0 %v15058_v58, %s10853_s11 }
0x127a   : > { %v7593_v3 = vpop.permute.xlu1 %7592  ;;  %v7601_v45 = vpop.permute.xlu0 %7600 }
0x127b   : > { %v7608_v19 = vsel %vm14027_vm4, %v7593_v3, %v7601_v45 }
0x127c   : > { %v7612_v50 = vmin.f32 %v14967_v11, %v7608_v19  ;;  %v7616_v47 = vmax.f32 %v14967_v11, %v7608_v19 }
0x127e   : > { %v15072_v57 = vsel %vm15014_vm15, %v7612_v50, %v7616_v47 }
0x127f   : > { %7632 = vrot.lane.b32.xlu0 %v15072_v57, %s10853_s11  ;;  %7624 = vrot.lane.b32.xlu1 %v15072_v57, %s10852_s9 }
0x12a9   : > { %v7595_v24 = vpop.permute.xlu1 %7594 }
0x12ad   : > { %v7603_v54 = vpop.permute.xlu1 %7602 }
0x12ae   : > { %v7609_v52 = vsel %vm14027_vm4, %v7595_v24, %v7603_v54 }
0x12af   : > { %v7613_v38 = vmin.f32 %v14979_v15, %v7609_v52  ;;  %v7617_v34 = vmax.f32 %v14979_v15, %v7609_v52 }
0x12b1   : > { %v15084_v31 = vsel %vm15014_vm15, %v7613_v38, %v7617_v34 }
0x12b2   : > { %7626 = vrot.lane.b32.xlu1 %v15084_v31, %s10852_s9 }
0x12b6   : > { %7634 = vrot.lane.b32.xlu1 %v15084_v31, %s10853_s11 }
0x12c5   : > { %v7597_v63 = vpop.permute.xlu0 %7596 }
0x12c9   : > { %v7599_v11 = vpop.permute.xlu1 %7598  ;;  %v7605_v6 = vpop.permute.xlu0 %7604 }
0x12ca   : > { %v7610_v8 = vsel %vm14027_vm4, %v7597_v63, %v7605_v6 }
0x12cb   : > { %v7614_v30 = vmin.f32 %v14991_v23, %v7610_v8  ;;  %v7618_v16 = vmax.f32 %v14991_v23, %v7610_v8 }
0x12cd   : > { %v3881_v15 = vpop.permute.xlu1 %3880  ;;  %v7607_v41 = vpop.permute.xlu0 %7606  ;;  %v15101_v0 = vsel %vm15014_vm15, %v7614_v30, %v7618_v16 }
0x12ce   : > { %v7611_v53 = vsel %vm14027_vm4, %v7599_v11, %v7607_v41  ;;  %7628 = vrot.lane.b32.xlu0 %v15101_v0, %s10852_s9 }
0x12cf   : > { %v7615_v20 = vmin.f32 %v15005_v61, %v7611_v53  ;;  %v7619_v22 = vmax.f32 %v15005_v61, %v7611_v53 }
0x12d1   : > { %v3889_v42 = vpop.permute.xlu0 %3888  ;;  %v15115_v5 = vsel %vm15014_vm15, %v7615_v20, %v7619_v22  ;;  %vm4036_vm15 = vmxor %vm14027_vm4, %vm15095_vm9 }
0x12d2   : > { %v3896_v33 = vsel %vm14670_vm7, %v3881_v15, %v3889_v42  ;;  %7636 = vrot.lane.b32.xlu0 %v15101_v0, %s10853_s11  ;;  %7630 = vrot.lane.b32.xlu1 %v15115_v5, %s10852_s9  ;;  %vm15544_vm14 = vmxor %vm4036_vm15, %vm10847_vm6 }
0x12d3   : > { %v3902_v18 = vmin.f32 %v15022_v4, %v3896_v33  ;;  %v3906_v28 = vmax.f32 %v15022_v4, %v3896_v33 }
0x12d5   : > { %v3883_v56 = vpop.permute.xlu1 %3882  ;;  %v3885_v39 = vpop.permute.xlu0 %3884  ;;  %v15132_v61 = vsel %vm15124_vm5, %v3902_v18, %v3906_v28 }
0x12d6   : > { %7638 = vrot.lane.b32.xlu0 %v15115_v5, %s10853_s11  ;;  %3914 = vrot.lane.b32.xlu1 %v15132_v61, %s10844_s10 }
0x12d9   : > { %v3891_v43 = vpop.permute.xlu1 %3890  ;;  %v3893_v35 = vpop.permute.xlu0 %3892 }
0x12da   : > { %v3897_v27 = vsel %vm14670_vm7, %v3883_v56, %v3891_v43  ;;  %v3898_v25 = vsel %vm14670_vm7, %v3885_v39, %v3893_v35  ;;  %3922 = vrot.lane.b32.xlu0 %v15132_v61, %s10843_s16 }
0x12db   : > { %v3903_v9 = vmin.f32 %v15040_v46, %v3897_v27  ;;  %v3907_v36 = vmax.f32 %v15040_v46, %v3897_v27  ;;  %v3904_v4 = vmin.f32 %v15046_v29, %v3898_v25  ;;  %v3908_v14 = vmax.f32 %v15046_v29, %v3898_v25 }
0x12dd   : > { %v15150_v17 = vsel %vm15124_vm5, %v3903_v9, %v3907_v36  ;;  %v3887_v1 = vpop.permute.xlu1 %3886  ;;  %v3895_v13 = vpop.permute.xlu0 %3894  ;;  %v15156_v48 = vsel %vm15124_vm5, %v3904_v4, %v3908_v14 }
0x12de   : > { %3916 = vrot.lane.b32.xlu1 %v15150_v17, %s10844_s10  ;;  %v3899_v10 = vsel %vm14670_vm7, %v3887_v1, %v3895_v13  ;;  %3918 = vrot.lane.b32.xlu0 %v15156_v48, %s10844_s10 }
0x12df   : > { %v3905_v49 = vmin.f32 %v15058_v58, %v3899_v10  ;;  %v3909_v26 = vmax.f32 %v15058_v58, %v3899_v10 }
0x12e1   : > { %v15168_v46 = vsel %vm15124_vm5, %v3905_v49, %v3909_v26 }
0x12e2   : > { %3924 = vrot.lane.b32.xlu1 %v15150_v17, %s10843_s16  ;;  %3926 = vrot.lane.b32.xlu0 %v15156_v48, %s10843_s16 }
0x12e6   : > { %3920 = vrot.lane.b32.xlu1 %v15168_v46, %s10844_s10  ;;  %3928 = vrot.lane.b32.xlu0 %v15168_v46, %s10843_s16 }
0x12f1   : > { %v7625_v60 = vpop.permute.xlu1 %7624  ;;  %v7633_v21 = vpop.permute.xlu0 %7632 }
0x12f2   : > { %v7640_v29 = vsel %vm14670_vm7, %v7625_v60, %v7633_v21 }
0x12f3   : > { %v7644_v40 = vmin.f32 %v15072_v57, %v7640_v29  ;;  %v7648_v59 = vmax.f32 %v15072_v57, %v7640_v29 }
0x12f5   : > { %v15182_v55 = vsel %vm15124_vm5, %v7644_v40, %v7648_v59 }
0x12f6   : > { %7664 = vrot.lane.b32.xlu0 %v15182_v55, %s10843_s16  ;;  %7656 = vrot.lane.b32.xlu1 %v15182_v55, %s10844_s10 }
0x1324   : > { %v7627_v58 = vpop.permute.xlu1 %7626 }
0x1328   : > { %v7635_v3 = vpop.permute.xlu1 %7634 }
0x1329   : > { %v7641_v45 = vsel %vm14670_vm7, %v7627_v58, %v7635_v3 }
0x132a   : > { %v7645_v19 = vmin.f32 %v15084_v31, %v7641_v45  ;;  %v7649_v50 = vmax.f32 %v15084_v31, %v7641_v45 }
0x132c   : > { %v15194_v47 = vsel %vm15124_vm5, %v7645_v19, %v7649_v50 }
0x132d   : > { %7658 = vrot.lane.b32.xlu1 %v15194_v47, %s10844_s10 }
0x1331   : > { %7666 = vrot.lane.b32.xlu1 %v15194_v47, %s10843_s16 }
0x1340   : > { %v7629_v57 = vpop.permute.xlu0 %7628 }
0x1344   : > { %v7631_v24 = vpop.permute.xlu1 %7630  ;;  %v7637_v54 = vpop.permute.xlu0 %7636 }
0x1345   : > { %v7642_v52 = vsel %vm14670_vm7, %v7629_v57, %v7637_v54 }
0x1346   : > { %v7646_v38 = vmin.f32 %v15101_v0, %v7642_v52  ;;  %v7650_v34 = vmax.f32 %v15101_v0, %v7642_v52 }
0x1348   : > { %v3915_v31 = vpop.permute.xlu1 %3914  ;;  %v7639_v63 = vpop.permute.xlu0 %7638  ;;  %v15206_v51 = vsel %vm15124_vm5, %v7646_v38, %v7650_v34 }
0x1349   : > { %v7643_v11 = vsel %vm14670_vm7, %v7631_v24, %v7639_v63  ;;  %7660 = vrot.lane.b32.xlu0 %v15206_v51, %s10844_s10 }
0x134a   : > { %v7647_v6 = vmin.f32 %v15115_v5, %v7643_v11  ;;  %v7651_v8 = vmax.f32 %v15115_v5, %v7643_v11 }
0x134c   : > { %v3923_v30 = vpop.permute.xlu0 %3922  ;;  %v15220_v16 = vsel %vm15124_vm5, %v7647_v6, %v7651_v8 }
0x134d   : > { %v3930_v15 = vsel %vm14350_vm0, %v3915_v31, %v3923_v30  ;;  %7668 = vrot.lane.b32.xlu0 %v15206_v51, %s10843_s16  ;;  %7662 = vrot.lane.b32.xlu1 %v15220_v16, %s10844_s10 }
0x134e   : > { %v3936_v53 = vmin.f32 %v15132_v61, %v3930_v15  ;;  %v3940_v20 = vmax.f32 %v15132_v61, %v3930_v15 }
0x1350   : > { %v3917_v0 = vpop.permute.xlu1 %3916  ;;  %v3919_v22 = vpop.permute.xlu0 %3918  ;;  %v15237_v42 = vsel %vm15229_vm10, %v3936_v53, %v3940_v20 }
0x1351   : > { %7670 = vrot.lane.b32.xlu0 %v15220_v16, %s10843_s16  ;;  %3948 = vrot.lane.b32.xlu1 %v15237_v42, %s10850_s26 }
0x1354   : > { %v3925_v5 = vpop.permute.xlu1 %3924  ;;  %v3927_v18 = vpop.permute.xlu0 %3926 }
0x1355   : > { %v3931_v33 = vsel %vm14350_vm0, %v3917_v0, %v3925_v5  ;;  %v3932_v28 = vsel %vm14350_vm0, %v3919_v22, %v3927_v18  ;;  %3956 = vrot.lane.b32.xlu0 %v15237_v42, %s10851_s29 }
0x1356   : > { %v3937_v23 = vmin.f32 %v15150_v17, %v3931_v33  ;;  %v3941_v56 = vmax.f32 %v15150_v17, %v3931_v33  ;;  %v3938_v39 = vmin.f32 %v15156_v48, %v3932_v28  ;;  %v3942_v61 = vmax.f32 %v15156_v48, %v3932_v28 }
0x1358   : > { %v15255_v43 = vsel %vm15229_vm10, %v3937_v23, %v3941_v56  ;;  %v3921_v27 = vpop.permute.xlu1 %3920  ;;  %v3929_v9 = vpop.permute.xlu0 %3928  ;;  %v15261_v36 = vsel %vm15229_vm10, %v3938_v39, %v3942_v61 }
0x1359   : > { %3950 = vrot.lane.b32.xlu1 %v15255_v43, %s10850_s26  ;;  %v3933_v35 = vsel %vm14350_vm0, %v3921_v27, %v3929_v9  ;;  %3952 = vrot.lane.b32.xlu0 %v15261_v36, %s10850_s26 }
0x135a   : > { %v3939_v25 = vmin.f32 %v15168_v46, %v3933_v35  ;;  %v3943_v4 = vmax.f32 %v15168_v46, %v3933_v35 }
0x135c   : > { %v15273_v14 = vsel %vm15229_vm10, %v3939_v25, %v3943_v4 }
0x135d   : > { %3958 = vrot.lane.b32.xlu1 %v15255_v43, %s10851_s29  ;;  %3960 = vrot.lane.b32.xlu0 %v15261_v36, %s10851_s29 }
0x1361   : > { %3954 = vrot.lane.b32.xlu1 %v15273_v14, %s10850_s26  ;;  %3962 = vrot.lane.b32.xlu0 %v15273_v14, %s10851_s29 }
0x1368   : > { %v7657_v17 = vpop.permute.xlu1 %7656  ;;  %v7665_v1 = vpop.permute.xlu0 %7664 }
0x1369   : > { %v7672_v13 = vsel %vm14350_vm0, %v7657_v17, %v7665_v1 }
0x136a   : > { %v7676_v48 = vmin.f32 %v15182_v55, %v7672_v13  ;;  %v7680_v10 = vmax.f32 %v15182_v55, %v7672_v13 }
0x136c   : > { %v15287_v49 = vsel %vm15229_vm10, %v7676_v48, %v7680_v10 }
0x136d   : > { %7696 = vrot.lane.b32.xlu0 %v15287_v49, %s10851_s29  ;;  %7688 = vrot.lane.b32.xlu1 %v15287_v49, %s10850_s26 }
0x139f   : > { %v7659_v26 = vpop.permute.xlu1 %7658 }
0x13a3   : > { %v7667_v46 = vpop.permute.xlu1 %7666 }
0x13a4   : > { %v7673_v60 = vsel %vm14350_vm0, %v7659_v26, %v7667_v46 }
0x13a5   : > { %v7677_v21 = vmin.f32 %v15194_v47, %v7673_v60  ;;  %v7681_v29 = vmax.f32 %v15194_v47, %v7673_v60 }
0x13a7   : > { %v15299_v40 = vsel %vm15229_vm10, %v7677_v21, %v7681_v29 }
0x13a8   : > { %7690 = vrot.lane.b32.xlu1 %v15299_v40, %s10850_s26 }
0x13ac   : > { %7698 = vrot.lane.b32.xlu1 %v15299_v40, %s10851_s29 }
0x13bb   : > { %v7661_v59 = vpop.permute.xlu0 %7660 }
0x13bf   : > { %v7663_v55 = vpop.permute.xlu1 %7662  ;;  %v7669_v58 = vpop.permute.xlu0 %7668 }
0x13c0   : > { %v7674_v3 = vsel %vm14350_vm0, %v7661_v59, %v7669_v58 }
0x13c1   : > { %v7678_v45 = vmin.f32 %v15206_v51, %v7674_v3  ;;  %v7682_v19 = vmax.f32 %v15206_v51, %v7674_v3 }
0x13c3   : > { %v3949_v50 = vpop.permute.xlu1 %3948  ;;  %v7671_v47 = vpop.permute.xlu0 %7670  ;;  %v15311_v57 = vsel %vm15229_vm10, %v7678_v45, %v7682_v19 }
0x13c4   : > { %v7675_v24 = vsel %vm14350_vm0, %v7663_v55, %v7671_v47  ;;  %7692 = vrot.lane.b32.xlu0 %v15311_v57, %s10850_s26 }
0x13c5   : > { %v7679_v54 = vmin.f32 %v15220_v16, %v7675_v24  ;;  %v7683_v52 = vmax.f32 %v15220_v16, %v7675_v24 }
0x13c7   : > { %v3957_v38 = vpop.permute.xlu0 %3956  ;;  %v15325_v34 = vsel %vm15229_vm10, %v7679_v54, %v7683_v52 }
0x13c8   : > { %v3964_v31 = vsel %vm14135_vm3, %v3949_v50, %v3957_v38  ;;  %7700 = vrot.lane.b32.xlu0 %v15311_v57, %s10851_s29  ;;  %7694 = vrot.lane.b32.xlu1 %v15325_v34, %s10850_s26 }
0x13c9   : > { %v3970_v11 = vmin.f32 %v15237_v42, %v3964_v31  ;;  %v3974_v6 = vmax.f32 %v15237_v42, %v3964_v31 }
0x13cb   : > { %v3951_v51 = vpop.permute.xlu1 %3950  ;;  %v3953_v8 = vpop.permute.xlu0 %3952  ;;  %v15342_v30 = vsel %vm15334_vm2, %v3970_v11, %v3974_v6 }
0x13cc   : > { %7702 = vrot.lane.b32.xlu0 %v15325_v34, %s10851_s29  ;;  %3982 = vrot.lane.b32.xlu1 %v15342_v30, %s10848_s18 }
0x13cf   : > { %v3959_v16 = vpop.permute.xlu1 %3958  ;;  %v3961_v53 = vpop.permute.xlu0 %3960 }
0x13d0   : > { %v3965_v15 = vsel %vm14135_vm3, %v3951_v51, %v3959_v16  ;;  %v3966_v20 = vsel %vm14135_vm3, %v3953_v8, %v3961_v53  ;;  %3990 = vrot.lane.b32.xlu0 %v15342_v30, %s10849_s20 }
0x13d1   : > { %v3971_v41 = vmin.f32 %v15255_v43, %v3965_v15  ;;  %v3975_v0 = vmax.f32 %v15255_v43, %v3965_v15  ;;  %v3972_v22 = vmin.f32 %v15261_v36, %v3966_v20  ;;  %v3976_v42 = vmax.f32 %v15261_v36, %v3966_v20 }
0x13d3   : > { %v15360_v5 = vsel %vm15334_vm2, %v3971_v41, %v3975_v0  ;;  %v3955_v33 = vpop.permute.xlu1 %3954  ;;  %v3963_v23 = vpop.permute.xlu0 %3962  ;;  %v15366_v56 = vsel %vm15334_vm2, %v3972_v22, %v3976_v42 }
0x13d4   : > { %3984 = vrot.lane.b32.xlu1 %v15360_v5, %s10848_s18  ;;  %v3967_v18 = vsel %vm14135_vm3, %v3955_v33, %v3963_v23  ;;  %3986 = vrot.lane.b32.xlu0 %v15366_v56, %s10848_s18 }
0x13d5   : > { %v3973_v28 = vmin.f32 %v15273_v14, %v3967_v18  ;;  %v3977_v39 = vmax.f32 %v15273_v14, %v3967_v18 }
0x13d7   : > { %v15378_v61 = vsel %vm15334_vm2, %v3973_v28, %v3977_v39 }
0x13d8   : > { %3992 = vrot.lane.b32.xlu1 %v15360_v5, %s10849_s20  ;;  %3994 = vrot.lane.b32.xlu0 %v15366_v56, %s10849_s20 }
0x13dc   : > { %3988 = vrot.lane.b32.xlu1 %v15378_v61, %s10848_s18  ;;  %3996 = vrot.lane.b32.xlu0 %v15378_v61, %s10849_s20 }
0x13df   : > { %v7689_v43 = vpop.permute.xlu1 %7688  ;;  %v7697_v27 = vpop.permute.xlu0 %7696 }
0x13e0   : > { %v7704_v9 = vsel %vm14135_vm3, %v7689_v43, %v7697_v27 }
0x13e1   : > { %v7708_v36 = vmin.f32 %v15287_v49, %v7704_v9  ;;  %v7712_v35 = vmax.f32 %v15287_v49, %v7704_v9 }
0x13e3   : > { %v15392_v25 = vsel %vm15334_vm2, %v7708_v36, %v7712_v35 }
0x13e4   : > { %7728 = vrot.lane.b32.xlu0 %v15392_v25, %s10849_s20  ;;  %7720 = vrot.lane.b32.xlu1 %v15392_v25, %s10848_s18 }
0x141a   : > { %v7691_v4 = vpop.permute.xlu1 %7690 }
0x141e   : > { %v7699_v14 = vpop.permute.xlu1 %7698 }
0x141f   : > { %v7705_v17 = vsel %vm14135_vm3, %v7691_v4, %v7699_v14 }
0x1420   : > { %v7709_v1 = vmin.f32 %v15299_v40, %v7705_v17  ;;  %v7713_v13 = vmax.f32 %v15299_v40, %v7705_v17 }
0x1422   : > { %v15404_v48 = vsel %vm15334_vm2, %v7709_v1, %v7713_v13 }
0x1423   : > { %7722 = vrot.lane.b32.xlu1 %v15404_v48, %s10848_s18 }
0x1427   : > { %7730 = vrot.lane.b32.xlu1 %v15404_v48, %s10849_s20 }
0x1436   : > { %v7693_v10 = vpop.permute.xlu0 %7692 }
0x143a   : > { %v7695_v49 = vpop.permute.xlu1 %7694  ;;  %v7701_v26 = vpop.permute.xlu0 %7700 }
0x143b   : > { %v7706_v46 = vsel %vm14135_vm3, %v7693_v10, %v7701_v26 }
0x143c   : > { %v7710_v60 = vmin.f32 %v15311_v57, %v7706_v46  ;;  %v7714_v21 = vmax.f32 %v15311_v57, %v7706_v46 }
0x143e   : > { %v3983_v29 = vpop.permute.xlu1 %3982  ;;  %v7703_v40 = vpop.permute.xlu0 %7702  ;;  %v15416_v59 = vsel %vm15334_vm2, %v7710_v60, %v7714_v21 }
0x143f   : > { %v7707_v55 = vsel %vm14135_vm3, %v7695_v49, %v7703_v40  ;;  %7724 = vrot.lane.b32.xlu0 %v15416_v59, %s10848_s18 }
0x1440   : > { %v7711_v58 = vmin.f32 %v15325_v34, %v7707_v55  ;;  %v7715_v3 = vmax.f32 %v15325_v34, %v7707_v55 }
0x1442   : > { %v3991_v45 = vpop.permute.xlu0 %3990  ;;  %v15430_v19 = vsel %vm15334_vm2, %v7711_v58, %v7715_v3 }
0x1443   : > { %v3998_v50 = vsel %vm14036_vm11, %v3983_v29, %v3991_v45  ;;  %7732 = vrot.lane.b32.xlu0 %v15416_v59, %s10849_s20  ;;  %7726 = vrot.lane.b32.xlu1 %v15430_v19, %s10848_s18 }
0x1444   : > { %v4004_v24 = vmin.f32 %v15342_v30, %v3998_v50  ;;  %v4008_v54 = vmax.f32 %v15342_v30, %v3998_v50 }
0x1446   : > { %v3985_v57 = vpop.permute.xlu1 %3984  ;;  %v3987_v52 = vpop.permute.xlu0 %3986  ;;  %v15447_v38 = vsel %vm15439_vm1, %v4004_v24, %v4008_v54 }
0x1447   : > { %7734 = vrot.lane.b32.xlu0 %v15430_v19, %s10849_s20  ;;  %4016 = vrot.lane.b32.xlu1 %v15447_v38, %s10846_s17 }
0x144a   : > { %v3993_v34 = vpop.permute.xlu1 %3992  ;;  %v3995_v11 = vpop.permute.xlu0 %3994 }
0x144b   : > { %v3999_v31 = vsel %vm14036_vm11, %v3985_v57, %v3993_v34  ;;  %v4000_v6 = vsel %vm14036_vm11, %v3987_v52, %v3995_v11  ;;  %4024 = vrot.lane.b32.xlu0 %v15447_v38, %s10845_s15 }
0x144c   : > { %v4005_v63 = vmin.f32 %v15360_v5, %v3999_v31  ;;  %v4009_v51 = vmax.f32 %v15360_v5, %v3999_v31  ;;  %v4006_v8 = vmin.f32 %v15366_v56, %v4000_v6  ;;  %v4010_v30 = vmax.f32 %v15366_v56, %v4000_v6 }
0x144e   : > { %v15465_v16 = vsel %vm15439_vm1, %v4005_v63, %v4009_v51  ;;  %v3989_v15 = vpop.permute.xlu1 %3988  ;;  %v3997_v41 = vpop.permute.xlu0 %3996  ;;  %v15471_v0 = vsel %vm15439_vm1, %v4006_v8, %v4010_v30 }
0x144f   : > { %4018 = vrot.lane.b32.xlu1 %v15465_v16, %s10846_s17  ;;  %v4001_v53 = vsel %vm14036_vm11, %v3989_v15, %v3997_v41  ;;  %4020 = vrot.lane.b32.xlu0 %v15471_v0, %s10846_s17 }
0x1450   : > { %v4007_v20 = vmin.f32 %v15378_v61, %v4001_v53  ;;  %v4011_v22 = vmax.f32 %v15378_v61, %v4001_v53 }
0x1452   : > { %v15483_v42 = vsel %vm15439_vm1, %v4007_v20, %v4011_v22 }
0x1453   : > { %4026 = vrot.lane.b32.xlu1 %v15465_v16, %s10845_s15  ;;  %4028 = vrot.lane.b32.xlu0 %v15471_v0, %s10845_s15 }
0x1456   : > { %v7721_v5 = vpop.permute.xlu1 %7720  ;;  %v7729_v33 = vpop.permute.xlu0 %7728 }
0x1457   : > { %4022 = vrot.lane.b32.xlu1 %v15483_v42, %s10846_s17  ;;  %4030 = vrot.lane.b32.xlu0 %v15483_v42, %s10845_s15  ;;  %v7736_v23 = vsel %vm14036_vm11, %v7721_v5, %v7729_v33 }
0x1458   : > { %v7740_v56 = vmin.f32 %v15392_v25, %v7736_v23  ;;  %v7744_v18 = vmax.f32 %v15392_v25, %v7736_v23 }
0x145a   : > { %v15497_v28 = vsel %vm15439_vm1, %v7740_v56, %v7744_v18 }
0x145b   : > { %7760 = vrot.lane.b32.xlu0 %v15497_v28, %s10845_s15  ;;  %7752 = vrot.lane.b32.xlu1 %v15497_v28, %s10846_s17 }
0x1495   : > { %v7723_v39 = vpop.permute.xlu1 %7722 }
0x1499   : > { %v7731_v61 = vpop.permute.xlu1 %7730 }
0x149a   : > { %v7737_v43 = vsel %vm14036_vm11, %v7723_v39, %v7731_v61 }
0x149b   : > { %v7741_v27 = vmin.f32 %v15404_v48, %v7737_v43  ;;  %v7745_v9 = vmax.f32 %v15404_v48, %v7737_v43 }
0x149d   : > { %v15509_v36 = vsel %vm15439_vm1, %v7741_v27, %v7745_v9 }
0x149e   : > { %7754 = vrot.lane.b32.xlu1 %v15509_v36, %s10846_s17 }
0x14a2   : > { %7762 = vrot.lane.b32.xlu1 %v15509_v36, %s10845_s15 }
0x14b1   : > { %v7725_v35 = vpop.permute.xlu0 %7724 }
0x14b5   : > { %v7727_v25 = vpop.permute.xlu1 %7726  ;;  %v7733_v4 = vpop.permute.xlu0 %7732 }
0x14b6   : > { %v7738_v14 = vsel %vm14036_vm11, %v7725_v35, %v7733_v4 }
0x14b7   : > { %v7742_v17 = vmin.f32 %v15416_v59, %v7738_v14  ;;  %v7746_v1 = vmax.f32 %v15416_v59, %v7738_v14 }
0x14b9   : > { %v4017_v13 = vpop.permute.xlu1 %4016  ;;  %v7735_v48 = vpop.permute.xlu0 %7734  ;;  %v15521_v10 = vsel %vm15439_vm1, %v7742_v17, %v7746_v1 }
0x14ba   : > { %v7739_v49 = vsel %vm14036_vm11, %v7727_v25, %v7735_v48  ;;  %7756 = vrot.lane.b32.xlu0 %v15521_v10, %s10846_s17 }
0x14bb   : > { %v7743_v26 = vmin.f32 %v15430_v19, %v7739_v49  ;;  %v7747_v46 = vmax.f32 %v15430_v19, %v7739_v49 }
0x14bd   : > { %v4025_v60 = vpop.permute.xlu0 %4024  ;;  %v15535_v21 = vsel %vm15439_vm1, %v7743_v26, %v7747_v46 }
0x14be   : > { %v4032_v29 = vsel %vm14027_vm4, %v4017_v13, %v4025_v60  ;;  %7764 = vrot.lane.b32.xlu0 %v15521_v10, %s10845_s15  ;;  %7758 = vrot.lane.b32.xlu1 %v15535_v21, %s10846_s17 }
0x14bf   : > { %v4038_v55 = vmin.f32 %v15447_v38, %v4032_v29  ;;  %v4042_v58 = vmax.f32 %v15447_v38, %v4032_v29 }
0x14c1   : > { %v4019_v59 = vpop.permute.xlu1 %4018  ;;  %v4021_v3 = vpop.permute.xlu0 %4020  ;;  %v15552_v45 = vsel %vm15544_vm14, %v4038_v55, %v4042_v58 }
0x14c2   : > { %7766 = vrot.lane.b32.xlu0 %v15535_v21, %s10845_s15  ;;  %4052 = vrot.lane.b32.xlu1 %v15552_v45, %s10842_s28 }
0x14c5   : > { %v4027_v19 = vpop.permute.xlu1 %4026  ;;  %v4029_v24 = vpop.permute.xlu0 %4028 }
0x14c6   : > { %v4033_v50 = vsel %vm14027_vm4, %v4019_v59, %v4027_v19  ;;  %v4034_v54 = vsel %vm14027_vm4, %v4021_v3, %v4029_v24  ;;  %4060 = vrot.lane.b32.xlu0 %v15552_v45, %s10838_s19 }
0x14c7   : > { %v4039_v47 = vmin.f32 %v15465_v16, %v4033_v50  ;;  %v4043_v57 = vmax.f32 %v15465_v16, %v4033_v50  ;;  %v4040_v52 = vmin.f32 %v15471_v0, %v4034_v54  ;;  %v4044_v38 = vmax.f32 %v15471_v0, %v4034_v54 }
0x14c9   : > { %v15570_v34 = vsel %vm15544_vm14, %v4039_v47, %v4043_v57  ;;  %v4023_v31 = vpop.permute.xlu1 %4022  ;;  %v4031_v63 = vpop.permute.xlu0 %4030  ;;  %v15576_v51 = vsel %vm15544_vm14, %v4040_v52, %v4044_v38 }
0x14ca   : > { %4054 = vrot.lane.b32.xlu1 %v15570_v34, %s10842_s28  ;;  %v4035_v11 = vsel %vm14027_vm4, %v4023_v31, %v4031_v63  ;;  %4056 = vrot.lane.b32.xlu0 %v15576_v51, %s10842_s28 }
0x14cb   : > { %v4041_v6 = vmin.f32 %v15483_v42, %v4035_v11  ;;  %v4045_v8 = vmax.f32 %v15483_v42, %v4035_v11 }
0x14cd   : > { %v15588_v30 = vsel %vm15544_vm14, %v4041_v6, %v4045_v8  ;;  %v7753_v16 = vpop.permute.xlu1 %7752  ;;  %v7761_v15 = vpop.permute.xlu0 %7760 }
0x14ce   : > { %4062 = vrot.lane.b32.xlu1 %v15570_v34, %s10838_s19  ;;  %4064 = vrot.lane.b32.xlu0 %v15576_v51, %s10838_s19  ;;  %v7768_v41 = vsel %vm14027_vm4, %v7753_v16, %v7761_v15 }
0x14cf   : > { %v7772_v0 = vmin.f32 %v15497_v28, %v7768_v41  ;;  %v7776_v53 = vmax.f32 %v15497_v28, %v7768_v41  ;;  %v4050_v28 = vand.u32 64, %v17591_v2 }
0x14d1   : > { %v15602_v20 = vsel %vm15544_vm14, %v7772_v0, %v7776_v53  ;;  %vm15625_vm5 = vcmp.eq.s32.totalorder %v4050_v28, 0 }
0x14d2   : > { %4058 = vrot.lane.b32.xlu1 %v15588_v30, %s10842_s28  ;;  %4066 = vrot.lane.b32.xlu0 %v15588_v30, %s10838_s19  ;;  %vm4072_vm8 = vmxor %vm15095_vm9, %vm15625_vm5 }
0x14d3   : > { %vm15654_vm10 = vmxor %vm4072_vm8, %vm10847_vm6 }
0x14d4   : > { %vm4106_vm13 = vmxor %vm14670_vm7, %vm15625_vm5 }
0x14d5   : > { %vm15759_vm2 = vmxor %vm4106_vm13, %vm10847_vm6 }
0x14d6   : > { %7792 = vrot.lane.b32.xlu0 %v15602_v20, %s10838_s19  ;;  %7784 = vrot.lane.b32.xlu1 %v15602_v20, %s10842_s28  ;;  %vm4140_vm12 = vmxor %vm14350_vm0, %vm15625_vm5 }
0x14d7   : > { %vm15864_vm1 = vmxor %vm4140_vm12, %vm10847_vm6 }
0x14d8   : > { %vm4174_vm15 = vmxor %vm14135_vm3, %vm15625_vm5 }
0x14d9   : > { %vm4208_vm8 = vmxor %vm14036_vm11, %vm15625_vm5 }
0x14da   : > { %vm4242_vm13 = vmxor %vm14027_vm4, %vm15625_vm5 }
0x14db   : > { %vm4266_vm12 = vmxor %vm15625_vm5, %vm10847_vm6 }
0x14dc   : > { %vm4300_vm5 = vmxor %vm15095_vm9, %vm10847_vm6 }
0x1510   : > { %v7755_v22 = vpop.permute.xlu1 %7754 }
0x1514   : > { %v7763_v42 = vpop.permute.xlu1 %7762 }
0x1515   : > { %v7769_v5 = vsel %vm14027_vm4, %v7755_v22, %v7763_v42 }
0x1516   : > { %v7773_v33 = vmin.f32 %v15509_v36, %v7769_v5  ;;  %v7777_v23 = vmax.f32 %v15509_v36, %v7769_v5 }
0x1518   : > { %v15614_v56 = vsel %vm15544_vm14, %v7773_v33, %v7777_v23 }
0x1519   : > { %7786 = vrot.lane.b32.xlu1 %v15614_v56, %s10842_s28 }
0x151d   : > { %7794 = vrot.lane.b32.xlu1 %v15614_v56, %s10838_s19 }
0x152c   : > { %v7757_v18 = vpop.permute.xlu0 %7756 }
0x1530   : > { %v7759_v39 = vpop.permute.xlu1 %7758  ;;  %v7765_v61 = vpop.permute.xlu0 %7764 }
0x1531   : > { %v7770_v43 = vsel %vm14027_vm4, %v7757_v18, %v7765_v61 }
0x1532   : > { %v7774_v27 = vmin.f32 %v15521_v10, %v7770_v43  ;;  %v7778_v9 = vmax.f32 %v15521_v10, %v7770_v43 }
0x1534   : > { %v4053_v35 = vpop.permute.xlu1 %4052  ;;  %v7767_v25 = vpop.permute.xlu0 %7766  ;;  %v15631_v4 = vsel %vm15544_vm14, %v7774_v27, %v7778_v9 }
0x1535   : > { %v7771_v2 = vsel %vm14027_vm4, %v7759_v39, %v7767_v25  ;;  %7788 = vrot.lane.b32.xlu0 %v15631_v4, %s10842_s28 }
0x1536   : > { %v7775_v14 = vmin.f32 %v15535_v21, %v7771_v2  ;;  %v7779_v17 = vmax.f32 %v15535_v21, %v7771_v2 }
0x1538   : > { %v4061_v1 = vpop.permute.xlu0 %4060  ;;  %v15645_v13 = vsel %vm15544_vm14, %v7775_v14, %v7779_v17  ;;  %vm15969_vm14 = vmxor %vm4174_vm15, %vm10847_vm6 }
0x1539   : > { %v4068_v48 = vsel %vm15095_vm9, %v4053_v35, %v4061_v1  ;;  %7796 = vrot.lane.b32.xlu0 %v15631_v4, %s10838_s19  ;;  %7790 = vrot.lane.b32.xlu1 %v15645_v13, %s10842_s28  ;;  %vm16283_vm15 = vmxor %vm4300_vm5, %vm10847_vm6  ;;  %vm17668_vm5 = vcmask 261120  }
0x153a   : > { %v4074_v26 = vmin.f32 %v15552_v45, %v4068_v48  ;;  %v4078_v46 = vmax.f32 %v15552_v45, %v4068_v48 }
0x153c   : > { %v4055_v49 = vpop.permute.xlu1 %4054  ;;  %v4057_v60 = vpop.permute.xlu0 %4056  ;;  %v15662_v21 = vsel %vm15654_vm10, %v4074_v26, %v4078_v46 }
0x153d   : > { %7798 = vrot.lane.b32.xlu0 %v15645_v13, %s10838_s19  ;;  %4086 = vrot.lane.b32.xlu1 %v15662_v21, %s10852_s9 }
0x1540   : > { %v4063_v29 = vpop.permute.xlu1 %4062  ;;  %v4065_v58 = vpop.permute.xlu0 %4064 }
0x1541   : > { %v4069_v40 = vsel %vm15095_vm9, %v4055_v49, %v4063_v29  ;;  %v4070_v3 = vsel %vm15095_vm9, %v4057_v60, %v4065_v58  ;;  %4094 = vrot.lane.b32.xlu0 %v15662_v21, %s10853_s11 }
0x1542   : > { %v4075_v59 = vmin.f32 %v15570_v34, %v4069_v40  ;;  %v4079_v55 = vmax.f32 %v15570_v34, %v4069_v40  ;;  %v4076_v45 = vmin.f32 %v15576_v51, %v4070_v3  ;;  %v4080_v19 = vmax.f32 %v15576_v51, %v4070_v3 }
0x1544   : > { %v15680_v50 = vsel %vm15654_vm10, %v4075_v59, %v4079_v55  ;;  %v4059_v47 = vpop.permute.xlu1 %4058  ;;  %v4067_v57 = vpop.permute.xlu0 %4066  ;;  %v15686_v24 = vsel %vm15654_vm10, %v4076_v45, %v4080_v19 }
0x1545   : > { %4088 = vrot.lane.b32.xlu1 %v15680_v50, %s10852_s9  ;;  %v4071_v54 = vsel %vm15095_vm9, %v4059_v47, %v4067_v57  ;;  %4090 = vrot.lane.b32.xlu0 %v15686_v24, %s10852_s9 }
0x1546   : > { %v4077_v52 = vmin.f32 %v15588_v30, %v4071_v54  ;;  %v4081_v38 = vmax.f32 %v15588_v30, %v4071_v54 }
0x1548   : > { %v15698_v34 = vsel %vm15654_vm10, %v4077_v52, %v4081_v38  ;;  %v7785_v31 = vpop.permute.xlu1 %7784  ;;  %v7793_v63 = vpop.permute.xlu0 %7792 }
0x1549   : > { %4096 = vrot.lane.b32.xlu1 %v15680_v50, %s10853_s11  ;;  %4098 = vrot.lane.b32.xlu0 %v15686_v24, %s10853_s11  ;;  %v7800_v51 = vsel %vm15095_vm9, %v7785_v31, %v7793_v63 }
0x154a   : > { %v7804_v11 = vmin.f32 %v15602_v20, %v7800_v51  ;;  %v7808_v6 = vmax.f32 %v15602_v20, %v7800_v51 }
0x154c   : > { %v15712_v8 = vsel %vm15654_vm10, %v7804_v11, %v7808_v6 }
0x154d   : > { %4092 = vrot.lane.b32.xlu1 %v15698_v34, %s10852_s9  ;;  %4100 = vrot.lane.b32.xlu0 %v15698_v34, %s10853_s11 }
0x1551   : > { %7816 = vrot.lane.b32.xlu1 %v15712_v8, %s10852_s9  ;;  %7824 = vrot.lane.b32.xlu0 %v15712_v8, %s10853_s11 }
0x158b   : > { %v7787_v30 = vpop.permute.xlu1 %7786 }
0x158f   : > { %v7795_v16 = vpop.permute.xlu1 %7794 }
0x1590   : > { %v7801_v15 = vsel %vm15095_vm9, %v7787_v30, %v7795_v16 }
0x1591   : > { %v7805_v41 = vmin.f32 %v15614_v56, %v7801_v15  ;;  %v7809_v0 = vmax.f32 %v15614_v56, %v7801_v15 }
0x1593   : > { %v15724_v53 = vsel %vm15654_vm10, %v7805_v41, %v7809_v0 }
0x1594   : > { %7818 = vrot.lane.b32.xlu1 %v15724_v53, %s10852_s9 }
0x1598   : > { %7826 = vrot.lane.b32.xlu1 %v15724_v53, %s10853_s11 }
0x15a7   : > { %v7789_v20 = vpop.permute.xlu0 %7788 }
0x15ab   : > { %v7791_v22 = vpop.permute.xlu1 %7790  ;;  %v7797_v42 = vpop.permute.xlu0 %7796 }
0x15ac   : > { %v7802_v5 = vsel %vm15095_vm9, %v7789_v20, %v7797_v42 }
0x15ad   : > { %v7806_v33 = vmin.f32 %v15631_v4, %v7802_v5  ;;  %v7810_v23 = vmax.f32 %v15631_v4, %v7802_v5 }
0x15af   : > { %v4087_v56 = vpop.permute.xlu1 %4086  ;;  %v7799_v18 = vpop.permute.xlu0 %7798  ;;  %v15736_v28 = vsel %vm15654_vm10, %v7806_v33, %v7810_v23 }
0x15b0   : > { %v7803_v39 = vsel %vm15095_vm9, %v7791_v22, %v7799_v18  ;;  %7820 = vrot.lane.b32.xlu0 %v15736_v28, %s10852_s9 }
0x15b1   : > { %v7807_v61 = vmin.f32 %v15645_v13, %v7803_v39  ;;  %v7811_v43 = vmax.f32 %v15645_v13, %v7803_v39 }
0x15b3   : > { %v4095_v27 = vpop.permute.xlu0 %4094  ;;  %v15750_v9 = vsel %vm15654_vm10, %v7807_v61, %v7811_v43  ;;  %vm16074_vm10 = vmxor %vm4208_vm8, %vm10847_vm6 }
0x15b4   : > { %v4102_v35 = vsel %vm14670_vm7, %v4087_v56, %v4095_v27  ;;  %7828 = vrot.lane.b32.xlu0 %v15736_v28, %s10853_s11  ;;  %7822 = vrot.lane.b32.xlu1 %v15750_v9, %s10852_s9  ;;  %vm4368_vm8 = vmxor %vm14350_vm0, %vm10847_vm6 }
0x15b5   : > { %v4108_v2 = vmin.f32 %v15662_v21, %v4102_v35  ;;  %v4112_v14 = vmax.f32 %v15662_v21, %v4102_v35 }
0x15b7   : > { %v4089_v4 = vpop.permute.xlu1 %4088  ;;  %v4091_v17 = vpop.permute.xlu0 %4090  ;;  %v15767_v1 = vsel %vm15759_vm2, %v4108_v2, %v4112_v14 }
0x15b8   : > { %7830 = vrot.lane.b32.xlu0 %v15750_v9, %s10853_s11  ;;  %4120 = vrot.lane.b32.xlu1 %v15767_v1, %s10844_s10 }
0x15bb   : > { %v4097_v13 = vpop.permute.xlu1 %4096  ;;  %v4099_v26 = vpop.permute.xlu0 %4098 }
0x15bc   : > { %v4103_v48 = vsel %vm14670_vm7, %v4089_v4, %v4097_v13  ;;  %v4104_v46 = vsel %vm14670_vm7, %v4091_v17, %v4099_v26  ;;  %4128 = vrot.lane.b32.xlu0 %v15767_v1, %s10843_s16 }
0x15bd   : > { %v4109_v10 = vmin.f32 %v15680_v50, %v4103_v48  ;;  %v4113_v49 = vmax.f32 %v15680_v50, %v4103_v48  ;;  %v4110_v60 = vmin.f32 %v15686_v24, %v4104_v46  ;;  %v4114_v21 = vmax.f32 %v15686_v24, %v4104_v46 }
0x15bf   : > { %v15785_v29 = vsel %vm15759_vm2, %v4109_v10, %v4113_v49  ;;  %v4093_v40 = vpop.permute.xlu1 %4092  ;;  %v4101_v59 = vpop.permute.xlu0 %4100  ;;  %v15791_v55 = vsel %vm15759_vm2, %v4110_v60, %v4114_v21 }
0x15c0   : > { %4122 = vrot.lane.b32.xlu1 %v15785_v29, %s10844_s10  ;;  %v4105_v58 = vsel %vm14670_vm7, %v4093_v40, %v4101_v59  ;;  %4124 = vrot.lane.b32.xlu0 %v15791_v55, %s10844_s10 }
0x15c1   : > { %v4111_v3 = vmin.f32 %v15698_v34, %v4105_v58  ;;  %v4115_v45 = vmax.f32 %v15698_v34, %v4105_v58 }
0x15c3   : > { %v7817_v19 = vpop.permute.xlu1 %7816  ;;  %v7825_v50 = vpop.permute.xlu0 %7824  ;;  %v15803_v47 = vsel %vm15759_vm2, %v4111_v3, %v4115_v45 }
0x15c4   : > { %4130 = vrot.lane.b32.xlu1 %v15785_v29, %s10843_s16  ;;  %v7832_v57 = vsel %vm14670_vm7, %v7817_v19, %v7825_v50  ;;  %4132 = vrot.lane.b32.xlu0 %v15791_v55, %s10843_s16 }
0x15c5   : > { %v7836_v24 = vmin.f32 %v15712_v8, %v7832_v57  ;;  %v7840_v54 = vmax.f32 %v15712_v8, %v7832_v57 }
0x15c7   : > { %v15815_v52 = vsel %vm15759_vm2, %v7836_v24, %v7840_v54 }
0x15c8   : > { %4126 = vrot.lane.b32.xlu1 %v15803_v47, %s10844_s10  ;;  %4134 = vrot.lane.b32.xlu0 %v15803_v47, %s10843_s16 }
0x15cc   : > { %7848 = vrot.lane.b32.xlu1 %v15815_v52, %s10844_s10  ;;  %7856 = vrot.lane.b32.xlu0 %v15815_v52, %s10843_s16 }
0x1606   : > { %v7819_v38 = vpop.permute.xlu1 %7818 }
0x160a   : > { %v7827_v34 = vpop.permute.xlu1 %7826 }
0x160b   : > { %v7833_v31 = vsel %vm14670_vm7, %v7819_v38, %v7827_v34 }
0x160c   : > { %v7837_v63 = vmin.f32 %v15724_v53, %v7833_v31  ;;  %v7841_v51 = vmax.f32 %v15724_v53, %v7833_v31 }
0x160e   : > { %v15829_v11 = vsel %vm15759_vm2, %v7837_v63, %v7841_v51 }
0x160f   : > { %7850 = vrot.lane.b32.xlu1 %v15829_v11, %s10844_s10 }
0x1613   : > { %7858 = vrot.lane.b32.xlu1 %v15829_v11, %s10843_s16 }
0x1622   : > { %v7821_v6 = vpop.permute.xlu0 %7820 }
0x1626   : > { %v7823_v8 = vpop.permute.xlu1 %7822  ;;  %v7829_v30 = vpop.permute.xlu0 %7828 }
0x1627   : > { %v7834_v16 = vsel %vm14670_vm7, %v7821_v6, %v7829_v30 }
0x1628   : > { %v7838_v15 = vmin.f32 %v15736_v28, %v7834_v16  ;;  %v7842_v41 = vmax.f32 %v15736_v28, %v7834_v16 }
0x162a   : > { %v4121_v0 = vpop.permute.xlu1 %4120  ;;  %v7831_v53 = vpop.permute.xlu0 %7830  ;;  %v15841_v20 = vsel %vm15759_vm2, %v7838_v15, %v7842_v41 }
0x162b   : > { %v7835_v22 = vsel %vm14670_vm7, %v7823_v8, %v7831_v53  ;;  %7852 = vrot.lane.b32.xlu0 %v15841_v20, %s10844_s10 }
0x162c   : > { %v7839_v42 = vmin.f32 %v15750_v9, %v7835_v22  ;;  %v7843_v5 = vmax.f32 %v15750_v9, %v7835_v22 }
0x162e   : > { %v4129_v33 = vpop.permute.xlu0 %4128  ;;  %v15855_v23 = vsel %vm15759_vm2, %v7839_v42, %v7843_v5  ;;  %vm16171_vm2 = vmxor %vm4242_vm13, %vm10847_vm6 }
0x162f   : > { %v4136_v56 = vsel %vm14350_vm0, %v4121_v0, %v4129_v33  ;;  %7860 = vrot.lane.b32.xlu0 %v15841_v20, %s10843_s16  ;;  %7854 = vrot.lane.b32.xlu1 %v15855_v23, %s10844_s10  ;;  %vm4436_vm13 = vmxor %vm14036_vm11, %vm10847_vm6 }
0x1630   : > { %v4142_v39 = vmin.f32 %v15767_v1, %v4136_v56  ;;  %v4146_v61 = vmax.f32 %v15767_v1, %v4136_v56 }
0x1632   : > { %v4123_v28 = vpop.permute.xlu1 %4122  ;;  %v4125_v43 = vpop.permute.xlu0 %4124  ;;  %v15872_v27 = vsel %vm15864_vm1, %v4142_v39, %v4146_v61 }
0x1633   : > { %7862 = vrot.lane.b32.xlu0 %v15855_v23, %s10843_s16  ;;  %4154 = vrot.lane.b32.xlu1 %v15872_v27, %s10850_s26 }
0x1636   : > { %v4131_v9 = vpop.permute.xlu1 %4130  ;;  %v4133_v2 = vpop.permute.xlu0 %4132 }
0x1637   : > { %v4137_v35 = vsel %vm14350_vm0, %v4123_v28, %v4131_v9  ;;  %v4138_v14 = vsel %vm14350_vm0, %v4125_v43, %v4133_v2  ;;  %4162 = vrot.lane.b32.xlu0 %v15872_v27, %s10851_s29 }
0x1638   : > { %v4143_v25 = vmin.f32 %v15785_v29, %v4137_v35  ;;  %v4147_v4 = vmax.f32 %v15785_v29, %v4137_v35  ;;  %v4144_v1 = vmin.f32 %v15791_v55, %v4138_v14  ;;  %v4148_v13 = vmax.f32 %v15791_v55, %v4138_v14 }
0x163a   : > { %v4127_v17 = vpop.permute.xlu1 %4126  ;;  %v15890_v48 = vsel %vm15864_vm1, %v4143_v25, %v4147_v4  ;;  %v4135_v10 = vpop.permute.xlu0 %4134  ;;  %v15896_v49 = vsel %vm15864_vm1, %v4144_v1, %v4148_v13 }
0x163b   : > { %4156 = vrot.lane.b32.xlu1 %v15890_v48, %s10850_s26  ;;  %v4139_v26 = vsel %vm14350_vm0, %v4127_v17, %v4135_v10  ;;  %4158 = vrot.lane.b32.xlu0 %v15896_v49, %s10850_s26 }
0x163c   : > { %v4145_v46 = vmin.f32 %v15803_v47, %v4139_v26  ;;  %v4149_v60 = vmax.f32 %v15803_v47, %v4139_v26 }
0x163e   : > { %v7849_v21 = vpop.permute.xlu1 %7848  ;;  %v7857_v29 = vpop.permute.xlu0 %7856  ;;  %v15908_v40 = vsel %vm15864_vm1, %v4145_v46, %v4149_v60 }
0x163f   : > { %4164 = vrot.lane.b32.xlu1 %v15890_v48, %s10851_s29  ;;  %v7864_v59 = vsel %vm14350_vm0, %v7849_v21, %v7857_v29  ;;  %4166 = vrot.lane.b32.xlu0 %v15896_v49, %s10851_s29 }
0x1640   : > { %v7868_v55 = vmin.f32 %v15815_v52, %v7864_v59  ;;  %v7872_v58 = vmax.f32 %v15815_v52, %v7864_v59 }
0x1642   : > { %v15920_v3 = vsel %vm15864_vm1, %v7868_v55, %v7872_v58 }
0x1643   : > { %4160 = vrot.lane.b32.xlu1 %v15908_v40, %s10850_s26  ;;  %4168 = vrot.lane.b32.xlu0 %v15908_v40, %s10851_s29 }
0x1647   : > { %7880 = vrot.lane.b32.xlu1 %v15920_v3, %s10850_s26  ;;  %7888 = vrot.lane.b32.xlu0 %v15920_v3, %s10851_s29 }
0x1681   : > { %v7851_v45 = vpop.permute.xlu1 %7850 }
0x1685   : > { %v7859_v19 = vpop.permute.xlu1 %7858 }
0x1686   : > { %v7865_v50 = vsel %vm14350_vm0, %v7851_v45, %v7859_v19 }
0x1687   : > { %v7869_v47 = vmin.f32 %v15829_v11, %v7865_v50  ;;  %v7873_v57 = vmax.f32 %v15829_v11, %v7865_v50 }
0x1689   : > { %v15934_v24 = vsel %vm15864_vm1, %v7869_v47, %v7873_v57 }
0x168a   : > { %7882 = vrot.lane.b32.xlu1 %v15934_v24, %s10850_s26 }
0x168e   : > { %7890 = vrot.lane.b32.xlu1 %v15934_v24, %s10851_s29 }
0x169d   : > { %v7853_v54 = vpop.permute.xlu0 %7852 }
0x16a1   : > { %v7855_v52 = vpop.permute.xlu1 %7854  ;;  %v7861_v38 = vpop.permute.xlu0 %7860 }
0x16a2   : > { %v7866_v34 = vsel %vm14350_vm0, %v7853_v54, %v7861_v38 }
0x16a3   : > { %v7870_v31 = vmin.f32 %v15841_v20, %v7866_v34  ;;  %v7874_v63 = vmax.f32 %v15841_v20, %v7866_v34 }
0x16a5   : > { %v4155_v51 = vpop.permute.xlu1 %4154  ;;  %v7863_v11 = vpop.permute.xlu0 %7862  ;;  %v15946_v6 = vsel %vm15864_vm1, %v7870_v31, %v7874_v63 }
0x16a6   : > { %v7867_v8 = vsel %vm14350_vm0, %v7855_v52, %v7863_v11  ;;  %7884 = vrot.lane.b32.xlu0 %v15946_v6, %s10850_s26 }
0x16a7   : > { %v7871_v30 = vmin.f32 %v15855_v23, %v7867_v8  ;;  %v7875_v16 = vmax.f32 %v15855_v23, %v7867_v8 }
0x16a9   : > { %v4163_v15 = vpop.permute.xlu0 %4162  ;;  %v15960_v41 = vsel %vm15864_vm1, %v7871_v30, %v7875_v16  ;;  %vm16223_vm1 = vmxor %vm4266_vm12, %vm10847_vm6  ;;  %vm4489_vm12 = vcmask 1041409  }
0x16aa   : > { %v4170_v0 = vsel %vm14135_vm3, %v4155_v51, %v4163_v15  ;;  %7892 = vrot.lane.b32.xlu0 %v15946_v6, %s10851_s29  ;;  %7886 = vrot.lane.b32.xlu1 %v15960_v41, %s10850_s26 }
0x16ab   : > { %v4176_v22 = vmin.f32 %v15872_v27, %v4170_v0  ;;  %v4180_v42 = vmax.f32 %v15872_v27, %v4170_v0 }
0x16ad   : > { %v4157_v20 = vpop.permute.xlu1 %4156  ;;  %v4159_v5 = vpop.permute.xlu0 %4158  ;;  %v15977_v33 = vsel %vm15969_vm14, %v4176_v22, %v4180_v42 }
0x16ae   : > { %7894 = vrot.lane.b32.xlu0 %v15960_v41, %s10851_s29  ;;  %4188 = vrot.lane.b32.xlu1 %v15977_v33, %s10848_s18 }
0x16b1   : > { %v4165_v23 = vpop.permute.xlu1 %4164  ;;  %v4167_v39 = vpop.permute.xlu0 %4166 }
0x16b2   : > { %v4171_v56 = vsel %vm14135_vm3, %v4157_v20, %v4165_v23  ;;  %v4172_v61 = vsel %vm14135_vm3, %v4159_v5, %v4167_v39  ;;  %4196 = vrot.lane.b32.xlu0 %v15977_v33, %s10849_s20 }
0x16b3   : > { %v4177_v18 = vmin.f32 %v15890_v48, %v4171_v56  ;;  %v4181_v28 = vmax.f32 %v15890_v48, %v4171_v56  ;;  %v4178_v27 = vmin.f32 %v15896_v49, %v4172_v61  ;;  %v4182_v9 = vmax.f32 %v15896_v49, %v4172_v61 }
0x16b5   : > { %v4161_v43 = vpop.permute.xlu1 %4160  ;;  %v15995_v35 = vsel %vm15969_vm14, %v4177_v18, %v4181_v28  ;;  %v4169_v25 = vpop.permute.xlu0 %4168  ;;  %v16001_v4 = vsel %vm15969_vm14, %v4178_v27, %v4182_v9 }
0x16b6   : > { %4190 = vrot.lane.b32.xlu1 %v15995_v35, %s10848_s18  ;;  %v4173_v2 = vsel %vm14135_vm3, %v4161_v43, %v4169_v25  ;;  %4192 = vrot.lane.b32.xlu0 %v16001_v4, %s10848_s18 }
0x16b7   : > { %v4179_v14 = vmin.f32 %v15908_v40, %v4173_v2  ;;  %v4183_v17 = vmax.f32 %v15908_v40, %v4173_v2 }
0x16b9   : > { %v7881_v1 = vpop.permute.xlu1 %7880  ;;  %v7889_v13 = vpop.permute.xlu0 %7888  ;;  %v16013_v48 = vsel %vm15969_vm14, %v4179_v14, %v4183_v17 }
0x16ba   : > { %4198 = vrot.lane.b32.xlu1 %v15995_v35, %s10849_s20  ;;  %v7896_v10 = vsel %vm14135_vm3, %v7881_v1, %v7889_v13  ;;  %4200 = vrot.lane.b32.xlu0 %v16001_v4, %s10849_s20 }
0x16bb   : > { %v7900_v49 = vmin.f32 %v15920_v3, %v7896_v10  ;;  %v7904_v26 = vmax.f32 %v15920_v3, %v7896_v10 }
0x16bd   : > { %v16025_v46 = vsel %vm15969_vm14, %v7900_v49, %v7904_v26 }
0x16be   : > { %4194 = vrot.lane.b32.xlu1 %v16013_v48, %s10848_s18  ;;  %4202 = vrot.lane.b32.xlu0 %v16013_v48, %s10849_s20 }
0x16c2   : > { %7912 = vrot.lane.b32.xlu1 %v16025_v46, %s10848_s18  ;;  %7920 = vrot.lane.b32.xlu0 %v16025_v46, %s10849_s20 }
0x16fc   : > { %v7883_v60 = vpop.permute.xlu1 %7882 }
0x1700   : > { %v7891_v21 = vpop.permute.xlu1 %7890 }
0x1701   : > { %v7897_v29 = vsel %vm14135_vm3, %v7883_v60, %v7891_v21 }
0x1702   : > { %v7901_v40 = vmin.f32 %v15934_v24, %v7897_v29  ;;  %v7905_v59 = vmax.f32 %v15934_v24, %v7897_v29 }
0x1704   : > { %v16039_v55 = vsel %vm15969_vm14, %v7901_v40, %v7905_v59 }
0x1705   : > { %7914 = vrot.lane.b32.xlu1 %v16039_v55, %s10848_s18 }
0x1709   : > { %7922 = vrot.lane.b32.xlu1 %v16039_v55, %s10849_s20 }
0x1718   : > { %v7885_v58 = vpop.permute.xlu0 %7884 }
0x171c   : > { %v7887_v3 = vpop.permute.xlu1 %7886  ;;  %v7893_v45 = vpop.permute.xlu0 %7892 }
0x171d   : > { %v7898_v19 = vsel %vm14135_vm3, %v7885_v58, %v7893_v45 }
0x171e   : > { %v7902_v50 = vmin.f32 %v15946_v6, %v7898_v19  ;;  %v7906_v47 = vmax.f32 %v15946_v6, %v7898_v19 }
0x1720   : > { %v4189_v57 = vpop.permute.xlu1 %4188  ;;  %v7895_v24 = vpop.permute.xlu0 %7894  ;;  %v16051_v54 = vsel %vm15969_vm14, %v7902_v50, %v7906_v47 }
0x1721   : > { %v7899_v52 = vsel %vm14135_vm3, %v7887_v3, %v7895_v24  ;;  %7916 = vrot.lane.b32.xlu0 %v16051_v54, %s10848_s18 }
0x1722   : > { %v7903_v38 = vmin.f32 %v15960_v41, %v7899_v52  ;;  %v7907_v34 = vmax.f32 %v15960_v41, %v7899_v52 }
0x1724   : > { %v4197_v31 = vpop.permute.xlu0 %4196  ;;  %v16065_v63 = vsel %vm15969_vm14, %v7903_v38, %v7907_v34  ;;  %vm4334_vm14 = vmxor %vm14670_vm7, %vm10847_vm6 }
0x1725   : > { %v4204_v51 = vsel %vm14036_vm11, %v4189_v57, %v4197_v31  ;;  %7924 = vrot.lane.b32.xlu0 %v16051_v54, %s10849_s20  ;;  %7918 = vrot.lane.b32.xlu1 %v16065_v63, %s10848_s18 }
0x1726   : > { %v4210_v8 = vmin.f32 %v15977_v33, %v4204_v51  ;;  %v4214_v30 = vmax.f32 %v15977_v33, %v4204_v51 }
0x1728   : > { %v4191_v6 = vpop.permute.xlu1 %4190  ;;  %v4193_v16 = vpop.permute.xlu0 %4192  ;;  %v16082_v15 = vsel %vm16074_vm10, %v4210_v8, %v4214_v30 }
0x1729   : > { %7926 = vrot.lane.b32.xlu0 %v16065_v63, %s10849_s20  ;;  %4222 = vrot.lane.b32.xlu1 %v16082_v15, %s10846_s17 }
0x172c   : > { %v4199_v41 = vpop.permute.xlu1 %4198  ;;  %v4201_v22 = vpop.permute.xlu0 %4200 }
0x172d   : > { %v4205_v0 = vsel %vm14036_vm11, %v4191_v6, %v4199_v41  ;;  %v4206_v42 = vsel %vm14036_vm11, %v4193_v16, %v4201_v22  ;;  %4230 = vrot.lane.b32.xlu0 %v16082_v15, %s10845_s15 }
0x172e   : > { %v4211_v53 = vmin.f32 %v15995_v35, %v4205_v0  ;;  %v4215_v20 = vmax.f32 %v15995_v35, %v4205_v0  ;;  %v4212_v33 = vmin.f32 %v16001_v4, %v4206_v42  ;;  %v4216_v23 = vmax.f32 %v16001_v4, %v4206_v42 }
0x1730   : > { %v4195_v5 = vpop.permute.xlu1 %4194  ;;  %v16100_v56 = vsel %vm16074_vm10, %v4211_v53, %v4215_v20  ;;  %v4203_v18 = vpop.permute.xlu0 %4202  ;;  %v16106_v28 = vsel %vm16074_vm10, %v4212_v33, %v4216_v23 }
0x1731   : > { %4224 = vrot.lane.b32.xlu1 %v16100_v56, %s10846_s17  ;;  %v4207_v39 = vsel %vm14036_vm11, %v4195_v5, %v4203_v18  ;;  %4226 = vrot.lane.b32.xlu0 %v16106_v28, %s10846_s17 }
0x1732   : > { %v4213_v61 = vmin.f32 %v16013_v48, %v4207_v39  ;;  %v4217_v43 = vmax.f32 %v16013_v48, %v4207_v39 }
0x1734   : > { %v7913_v27 = vpop.permute.xlu1 %7912  ;;  %v7921_v9 = vpop.permute.xlu0 %7920  ;;  %v16118_v35 = vsel %vm16074_vm10, %v4213_v61, %v4217_v43 }
0x1735   : > { %4232 = vrot.lane.b32.xlu1 %v16100_v56, %s10845_s15  ;;  %v7928_v25 = vsel %vm14036_vm11, %v7913_v27, %v7921_v9  ;;  %4234 = vrot.lane.b32.xlu0 %v16106_v28, %s10845_s15 }
0x1736   : > { %v7932_v4 = vmin.f32 %v16025_v46, %v7928_v25  ;;  %v7936_v2 = vmax.f32 %v16025_v46, %v7928_v25 }
0x1738   : > { %v7940_v14 = vsel %vm16074_vm10, %v7932_v4, %v7936_v2 }
0x1739   : > { %4228 = vrot.lane.b32.xlu1 %v16118_v35, %s10846_s17  ;;  %4236 = vrot.lane.b32.xlu0 %v16118_v35, %s10845_s15 }
0x173d   : > { %7944 = vrot.lane.b32.xlu1 %v7940_v14, %s10846_s17  ;;  %7952 = vrot.lane.b32.xlu0 %v7940_v14, %s10845_s15 }
0x1777   : > { %v7915_v17 = vpop.permute.xlu1 %7914 }
0x177b   : > { %v7923_v1 = vpop.permute.xlu1 %7922 }
0x177c   : > { %v7929_v13 = vsel %vm14036_vm11, %v7915_v17, %v7923_v1 }
0x177d   : > { %v7933_v48 = vmin.f32 %v16039_v55, %v7929_v13  ;;  %v7937_v10 = vmax.f32 %v16039_v55, %v7929_v13 }
0x177f   : > { %v7941_v49 = vsel %vm16074_vm10, %v7933_v48, %v7937_v10 }
0x1780   : > { %7946 = vrot.lane.b32.xlu1 %v7941_v49, %s10846_s17 }
0x1784   : > { %7954 = vrot.lane.b32.xlu1 %v7941_v49, %s10845_s15 }
0x1793   : > { %v7917_v26 = vpop.permute.xlu0 %7916 }
0x1797   : > { %v7919_v46 = vpop.permute.xlu1 %7918  ;;  %v7925_v60 = vpop.permute.xlu0 %7924 }
0x1798   : > { %v7930_v21 = vsel %vm14036_vm11, %v7917_v26, %v7925_v60 }
0x1799   : > { %v7934_v29 = vmin.f32 %v16051_v54, %v7930_v21  ;;  %v7938_v40 = vmax.f32 %v16051_v54, %v7930_v21 }
0x179b   : > { %v4223_v59 = vpop.permute.xlu1 %4222  ;;  %v7927_v58 = vpop.permute.xlu0 %7926  ;;  %v16148_v55 = vsel %vm16074_vm10, %v7934_v29, %v7938_v40 }
0x179c   : > { %v7931_v3 = vsel %vm14036_vm11, %v7919_v46, %v7927_v58  ;;  %7948 = vrot.lane.b32.xlu0 %v16148_v55, %s10846_s17 }
0x179d   : > { %v7935_v45 = vmin.f32 %v16065_v63, %v7931_v3  ;;  %v7939_v19 = vmax.f32 %v16065_v63, %v7931_v3 }
0x179f   : > { %v4231_v50 = vpop.permute.xlu0 %4230  ;;  %v16162_v47 = vsel %vm16074_vm10, %v7935_v45, %v7939_v19  ;;  %vm4402_vm10 = vmxor %vm14135_vm3, %vm10847_vm6 }
0x17a0   : > { %v4238_v57 = vsel %vm14027_vm4, %v4223_v59, %v4231_v50  ;;  %7956 = vrot.lane.b32.xlu0 %v16148_v55, %s10845_s15  ;;  %7950 = vrot.lane.b32.xlu1 %v16162_v47, %s10846_s17 }
0x17a1   : > { %v4244_v52 = vmin.f32 %v16082_v15, %v4238_v57  ;;  %v4248_v38 = vmax.f32 %v16082_v15, %v4238_v57 }
0x17a3   : > { %v4225_v54 = vpop.permute.xlu1 %4224  ;;  %v4227_v34 = vpop.permute.xlu0 %4226  ;;  %v4252_v31 = vsel %vm16171_vm2, %v4244_v52, %v4248_v38 }
0x17a4   : > { %7958 = vrot.lane.b32.xlu0 %v16162_v47, %s10845_s15  ;;  %4258 = vrot.lane.b32.xlu1 %v4252_v31, %s10854_s12 }
0x17a7   : > { %v4233_v63 = vpop.permute.xlu1 %4232  ;;  %v4235_v8 = vpop.permute.xlu0 %4234 }
0x17a8   : > { %v4239_v51 = vsel %vm14027_vm4, %v4225_v54, %v4233_v63  ;;  %v4240_v30 = vsel %vm14027_vm4, %v4227_v34, %v4235_v8 }
0x17a9   : > { %v4245_v11 = vmin.f32 %v16100_v56, %v4239_v51  ;;  %v4249_v6 = vmax.f32 %v16100_v56, %v4239_v51  ;;  %v4246_v15 = vmin.f32 %v16106_v28, %v4240_v30  ;;  %v4250_v41 = vmax.f32 %v16106_v28, %v4240_v30 }
0x17ab   : > { %v4229_v16 = vpop.permute.xlu1 %4228  ;;  %v4253_v0 = vsel %vm16171_vm2, %v4245_v11, %v4249_v6  ;;  %v4237_v53 = vpop.permute.xlu0 %4236  ;;  %v4254_v20 = vsel %vm16171_vm2, %v4246_v15, %v4250_v41 }
0x17ac   : > { %4260 = vrot.lane.b32.xlu1 %v4253_v0, %s10854_s12  ;;  %4262 = vrot.lane.b32.xlu0 %v4254_v20, %s10854_s12  ;;  %v4241_v39 = vsel %vm14027_vm4, %v4229_v16, %v4237_v53 }
0x17ad   : > { %v4247_v9 = vmin.f32 %v16118_v35, %v4241_v39  ;;  %v4251_v25 = vmax.f32 %v16118_v35, %v4241_v39 }
0x17af   : > { %v7945_v22 = vpop.permute.xlu1 %7944  ;;  %v7953_v42 = vpop.permute.xlu0 %7952  ;;  %v4255_v2 = vsel %vm16171_vm2, %v4247_v9, %v4251_v25 }
0x17b0   : > { %v7960_v5 = vsel %vm14027_vm4, %v7945_v22, %v7953_v42 }
0x17b1   : > { %v7964_v33 = vmin.f32 %v7940_v14, %v7960_v5  ;;  %v7968_v23 = vmax.f32 %v7940_v14, %v7960_v5 }
0x17b3   : > { %v7972_v56 = vsel %vm16171_vm2, %v7964_v33, %v7968_v23 }
0x17b4   : > { %7976 = vrot.lane.b32.xlu0 %v7972_v56, %s10854_s12 }
0x17f2   : > { %v7947_v18 = vpop.permute.xlu1 %7946 }
0x17f6   : > { %v7955_v28 = vpop.permute.xlu1 %7954 }
0x17f7   : > { %v7961_v61 = vsel %vm14027_vm4, %v7947_v18, %v7955_v28 }
0x17f8   : > { %v7965_v43 = vmin.f32 %v7941_v49, %v7961_v61  ;;  %v7969_v27 = vmax.f32 %v7941_v49, %v7961_v61 }
0x17fa   : > { %v7973_v4 = vsel %vm16171_vm2, %v7965_v43, %v7969_v27 }
0x17fb   : > { %7978 = vrot.lane.b32.xlu1 %v7973_v4, %s10854_s12 }
0x17ff   : > { %4264 = vrot.lane.b32.xlu1 %v4255_v2, %s10854_s12 }
0x180e   : > { %v7949_v14 = vpop.permute.xlu0 %7948 }
0x1812   : > { %v7951_v17 = vpop.permute.xlu1 %7950  ;;  %v7957_v1 = vpop.permute.xlu0 %7956 }
0x1813   : > { %v7962_v13 = vsel %vm14027_vm4, %v7949_v14, %v7957_v1 }
0x1814   : > { %v7966_v35 = vmin.f32 %v16148_v55, %v7962_v13  ;;  %v7970_v48 = vmax.f32 %v16148_v55, %v7962_v13 }
0x1816   : > { %v4259_v10 = vpop.permute.xlu1 %4258  ;;  %v7959_v49 = vpop.permute.xlu0 %7958  ;;  %v7974_v26 = vsel %vm16171_vm2, %v7966_v35, %v7970_v48 }
0x1817   : > { %v4268_v60 = vmin.f32 %v4252_v31, %v4259_v10  ;;  %v4272_v21 = vmax.f32 %v4252_v31, %v4259_v10  ;;  %v7963_v36 = vsel %vm14027_vm4, %v7951_v17, %v7959_v49  ;;  %7980 = vrot.lane.b32.xlu0 %v7974_v26, %s10854_s12 }
0x1818   : > { %v7967_v29 = vmin.f32 %v16162_v47, %v7963_v36  ;;  %v7971_v40 = vmax.f32 %v16162_v47, %v7963_v36 }
0x1819   : > { %v4276_v59 = vsel %vm16223_vm1, %v4268_v60, %v4272_v21 }
0x181a   : > { %4280 = vrot.lane.b32.xlu1 %v4276_v59, %s10842_s28  ;;  %v7975_v58 = vsel %vm16171_vm2, %v7967_v29, %v7971_v40 }
0x181b   : > { %7982 = vrot.lane.b32.xlu0 %v7975_v58, %s10854_s12 }
0x181e   : > { %v4261_v55 = vpop.permute.xlu1 %4260  ;;  %v4263_v19 = vpop.permute.xlu0 %4262 }
0x181f   : > { %v4269_v3 = vmin.f32 %v4253_v0, %v4261_v55  ;;  %v4273_v45 = vmax.f32 %v4253_v0, %v4261_v55  ;;  %v4270_v57 = vmin.f32 %v4254_v20, %v4263_v19  ;;  %v4274_v54 = vmax.f32 %v4254_v20, %v4263_v19  ;;  %4288 = vrot.lane.b32.xlu0 %v4276_v59, %s10838_s19 }
0x1821   : > { %v4277_v50 = vsel %vm16223_vm1, %v4269_v3, %v4273_v45  ;;  %v4278_v47 = vsel %vm16223_vm1, %v4270_v57, %v4274_v54 }
0x1822   : > { %4282 = vrot.lane.b32.xlu1 %v4277_v50, %s10842_s28 }
0x1823   : > { %4284 = vrot.lane.b32.xlu0 %v4278_v47, %s10842_s28 }
0x1826   : > { %4290 = vrot.lane.b32.xlu1 %v4277_v50, %s10838_s19  ;;  %v7977_v52 = vpop.permute.xlu0 %7976 }
0x1827   : > { %4292 = vrot.lane.b32.xlu0 %v4278_v47, %s10838_s19  ;;  %v7984_v63 = vmin.f32 %v7972_v56, %v7977_v52  ;;  %v7988_v51 = vmax.f32 %v7972_v56, %v7977_v52 }
0x1829   : > { %v7992_v30 = vsel %vm16223_vm1, %v7984_v63, %v7988_v51 }
0x186d   : > { %v7979_v24 = vpop.permute.xlu1 %7978 }
0x186e   : > { %v7985_v6 = vmin.f32 %v7973_v4, %v7979_v24  ;;  %v7989_v8 = vmax.f32 %v7973_v4, %v7979_v24 }
0x1870   : > { %v16257_v16 = vsel %vm16223_vm1, %v7985_v6, %v7989_v8 }
0x1871   : > { %v4265_v38 = vpop.permute.xlu1 %4264 }
0x1872   : > { %v4271_v34 = vmin.f32 %v4255_v2, %v4265_v38  ;;  %v4275_v31 = vmax.f32 %v4255_v2, %v4265_v38 }
0x1874   : > { %v4279_v11 = vsel %vm16223_vm1, %v4271_v34, %v4275_v31 }
0x1875   : > { %4286 = vrot.lane.b32.xlu1 %v4279_v11, %s10842_s28  ;;  %4294 = vrot.lane.b32.xlu0 %v4279_v11, %s10838_s19 }
0x1879   : > { %8004 = vrot.lane.b32.xlu0 %v7992_v30, %s10838_s19  ;;  %7996 = vrot.lane.b32.xlu1 %v7992_v30, %s10842_s28 }
0x187d   : > { %7998 = vrot.lane.b32.xlu1 %v16257_v16, %s10842_s28 }
0x1881   : > { %8006 = vrot.lane.b32.xlu1 %v16257_v16, %s10838_s19 }
0x1889   : > { %v7981_v15 = vpop.permute.xlu0 %7980 }
0x188a   : > { %v7986_v41 = vmin.f32 %v7974_v26, %v7981_v15  ;;  %v7990_v0 = vmax.f32 %v7974_v26, %v7981_v15 }
0x188c   : > { %v4281_v53 = vpop.permute.xlu1 %4280  ;;  %v16265_v20 = vsel %vm16223_vm1, %v7986_v41, %v7990_v0 }
0x188d   : > { %8000 = vrot.lane.b32.xlu0 %v16265_v20, %s10842_s28  ;;  %v7983_v22 = vpop.permute.xlu0 %7982 }
0x188e   : > { %v7987_v42 = vmin.f32 %v7975_v58, %v7983_v22  ;;  %v7991_v5 = vmax.f32 %v7975_v58, %v7983_v22 }
0x1890   : > { %v16274_v33 = vsel %vm16223_vm1, %v7987_v42, %v7991_v5  ;;  %vm4495_vm1 = vcmask 1043459  }
0x1891   : > { %8008 = vrot.lane.b32.xlu0 %v16265_v20, %s10838_s19  ;;  %8002 = vrot.lane.b32.xlu1 %v16274_v33, %s10842_s28  ;;  %v4289_v23 = vpop.permute.xlu0 %4288 }
0x1892   : > { %v4296_v18 = vsel %vm15095_vm9, %v4281_v53, %v4289_v23 }
0x1893   : > { %v4302_v39 = vmin.f32 %v4276_v59, %v4296_v18  ;;  %v4306_v61 = vmax.f32 %v4276_v59, %v4296_v18 }
0x1894   : > { %v4283_v56 = vpop.permute.xlu1 %4282 }
0x1895   : > { %8010 = vrot.lane.b32.xlu0 %v16274_v33, %s10838_s19  ;;  %v4285_v43 = vpop.permute.xlu0 %4284  ;;  %v16291_v27 = vsel %vm16283_vm15, %v4302_v39, %v4306_v61 }
0x1896   : > { %4314 = vrot.lane.b32.xlu1 %v16291_v27, %s10852_s9 }
0x1898   : > { %v4291_v9 = vpop.permute.xlu1 %4290 }
0x1899   : > { %v4297_v25 = vsel %vm15095_vm9, %v4283_v56, %v4291_v9  ;;  %4322 = vrot.lane.b32.xlu0 %v16291_v27, %s10853_s11  ;;  %v4293_v14 = vpop.permute.xlu0 %4292 }
0x189a   : > { %v4303_v4 = vmin.f32 %v4277_v50, %v4297_v25  ;;  %v4307_v2 = vmax.f32 %v4277_v50, %v4297_v25  ;;  %v4298_v17 = vsel %vm15095_vm9, %v4285_v43, %v4293_v14 }
0x189b   : > { %v4304_v13 = vmin.f32 %v4278_v47, %v4298_v17  ;;  %v4308_v35 = vmax.f32 %v4278_v47, %v4298_v17 }
0x189c   : > { %v16303_v1 = vsel %vm16283_vm15, %v4303_v4, %v4307_v2 }
0x189d   : > { %4316 = vrot.lane.b32.xlu1 %v16303_v1, %s10852_s9  ;;  %v16309_v48 = vsel %vm16283_vm15, %v4304_v13, %v4308_v35 }
0x189e   : > { %4318 = vrot.lane.b32.xlu0 %v16309_v48, %s10852_s9 }
0x18a1   : > { %4324 = vrot.lane.b32.xlu1 %v16303_v1, %s10853_s11 }
0x18a2   : > { %4326 = vrot.lane.b32.xlu0 %v16309_v48, %s10853_s11 }
0x18e7   : > { %v4287_v10 = vpop.permute.xlu1 %4286  ;;  %v4295_v49 = vpop.permute.xlu0 %4294 }
0x18e8   : > { %v4299_v26 = vsel %vm15095_vm9, %v4287_v10, %v4295_v49 }
0x18e9   : > { %v4305_v46 = vmin.f32 %v4279_v11, %v4299_v26  ;;  %v4309_v60 = vmax.f32 %v4279_v11, %v4299_v26 }
0x18eb   : > { %v7997_v21 = vpop.permute.xlu1 %7996  ;;  %v8005_v36 = vpop.permute.xlu0 %8004  ;;  %v16321_v29 = vsel %vm16283_vm15, %v4305_v46, %v4309_v60 }
0x18ec   : > { %v8012_v40 = vsel %vm15095_vm9, %v7997_v21, %v8005_v36  ;;  %4328 = vrot.lane.b32.xlu0 %v16321_v29, %s10853_s11  ;;  %4320 = vrot.lane.b32.xlu1 %v16321_v29, %s10852_s9 }
0x18ed   : > { %v8016_v59 = vmin.f32 %v7992_v30, %v8012_v40  ;;  %v8020_v58 = vmax.f32 %v7992_v30, %v8012_v40 }
0x18ef   : > { %v7999_v55 = vpop.permute.xlu1 %7998  ;;  %v16331_v3 = vsel %vm16283_vm15, %v8016_v59, %v8020_v58 }
0x18f0   : > { %8036 = vrot.lane.b32.xlu0 %v16331_v3, %s10853_s11  ;;  %8028 = vrot.lane.b32.xlu1 %v16331_v3, %s10852_s9 }
0x18f3   : > { %v8007_v45 = vpop.permute.xlu1 %8006 }
0x18f4   : > { %v8013_v19 = vsel %vm15095_vm9, %v7999_v55, %v8007_v45 }
0x18f5   : > { %v8017_v50 = vmin.f32 %v16257_v16, %v8013_v19  ;;  %v8021_v57 = vmax.f32 %v16257_v16, %v8013_v19 }
0x18f7   : > { %v16343_v54 = vsel %vm16283_vm15, %v8017_v50, %v8021_v57 }
0x18f8   : > { %8030 = vrot.lane.b32.xlu1 %v16343_v54, %s10852_s9 }
0x18fc   : > { %8038 = vrot.lane.b32.xlu1 %v16343_v54, %s10853_s11 }
0x18ff   : > { %v8001_v47 = vpop.permute.xlu0 %8000 }
0x1903   : > { %v8003_v24 = vpop.permute.xlu1 %8002  ;;  %v8009_v52 = vpop.permute.xlu0 %8008 }
0x1904   : > { %v8014_v38 = vsel %vm15095_vm9, %v8001_v47, %v8009_v52 }
0x1905   : > { %v8018_v34 = vmin.f32 %v16265_v20, %v8014_v38  ;;  %v8022_v31 = vmax.f32 %v16265_v20, %v8014_v38 }
0x1907   : > { %v8011_v63 = vpop.permute.xlu0 %8010  ;;  %v16355_v51 = vsel %vm16283_vm15, %v8018_v34, %v8022_v31 }
0x1908   : > { %v8015_v11 = vsel %vm15095_vm9, %v8003_v24, %v8011_v63  ;;  %v4315_v6 = vpop.permute.xlu1 %4314  ;;  %8032 = vrot.lane.b32.xlu0 %v16355_v51, %s10852_s9  ;;  %vm16377_vm9 = vmxor %vm4334_vm14, %vm10847_vm6  ;;  %vm8227_vm14 = vcmask 130048  }
0x1909   : > { %v8019_v8 = vmin.f32 %v16274_v33, %v8015_v11  ;;  %v8023_v30 = vmax.f32 %v16274_v33, %v8015_v11 }
0x190b   : > { %v4323_v16 = vpop.permute.xlu0 %4322  ;;  %v16368_v15 = vsel %vm16283_vm15, %v8019_v8, %v8023_v30  ;;  %vm17669_vm15 = vcmask 523264  }
0x190c   : > { %v4330_v44 = vsel %vm14670_vm7, %v4315_v6, %v4323_v16  ;;  %8040 = vrot.lane.b32.xlu0 %v16355_v51, %s10853_s11  ;;  %8034 = vrot.lane.b32.xlu1 %v16368_v15, %s10852_s9 }
0x190d   : > { %v4336_v0 = vmin.f32 %v16291_v27, %v4330_v44  ;;  %v4340_v53 = vmax.f32 %v16291_v27, %v4330_v44 }
0x190f   : > { %v4317_v20 = vpop.permute.xlu1 %4316  ;;  %v16385_v22 = vsel %vm16377_vm9, %v4336_v0, %v4340_v53 }
0x1910   : > { %8042 = vrot.lane.b32.xlu0 %v16368_v15, %s10853_s11  ;;  %4348 = vrot.lane.b32.xlu1 %v16385_v22, %s10844_s10  ;;  %v4319_v42 = vpop.permute.xlu0 %4318 }
0x1913   : > { %v4325_v5 = vpop.permute.xlu1 %4324 }
0x1914   : > { %v4331_v33 = vsel %vm14670_vm7, %v4317_v20, %v4325_v5  ;;  %4356 = vrot.lane.b32.xlu0 %v16385_v22, %s10843_s16  ;;  %v4327_v18 = vpop.permute.xlu0 %4326 }
0x1915   : > { %v4337_v23 = vmin.f32 %v16303_v1, %v4331_v33  ;;  %v4341_v56 = vmax.f32 %v16303_v1, %v4331_v33  ;;  %v4332_v28 = vsel %vm14670_vm7, %v4319_v42, %v4327_v18 }
0x1916   : > { %v4338_v61 = vmin.f32 %v16309_v48, %v4332_v28  ;;  %v4342_v43 = vmax.f32 %v16309_v48, %v4332_v28 }
0x1917   : > { %v16401_v39 = vsel %vm16377_vm9, %v4337_v23, %v4341_v56 }
0x1918   : > { %4350 = vrot.lane.b32.xlu1 %v16401_v39, %s10844_s10  ;;  %v16409_v27 = vsel %vm16377_vm9, %v4338_v61, %v4342_v43 }
0x1919   : > { %4352 = vrot.lane.b32.xlu0 %v16409_v27, %s10844_s10 }
0x191c   : > { %4358 = vrot.lane.b32.xlu1 %v16401_v39, %s10843_s16 }
0x191d   : > { %4360 = vrot.lane.b32.xlu0 %v16409_v27, %s10843_s16 }
0x195e   : > { %v4321_v9 = vpop.permute.xlu1 %4320  ;;  %v4329_v25 = vpop.permute.xlu0 %4328 }
0x195f   : > { %v4333_v4 = vsel %vm14670_vm7, %v4321_v9, %v4329_v25 }
0x1960   : > { %v4339_v2 = vmin.f32 %v16321_v29, %v4333_v4  ;;  %v4343_v14 = vmax.f32 %v16321_v29, %v4333_v4 }
0x1962   : > { %v8029_v17 = vpop.permute.xlu1 %8028  ;;  %v8037_v1 = vpop.permute.xlu0 %8036  ;;  %v16423_v13 = vsel %vm16377_vm9, %v4339_v2, %v4343_v14 }
0x1963   : > { %v8044_v35 = vsel %vm14670_vm7, %v8029_v17, %v8037_v1  ;;  %4362 = vrot.lane.b32.xlu0 %v16423_v13, %s10843_s16  ;;  %4354 = vrot.lane.b32.xlu1 %v16423_v13, %s10844_s10 }
0x1964   : > { %v8048_v48 = vmin.f32 %v16331_v3, %v8044_v35  ;;  %v8052_v10 = vmax.f32 %v16331_v3, %v8044_v35 }
0x1966   : > { %v16435_v49 = vsel %vm16377_vm9, %v8048_v48, %v8052_v10 }
0x1967   : > { %8068 = vrot.lane.b32.xlu0 %v16435_v49, %s10843_s16  ;;  %8060 = vrot.lane.b32.xlu1 %v16435_v49, %s10844_s10 }
0x196a   : > { %v8031_v26 = vpop.permute.xlu1 %8030 }
0x196e   : > { %v8039_v46 = vpop.permute.xlu1 %8038 }
0x196f   : > { %v8045_v60 = vsel %vm14670_vm7, %v8031_v26, %v8039_v46 }
0x1970   : > { %v8049_v21 = vmin.f32 %v16343_v54, %v8045_v60  ;;  %v8053_v36 = vmax.f32 %v16343_v54, %v8045_v60 }
0x1972   : > { %v16447_v29 = vsel %vm16377_vm9, %v8049_v21, %v8053_v36 }
0x1973   : > { %8062 = vrot.lane.b32.xlu1 %v16447_v29, %s10844_s10 }
0x1977   : > { %8070 = vrot.lane.b32.xlu1 %v16447_v29, %s10843_s16 }
0x197a   : > { %v8033_v40 = vpop.permute.xlu0 %8032 }
0x197e   : > { %v8035_v59 = vpop.permute.xlu1 %8034  ;;  %v8041_v58 = vpop.permute.xlu0 %8040 }
0x197f   : > { %v8046_v55 = vsel %vm14670_vm7, %v8033_v40, %v8041_v58 }
0x1980   : > { %v8050_v3 = vmin.f32 %v16355_v51, %v8046_v55  ;;  %v8054_v45 = vmax.f32 %v16355_v51, %v8046_v55 }
0x1982   : > { %v4349_v19 = vpop.permute.xlu1 %4348  ;;  %v8043_v50 = vpop.permute.xlu0 %8042  ;;  %v16459_v57 = vsel %vm16377_vm9, %v8050_v3, %v8054_v45 }
0x1983   : > { %v8047_v54 = vsel %vm14670_vm7, %v8035_v59, %v8043_v50  ;;  %8064 = vrot.lane.b32.xlu0 %v16459_v57, %s10844_s10  ;;  %vm16481_vm7 = vmxor %vm4368_vm8, %vm10847_vm6  ;;  %vm17670_vm8 = vcmask 64512  }
0x1984   : > { %v8051_v47 = vmin.f32 %v16368_v15, %v8047_v54  ;;  %v8055_v24 = vmax.f32 %v16368_v15, %v8047_v54 }
0x1986   : > { %v4357_v52 = vpop.permute.xlu0 %4356  ;;  %v16472_v38 = vsel %vm16377_vm9, %v8051_v47, %v8055_v24  ;;  %vm8229_vm9 = vcmask 195584  }
0x1987   : > { %v4364_v62 = vsel %vm14350_vm0, %v4349_v19, %v4357_v52  ;;  %8072 = vrot.lane.b32.xlu0 %v16459_v57, %s10843_s16  ;;  %8066 = vrot.lane.b32.xlu1 %v16472_v38, %s10844_s10  ;;  %s8625_s10 = sshll.u32 %s10913_s25, 7 }
0x1988   : > { %v4370_v31 = vmin.f32 %v16385_v22, %v4364_v62  ;;  %v4374_v63 = vmax.f32 %v16385_v22, %v4364_v62 }
0x198a   : > { %v4351_v51 = vpop.permute.xlu1 %4350  ;;  %v16489_v11 = vsel %vm16481_vm7, %v4370_v31, %v4374_v63 }
0x198b   : > { %8074 = vrot.lane.b32.xlu0 %v16472_v38, %s10843_s16  ;;  %4382 = vrot.lane.b32.xlu1 %v16489_v11, %s10850_s26  ;;  %v4353_v6 = vpop.permute.xlu0 %4352 }
0x198e   : > { %v4359_v8 = vpop.permute.xlu1 %4358 }
0x198f   : > { %v4365_v30 = vsel %vm14350_vm0, %v4351_v51, %v4359_v8  ;;  %4390 = vrot.lane.b32.xlu0 %v16489_v11, %s10851_s29  ;;  %v4361_v44 = vpop.permute.xlu0 %4360 }
0x1990   : > { %v4371_v16 = vmin.f32 %v16401_v39, %v4365_v30  ;;  %v4375_v15 = vmax.f32 %v16401_v39, %v4365_v30  ;;  %v4366_v41 = vsel %vm14350_vm0, %v4353_v6, %v4361_v44 }
0x1991   : > { %v4372_v53 = vmin.f32 %v16409_v27, %v4366_v41  ;;  %v4376_v20 = vmax.f32 %v16409_v27, %v4366_v41 }
0x1992   : > { %v16505_v0 = vsel %vm16481_vm7, %v4371_v16, %v4375_v15 }
0x1993   : > { %4384 = vrot.lane.b32.xlu1 %v16505_v0, %s10850_s26  ;;  %v16513_v22 = vsel %vm16481_vm7, %v4372_v53, %v4376_v20 }
0x1994   : > { %4386 = vrot.lane.b32.xlu0 %v16513_v22, %s10850_s26 }
0x1997   : > { %4392 = vrot.lane.b32.xlu1 %v16505_v0, %s10851_s29 }
0x1998   : > { %4394 = vrot.lane.b32.xlu0 %v16513_v22, %s10851_s29 }
0x19d5   : > { %v4355_v42 = vpop.permute.xlu1 %4354  ;;  %v4363_v5 = vpop.permute.xlu0 %4362 }
0x19d6   : > { %v4367_v33 = vsel %vm14350_vm0, %v4355_v42, %v4363_v5 }
0x19d7   : > { %v4373_v23 = vmin.f32 %v16423_v13, %v4367_v33  ;;  %v4377_v56 = vmax.f32 %v16423_v13, %v4367_v33 }
0x19d9   : > { %v8061_v18 = vpop.permute.xlu1 %8060  ;;  %v8069_v28 = vpop.permute.xlu0 %8068  ;;  %v16527_v39 = vsel %vm16481_vm7, %v4373_v23, %v4377_v56 }
0x19da   : > { %v8076_v61 = vsel %vm14350_vm0, %v8061_v18, %v8069_v28  ;;  %4396 = vrot.lane.b32.xlu0 %v16527_v39, %s10851_s29  ;;  %4388 = vrot.lane.b32.xlu1 %v16527_v39, %s10850_s26 }
0x19db   : > { %v8080_v43 = vmin.f32 %v16435_v49, %v8076_v61  ;;  %v8084_v27 = vmax.f32 %v16435_v49, %v8076_v61 }
0x19dd   : > { %v16539_v9 = vsel %vm16481_vm7, %v8080_v43, %v8084_v27 }
0x19de   : > { %8100 = vrot.lane.b32.xlu0 %v16539_v9, %s10851_s29  ;;  %8092 = vrot.lane.b32.xlu1 %v16539_v9, %s10850_s26 }
0x19e5   : > { %v8063_v25 = vpop.permute.xlu1 %8062 }
0x19e9   : > { %v8071_v4 = vpop.permute.xlu1 %8070 }
0x19ea   : > { %v8077_v2 = vsel %vm14350_vm0, %v8063_v25, %v8071_v4 }
0x19eb   : > { %v8081_v14 = vmin.f32 %v16447_v29, %v8077_v2  ;;  %v8085_v17 = vmax.f32 %v16447_v29, %v8077_v2 }
0x19ed   : > { %v16551_v1 = vsel %vm16481_vm7, %v8081_v14, %v8085_v17 }
0x19ee   : > { %8094 = vrot.lane.b32.xlu1 %v16551_v1, %s10850_s26 }
0x19f2   : > { %8102 = vrot.lane.b32.xlu1 %v16551_v1, %s10851_s29 }
0x19f5   : > { %v8065_v13 = vpop.permute.xlu0 %8064 }
0x19f9   : > { %v8067_v35 = vpop.permute.xlu1 %8066  ;;  %v8073_v48 = vpop.permute.xlu0 %8072 }
0x19fa   : > { %v8078_v10 = vsel %vm14350_vm0, %v8065_v13, %v8073_v48 }
0x19fb   : > { %v8082_v49 = vmin.f32 %v16459_v57, %v8078_v10  ;;  %v8086_v26 = vmax.f32 %v16459_v57, %v8078_v10 }
0x19fd   : > { %v4383_v46 = vpop.permute.xlu1 %4382  ;;  %v8075_v60 = vpop.permute.xlu0 %8074  ;;  %v16563_v21 = vsel %vm16481_vm7, %v8082_v49, %v8086_v26 }
0x19fe   : > { %v8079_v36 = vsel %vm14350_vm0, %v8067_v35, %v8075_v60  ;;  %8096 = vrot.lane.b32.xlu0 %v16563_v21, %s10850_s26  ;;  %vm16585_vm0 = vmxor %vm4402_vm10, %vm10847_vm6  ;;  %vm8241_vm10 = vcmask 1043456  }
0x19ff   : > { %v8083_v29 = vmin.f32 %v16472_v38, %v8079_v36  ;;  %v8087_v40 = vmax.f32 %v16472_v38, %v8079_v36 }
0x1a01   : > { %v4391_v59 = vpop.permute.xlu0 %4390  ;;  %v16576_v58 = vsel %vm16481_vm7, %v8083_v29, %v8087_v40 }
0x1a02   : > { %v4398_v7 = vsel %vm14135_vm3, %v4383_v46, %v4391_v59  ;;  %8104 = vrot.lane.b32.xlu0 %v16563_v21, %s10851_s29  ;;  %8098 = vrot.lane.b32.xlu1 %v16576_v58, %s10850_s26  ;;  %s10856_s26 = smov [#allocation2]  }
0x1a03   : > { %v4404_v3 = vmin.f32 %v16489_v11, %v4398_v7  ;;  %v4408_v45 = vmax.f32 %v16489_v11, %v4398_v7 }
0x1a05   : > { %v4385_v19 = vpop.permute.xlu1 %4384  ;;  %v16593_v50 = vsel %vm16585_vm0, %v4404_v3, %v4408_v45 }
0x1a06   : > { %8106 = vrot.lane.b32.xlu0 %v16576_v58, %s10851_s29  ;;  %4416 = vrot.lane.b32.xlu1 %v16593_v50, %s10848_s18  ;;  %v4387_v57 = vpop.permute.xlu0 %4386  ;;  %s10775_s29 = sshll.u32 %s10856_s26, 4  ;;  %s10776_s29 = int_to_ptr.vmem [resolvable:$false] %s10775_s29 }
0x1a07   : > { %s10777_s9 = scalar_lea.vmem %s10776_s29, 256 }
0x1a09   : > { %v4393_v54 = vpop.permute.xlu1 %4392 }
0x1a0a   : > { %v4399_v47 = vsel %vm14135_vm3, %v4385_v19, %v4393_v54  ;;  %4424 = vrot.lane.b32.xlu0 %v16593_v50, %s10849_s20  ;;  %v4395_v38 = vpop.permute.xlu0 %4394 }
0x1a0b   : > { %v4405_v24 = vmin.f32 %v16505_v0, %v4399_v47  ;;  %v4409_v52 = vmax.f32 %v16505_v0, %v4399_v47  ;;  %v4400_v62 = vsel %vm14135_vm3, %v4387_v57, %v4395_v38 }
0x1a0c   : > { %v4406_v31 = vmin.f32 %v16513_v22, %v4400_v62  ;;  %v4410_v63 = vmax.f32 %v16513_v22, %v4400_v62 }
0x1a0d   : > { %v16609_v34 = vsel %vm16585_vm0, %v4405_v24, %v4409_v52 }
0x1a0e   : > { %4418 = vrot.lane.b32.xlu1 %v16609_v34, %s10848_s18  ;;  %v16617_v51 = vsel %vm16585_vm0, %v4406_v31, %v4410_v63 }
0x1a0f   : > { %4420 = vrot.lane.b32.xlu0 %v16617_v51, %s10848_s18 }
0x1a12   : > { %4426 = vrot.lane.b32.xlu1 %v16609_v34, %s10849_s20 }
0x1a13   : > { %4428 = vrot.lane.b32.xlu0 %v16617_v51, %s10849_s20 }
0x1a4c   : > { %v4389_v11 = vpop.permute.xlu1 %4388  ;;  %v4397_v6 = vpop.permute.xlu0 %4396 }
0x1a4d   : > { %v4401_v8 = vsel %vm14135_vm3, %v4389_v11, %v4397_v6 }
0x1a4e   : > { %v4407_v30 = vmin.f32 %v16527_v39, %v4401_v8  ;;  %v4411_v16 = vmax.f32 %v16527_v39, %v4401_v8 }
0x1a50   : > { %v8093_v15 = vpop.permute.xlu1 %8092  ;;  %v8101_v44 = vpop.permute.xlu0 %8100  ;;  %v16631_v41 = vsel %vm16585_vm0, %v4407_v30, %v4411_v16 }
0x1a51   : > { %v8108_v0 = vsel %vm14135_vm3, %v8093_v15, %v8101_v44  ;;  %4430 = vrot.lane.b32.xlu0 %v16631_v41, %s10849_s20  ;;  %4422 = vrot.lane.b32.xlu1 %v16631_v41, %s10848_s18 }
0x1a52   : > { %v8112_v53 = vmin.f32 %v16539_v9, %v8108_v0  ;;  %v8116_v20 = vmax.f32 %v16539_v9, %v8108_v0 }
0x1a54   : > { %v16643_v22 = vsel %vm16585_vm0, %v8112_v53, %v8116_v20 }
0x1a55   : > { %8132 = vrot.lane.b32.xlu0 %v16643_v22, %s10849_s20  ;;  %8124 = vrot.lane.b32.xlu1 %v16643_v22, %s10848_s18 }
0x1a60   : > { %v8095_v42 = vpop.permute.xlu1 %8094 }
0x1a64   : > { %v8103_v5 = vpop.permute.xlu1 %8102 }
0x1a65   : > { %v8109_v33 = vsel %vm14135_vm3, %v8095_v42, %v8103_v5 }
0x1a66   : > { %v8113_v23 = vmin.f32 %v16551_v1, %v8109_v33  ;;  %v8117_v56 = vmax.f32 %v16551_v1, %v8109_v33 }
0x1a68   : > { %v16655_v18 = vsel %vm16585_vm0, %v8113_v23, %v8117_v56 }
0x1a69   : > { %8126 = vrot.lane.b32.xlu1 %v16655_v18, %s10848_s18 }
0x1a6d   : > { %8134 = vrot.lane.b32.xlu1 %v16655_v18, %s10849_s20 }
0x1a70   : > { %v8097_v28 = vpop.permute.xlu0 %8096 }
0x1a74   : > { %v8099_v39 = vpop.permute.xlu1 %8098  ;;  %v8105_v61 = vpop.permute.xlu0 %8104 }
0x1a75   : > { %v8110_v43 = vsel %vm14135_vm3, %v8097_v28, %v8105_v61 }
0x1a76   : > { %v8114_v27 = vmin.f32 %v16563_v21, %v8110_v43  ;;  %v8118_v9 = vmax.f32 %v16563_v21, %v8110_v43 }
0x1a78   : > { %v4417_v25 = vpop.permute.xlu1 %4416  ;;  %v8107_v4 = vpop.permute.xlu0 %8106  ;;  %v16667_v2 = vsel %vm16585_vm0, %v8114_v27, %v8118_v9 }
0x1a79   : > { %v8111_v14 = vsel %vm14135_vm3, %v8099_v39, %v8107_v4  ;;  %8128 = vrot.lane.b32.xlu0 %v16667_v2, %s10848_s18  ;;  %vm16689_vm3 = vmxor %vm4436_vm13, %vm10847_vm6 }
0x1a7a   : > { %v8115_v17 = vmin.f32 %v16576_v58, %v8111_v14  ;;  %v8119_v1 = vmax.f32 %v16576_v58, %v8111_v14 }
0x1a7c   : > { %v4425_v13 = vpop.permute.xlu0 %4424  ;;  %v16680_v35 = vsel %vm16585_vm0, %v8115_v17, %v8119_v1  ;;  %vm8242_vm0 = vcmask 261124  }
0x1a7d   : > { %v4432_v12 = vsel %vm14036_vm11, %v4417_v25, %v4425_v13  ;;  %8136 = vrot.lane.b32.xlu0 %v16667_v2, %s10849_s20  ;;  %8130 = vrot.lane.b32.xlu1 %v16680_v35, %s10848_s18  ;;  %s16887_s18 = scalar_lea.hbm %s16937_s6, %s8625_s10 }
0x1a7e   : > { %v4438_v10 = vmin.f32 %v16593_v50, %v4432_v12  ;;  %v4442_v49 = vmax.f32 %v16593_v50, %v4432_v12 }
0x1a80   : > { %v4419_v26 = vpop.permute.xlu1 %4418  ;;  %v16697_v46 = vsel %vm16689_vm3, %v4438_v10, %v4442_v49 }
0x1a81   : > { %8138 = vrot.lane.b32.xlu0 %v16680_v35, %s10849_s20  ;;  %4450 = vrot.lane.b32.xlu1 %v16697_v46, %s10846_s17  ;;  %v4421_v60 = vpop.permute.xlu0 %4420 }
0x1a84   : > { %v4427_v21 = vpop.permute.xlu1 %4426 }
0x1a85   : > { %v4433_v36 = vsel %vm14036_vm11, %v4419_v26, %v4427_v21  ;;  %4458 = vrot.lane.b32.xlu0 %v16697_v46, %s10845_s15  ;;  %v4429_v59 = vpop.permute.xlu0 %4428 }
0x1a86   : > { %v4439_v29 = vmin.f32 %v16609_v34, %v4433_v36  ;;  %v4443_v40 = vmax.f32 %v16609_v34, %v4433_v36  ;;  %v4434_v58 = vsel %vm14036_vm11, %v4421_v60, %v4429_v59 }
0x1a87   : > { %v4440_v55 = vmin.f32 %v16617_v51, %v4434_v58  ;;  %v4444_v3 = vmax.f32 %v16617_v51, %v4434_v58 }
0x1a88   : > { %v16713_v7 = vsel %vm16689_vm3, %v4439_v29, %v4443_v40 }
0x1a89   : > { %4452 = vrot.lane.b32.xlu1 %v16713_v7, %s10846_s17  ;;  %v16721_v45 = vsel %vm16689_vm3, %v4440_v55, %v4444_v3 }
0x1a8a   : > { %4454 = vrot.lane.b32.xlu0 %v16721_v45, %s10846_s17 }
0x1a8d   : > { %4460 = vrot.lane.b32.xlu1 %v16713_v7, %s10845_s15 }
0x1a8e   : > { %4462 = vrot.lane.b32.xlu0 %v16721_v45, %s10845_s15 }
0x1ac3   : > { %v4423_v19 = vpop.permute.xlu1 %4422  ;;  %v4431_v50 = vpop.permute.xlu0 %4430 }
0x1ac4   : > { %v4435_v57 = vsel %vm14036_vm11, %v4423_v19, %v4431_v50 }
0x1ac5   : > { %v4441_v54 = vmin.f32 %v16631_v41, %v4435_v57  ;;  %v4445_v47 = vmax.f32 %v16631_v41, %v4435_v57 }
0x1ac7   : > { %v8125_v24 = vpop.permute.xlu1 %8124  ;;  %v8133_v52 = vpop.permute.xlu0 %8132  ;;  %v16735_v38 = vsel %vm16689_vm3, %v4441_v54, %v4445_v47 }
0x1ac8   : > { %v8140_v62 = vsel %vm14036_vm11, %v8125_v24, %v8133_v52  ;;  %4464 = vrot.lane.b32.xlu0 %v16735_v38, %s10845_s15  ;;  %4456 = vrot.lane.b32.xlu1 %v16735_v38, %s10846_s17 }
0x1ac9   : > { %v8144_v34 = vmin.f32 %v16643_v22, %v8140_v62  ;;  %v8148_v31 = vmax.f32 %v16643_v22, %v8140_v62 }
0x1acb   : > { %v16747_v63 = vsel %vm16689_vm3, %v8144_v34, %v8148_v31 }
0x1acc   : > { %8164 = vrot.lane.b32.xlu0 %v16747_v63, %s10845_s15  ;;  %8156 = vrot.lane.b32.xlu1 %v16747_v63, %s10846_s17 }
0x1adb   : > { %v8127_v51 = vpop.permute.xlu1 %8126 }
0x1adf   : > { %v8135_v11 = vpop.permute.xlu1 %8134 }
0x1ae0   : > { %v8141_v6 = vsel %vm14036_vm11, %v8127_v51, %v8135_v11 }
0x1ae1   : > { %v8145_v8 = vmin.f32 %v16655_v18, %v8141_v6  ;;  %v8149_v30 = vmax.f32 %v16655_v18, %v8141_v6 }
0x1ae3   : > { %v16759_v16 = vsel %vm16689_vm3, %v8145_v8, %v8149_v30 }
0x1ae4   : > { %8158 = vrot.lane.b32.xlu1 %v16759_v16, %s10846_s17 }
0x1ae8   : > { %8166 = vrot.lane.b32.xlu1 %v16759_v16, %s10845_s15 }
0x1aeb   : > { %v8129_v15 = vpop.permute.xlu0 %8128 }
0x1aef   : > { %v8131_v44 = vpop.permute.xlu1 %8130  ;;  %v8137_v41 = vpop.permute.xlu0 %8136 }
0x1af0   : > { %v8142_v0 = vsel %vm14036_vm11, %v8129_v15, %v8137_v41 }
0x1af1   : > { %v8146_v53 = vmin.f32 %v16667_v2, %v8142_v0  ;;  %v8150_v20 = vmax.f32 %v16667_v2, %v8142_v0 }
0x1af3   : > { %v4451_v22 = vpop.permute.xlu1 %4450  ;;  %v8139_v42 = vpop.permute.xlu0 %8138  ;;  %v16771_v5 = vsel %vm16689_vm3, %v8146_v53, %v8150_v20 }
0x1af4   : > { %v8143_v33 = vsel %vm14036_vm11, %v8131_v44, %v8139_v42  ;;  %8160 = vrot.lane.b32.xlu0 %v16771_v5, %s10846_s17  ;;  %vm4470_vm11 = vmxor %vm14027_vm4, %vm10847_vm6 }
0x1af5   : > { %v8147_v23 = vmin.f32 %v16680_v35, %v8143_v33  ;;  %v8151_v56 = vmax.f32 %v16680_v35, %v8143_v33  ;;  %vm16801_vm2 = vmxor %vm4470_vm11, %vm10847_vm6  ;;  %vm4492_vm6 = vcmask 1042434  }
0x1af7   : > { %v4459_v18 = vpop.permute.xlu0 %4458  ;;  %v16781_v28 = vsel %vm16689_vm3, %v8147_v23, %v8151_v56  ;;  %vm8243_vm3 = vmor %vm8242_vm0, %vm8241_vm10 }
0x1af8   : > { %8168 = vrot.lane.b32.xlu0 %v16771_v5, %s10845_s15  ;;  %8162 = vrot.lane.b32.xlu1 %v16781_v28, %s10846_s17  ;;  %v4466_v39 = vsel %vm14027_vm4, %v4451_v22, %v4459_v18 }
0x1af9   : > { %v4472_v9 = vmin.f32 %v16697_v46, %v4466_v39  ;;  %v4476_v25 = vmax.f32 %v16697_v46, %v4466_v39 }
0x1afb   : > { %v4453_v32 = vpop.permute.xlu1 %4452  ;;  %v4480_v48 = vsel %vm16801_vm2, %v4472_v9, %v4476_v25 }
0x1afc   : > { %8170 = vrot.lane.b32.xlu0 %v16781_v28, %s10845_s15  ;;  %v4455_v61 = vpop.permute.xlu0 %4454  ;;  %v4516_v51 = vrot.slane %v4480_v48, 3 }
0x1aff   : > { %v4461_v43 = vpop.permute.xlu1 %4460 }
0x1b00   : > { %v4467_v27 = vsel %vm14027_vm4, %v4453_v32, %v4461_v43  ;;  %v4463_v17 = vpop.permute.xlu0 %4462 }
0x1b01   : > { %v4473_v4 = vmin.f32 %v16713_v7, %v4467_v27  ;;  %v4477_v2 = vmax.f32 %v16713_v7, %v4467_v27  ;;  %v4468_v13 = vsel %vm14027_vm4, %v4455_v61, %v4463_v17  ;;  %v4498_v7 = vrot.slane %v4480_v48, 1 }
0x1b02   : > { %v4474_v12 = vmin.f32 %v16721_v45, %v4468_v13  ;;  %v4478_v10 = vmax.f32 %v16721_v45, %v4468_v13  ;;  %v4507_v45 = vrot.slane %v4480_v48, 2 }
0x1b03   : > { %v4481_v1 = vsel %vm16801_vm2, %v4473_v4, %v4477_v2 }
0x1b04   : > { %v4488_v35 = vrot.slane %v4481_v1, 7  ;;  %v4482_v26 = vsel %vm16801_vm2, %v4474_v12, %v4478_v10  ;;  %v4508_v55 = vrot.slane %v4481_v1, 1  ;;  %v4499_v19 = vsel %vm4489_vm12, %v4481_v1, %v4498_v7 }
0x1b05   : > { %v4491_v46 = vrot.slane %v4482_v26, 6  ;;  %v4500_v58 = vrot.slane %v4482_v26, 7  ;;  %v4517_v62 = vrot.slane %v4481_v1, 2  ;;  %v4519_v31 = vrot.slane %v4482_v26, 1 }
0x1b06   : > { %v4490_v49 = vsel %vm4489_vm12, %v4488_v35, %v4480_v48  ;;  %v4509_v24 = vsel %vm4489_vm12, %v4508_v55, %v4507_v45 }
0x1b07   : > { %v4493_v60 = vsel %vm4492_vm6, %v4491_v46, %v4490_v49  ;;  %v4501_v57 = vsel %vm4492_vm6, %v4500_v58, %v4499_v19  ;;  %v4510_v34 = vsel %vm4492_vm6, %v4482_v26, %v4509_v24  ;;  %v4518_v6 = vsel %vm4489_vm12, %v4517_v62, %v4516_v51 }
0x1b08   : > { %v4520_v8 = vsel %vm4492_vm6, %v4519_v31, %v4518_v6 }
0x1b3a   : > { %v4457_v21 = vpop.permute.xlu1 %4456  ;;  %v4465_v36 = vpop.permute.xlu0 %4464 }
0x1b3b   : > { %v4469_v29 = vsel %vm14027_vm4, %v4457_v21, %v4465_v36 }
0x1b3c   : > { %v4475_v40 = vmin.f32 %v16735_v38, %v4469_v29  ;;  %v4479_v59 = vmax.f32 %v16735_v38, %v4469_v29 }
0x1b3e   : > { %v4483_v3 = vsel %vm16801_vm2, %v4475_v40, %v4479_v59  ;;  %v8157_v15 = vpop.permute.xlu1 %8156  ;;  %v8165_v44 = vpop.permute.xlu0 %8164 }
0x1b3f   : > { %v4502_v50 = vrot.slane %v4483_v3, 6  ;;  %v4494_v54 = vrot.slane %v4483_v3, 5  ;;  %v4511_v52 = vrot.slane %v4483_v3, 7  ;;  %v4521_v30 = vsel %vm4495_vm1, %v4483_v3, %v4520_v8 }
0x1b40   : > { %v8172_v0 = vsel %vm14027_vm4, %v8157_v15, %v8165_v44 }
0x1b41   : > { %v4503_v47 = vsel %vm4495_vm1, %v4502_v50, %v4501_v57  ;;  %v16829_v38 = vsel %vm4495_vm1, %v4494_v54, %v4493_v60  ;;  %v4512_v11 = vsel %vm4495_vm1, %v4511_v52, %v4510_v34  ;;  %v8176_v22 = vmin.f32 %v16747_v63, %v8172_v0 }
0x1b42   : > { %4504 = vrot.lane.b32.xlu1 %v4503_v47, %s10838_s19  ;;  %v8180_v42 = vmax.f32 %v16747_v63, %v8172_v0  ;;  %s10855_s19 = smov 24  }
0x1b44   : > { %v8184_v32 = vsel %vm16801_vm2, %v8176_v22, %v8180_v42 }
0x1b45   : > { %v8199_v12 = vrot.slane %v8184_v32, 1  ;;  %v8208_v60 = vrot.slane %v8184_v32, 2  ;;  %v8217_v40 = vrot.slane %v8184_v32, 3 }
0x1b46   : > { %4513 = vrot.lane.b32.xlu1 %v4512_v11, %s10854_s12 }
0x1b4a   : > { %4522 = vrot.lane.b32.xlu1 %v4521_v30, %s10842_s28  ;;  %s263_s28 = sand.u32 1, %s10825_s22  }
0x1b4b   : > { %s8246_s20 = scalar_lea.sflag [#allocation3], %s263_s28 }
0x1b56   : > { %v8159_v41 = vpop.permute.xlu1 %8158 }
0x1b5a   : > { %v8167_v53 = vpop.permute.xlu1 %8166 }
0x1b5b   : > { %v8173_v20 = vsel %vm14027_vm4, %v8159_v41, %v8167_v53 }
0x1b5c   : > { %v8177_v33 = vmin.f32 %v16759_v16, %v8173_v20  ;;  %v8181_v23 = vmax.f32 %v16759_v16, %v8173_v20 }
0x1b5e   : > { %v8185_v56 = vsel %vm16801_vm2, %v8177_v33, %v8181_v23 }
0x1b5f   : > { %v8192_v18 = vrot.slane %v8185_v56, 7  ;;  %v8209_v10 = vrot.slane %v8185_v56, 1  ;;  %v8200_v49 = vsel %vm4489_vm12, %v8185_v56, %v8199_v12  ;;  %v8218_v21 = vrot.slane %v8185_v56, 2 }
0x1b61   : > { %v8193_v39 = vsel %vm4489_vm12, %v8192_v18, %v8184_v32  ;;  %v8210_v59 = vsel %vm4489_vm12, %v8209_v10, %v8208_v60  ;;  %v8219_v55 = vsel %vm4489_vm12, %v8218_v21, %v8217_v40 }
0x1b66   : > { %v8161_v61 = vpop.permute.xlu0 %8160 }
0x1b6a   : > { %v8169_v43 = vpop.permute.xlu0 %8168  ;;  %v8163_v25 = vpop.permute.xlu1 %8162 }
0x1b6b   : > { %v8174_v27 = vsel %vm14027_vm4, %v8161_v61, %v8169_v43 }
0x1b6c   : > { %v8178_v63 = vmin.f32 %v16771_v5, %v8174_v27  ;;  %v8182_v9 = vmax.f32 %v16771_v5, %v8174_v27 }
0x1b6e   : > { %v8186_v16 = vsel %vm16801_vm2, %v8178_v63, %v8182_v9  ;;  %v8171_v4 = vpop.permute.xlu0 %8170 }
0x1b6f   : > { %v8175_v2 = vsel %vm14027_vm4, %v8163_v25, %v8171_v4  ;;  %v8201_v13 = vrot.slane %v8186_v16, 7  ;;  %v8194_v35 = vrot.slane %v8186_v16, 6  ;;  %v8220_v14 = vrot.slane %v8186_v16, 1 }
0x1b70   : > { %v8179_v17 = vmin.f32 %v16781_v28, %v8175_v2  ;;  %v8183_v1 = vmax.f32 %v16781_v28, %v8175_v2  ;;  %v8211_v58 = vsel %vm4492_vm6, %v8186_v16, %v8210_v59  ;;  %vm4527_vm4 = vcmask 785408  }
0x1b71   : > { %v8195_v5 = vsel %vm4492_vm6, %v8194_v35, %v8193_v39  ;;  %v8202_v37 = vsel %vm4492_vm6, %v8201_v13, %v8200_v49  ;;  %v8221_v3 = vsel %vm4492_vm6, %v8220_v14, %v8219_v55 }
0x1b72   : > { %v8187_v48 = vsel %vm16801_vm2, %v8179_v17, %v8183_v1 }
0x1b73   : > { %v8203_v26 = vrot.slane %v8187_v48, 6  ;;  %v8196_v46 = vrot.slane %v8187_v48, 5  ;;  %v8212_v28 = vrot.slane %v8187_v48, 7  ;;  %v8222_v45 = vsel %vm4495_vm1, %v8187_v48, %v8221_v3 }
0x1b75   : > { %v8204_v36 = vsel %vm4495_vm1, %v8203_v26, %v8202_v37  ;;  %v8197_v29 = vsel %vm4495_vm1, %v8196_v46, %v8195_v5  ;;  %v8213_v7 = vsel %vm4495_vm1, %v8212_v28, %v8211_v58 }
0x1b76   : > { %8205 = vrot.lane.b32.xlu0 %v8204_v36, %s10843_s16  ;;  %s8335_s16 = sshll.u32 %s263_s28, 3 }
0x1b77   : > { %s265_s13 = scalar_lea.vmem [#allocation2], %s8335_s16 }
0x1b78   : > { %s8260_s14 = sshll.u32 %s265_s13, 4  ;;  %s16889_s14 = int_to_ptr.vmem [resolvable:$true] %s8260_s14 }
0x1b79   : > { %s10771_s25 = scalar_lea.vmem %s16889_s14, 128  ;;  %p10778_p0 = scmp.lt.s32.totalorder %s16889_s14, %s10776_s29 }
0x1b7a   : > { %8214 = vrot.lane.b32.xlu0 %v8213_v7, %s10853_s11  ;;  %p10772_p11 = scmp.ne.s32.totalorder %s16889_s14, %s10771_s25  ;;  %p10779_p1 = scmp.lt.s32.totalorder %s10777_s9, %s10771_s25 }
0x1b7c   : > { %p10773_p12 = pnand %p10772_p11, %p10930_p5  ;;  %p10780_p2 = por %p10779_p1, %p10778_p0 }
0x1b7e   : > { %8223 = vrot.lane.b32.xlu0 %v8222_v45, %s10855_s19  ;;  %p10774_p13 = pneg %p10773_p12 }
0x1b80   : > { %p10781_p3 = pnand %p10780_p2, %p10774_p13 }
0x1bb4   : > { %v4505_v19 = vpop.permute.xlu1 %4504 }
0x1bb5   : > { %v4525_v47 = vsel %vm17668_vm5, %v16829_v38, %v4505_v19 }
0x1bb8   : > { %v4514_v50 = vpop.permute.xlu1 %4513 }
0x1bb9   : > { %v4526_v24 = vsel %vm17669_vm15, %v4525_v47, %v4514_v50 }
0x1bbc   : > { %v4523_v54 = vpop.permute.xlu1 %4522 }
0x1bbd   : > { %v4528_v62 = vsel %vm4527_vm4, %v4526_v24, %v4523_v54 }
0x1bbe   : > { %v8233_v31 = vmul.f32 0.01, %v4528_v62  ;;  %vm8231_vm7 = vcmp.gt.f32.partialorder %v4528_v62, 0.0 }
0x1bc0   : > { %v8235_v8 = vsel %vm8231_vm7, %v4528_v62, %v8233_v31 }
0x1be8   : > { %v8206_v57 = vpop.permute.xlu0 %8205 }
0x1be9   : > { %v8226_v34 = vsel %vm17670_vm8, %v8197_v29, %v8206_v57 }
0x1bec   : > { %v8215_v52 = vpop.permute.xlu0 %8214 }
0x1bed   : > { %v8228_v51 = vsel %vm8227_vm14, %v8226_v34, %v8215_v52 }
0x1bf0   : > { %v8224_v11 = vpop.permute.xlu0 %8223 }
0x1bf1   : > { %v8230_v6 = vsel %vm8229_vm9, %v8228_v51, %v8224_v11 }
0x1bf2   : > { %vm8232_vm13 = vcmp.gt.f32.partialorder %v8230_v6, 0.0  ;;  %v8234_v38 = vmul.f32 0.01, %v8230_v6 }
0x1bf4   : > { %v8236_v30 = vsel %vm8232_vm13, %v8230_v6, %v8234_v38 }
0x1bf5   : > { %v8239_v15 = vcombine.low %v8235_v8, %v8236_v30 }
0x1bf7   : > { %8244 = vst.msk [vmem:[%s265_s13] sm:$0xff] %vm8243_vm3, %v8239_v15 }
0x1bf8   : > { %10784 = shalt.err (!%p10781_p3)
}
0x1bf9   : > { %s10785_s11 = scalar_lea.hbm %s16887_s18, 128  ;;  %s10789_s28 = scalar_lea.hbm %s16937_s6, 256 }
0x1bfa   : > { %p10786_p4 = scmp.ne.s32.totalorder %s16887_s18, %s10785_s11  ;;  %p10790_p9 = scmp.lt.u32.totalorder %s16887_s18, %s16937_s6 }
0x1bfb   : > { %p10791_p10 = scmp.lt.u32.totalorder %s10789_s28, %s10785_s11  ;;  %p10793_p12 = scmp.lt.u32.totalorder %s10785_s11, %s16887_s18 }
0x1bfc   : > { %p10787_p7 = pnand %p10786_p4, %p10930_p5 }
0x1bfd   : > { %p10792_p11 = por %p10791_p10, %p10790_p9 }
0x1bfe   : > { %p10788_p8 = pneg %p10787_p7 }
0x1bff   : > { %p10794_p13 = por %p10793_p12, %p10792_p11 }
0x1c01   : > { %p10795_p0 = pnand %p10794_p13, %p10788_p8 }
0x1c03   : > { %10798 = shalt.err (!%p10795_p0)
}
0x1c04   : > { %10489 = dma.vmem_to_hbm [thread:$0]  (%p10930_p5), %s16889_s14, 128, %s16887_s18, %s8246_s20  }
0x1c05 PF: > { %p10495_p1 = scmp.ge.s32.totalorder %s10833_s24, 2  ;;  %s8272_s13 = sand.u32 1, %s10821_s21  }
0x1c06   : > { %s8273_s15 = scalar_lea.sflag [#allocation3], %s8272_s13 }
0x1c07   : > { %p10492_p2 = pnand %p10495_p1, %p10934_p6 }
0x1c09   : > { %10816 = dma.done.wait (!%p10492_p2), %s8273_s15, 128  }
0x1c0a   : > { %10818 = vsyncadd (!%p10492_p2), %s8273_s15, 4294967168  ;;  %p16_p3 = scmp.ge.s32.totalorder %s10917_s27, 4   ;;  %s17671_s21 = smov %s10825_s22 }
0x1c0b   : > { %s17672_s22 = smov %s10829_s23  ;;  %s17673_s23 = smov %s10928_s30 }
0x1c0c   : > { %s17674_s24 = smov %s10917_s27  ;;  %18 = sbr.rel (!%p16_p3) target bundleno = 3 (0x3), region = 82 }
0x1c13   :  { %8278 = vsyncpa [#allocation3], 1 }
0x1c14   :  { %8280 = vsyncpa [#allocation3 + $0x1], 1 }

</bundles_post_ra>
